<compile_context>
chip_gen: v7x
topology: tpu7x:2x2x1
jax: 0.10.0
libtpu: 0.0.40
codegen_flags: <defaults>
</compile_context>

<pallas_src>
import numpy as np

import jax
import jax.numpy as jnp
from jax import lax
from jax.experimental import pallas as pl
from jax.experimental.pallas import tpu as pltpu

EPS = 1e-5
CIN_PAD = 8          # stem input channels padded 3 -> 8


# ---------------------------------------------------------------------------
# In-kernel building blocks
# ---------------------------------------------------------------------------
def _relu(v):
    return jnp.maximum(v, 0.0)


def _conv3x3(x, w_ref, b_ref, mask_ref, patch_ref, W):
    """3x3 / pad-1 / stride-1 conv on a row-major flattened (S=H*W, Cin) bf16 image.

    The 9 taps are gathered with pltpu.roll (f32 copies -> plain 32-bit sublane
    rotates), written into the (S, 9*Cin) VMEM patch buffer, masked with a
    precomputed 0/1 boundary mask and contracted in a single MXU dot.
    Returns the f32 pre-activation (BN bias already added).
    """
    S, Cin = x.shape
    x32 = x.astype(jnp.float32)
    for kh in range(3):
        for kw in range(3):
            delta = (kh - 1) * W + (kw - 1)
            if delta == 0:
                tap = x
            else:
                tap = pltpu.roll(x32, shift=(-delta) % S, axis=0).astype(x.dtype)
            k = kh * 3 + kw
            patch_ref[:, k * Cin:(k + 1) * Cin] = tap
    patches = patch_ref[...] * mask_ref[...]
    return jnp.dot(patches, w_ref[...],
                   preferred_element_type=jnp.float32) + b_ref[...]


def _resnet_kernel(x_ref,
                   m_stem_ref, m_l1_ref, m_l2_ref, m_l3_ref,
                   sel2_ref, sel3_ref, p2_ref, p3_ref,
                   w0_ref, b0_ref,
                   w1a_ref, b1a_ref, w1b_ref, b1b_ref,
                   w2a_ref, b2a_ref, w2b_ref, b2b_ref,
                   w3a_ref, b3a_ref, w3b_ref, b3b_ref,
                   fcw_ref, fcb_ref,
                   o_ref,
                   pb_stem, pb16, pb8, pb4):
    f32, bf16 = jnp.float32, jnp.bfloat16
    x = x_ref[0]                                                        # (256, 8) bf16

    # ---- stem: conv3x3(3->16) + BN + ReLU                            @ 16x16
    a = _relu(_conv3x3(x, w0_ref, b0_ref, m_stem_ref, pb_stem, 16)).astype(bf16)

    # ---- layer1 / block0 (stride 1, 16->16), identity = a            @ 16x16
    t = _relu(_conv3x3(a, w1a_ref, b1a_ref, m_l1_ref, pb16, 16)).astype(bf16)
    u = _conv3x3(t, w1b_ref, b1b_ref, m_l1_ref, pb16, 16) + a.astype(f32)
    u = _relu(u).astype(bf16)                                           # (256, 16)

    # ---- layer2 / block0 (stride 2, 16->32)                          -> 8x8
    sel2 = sel2_ref[...]                                                # (64, 256)
    c1 = _relu(_conv3x3(u, w2a_ref, b2a_ref, m_l1_ref, pb16, 16)).astype(bf16)
    c1 = jnp.dot(sel2, c1, preferred_element_type=f32).astype(bf16)     # (64, 32)
    idn = jnp.dot(sel2, u, preferred_element_type=f32).astype(bf16)     # (64, 16)
    idn = jnp.dot(idn, p2_ref[...], preferred_element_type=f32)         # (64, 32) f32
    v = _conv3x3(c1, w2b_ref, b2b_ref, m_l2_ref, pb8, 8) + idn
    v = _relu(v).astype(bf16)                                           # (64, 32)

    # ---- layer3 / block0 (stride 2, 32->64)                          -> 4x4
    sel3 = sel3_ref[...]                                                # (16, 64)
    c1 = _relu(_conv3x3(v, w3a_ref, b3a_ref, m_l2_ref, pb8, 8)).astype(bf16)
    c1 = jnp.dot(sel3, c1, preferred_element_type=f32).astype(bf16)     # (16, 64)
    idn = jnp.dot(sel3, v, preferred_element_type=f32).astype(bf16)     # (16, 32)
    idn = jnp.dot(idn, p3_ref[...], preferred_element_type=f32)         # (16, 64) f32
    z = _conv3x3(c1, w3b_ref, b3b_ref, m_l3_ref, pb4, 4) + idn
    z = _relu(z).astype(bf16)                                           # (16, 64)

    # ---- global average pool + FC
    pooled = (jnp.sum(z.astype(f32), axis=0, keepdims=True) / z.shape[0]).astype(bf16)
    logits = jnp.dot(pooled, fcw_ref[...],
                     preferred_element_type=f32) + fcb_ref[...]          # (1, classes)
    o_ref[0] = logits


# ---------------------------------------------------------------------------
# Trace-time constants (masks / selection matrices), built once with numpy
# ---------------------------------------------------------------------------
def _patch_mask(H, W, Cin):
    """(H*W, 9*Cin) 0/1 mask zeroing the out-of-bounds taps of the im2col matrix."""
    h = np.arange(H)[:, None]
    w = np.arange(W)[None, :]
    cols = []
    for kh in range(3):
        for kw in range(3):
            dh, dw = kh - 1, kw - 1
            valid = ((h + dh >= 0) & (h + dh < H) & (w + dw >= 0) & (w + dw < W))
            valid = valid.astype(np.float32).reshape(H * W, 1)
            cols.append(np.repeat(valid, Cin, axis=1))
    return jnp.asarray(np.concatenate(cols, axis=1), dtype=jnp.bfloat16)


def _sel_matrix(H, W):
    """(Ho*Wo, H*W) 0/1 matrix selecting the stride-2 (::2, ::2) positions."""
    Ho, Wo = H // 2, W // 2
    sel = np.zeros((Ho * Wo, H * W), np.float32)
    for ho in range(Ho):
        for wo in range(Wo):
            sel[ho * Wo + wo, (2 * ho) * W + 2 * wo] = 1.0
    return jnp.asarray(sel, dtype=jnp.bfloat16)


def _chan_pad_matrix(cin, cout, offset):
    """(cin, cout) 0/1 placement matrix: channel c -> channel c + offset."""
    p = np.zeros((cin, cout), np.float32)
    p[np.arange(cin), np.arange(cin) + offset] = 1.0
    return jnp.asarray(p, dtype=jnp.bfloat16)


# ---------------------------------------------------------------------------
# Parameter preparation (BN folding, flattening, constants) — run once, not jitted
# ---------------------------------------------------------------------------
def _fold_bn(w, bn):
    """Fold eval-mode BN into the conv weight + a single f32 bias."""
    scale = bn['gamma'] / jnp.sqrt(bn['var'] + EPS)
    bias = (bn['beta'] - bn['mean'] * scale).astype(jnp.float32)
    return w * scale, bias


def _flat_w(w):
    """(3,3,Cin,Cout) -> (9*Cin, Cout) bf16 with (kh, kw, cin) row ordering."""
    k1, k2, ci, co = w.shape
    return w.reshape(k1 * k2 * ci, co).astype(jnp.bfloat16)


def prepare_params(params):
    assert all(len(params[f'layer{i}']) == 1 for i in (1, 2, 3)), \
        "fused kernel implements the layers=[1,1,1] small_model configuration"
    prep = {}
    w, b = _fold_bn(params['conv1'], params['bn1'])
    w = jnp.pad(w, ((0, 0), (0, 0), (0, CIN_PAD - w.shape[2]), (0, 0)))
    prep['w0'], prep['b0'] = _flat_w(w), b.reshape(1, -1)

    for wn, bn_, layer, ck, bk in (
            ('w1a', 'b1a', 'layer1', 'conv1', 'bn1'),
            ('w1b', 'b1b', 'layer1', 'conv2', 'bn2'),
            ('w2a', 'b2a', 'layer2', 'conv1', 'bn1'),
            ('w2b', 'b2b', 'layer2', 'conv2', 'bn2'),
            ('w3a', 'b3a', 'layer3', 'conv1', 'bn1'),
            ('w3b', 'b3b', 'layer3', 'conv2', 'bn2')):
        blk = params[layer][0]
        wf, bias = _fold_bn(blk[ck], blk[bk])
        prep[wn], prep[bn_] = _flat_w(wf), bias.reshape(1, -1)

    prep['fc_w'] = params['fc']['w'].astype(jnp.bfloat16)
    prep['fc_b'] = params['fc']['b'].reshape(1, -1).astype(jnp.float32)

    prep['m_stem'] = _patch_mask(16, 16, CIN_PAD)
    prep['m_l1'] = _patch_mask(16, 16, 16)
    prep['m_l2'] = _patch_mask(8, 8, 32)
    prep['m_l3'] = _patch_mask(4, 4, 64)
    prep['sel2'] = _sel_matrix(16, 16)
    prep['sel3'] = _sel_matrix(8, 8)
    prep['p2'] = _chan_pad_matrix(16, 32, 8)     # option-'A' pad = planes // 4
    prep['p3'] = _chan_pad_matrix(32, 64, 16)
    return prep


_CONST_NAMES = ('m_stem', 'm_l1', 'm_l2', 'm_l3', 'sel2', 'sel3', 'p2', 'p3',
                'w0', 'b0', 'w1a', 'b1a', 'w1b', 'b1b', 'w2a', 'b2a',
                'w2b', 'b2b', 'w3a', 'b3a', 'w3b', 'b3b', 'fc_w', 'fc_b')


# ---------------------------------------------------------------------------
# Forward pass: one fused pallas_call over the whole network
# ---------------------------------------------------------------------------
def resnet_forward(prep, x_nchw):
    N, C, H, W = x_nchw.shape
    assert (C, H, W) == (3, 16, 16), "kernel is specialized to 3x16x16 inputs"
    x = jnp.transpose(x_nchw, (0, 2, 3, 1)).reshape(N, H * W, C)
    x = jnp.pad(x, ((0, 0), (0, 0), (0, CIN_PAD - C))).astype(jnp.bfloat16)

    consts = [prep[k] for k in _CONST_NAMES]
    nc = prep['fc_b'].shape[-1]

    def _const_spec(a):
        return pl.BlockSpec(a.shape, lambda n: (0,) * a.ndim)

    out = pl.pallas_call(
        _resnet_kernel,
        out_shape=jax.ShapeDtypeStruct((N, 1, nc), jnp.float32),
        grid=(N,),
        in_specs=[pl.BlockSpec((1, H * W, CIN_PAD), lambda n: (n, 0, 0))]
                 + [_const_spec(a) for a in consts],
        out_specs=pl.BlockSpec((1, 1, nc), lambda n: (n, 0, 0)),
        scratch_shapes=[
            pltpu.VMEM((256, 9 * CIN_PAD), jnp.bfloat16),   # stem patches
            pltpu.VMEM((256, 9 * 16), jnp.bfloat16),        # 16x16 / Cin=16 patches
            pltpu.VMEM((64, 9 * 32), jnp.bfloat16),         # 8x8  / Cin=32 patches
            pltpu.VMEM((16, 9 * 64), jnp.bfloat16),         # 4x4  / Cin=64 patches
        ],
        compiler_params=pltpu.CompilerParams(
            dimension_semantics=("parallel",)),
    )(x, *consts)
    return out.reshape(N, nc)


# ---------------------------------------------------------------------------
# Deterministic parameter init (mirrors module __init__ shapes/inits)
# ---------------------------------------------------------------------------
def _kaiming_conv(key, kh, kw, cin, cout):
    fan_out = cout * kh * kw
    std = (2.0 / fan_out) ** 0.5
    return jax.random.normal(key, (kh, kw, cin, cout), jnp.float32) * std


def _bn_params(c):
    return dict(gamma=jnp.ones((c,), jnp.float32),
                beta=jnp.zeros((c,), jnp.float32),
                mean=jnp.zeros((c,), jnp.float32),
                var=jnp.ones((c,), jnp.float32))


def init_params(key, layers=(1, 1, 1), num_classes=10):
    keys = iter(jax.random.split(key, 64))
    p = {'conv1': _kaiming_conv(next(keys), 3, 3, 3, 16), 'bn1': _bn_params(16)}
    inplanes = 16
    for li, (planes, nblocks, stride0) in enumerate(
            zip((16, 32, 64), layers, (1, 2, 2)), start=1):
        blocks, s = [], stride0
        for _ in range(nblocks):
            blocks.append(dict(
                conv1=_kaiming_conv(next(keys), 3, 3, inplanes, planes),
                bn1=_bn_params(planes),
                conv2=_kaiming_conv(next(keys), 3, 3, planes, planes),
                bn2=_bn_params(planes),
                stride=s))
            inplanes, s = planes, 1
        p[f'layer{li}'] = blocks
    fan_in = 64
    bound = 1.0 / (fan_in ** 0.5)
    kw_, kb_ = jax.random.split(next(keys))
    p['fc'] = dict(
        w=jax.random.uniform(kw_, (fan_in, num_classes), jnp.float32, -bound, bound),
        b=jax.random.uniform(kb_, (num_classes,), jnp.float32, -bound, bound))
    return p


# ---------------------------------------------------------------------------
# Pure-JAX reference with the same precision policy (bf16 MXU inputs, f32 accum)
# ---------------------------------------------------------------------------
def ref_forward(params, x_nchw):
    x = jnp.transpose(x_nchw, (0, 2, 3, 1)).astype(jnp.bfloat16)

    def cb(x, w, bn, stride, relu, residual=None):
        scale = bn['gamma'] / jnp.sqrt(bn['var'] + EPS)
        w_f = (w * scale).astype(jnp.bfloat16)
        bias = (bn['beta'] - bn['mean'] * scale).astype(jnp.float32)
        out = lax.conv_general_dilated(
            x, w_f, (stride, stride), ((1, 1), (1, 1)),
            dimension_numbers=('NHWC', 'HWIO', 'NHWC'),
            preferred_element_type=jnp.float32)
        out = out + bias
        if residual is not None:
            out = out + residual.astype(jnp.float32)
        if relu:
            out = jnp.maximum(out, 0.0)
        return out.astype(jnp.bfloat16)

    x = cb(x, params['conv1'], params['bn1'], 1, True)
    for li in (1, 2, 3):
        for blk in params[f'layer{li}']:
            stride, planes = blk['stride'], blk['conv1'].shape[-1]
            if stride != 1 or x.shape[-1] != planes:
                pad = planes // 4
                identity = jnp.pad(x[:, ::2, ::2, :],
                                   ((0, 0), (0, 0), (0, 0), (pad, pad)))
            else:
                identity = x
            out = cb(x, blk['conv1'], blk['bn1'], stride, True)
            x = cb(out, blk['conv2'], blk['bn2'], 1, True, identity)
    pooled = jnp.mean(x.astype(jnp.float32), axis=(1, 2)).astype(jnp.bfloat16)
    return jnp.dot(pooled, params['fc']['w'].astype(jnp.bfloat16),
                   preferred_element_type=jnp.float32) + params['fc']['b']


if __name__ == "__main__":
    key = jax.random.PRNGKey(0)
    kx, kp = jax.random.split(key)
    # small input consistent with the module's small_model stem (3 channels, NCHW)
    x = jax.random.normal(kx, (2, 3, 16, 16), jnp.float32)
    params = init_params(kp, layers=(1, 1, 1), num_classes=10)
    prep = prepare_params(params)

    fwd = jax.jit(lambda a: resnet_forward(prep, a))
    out = jax.block_until_ready(fwd(x))
    assert out.shape == (2, 10), out.shape

    ref = jax.block_until_ready(jax.jit(lambda a: ref_forward(params, a))(x))
    err = float(jnp.max(jnp.abs(out - ref)))
    assert jnp.allclose(out, ref, rtol=2e-2, atol=2e-2), ("mismatch vs reference", err)

    print("KERNEL_OK")
</pallas_src>

<mosaic_0001>
module attributes {stable_mosaic.version = 11 : i64} {
  func.func @_resnet_kernel(%arg0: i32, %arg1: memref<1x256x8xbf16, #tpu.memory_space<vmem>>, %arg2: memref<256x72xbf16, #tpu.memory_space<vmem>>, %arg3: memref<256x144xbf16, #tpu.memory_space<vmem>>, %arg4: memref<64x288xbf16, #tpu.memory_space<vmem>>, %arg5: memref<16x576xbf16, #tpu.memory_space<vmem>>, %arg6: memref<64x256xbf16, #tpu.memory_space<vmem>>, %arg7: memref<16x64xbf16, #tpu.memory_space<vmem>>, %arg8: memref<16x32xbf16, #tpu.memory_space<vmem>>, %arg9: memref<32x64xbf16, #tpu.memory_space<vmem>>, %arg10: memref<72x16xbf16, #tpu.memory_space<vmem>>, %arg11: memref<1x16xf32, #tpu.memory_space<vmem>>, %arg12: memref<144x16xbf16, #tpu.memory_space<vmem>>, %arg13: memref<1x16xf32, #tpu.memory_space<vmem>>, %arg14: memref<144x16xbf16, #tpu.memory_space<vmem>>, %arg15: memref<1x16xf32, #tpu.memory_space<vmem>>, %arg16: memref<144x32xbf16, #tpu.memory_space<vmem>>, %arg17: memref<1x32xf32, #tpu.memory_space<vmem>>, %arg18: memref<288x32xbf16, #tpu.memory_space<vmem>>, %arg19: memref<1x32xf32, #tpu.memory_space<vmem>>, %arg20: memref<288x64xbf16, #tpu.memory_space<vmem>>, %arg21: memref<1x64xf32, #tpu.memory_space<vmem>>, %arg22: memref<576x64xbf16, #tpu.memory_space<vmem>>, %arg23: memref<1x64xf32, #tpu.memory_space<vmem>>, %arg24: memref<64x10xbf16, #tpu.memory_space<vmem>>, %arg25: memref<1x10xf32, #tpu.memory_space<vmem>>, %arg26: memref<1x1x10xf32, #tpu.memory_space<vmem>>, %arg27: memref<256x72xbf16, #tpu.memory_space<vmem>>, %arg28: memref<256x144xbf16, #tpu.memory_space<vmem>>, %arg29: memref<64x288xbf16, #tpu.memory_space<vmem>>, %arg30: memref<16x576xbf16, #tpu.memory_space<vmem>>) attributes {dimension_semantics = [#tpu.dimension_semantics<parallel>], iteration_bounds = array<i64: 2>, scalar_prefetch = 0 : i64, scratch_operands = 4 : i64, tpu.core_type = #tpu.core_type<tc>, window_params = [{transform_indices = @transform_0, window_bounds = array<i64: 1, 256, 8>}, {pipeline_mode = #tpu.pipeline_mode<synchronous>, transform_indices = @transform_1, window_bounds = array<i64: 256, 72>}, {pipeline_mode = #tpu.pipeline_mode<synchronous>, transform_indices = @transform_2, window_bounds = array<i64: 256, 144>}, {pipeline_mode = #tpu.pipeline_mode<synchronous>, transform_indices = @transform_3, window_bounds = array<i64: 64, 288>}, {pipeline_mode = #tpu.pipeline_mode<synchronous>, transform_indices = @transform_4, window_bounds = array<i64: 16, 576>}, {pipeline_mode = #tpu.pipeline_mode<synchronous>, transform_indices = @transform_5, window_bounds = array<i64: 64, 256>}, {pipeline_mode = #tpu.pipeline_mode<synchronous>, transform_indices = @transform_6, window_bounds = array<i64: 16, 64>}, {pipeline_mode = #tpu.pipeline_mode<synchronous>, transform_indices = @transform_7, window_bounds = array<i64: 16, 32>}, {pipeline_mode = #tpu.pipeline_mode<synchronous>, transform_indices = @transform_8, window_bounds = array<i64: 32, 64>}, {pipeline_mode = #tpu.pipeline_mode<synchronous>, transform_indices = @transform_9, window_bounds = array<i64: 72, 16>}, {pipeline_mode = #tpu.pipeline_mode<synchronous>, transform_indices = @transform_10, window_bounds = array<i64: 1, 16>}, {pipeline_mode = #tpu.pipeline_mode<synchronous>, transform_indices = @transform_11, window_bounds = array<i64: 144, 16>}, {pipeline_mode = #tpu.pipeline_mode<synchronous>, transform_indices = @transform_12, window_bounds = array<i64: 1, 16>}, {pipeline_mode = #tpu.pipeline_mode<synchronous>, transform_indices = @transform_13, window_bounds = array<i64: 144, 16>}, {pipeline_mode = #tpu.pipeline_mode<synchronous>, transform_indices = @transform_14, window_bounds = array<i64: 1, 16>}, {pipeline_mode = #tpu.pipeline_mode<synchronous>, transform_indices = @transform_15, window_bounds = array<i64: 144, 32>}, {pipeline_mode = #tpu.pipeline_mode<synchronous>, transform_indices = @transform_16, window_bounds = array<i64: 1, 32>}, {pipeline_mode = #tpu.pipeline_mode<synchronous>, transform_indices = @transform_17, window_bounds = array<i64: 288, 32>}, {pipeline_mode = #tpu.pipeline_mode<synchronous>, transform_indices = @transform_18, window_bounds = array<i64: 1, 32>}, {pipeline_mode = #tpu.pipeline_mode<synchronous>, transform_indices = @transform_19, window_bounds = array<i64: 288, 64>}, {pipeline_mode = #tpu.pipeline_mode<synchronous>, transform_indices = @transform_20, window_bounds = array<i64: 1, 64>}, {pipeline_mode = #tpu.pipeline_mode<synchronous>, transform_indices = @transform_21, window_bounds = array<i64: 576, 64>}, {pipeline_mode = #tpu.pipeline_mode<synchronous>, transform_indices = @transform_22, window_bounds = array<i64: 1, 64>}, {pipeline_mode = #tpu.pipeline_mode<synchronous>, transform_indices = @transform_23, window_bounds = array<i64: 64, 10>}, {pipeline_mode = #tpu.pipeline_mode<synchronous>, transform_indices = @transform_24, window_bounds = array<i64: 1, 10>}, {transform_indices = @transform_25, window_bounds = array<i64: 1, 1, 10>}]} {
    %c0 = arith.constant 0 : index
    %c0_0 = arith.constant 0 : index
    %c0_1 = arith.constant 0 : index
    %0 = vector.load %arg1[%c0, %c0_0, %c0_1] : memref<1x256x8xbf16, #tpu.memory_space<vmem>>, vector<1x256x8xbf16>
    %1 = vector.shape_cast %0 : vector<1x256x8xbf16> to vector<256x8xbf16>
    %2 = arith.extf %1 : vector<256x8xbf16> to vector<256x8xf32>
    %c17_i32 = arith.constant 17 : i32
    %3 = tpu.dynamic_rotate %2 by %c17_i32 dim 0 : vector<256x8xf32>, i32 -> vector<256x8xf32>
    %4 = arith.truncf %3 : vector<256x8xf32> to vector<256x8xbf16>
    %c0_2 = arith.constant 0 : index
    %c0_3 = arith.constant 0 : index
    %5 = vector.load %arg27[%c0_2, %c0_3] : memref<256x72xbf16, #tpu.memory_space<vmem>>, vector<256x8xbf16>
    tpu.vector_store %arg27[%c0_2, %c0_3], %4 {strides = array<i32>} : memref<256x72xbf16, #tpu.memory_space<vmem>>, vector<256x8xbf16>,
    %c16_i32 = arith.constant 16 : i32
    %6 = tpu.dynamic_rotate %2 by %c16_i32 dim 0 : vector<256x8xf32>, i32 -> vector<256x8xf32>
    %7 = arith.truncf %6 : vector<256x8xf32> to vector<256x8xbf16>
    %c0_4 = arith.constant 0 : index
    %c8 = arith.constant 8 : index
    %8 = vector.load %arg27[%c0_4, %c8] : memref<256x72xbf16, #tpu.memory_space<vmem>>, vector<256x8xbf16>
    tpu.vector_store %arg27[%c0_4, %c8], %7 {strides = array<i32>} : memref<256x72xbf16, #tpu.memory_space<vmem>>, vector<256x8xbf16>,
    %c15_i32 = arith.constant 15 : i32
    %9 = tpu.dynamic_rotate %2 by %c15_i32 dim 0 : vector<256x8xf32>, i32 -> vector<256x8xf32>
    %10 = arith.truncf %9 : vector<256x8xf32> to vector<256x8xbf16>
    %c0_5 = arith.constant 0 : index
    %c16 = arith.constant 16 : index
    %11 = vector.load %arg27[%c0_5, %c16] : memref<256x72xbf16, #tpu.memory_space<vmem>>, vector<256x8xbf16>
    tpu.vector_store %arg27[%c0_5, %c16], %10 {strides = array<i32>} : memref<256x72xbf16, #tpu.memory_space<vmem>>, vector<256x8xbf16>,
    %c1_i32 = arith.constant 1 : i32
    %12 = tpu.dynamic_rotate %2 by %c1_i32 dim 0 : vector<256x8xf32>, i32 -> vector<256x8xf32>
    %13 = arith.truncf %12 : vector<256x8xf32> to vector<256x8xbf16>
    %c0_6 = arith.constant 0 : index
    %c24 = arith.constant 24 : index
    %14 = vector.load %arg27[%c0_6, %c24] : memref<256x72xbf16, #tpu.memory_space<vmem>>, vector<256x8xbf16>
    tpu.vector_store %arg27[%c0_6, %c24], %13 {strides = array<i32>} : memref<256x72xbf16, #tpu.memory_space<vmem>>, vector<256x8xbf16>,
    %c0_7 = arith.constant 0 : index
    %c32 = arith.constant 32 : index
    %15 = vector.load %arg27[%c0_7, %c32] : memref<256x72xbf16, #tpu.memory_space<vmem>>, vector<256x8xbf16>
    tpu.vector_store %arg27[%c0_7, %c32], %1 {strides = array<i32>} : memref<256x72xbf16, #tpu.memory_space<vmem>>, vector<256x8xbf16>,
    %c255_i32 = arith.constant 255 : i32
    %16 = tpu.dynamic_rotate %2 by %c255_i32 dim 0 : vector<256x8xf32>, i32 -> vector<256x8xf32>
    %17 = arith.truncf %16 : vector<256x8xf32> to vector<256x8xbf16>
    %c0_8 = arith.constant 0 : index
    %c40 = arith.constant 40 : index
    %18 = vector.load %arg27[%c0_8, %c40] : memref<256x72xbf16, #tpu.memory_space<vmem>>, vector<256x8xbf16>
    tpu.vector_store %arg27[%c0_8, %c40], %17 {strides = array<i32>} : memref<256x72xbf16, #tpu.memory_space<vmem>>, vector<256x8xbf16>,
    %c241_i32 = arith.constant 241 : i32
    %19 = tpu.dynamic_rotate %2 by %c241_i32 dim 0 : vector<256x8xf32>, i32 -> vector<256x8xf32>
    %20 = arith.truncf %19 : vector<256x8xf32> to vector<256x8xbf16>
    %c0_9 = arith.constant 0 : index
    %c48 = arith.constant 48 : index
    %21 = vector.load %arg27[%c0_9, %c48] : memref<256x72xbf16, #tpu.memory_space<vmem>>, vector<256x8xbf16>
    tpu.vector_store %arg27[%c0_9, %c48], %20 {strides = array<i32>} : memref<256x72xbf16, #tpu.memory_space<vmem>>, vector<256x8xbf16>,
    %c240_i32 = arith.constant 240 : i32
    %22 = tpu.dynamic_rotate %2 by %c240_i32 dim 0 : vector<256x8xf32>, i32 -> vector<256x8xf32>
    %23 = arith.truncf %22 : vector<256x8xf32> to vector<256x8xbf16>
    %c0_10 = arith.constant 0 : index
    %c56 = arith.constant 56 : index
    %24 = vector.load %arg27[%c0_10, %c56] : memref<256x72xbf16, #tpu.memory_space<vmem>>, vector<256x8xbf16>
    tpu.vector_store %arg27[%c0_10, %c56], %23 {strides = array<i32>} : memref<256x72xbf16, #tpu.memory_space<vmem>>, vector<256x8xbf16>,
    %c239_i32 = arith.constant 239 : i32
    %25 = tpu.dynamic_rotate %2 by %c239_i32 dim 0 : vector<256x8xf32>, i32 -> vector<256x8xf32>
    %26 = arith.truncf %25 : vector<256x8xf32> to vector<256x8xbf16>
    %c0_11 = arith.constant 0 : index
    %c64 = arith.constant 64 : index
    %27 = vector.load %arg27[%c0_11, %c64] : memref<256x72xbf16, #tpu.memory_space<vmem>>, vector<256x8xbf16>
    tpu.vector_store %arg27[%c0_11, %c64], %26 {strides = array<i32>} : memref<256x72xbf16, #tpu.memory_space<vmem>>, vector<256x8xbf16>,
    %c0_12 = arith.constant 0 : index
    %c0_13 = arith.constant 0 : index
    %28 = vector.load %arg27[%c0_12, %c0_13] : memref<256x72xbf16, #tpu.memory_space<vmem>>, vector<256x72xbf16>
    %c0_14 = arith.constant 0 : index
    %c0_15 = arith.constant 0 : index
    %29 = vector.load %arg2[%c0_14, %c0_15] : memref<256x72xbf16, #tpu.memory_space<vmem>>, vector<256x72xbf16>
    %30 = arith.mulf %28, %29 : vector<256x72xbf16>
    %c0_16 = arith.constant 0 : index
    %c0_17 = arith.constant 0 : index
    %31 = vector.load %arg10[%c0_16, %c0_17] : memref<72x16xbf16, #tpu.memory_space<vmem>>, vector<72x16xbf16>
    %cst = arith.constant dense<0.000000e+00> : vector<256x16xf32>
    %32 = tpu.matmul %30, %31, %cst {dimension_numbers = #tpu.dot_dimension_numbers<[1], [0], [0], [1], [0, 0, 1, 1], [], []>} : vector<256x72xbf16>, vector<72x16xbf16>, vector<256x16xf32> -> vector<256x16xf32>
    %c0_18 = arith.constant 0 : index
    %c0_19 = arith.constant 0 : index
    %33 = vector.load %arg11[%c0_18, %c0_19] : memref<1x16xf32, #tpu.memory_space<vmem>>, vector<1x16xf32>
    %34 = vector.broadcast %33 : vector<1x16xf32> to vector<256x16xf32>
    %35 = arith.addf %32, %34 : vector<256x16xf32>
    %cst_20 = arith.constant 0.000000e+00 : f32
    %36 = vector.broadcast %cst_20 : f32 to vector<256x16xf32>
    %37 = arith.maximumf %35, %36 : vector<256x16xf32>
    %38 = arith.truncf %37 : vector<256x16xf32> to vector<256x16xbf16>
    %39 = arith.extf %38 : vector<256x16xbf16> to vector<256x16xf32>
    %c17_i32_21 = arith.constant 17 : i32
    %40 = tpu.dynamic_rotate %39 by %c17_i32_21 dim 0 : vector<256x16xf32>, i32 -> vector<256x16xf32>
    %41 = arith.truncf %40 : vector<256x16xf32> to vector<256x16xbf16>
    %c0_22 = arith.constant 0 : index
    %c0_23 = arith.constant 0 : index
    %42 = vector.load %arg28[%c0_22, %c0_23] : memref<256x144xbf16, #tpu.memory_space<vmem>>, vector<256x16xbf16>
    tpu.vector_store %arg28[%c0_22, %c0_23], %41 {strides = array<i32>} : memref<256x144xbf16, #tpu.memory_space<vmem>>, vector<256x16xbf16>,
    %c16_i32_24 = arith.constant 16 : i32
    %43 = tpu.dynamic_rotate %39 by %c16_i32_24 dim 0 : vector<256x16xf32>, i32 -> vector<256x16xf32>
    %44 = arith.truncf %43 : vector<256x16xf32> to vector<256x16xbf16>
    %c0_25 = arith.constant 0 : index
    %c16_26 = arith.constant 16 : index
    %45 = vector.load %arg28[%c0_25, %c16_26] : memref<256x144xbf16, #tpu.memory_space<vmem>>, vector<256x16xbf16>
    tpu.vector_store %arg28[%c0_25, %c16_26], %44 {strides = array<i32>} : memref<256x144xbf16, #tpu.memory_space<vmem>>, vector<256x16xbf16>,
    %c15_i32_27 = arith.constant 15 : i32
    %46 = tpu.dynamic_rotate %39 by %c15_i32_27 dim 0 : vector<256x16xf32>, i32 -> vector<256x16xf32>
    %47 = arith.truncf %46 : vector<256x16xf32> to vector<256x16xbf16>
    %c0_28 = arith.constant 0 : index
    %c32_29 = arith.constant 32 : index
    %48 = vector.load %arg28[%c0_28, %c32_29] : memref<256x144xbf16, #tpu.memory_space<vmem>>, vector<256x16xbf16>
    tpu.vector_store %arg28[%c0_28, %c32_29], %47 {strides = array<i32>} : memref<256x144xbf16, #tpu.memory_space<vmem>>, vector<256x16xbf16>,
    %c1_i32_30 = arith.constant 1 : i32
    %49 = tpu.dynamic_rotate %39 by %c1_i32_30 dim 0 : vector<256x16xf32>, i32 -> vector<256x16xf32>
    %50 = arith.truncf %49 : vector<256x16xf32> to vector<256x16xbf16>
    %c0_31 = arith.constant 0 : index
    %c48_32 = arith.constant 48 : index
    %51 = vector.load %arg28[%c0_31, %c48_32] : memref<256x144xbf16, #tpu.memory_space<vmem>>, vector<256x16xbf16>
    tpu.vector_store %arg28[%c0_31, %c48_32], %50 {strides = array<i32>} : memref<256x144xbf16, #tpu.memory_space<vmem>>, vector<256x16xbf16>,
    %c0_33 = arith.constant 0 : index
    %c64_34 = arith.constant 64 : index
    %52 = vector.load %arg28[%c0_33, %c64_34] : memref<256x144xbf16, #tpu.memory_space<vmem>>, vector<256x16xbf16>
    tpu.vector_store %arg28[%c0_33, %c64_34], %38 {strides = array<i32>} : memref<256x144xbf16, #tpu.memory_space<vmem>>, vector<256x16xbf16>,
    %c255_i32_35 = arith.constant 255 : i32
    %53 = tpu.dynamic_rotate %39 by %c255_i32_35 dim 0 : vector<256x16xf32>, i32 -> vector<256x16xf32>
    %54 = arith.truncf %53 : vector<256x16xf32> to vector<256x16xbf16>
    %c0_36 = arith.constant 0 : index
    %c80 = arith.constant 80 : index
    %55 = vector.load %arg28[%c0_36, %c80] : memref<256x144xbf16, #tpu.memory_space<vmem>>, vector<256x16xbf16>
    tpu.vector_store %arg28[%c0_36, %c80], %54 {strides = array<i32>} : memref<256x144xbf16, #tpu.memory_space<vmem>>, vector<256x16xbf16>,
    %c241_i32_37 = arith.constant 241 : i32
    %56 = tpu.dynamic_rotate %39 by %c241_i32_37 dim 0 : vector<256x16xf32>, i32 -> vector<256x16xf32>
    %57 = arith.truncf %56 : vector<256x16xf32> to vector<256x16xbf16>
    %c0_38 = arith.constant 0 : index
    %c96 = arith.constant 96 : index
    %58 = vector.load %arg28[%c0_38, %c96] : memref<256x144xbf16, #tpu.memory_space<vmem>>, vector<256x16xbf16>
    tpu.vector_store %arg28[%c0_38, %c96], %57 {strides = array<i32>} : memref<256x144xbf16, #tpu.memory_space<vmem>>, vector<256x16xbf16>,
    %c240_i32_39 = arith.constant 240 : i32
    %59 = tpu.dynamic_rotate %39 by %c240_i32_39 dim 0 : vector<256x16xf32>, i32 -> vector<256x16xf32>
    %60 = arith.truncf %59 : vector<256x16xf32> to vector<256x16xbf16>
    %c0_40 = arith.constant 0 : index
    %c112 = arith.constant 112 : index
    %61 = vector.load %arg28[%c0_40, %c112] : memref<256x144xbf16, #tpu.memory_space<vmem>>, vector<256x16xbf16>
    tpu.vector_store %arg28[%c0_40, %c112], %60 {strides = array<i32>} : memref<256x144xbf16, #tpu.memory_space<vmem>>, vector<256x16xbf16>,
    %c239_i32_41 = arith.constant 239 : i32
    %62 = tpu.dynamic_rotate %39 by %c239_i32_41 dim 0 : vector<256x16xf32>, i32 -> vector<256x16xf32>
    %63 = arith.truncf %62 : vector<256x16xf32> to vector<256x16xbf16>
    %c0_42 = arith.constant 0 : index
    %c128 = arith.constant 128 : index
    %64 = vector.load %arg28[%c0_42, %c128] : memref<256x144xbf16, #tpu.memory_space<vmem>>, vector<256x16xbf16>
    tpu.vector_store %arg28[%c0_42, %c128], %63 {strides = array<i32>} : memref<256x144xbf16, #tpu.memory_space<vmem>>, vector<256x16xbf16>,
    %c0_43 = arith.constant 0 : index
    %c0_44 = arith.constant 0 : index
    %65 = vector.load %arg28[%c0_43, %c0_44] : memref<256x144xbf16, #tpu.memory_space<vmem>>, vector<256x144xbf16>
    %c0_45 = arith.constant 0 : index
    %c0_46 = arith.constant 0 : index
    %66 = vector.load %arg3[%c0_45, %c0_46] : memref<256x144xbf16, #tpu.memory_space<vmem>>, vector<256x144xbf16>
    %67 = arith.mulf %65, %66 : vector<256x144xbf16>
    %c0_47 = arith.constant 0 : index
    %c0_48 = arith.constant 0 : index
    %68 = vector.load %arg12[%c0_47, %c0_48] : memref<144x16xbf16, #tpu.memory_space<vmem>>, vector<144x16xbf16>
    %cst_49 = arith.constant dense<0.000000e+00> : vector<256x16xf32>
    %69 = tpu.matmul %67, %68, %cst_49 {dimension_numbers = #tpu.dot_dimension_numbers<[1], [0], [0], [1], [0, 0, 1, 1], [], []>} : vector<256x144xbf16>, vector<144x16xbf16>, vector<256x16xf32> -> vector<256x16xf32>
    %c0_50 = arith.constant 0 : index
    %c0_51 = arith.constant 0 : index
    %70 = vector.load %arg13[%c0_50, %c0_51] : memref<1x16xf32, #tpu.memory_space<vmem>>, vector<1x16xf32>
    %71 = vector.broadcast %70 : vector<1x16xf32> to vector<256x16xf32>
    %72 = arith.addf %69, %71 : vector<256x16xf32>
    %cst_52 = arith.constant 0.000000e+00 : f32
    %73 = vector.broadcast %cst_52 : f32 to vector<256x16xf32>
    %74 = arith.maximumf %72, %73 : vector<256x16xf32>
    %75 = arith.truncf %74 : vector<256x16xf32> to vector<256x16xbf16>
    %76 = arith.extf %75 : vector<256x16xbf16> to vector<256x16xf32>
    %c17_i32_53 = arith.constant 17 : i32
    %77 = tpu.dynamic_rotate %76 by %c17_i32_53 dim 0 : vector<256x16xf32>, i32 -> vector<256x16xf32>
    %78 = arith.truncf %77 : vector<256x16xf32> to vector<256x16xbf16>
    %c0_54 = arith.constant 0 : index
    %c0_55 = arith.constant 0 : index
    %79 = vector.load %arg28[%c0_54, %c0_55] : memref<256x144xbf16, #tpu.memory_space<vmem>>, vector<256x16xbf16>
    tpu.vector_store %arg28[%c0_54, %c0_55], %78 {strides = array<i32>} : memref<256x144xbf16, #tpu.memory_space<vmem>>, vector<256x16xbf16>,
    %c16_i32_56 = arith.constant 16 : i32
    %80 = tpu.dynamic_rotate %76 by %c16_i32_56 dim 0 : vector<256x16xf32>, i32 -> vector<256x16xf32>
    %81 = arith.truncf %80 : vector<256x16xf32> to vector<256x16xbf16>
    %c0_57 = arith.constant 0 : index
    %c16_58 = arith.constant 16 : index
    %82 = vector.load %arg28[%c0_57, %c16_58] : memref<256x144xbf16, #tpu.memory_space<vmem>>, vector<256x16xbf16>
    tpu.vector_store %arg28[%c0_57, %c16_58], %81 {strides = array<i32>} : memref<256x144xbf16, #tpu.memory_space<vmem>>, vector<256x16xbf16>,
    %c15_i32_59 = arith.constant 15 : i32
    %83 = tpu.dynamic_rotate %76 by %c15_i32_59 dim 0 : vector<256x16xf32>, i32 -> vector<256x16xf32>
    %84 = arith.truncf %83 : vector<256x16xf32> to vector<256x16xbf16>
    %c0_60 = arith.constant 0 : index
    %c32_61 = arith.constant 32 : index
    %85 = vector.load %arg28[%c0_60, %c32_61] : memref<256x144xbf16, #tpu.memory_space<vmem>>, vector<256x16xbf16>
    tpu.vector_store %arg28[%c0_60, %c32_61], %84 {strides = array<i32>} : memref<256x144xbf16, #tpu.memory_space<vmem>>, vector<256x16xbf16>,
    %c1_i32_62 = arith.constant 1 : i32
    %86 = tpu.dynamic_rotate %76 by %c1_i32_62 dim 0 : vector<256x16xf32>, i32 -> vector<256x16xf32>
    %87 = arith.truncf %86 : vector<256x16xf32> to vector<256x16xbf16>
    %c0_63 = arith.constant 0 : index
    %c48_64 = arith.constant 48 : index
    %88 = vector.load %arg28[%c0_63, %c48_64] : memref<256x144xbf16, #tpu.memory_space<vmem>>, vector<256x16xbf16>
    tpu.vector_store %arg28[%c0_63, %c48_64], %87 {strides = array<i32>} : memref<256x144xbf16, #tpu.memory_space<vmem>>, vector<256x16xbf16>,
    %c0_65 = arith.constant 0 : index
    %c64_66 = arith.constant 64 : index
    %89 = vector.load %arg28[%c0_65, %c64_66] : memref<256x144xbf16, #tpu.memory_space<vmem>>, vector<256x16xbf16>
    tpu.vector_store %arg28[%c0_65, %c64_66], %75 {strides = array<i32>} : memref<256x144xbf16, #tpu.memory_space<vmem>>, vector<256x16xbf16>,
    %c255_i32_67 = arith.constant 255 : i32
    %90 = tpu.dynamic_rotate %76 by %c255_i32_67 dim 0 : vector<256x16xf32>, i32 -> vector<256x16xf32>
    %91 = arith.truncf %90 : vector<256x16xf32> to vector<256x16xbf16>
    %c0_68 = arith.constant 0 : index
    %c80_69 = arith.constant 80 : index
    %92 = vector.load %arg28[%c0_68, %c80_69] : memref<256x144xbf16, #tpu.memory_space<vmem>>, vector<256x16xbf16>
    tpu.vector_store %arg28[%c0_68, %c80_69], %91 {strides = array<i32>} : memref<256x144xbf16, #tpu.memory_space<vmem>>, vector<256x16xbf16>,
    %c241_i32_70 = arith.constant 241 : i32
    %93 = tpu.dynamic_rotate %76 by %c241_i32_70 dim 0 : vector<256x16xf32>, i32 -> vector<256x16xf32>
    %94 = arith.truncf %93 : vector<256x16xf32> to vector<256x16xbf16>
    %c0_71 = arith.constant 0 : index
    %c96_72 = arith.constant 96 : index
    %95 = vector.load %arg28[%c0_71, %c96_72] : memref<256x144xbf16, #tpu.memory_space<vmem>>, vector<256x16xbf16>
    tpu.vector_store %arg28[%c0_71, %c96_72], %94 {strides = array<i32>} : memref<256x144xbf16, #tpu.memory_space<vmem>>, vector<256x16xbf16>,
    %c240_i32_73 = arith.constant 240 : i32
    %96 = tpu.dynamic_rotate %76 by %c240_i32_73 dim 0 : vector<256x16xf32>, i32 -> vector<256x16xf32>
    %97 = arith.truncf %96 : vector<256x16xf32> to vector<256x16xbf16>
    %c0_74 = arith.constant 0 : index
    %c112_75 = arith.constant 112 : index
    %98 = vector.load %arg28[%c0_74, %c112_75] : memref<256x144xbf16, #tpu.memory_space<vmem>>, vector<256x16xbf16>
    tpu.vector_store %arg28[%c0_74, %c112_75], %97 {strides = array<i32>} : memref<256x144xbf16, #tpu.memory_space<vmem>>, vector<256x16xbf16>,
    %c239_i32_76 = arith.constant 239 : i32
    %99 = tpu.dynamic_rotate %76 by %c239_i32_76 dim 0 : vector<256x16xf32>, i32 -> vector<256x16xf32>
    %100 = arith.truncf %99 : vector<256x16xf32> to vector<256x16xbf16>
    %c0_77 = arith.constant 0 : index
    %c128_78 = arith.constant 128 : index
    %101 = vector.load %arg28[%c0_77, %c128_78] : memref<256x144xbf16, #tpu.memory_space<vmem>>, vector<256x16xbf16>
    tpu.vector_store %arg28[%c0_77, %c128_78], %100 {strides = array<i32>} : memref<256x144xbf16, #tpu.memory_space<vmem>>, vector<256x16xbf16>,
    %c0_79 = arith.constant 0 : index
    %c0_80 = arith.constant 0 : index
    %102 = vector.load %arg28[%c0_79, %c0_80] : memref<256x144xbf16, #tpu.memory_space<vmem>>, vector<256x144xbf16>
    %c0_81 = arith.constant 0 : index
    %c0_82 = arith.constant 0 : index
    %103 = vector.load %arg3[%c0_81, %c0_82] : memref<256x144xbf16, #tpu.memory_space<vmem>>, vector<256x144xbf16>
    %104 = arith.mulf %102, %103 : vector<256x144xbf16>
    %c0_83 = arith.constant 0 : index
    %c0_84 = arith.constant 0 : index
    %105 = vector.load %arg14[%c0_83, %c0_84] : memref<144x16xbf16, #tpu.memory_space<vmem>>, vector<144x16xbf16>
    %cst_85 = arith.constant dense<0.000000e+00> : vector<256x16xf32>
    %106 = tpu.matmul %104, %105, %cst_85 {dimension_numbers = #tpu.dot_dimension_numbers<[1], [0], [0], [1], [0, 0, 1, 1], [], []>} : vector<256x144xbf16>, vector<144x16xbf16>, vector<256x16xf32> -> vector<256x16xf32>
    %c0_86 = arith.constant 0 : index
    %c0_87 = arith.constant 0 : index
    %107 = vector.load %arg15[%c0_86, %c0_87] : memref<1x16xf32, #tpu.memory_space<vmem>>, vector<1x16xf32>
    %108 = vector.broadcast %107 : vector<1x16xf32> to vector<256x16xf32>
    %109 = arith.addf %106, %108 : vector<256x16xf32>
    %110 = arith.extf %38 : vector<256x16xbf16> to vector<256x16xf32>
    %111 = arith.addf %109, %110 : vector<256x16xf32>
    %cst_88 = arith.constant 0.000000e+00 : f32
    %112 = vector.broadcast %cst_88 : f32 to vector<256x16xf32>
    %113 = arith.maximumf %111, %112 : vector<256x16xf32>
    %114 = arith.truncf %113 : vector<256x16xf32> to vector<256x16xbf16>
    %c0_89 = arith.constant 0 : index
    %c0_90 = arith.constant 0 : index
    %115 = vector.load %arg6[%c0_89, %c0_90] : memref<64x256xbf16, #tpu.memory_space<vmem>>, vector<64x256xbf16>
    %116 = arith.extf %114 : vector<256x16xbf16> to vector<256x16xf32>
    %c17_i32_91 = arith.constant 17 : i32
    %117 = tpu.dynamic_rotate %116 by %c17_i32_91 dim 0 : vector<256x16xf32>, i32 -> vector<256x16xf32>
    %118 = arith.truncf %117 : vector<256x16xf32> to vector<256x16xbf16>
    %c0_92 = arith.constant 0 : index
    %c0_93 = arith.constant 0 : index
    %119 = vector.load %arg28[%c0_92, %c0_93] : memref<256x144xbf16, #tpu.memory_space<vmem>>, vector<256x16xbf16>
    tpu.vector_store %arg28[%c0_92, %c0_93], %118 {strides = array<i32>} : memref<256x144xbf16, #tpu.memory_space<vmem>>, vector<256x16xbf16>,
    %c16_i32_94 = arith.constant 16 : i32
    %120 = tpu.dynamic_rotate %116 by %c16_i32_94 dim 0 : vector<256x16xf32>, i32 -> vector<256x16xf32>
    %121 = arith.truncf %120 : vector<256x16xf32> to vector<256x16xbf16>
    %c0_95 = arith.constant 0 : index
    %c16_96 = arith.constant 16 : index
    %122 = vector.load %arg28[%c0_95, %c16_96] : memref<256x144xbf16, #tpu.memory_space<vmem>>, vector<256x16xbf16>
    tpu.vector_store %arg28[%c0_95, %c16_96], %121 {strides = array<i32>} : memref<256x144xbf16, #tpu.memory_space<vmem>>, vector<256x16xbf16>,
    %c15_i32_97 = arith.constant 15 : i32
    %123 = tpu.dynamic_rotate %116 by %c15_i32_97 dim 0 : vector<256x16xf32>, i32 -> vector<256x16xf32>
    %124 = arith.truncf %123 : vector<256x16xf32> to vector<256x16xbf16>
    %c0_98 = arith.constant 0 : index
    %c32_99 = arith.constant 32 : index
    %125 = vector.load %arg28[%c0_98, %c32_99] : memref<256x144xbf16, #tpu.memory_space<vmem>>, vector<256x16xbf16>
    tpu.vector_store %arg28[%c0_98, %c32_99], %124 {strides = array<i32>} : memref<256x144xbf16, #tpu.memory_space<vmem>>, vector<256x16xbf16>,
    %c1_i32_100 = arith.constant 1 : i32
    %126 = tpu.dynamic_rotate %116 by %c1_i32_100 dim 0 : vector<256x16xf32>, i32 -> vector<256x16xf32>
    %127 = arith.truncf %126 : vector<256x16xf32> to vector<256x16xbf16>
    %c0_101 = arith.constant 0 : index
    %c48_102 = arith.constant 48 : index
    %128 = vector.load %arg28[%c0_101, %c48_102] : memref<256x144xbf16, #tpu.memory_space<vmem>>, vector<256x16xbf16>
    tpu.vector_store %arg28[%c0_101, %c48_102], %127 {strides = array<i32>} : memref<256x144xbf16, #tpu.memory_space<vmem>>, vector<256x16xbf16>,
    %c0_103 = arith.constant 0 : index
    %c64_104 = arith.constant 64 : index
    %129 = vector.load %arg28[%c0_103, %c64_104] : memref<256x144xbf16, #tpu.memory_space<vmem>>, vector<256x16xbf16>
    tpu.vector_store %arg28[%c0_103, %c64_104], %114 {strides = array<i32>} : memref<256x144xbf16, #tpu.memory_space<vmem>>, vector<256x16xbf16>,
    %c255_i32_105 = arith.constant 255 : i32
    %130 = tpu.dynamic_rotate %116 by %c255_i32_105 dim 0 : vector<256x16xf32>, i32 -> vector<256x16xf32>
    %131 = arith.truncf %130 : vector<256x16xf32> to vector<256x16xbf16>
    %c0_106 = arith.constant 0 : index
    %c80_107 = arith.constant 80 : index
    %132 = vector.load %arg28[%c0_106, %c80_107] : memref<256x144xbf16, #tpu.memory_space<vmem>>, vector<256x16xbf16>
    tpu.vector_store %arg28[%c0_106, %c80_107], %131 {strides = array<i32>} : memref<256x144xbf16, #tpu.memory_space<vmem>>, vector<256x16xbf16>,
    %c241_i32_108 = arith.constant 241 : i32
    %133 = tpu.dynamic_rotate %116 by %c241_i32_108 dim 0 : vector<256x16xf32>, i32 -> vector<256x16xf32>
    %134 = arith.truncf %133 : vector<256x16xf32> to vector<256x16xbf16>
    %c0_109 = arith.constant 0 : index
    %c96_110 = arith.constant 96 : index
    %135 = vector.load %arg28[%c0_109, %c96_110] : memref<256x144xbf16, #tpu.memory_space<vmem>>, vector<256x16xbf16>
    tpu.vector_store %arg28[%c0_109, %c96_110], %134 {strides = array<i32>} : memref<256x144xbf16, #tpu.memory_space<vmem>>, vector<256x16xbf16>,
    %c240_i32_111 = arith.constant 240 : i32
    %136 = tpu.dynamic_rotate %116 by %c240_i32_111 dim 0 : vector<256x16xf32>, i32 -> vector<256x16xf32>
    %137 = arith.truncf %136 : vector<256x16xf32> to vector<256x16xbf16>
    %c0_112 = arith.constant 0 : index
    %c112_113 = arith.constant 112 : index
    %138 = vector.load %arg28[%c0_112, %c112_113] : memref<256x144xbf16, #tpu.memory_space<vmem>>, vector<256x16xbf16>
    tpu.vector_store %arg28[%c0_112, %c112_113], %137 {strides = array<i32>} : memref<256x144xbf16, #tpu.memory_space<vmem>>, vector<256x16xbf16>,
    %c239_i32_114 = arith.constant 239 : i32
    %139 = tpu.dynamic_rotate %116 by %c239_i32_114 dim 0 : vector<256x16xf32>, i32 -> vector<256x16xf32>
    %140 = arith.truncf %139 : vector<256x16xf32> to vector<256x16xbf16>
    %c0_115 = arith.constant 0 : index
    %c128_116 = arith.constant 128 : index
    %141 = vector.load %arg28[%c0_115, %c128_116] : memref<256x144xbf16, #tpu.memory_space<vmem>>, vector<256x16xbf16>
    tpu.vector_store %arg28[%c0_115, %c128_116], %140 {strides = array<i32>} : memref<256x144xbf16, #tpu.memory_space<vmem>>, vector<256x16xbf16>,
    %c0_117 = arith.constant 0 : index
    %c0_118 = arith.constant 0 : index
    %142 = vector.load %arg28[%c0_117, %c0_118] : memref<256x144xbf16, #tpu.memory_space<vmem>>, vector<256x144xbf16>
    %c0_119 = arith.constant 0 : index
    %c0_120 = arith.constant 0 : index
    %143 = vector.load %arg3[%c0_119, %c0_120] : memref<256x144xbf16, #tpu.memory_space<vmem>>, vector<256x144xbf16>
    %144 = arith.mulf %142, %143 : vector<256x144xbf16>
    %c0_121 = arith.constant 0 : index
    %c0_122 = arith.constant 0 : index
    %145 = vector.load %arg16[%c0_121, %c0_122] : memref<144x32xbf16, #tpu.memory_space<vmem>>, vector<144x32xbf16>
    %cst_123 = arith.constant dense<0.000000e+00> : vector<256x32xf32>
    %146 = tpu.matmul %144, %145, %cst_123 {dimension_numbers = #tpu.dot_dimension_numbers<[1], [0], [0], [1], [0, 0, 1, 1], [], []>} : vector<256x144xbf16>, vector<144x32xbf16>, vector<256x32xf32> -> vector<256x32xf32>
    %c0_124 = arith.constant 0 : index
    %c0_125 = arith.constant 0 : index
    %147 = vector.load %arg17[%c0_124, %c0_125] : memref<1x32xf32, #tpu.memory_space<vmem>>, vector<1x32xf32>
    %148 = vector.broadcast %147 : vector<1x32xf32> to vector<256x32xf32>
    %149 = arith.addf %146, %148 : vector<256x32xf32>
    %cst_126 = arith.constant 0.000000e+00 : f32
    %150 = vector.broadcast %cst_126 : f32 to vector<256x32xf32>
    %151 = arith.maximumf %149, %150 : vector<256x32xf32>
    %152 = arith.truncf %151 : vector<256x32xf32> to vector<256x32xbf16>
    %cst_127 = arith.constant dense<0.000000e+00> : vector<64x32xf32>
    %153 = tpu.matmul %115, %152, %cst_127 {dimension_numbers = #tpu.dot_dimension_numbers<[1], [0], [0], [1], [0, 0, 1, 1], [], []>} : vector<64x256xbf16>, vector<256x32xbf16>, vector<64x32xf32> -> vector<64x32xf32>
    %154 = arith.truncf %153 : vector<64x32xf32> to vector<64x32xbf16>
    %cst_128 = arith.constant dense<0.000000e+00> : vector<64x16xf32>
    %155 = tpu.matmul %115, %114, %cst_128 {dimension_numbers = #tpu.dot_dimension_numbers<[1], [0], [0], [1], [0, 0, 1, 1], [], []>} : vector<64x256xbf16>, vector<256x16xbf16>, vector<64x16xf32> -> vector<64x16xf32>
    %156 = arith.truncf %155 : vector<64x16xf32> to vector<64x16xbf16>
    %c0_129 = arith.constant 0 : index
    %c0_130 = arith.constant 0 : index
    %157 = vector.load %arg8[%c0_129, %c0_130] : memref<16x32xbf16, #tpu.memory_space<vmem>>, vector<16x32xbf16>
    %cst_131 = arith.constant dense<0.000000e+00> : vector<64x32xf32>
    %158 = tpu.matmul %156, %157, %cst_131 {dimension_numbers = #tpu.dot_dimension_numbers<[1], [0], [0], [1], [0, 0, 1, 1], [], []>} : vector<64x16xbf16>, vector<16x32xbf16>, vector<64x32xf32> -> vector<64x32xf32>
    %159 = arith.extf %154 : vector<64x32xbf16> to vector<64x32xf32>
    %c9_i32 = arith.constant 9 : i32
    %160 = tpu.dynamic_rotate %159 by %c9_i32 dim 0 : vector<64x32xf32>, i32 -> vector<64x32xf32>
    %161 = arith.truncf %160 : vector<64x32xf32> to vector<64x32xbf16>
    %c0_132 = arith.constant 0 : index
    %c0_133 = arith.constant 0 : index
    %162 = vector.load %arg29[%c0_132, %c0_133] : memref<64x288xbf16, #tpu.memory_space<vmem>>, vector<64x32xbf16>
    tpu.vector_store %arg29[%c0_132, %c0_133], %161 {strides = array<i32>} : memref<64x288xbf16, #tpu.memory_space<vmem>>, vector<64x32xbf16>,
    %c8_i32 = arith.constant 8 : i32
    %163 = tpu.dynamic_rotate %159 by %c8_i32 dim 0 : vector<64x32xf32>, i32 -> vector<64x32xf32>
    %164 = arith.truncf %163 : vector<64x32xf32> to vector<64x32xbf16>
    %c0_134 = arith.constant 0 : index
    %c32_135 = arith.constant 32 : index
    %165 = vector.load %arg29[%c0_134, %c32_135] : memref<64x288xbf16, #tpu.memory_space<vmem>>, vector<64x32xbf16>
    tpu.vector_store %arg29[%c0_134, %c32_135], %164 {strides = array<i32>} : memref<64x288xbf16, #tpu.memory_space<vmem>>, vector<64x32xbf16>,
    %c7_i32 = arith.constant 7 : i32
    %166 = tpu.dynamic_rotate %159 by %c7_i32 dim 0 : vector<64x32xf32>, i32 -> vector<64x32xf32>
    %167 = arith.truncf %166 : vector<64x32xf32> to vector<64x32xbf16>
    %c0_136 = arith.constant 0 : index
    %c64_137 = arith.constant 64 : index
    %168 = vector.load %arg29[%c0_136, %c64_137] : memref<64x288xbf16, #tpu.memory_space<vmem>>, vector<64x32xbf16>
    tpu.vector_store %arg29[%c0_136, %c64_137], %167 {strides = array<i32>} : memref<64x288xbf16, #tpu.memory_space<vmem>>, vector<64x32xbf16>,
    %c1_i32_138 = arith.constant 1 : i32
    %169 = tpu.dynamic_rotate %159 by %c1_i32_138 dim 0 : vector<64x32xf32>, i32 -> vector<64x32xf32>
    %170 = arith.truncf %169 : vector<64x32xf32> to vector<64x32xbf16>
    %c0_139 = arith.constant 0 : index
    %c96_140 = arith.constant 96 : index
    %171 = vector.load %arg29[%c0_139, %c96_140] : memref<64x288xbf16, #tpu.memory_space<vmem>>, vector<64x32xbf16>
    tpu.vector_store %arg29[%c0_139, %c96_140], %170 {strides = array<i32>} : memref<64x288xbf16, #tpu.memory_space<vmem>>, vector<64x32xbf16>,
    %c0_141 = arith.constant 0 : index
    %c128_142 = arith.constant 128 : index
    %172 = vector.load %arg29[%c0_141, %c128_142] : memref<64x288xbf16, #tpu.memory_space<vmem>>, vector<64x32xbf16>
    tpu.vector_store %arg29[%c0_141, %c128_142], %154 {strides = array<i32>} : memref<64x288xbf16, #tpu.memory_space<vmem>>, vector<64x32xbf16>,
    %c63_i32 = arith.constant 63 : i32
    %173 = tpu.dynamic_rotate %159 by %c63_i32 dim 0 : vector<64x32xf32>, i32 -> vector<64x32xf32>
    %174 = arith.truncf %173 : vector<64x32xf32> to vector<64x32xbf16>
    %c0_143 = arith.constant 0 : index
    %c160 = arith.constant 160 : index
    %175 = vector.load %arg29[%c0_143, %c160] : memref<64x288xbf16, #tpu.memory_space<vmem>>, vector<64x32xbf16>
    tpu.vector_store %arg29[%c0_143, %c160], %174 {strides = array<i32>} : memref<64x288xbf16, #tpu.memory_space<vmem>>, vector<64x32xbf16>,
    %c57_i32 = arith.constant 57 : i32
    %176 = tpu.dynamic_rotate %159 by %c57_i32 dim 0 : vector<64x32xf32>, i32 -> vector<64x32xf32>
    %177 = arith.truncf %176 : vector<64x32xf32> to vector<64x32xbf16>
    %c0_144 = arith.constant 0 : index
    %c192 = arith.constant 192 : index
    %178 = vector.load %arg29[%c0_144, %c192] : memref<64x288xbf16, #tpu.memory_space<vmem>>, vector<64x32xbf16>
    tpu.vector_store %arg29[%c0_144, %c192], %177 {strides = array<i32>} : memref<64x288xbf16, #tpu.memory_space<vmem>>, vector<64x32xbf16>,
    %c56_i32 = arith.constant 56 : i32
    %179 = tpu.dynamic_rotate %159 by %c56_i32 dim 0 : vector<64x32xf32>, i32 -> vector<64x32xf32>
    %180 = arith.truncf %179 : vector<64x32xf32> to vector<64x32xbf16>
    %c0_145 = arith.constant 0 : index
    %c224 = arith.constant 224 : index
    %181 = vector.load %arg29[%c0_145, %c224] : memref<64x288xbf16, #tpu.memory_space<vmem>>, vector<64x32xbf16>
    tpu.vector_store %arg29[%c0_145, %c224], %180 {strides = array<i32>} : memref<64x288xbf16, #tpu.memory_space<vmem>>, vector<64x32xbf16>,
    %c55_i32 = arith.constant 55 : i32
    %182 = tpu.dynamic_rotate %159 by %c55_i32 dim 0 : vector<64x32xf32>, i32 -> vector<64x32xf32>
    %183 = arith.truncf %182 : vector<64x32xf32> to vector<64x32xbf16>
    %c0_146 = arith.constant 0 : index
    %c256 = arith.constant 256 : index
    %184 = vector.load %arg29[%c0_146, %c256] : memref<64x288xbf16, #tpu.memory_space<vmem>>, vector<64x32xbf16>
    tpu.vector_store %arg29[%c0_146, %c256], %183 {strides = array<i32>} : memref<64x288xbf16, #tpu.memory_space<vmem>>, vector<64x32xbf16>,
    %c0_147 = arith.constant 0 : index
    %c0_148 = arith.constant 0 : index
    %185 = vector.load %arg29[%c0_147, %c0_148] : memref<64x288xbf16, #tpu.memory_space<vmem>>, vector<64x288xbf16>
    %c0_149 = arith.constant 0 : index
    %c0_150 = arith.constant 0 : index
    %186 = vector.load %arg4[%c0_149, %c0_150] : memref<64x288xbf16, #tpu.memory_space<vmem>>, vector<64x288xbf16>
    %187 = arith.mulf %185, %186 : vector<64x288xbf16>
    %c0_151 = arith.constant 0 : index
    %c0_152 = arith.constant 0 : index
    %188 = vector.load %arg18[%c0_151, %c0_152] : memref<288x32xbf16, #tpu.memory_space<vmem>>, vector<288x32xbf16>
    %cst_153 = arith.constant dense<0.000000e+00> : vector<64x32xf32>
    %189 = tpu.matmul %187, %188, %cst_153 {dimension_numbers = #tpu.dot_dimension_numbers<[1], [0], [0], [1], [0, 0, 1, 1], [], []>} : vector<64x288xbf16>, vector<288x32xbf16>, vector<64x32xf32> -> vector<64x32xf32>
    %c0_154 = arith.constant 0 : index
    %c0_155 = arith.constant 0 : index
    %190 = vector.load %arg19[%c0_154, %c0_155] : memref<1x32xf32, #tpu.memory_space<vmem>>, vector<1x32xf32>
    %191 = vector.broadcast %190 : vector<1x32xf32> to vector<64x32xf32>
    %192 = arith.addf %189, %191 : vector<64x32xf32>
    %193 = arith.addf %192, %158 : vector<64x32xf32>
    %cst_156 = arith.constant 0.000000e+00 : f32
    %194 = vector.broadcast %cst_156 : f32 to vector<64x32xf32>
    %195 = arith.maximumf %193, %194 : vector<64x32xf32>
    %196 = arith.truncf %195 : vector<64x32xf32> to vector<64x32xbf16>
    %c0_157 = arith.constant 0 : index
    %c0_158 = arith.constant 0 : index
    %197 = vector.load %arg7[%c0_157, %c0_158] : memref<16x64xbf16, #tpu.memory_space<vmem>>, vector<16x64xbf16>
    %198 = arith.extf %196 : vector<64x32xbf16> to vector<64x32xf32>
    %c9_i32_159 = arith.constant 9 : i32
    %199 = tpu.dynamic_rotate %198 by %c9_i32_159 dim 0 : vector<64x32xf32>, i32 -> vector<64x32xf32>
    %200 = arith.truncf %199 : vector<64x32xf32> to vector<64x32xbf16>
    %c0_160 = arith.constant 0 : index
    %c0_161 = arith.constant 0 : index
    %201 = vector.load %arg29[%c0_160, %c0_161] : memref<64x288xbf16, #tpu.memory_space<vmem>>, vector<64x32xbf16>
    tpu.vector_store %arg29[%c0_160, %c0_161], %200 {strides = array<i32>} : memref<64x288xbf16, #tpu.memory_space<vmem>>, vector<64x32xbf16>,
    %c8_i32_162 = arith.constant 8 : i32
    %202 = tpu.dynamic_rotate %198 by %c8_i32_162 dim 0 : vector<64x32xf32>, i32 -> vector<64x32xf32>
    %203 = arith.truncf %202 : vector<64x32xf32> to vector<64x32xbf16>
    %c0_163 = arith.constant 0 : index
    %c32_164 = arith.constant 32 : index
    %204 = vector.load %arg29[%c0_163, %c32_164] : memref<64x288xbf16, #tpu.memory_space<vmem>>, vector<64x32xbf16>
    tpu.vector_store %arg29[%c0_163, %c32_164], %203 {strides = array<i32>} : memref<64x288xbf16, #tpu.memory_space<vmem>>, vector<64x32xbf16>,
    %c7_i32_165 = arith.constant 7 : i32
    %205 = tpu.dynamic_rotate %198 by %c7_i32_165 dim 0 : vector<64x32xf32>, i32 -> vector<64x32xf32>
    %206 = arith.truncf %205 : vector<64x32xf32> to vector<64x32xbf16>
    %c0_166 = arith.constant 0 : index
    %c64_167 = arith.constant 64 : index
    %207 = vector.load %arg29[%c0_166, %c64_167] : memref<64x288xbf16, #tpu.memory_space<vmem>>, vector<64x32xbf16>
    tpu.vector_store %arg29[%c0_166, %c64_167], %206 {strides = array<i32>} : memref<64x288xbf16, #tpu.memory_space<vmem>>, vector<64x32xbf16>,
    %c1_i32_168 = arith.constant 1 : i32
    %208 = tpu.dynamic_rotate %198 by %c1_i32_168 dim 0 : vector<64x32xf32>, i32 -> vector<64x32xf32>
    %209 = arith.truncf %208 : vector<64x32xf32> to vector<64x32xbf16>
    %c0_169 = arith.constant 0 : index
    %c96_170 = arith.constant 96 : index
    %210 = vector.load %arg29[%c0_169, %c96_170] : memref<64x288xbf16, #tpu.memory_space<vmem>>, vector<64x32xbf16>
    tpu.vector_store %arg29[%c0_169, %c96_170], %209 {strides = array<i32>} : memref<64x288xbf16, #tpu.memory_space<vmem>>, vector<64x32xbf16>,
    %c0_171 = arith.constant 0 : index
    %c128_172 = arith.constant 128 : index
    %211 = vector.load %arg29[%c0_171, %c128_172] : memref<64x288xbf16, #tpu.memory_space<vmem>>, vector<64x32xbf16>
    tpu.vector_store %arg29[%c0_171, %c128_172], %196 {strides = array<i32>} : memref<64x288xbf16, #tpu.memory_space<vmem>>, vector<64x32xbf16>,
    %c63_i32_173 = arith.constant 63 : i32
    %212 = tpu.dynamic_rotate %198 by %c63_i32_173 dim 0 : vector<64x32xf32>, i32 -> vector<64x32xf32>
    %213 = arith.truncf %212 : vector<64x32xf32> to vector<64x32xbf16>
    %c0_174 = arith.constant 0 : index
    %c160_175 = arith.constant 160 : index
    %214 = vector.load %arg29[%c0_174, %c160_175] : memref<64x288xbf16, #tpu.memory_space<vmem>>, vector<64x32xbf16>
    tpu.vector_store %arg29[%c0_174, %c160_175], %213 {strides = array<i32>} : memref<64x288xbf16, #tpu.memory_space<vmem>>, vector<64x32xbf16>,
    %c57_i32_176 = arith.constant 57 : i32
    %215 = tpu.dynamic_rotate %198 by %c57_i32_176 dim 0 : vector<64x32xf32>, i32 -> vector<64x32xf32>
    %216 = arith.truncf %215 : vector<64x32xf32> to vector<64x32xbf16>
    %c0_177 = arith.constant 0 : index
    %c192_178 = arith.constant 192 : index
    %217 = vector.load %arg29[%c0_177, %c192_178] : memref<64x288xbf16, #tpu.memory_space<vmem>>, vector<64x32xbf16>
    tpu.vector_store %arg29[%c0_177, %c192_178], %216 {strides = array<i32>} : memref<64x288xbf16, #tpu.memory_space<vmem>>, vector<64x32xbf16>,
    %c56_i32_179 = arith.constant 56 : i32
    %218 = tpu.dynamic_rotate %198 by %c56_i32_179 dim 0 : vector<64x32xf32>, i32 -> vector<64x32xf32>
    %219 = arith.truncf %218 : vector<64x32xf32> to vector<64x32xbf16>
    %c0_180 = arith.constant 0 : index
    %c224_181 = arith.constant 224 : index
    %220 = vector.load %arg29[%c0_180, %c224_181] : memref<64x288xbf16, #tpu.memory_space<vmem>>, vector<64x32xbf16>
    tpu.vector_store %arg29[%c0_180, %c224_181], %219 {strides = array<i32>} : memref<64x288xbf16, #tpu.memory_space<vmem>>, vector<64x32xbf16>,
    %c55_i32_182 = arith.constant 55 : i32
    %221 = tpu.dynamic_rotate %198 by %c55_i32_182 dim 0 : vector<64x32xf32>, i32 -> vector<64x32xf32>
    %222 = arith.truncf %221 : vector<64x32xf32> to vector<64x32xbf16>
    %c0_183 = arith.constant 0 : index
    %c256_184 = arith.constant 256 : index
    %223 = vector.load %arg29[%c0_183, %c256_184] : memref<64x288xbf16, #tpu.memory_space<vmem>>, vector<64x32xbf16>
    tpu.vector_store %arg29[%c0_183, %c256_184], %222 {strides = array<i32>} : memref<64x288xbf16, #tpu.memory_space<vmem>>, vector<64x32xbf16>,
    %c0_185 = arith.constant 0 : index
    %c0_186 = arith.constant 0 : index
    %224 = vector.load %arg29[%c0_185, %c0_186] : memref<64x288xbf16, #tpu.memory_space<vmem>>, vector<64x288xbf16>
    %c0_187 = arith.constant 0 : index
    %c0_188 = arith.constant 0 : index
    %225 = vector.load %arg4[%c0_187, %c0_188] : memref<64x288xbf16, #tpu.memory_space<vmem>>, vector<64x288xbf16>
    %226 = arith.mulf %224, %225 : vector<64x288xbf16>
    %c0_189 = arith.constant 0 : index
    %c0_190 = arith.constant 0 : index
    %227 = vector.load %arg20[%c0_189, %c0_190] : memref<288x64xbf16, #tpu.memory_space<vmem>>, vector<288x64xbf16>
    %cst_191 = arith.constant dense<0.000000e+00> : vector<64x64xf32>
    %228 = tpu.matmul %226, %227, %cst_191 {dimension_numbers = #tpu.dot_dimension_numbers<[1], [0], [0], [1], [0, 0, 1, 1], [], []>} : vector<64x288xbf16>, vector<288x64xbf16>, vector<64x64xf32> -> vector<64x64xf32>
    %c0_192 = arith.constant 0 : index
    %c0_193 = arith.constant 0 : index
    %229 = vector.load %arg21[%c0_192, %c0_193] : memref<1x64xf32, #tpu.memory_space<vmem>>, vector<1x64xf32>
    %230 = vector.broadcast %229 : vector<1x64xf32> to vector<64x64xf32>
    %231 = arith.addf %228, %230 : vector<64x64xf32>
    %cst_194 = arith.constant 0.000000e+00 : f32
    %232 = vector.broadcast %cst_194 : f32 to vector<64x64xf32>
    %233 = arith.maximumf %231, %232 : vector<64x64xf32>
    %234 = arith.truncf %233 : vector<64x64xf32> to vector<64x64xbf16>
    %cst_195 = arith.constant dense<0.000000e+00> : vector<16x64xf32>
    %235 = tpu.matmul %197, %234, %cst_195 {dimension_numbers = #tpu.dot_dimension_numbers<[1], [0], [0], [1], [0, 0, 1, 1], [], []>} : vector<16x64xbf16>, vector<64x64xbf16>, vector<16x64xf32> -> vector<16x64xf32>
    %236 = arith.truncf %235 : vector<16x64xf32> to vector<16x64xbf16>
    %cst_196 = arith.constant dense<0.000000e+00> : vector<16x32xf32>
    %237 = tpu.matmul %197, %196, %cst_196 {dimension_numbers = #tpu.dot_dimension_numbers<[1], [0], [0], [1], [0, 0, 1, 1], [], []>} : vector<16x64xbf16>, vector<64x32xbf16>, vector<16x32xf32> -> vector<16x32xf32>
    %238 = arith.truncf %237 : vector<16x32xf32> to vector<16x32xbf16>
    %c0_197 = arith.constant 0 : index
    %c0_198 = arith.constant 0 : index
    %239 = vector.load %arg9[%c0_197, %c0_198] : memref<32x64xbf16, #tpu.memory_space<vmem>>, vector<32x64xbf16>
    %cst_199 = arith.constant dense<0.000000e+00> : vector<16x64xf32>
    %240 = tpu.matmul %238, %239, %cst_199 {dimension_numbers = #tpu.dot_dimension_numbers<[1], [0], [0], [1], [0, 0, 1, 1], [], []>} : vector<16x32xbf16>, vector<32x64xbf16>, vector<16x64xf32> -> vector<16x64xf32>
    %241 = arith.extf %236 : vector<16x64xbf16> to vector<16x64xf32>
    %c5_i32 = arith.constant 5 : i32
    %242 = tpu.dynamic_rotate %241 by %c5_i32 dim 0 : vector<16x64xf32>, i32 -> vector<16x64xf32>
    %243 = arith.truncf %242 : vector<16x64xf32> to vector<16x64xbf16>
    %c0_200 = arith.constant 0 : index
    %c0_201 = arith.constant 0 : index
    %244 = vector.load %arg30[%c0_200, %c0_201] : memref<16x576xbf16, #tpu.memory_space<vmem>>, vector<16x64xbf16>
    tpu.vector_store %arg30[%c0_200, %c0_201], %243 {strides = array<i32>} : memref<16x576xbf16, #tpu.memory_space<vmem>>, vector<16x64xbf16>,
    %c4_i32 = arith.constant 4 : i32
    %245 = tpu.dynamic_rotate %241 by %c4_i32 dim 0 : vector<16x64xf32>, i32 -> vector<16x64xf32>
    %246 = arith.truncf %245 : vector<16x64xf32> to vector<16x64xbf16>
    %c0_202 = arith.constant 0 : index
    %c64_203 = arith.constant 64 : index
    %247 = vector.load %arg30[%c0_202, %c64_203] : memref<16x576xbf16, #tpu.memory_space<vmem>>, vector<16x64xbf16>
    tpu.vector_store %arg30[%c0_202, %c64_203], %246 {strides = array<i32>} : memref<16x576xbf16, #tpu.memory_space<vmem>>, vector<16x64xbf16>,
    %c3_i32 = arith.constant 3 : i32
    %248 = tpu.dynamic_rotate %241 by %c3_i32 dim 0 : vector<16x64xf32>, i32 -> vector<16x64xf32>
    %249 = arith.truncf %248 : vector<16x64xf32> to vector<16x64xbf16>
    %c0_204 = arith.constant 0 : index
    %c128_205 = arith.constant 128 : index
    %250 = vector.load %arg30[%c0_204, %c128_205] : memref<16x576xbf16, #tpu.memory_space<vmem>>, vector<16x64xbf16>
    tpu.vector_store %arg30[%c0_204, %c128_205], %249 {strides = array<i32>} : memref<16x576xbf16, #tpu.memory_space<vmem>>, vector<16x64xbf16>,
    %c1_i32_206 = arith.constant 1 : i32
    %251 = tpu.dynamic_rotate %241 by %c1_i32_206 dim 0 : vector<16x64xf32>, i32 -> vector<16x64xf32>
    %252 = arith.truncf %251 : vector<16x64xf32> to vector<16x64xbf16>
    %c0_207 = arith.constant 0 : index
    %c192_208 = arith.constant 192 : index
    %253 = vector.load %arg30[%c0_207, %c192_208] : memref<16x576xbf16, #tpu.memory_space<vmem>>, vector<16x64xbf16>
    tpu.vector_store %arg30[%c0_207, %c192_208], %252 {strides = array<i32>} : memref<16x576xbf16, #tpu.memory_space<vmem>>, vector<16x64xbf16>,
    %c0_209 = arith.constant 0 : index
    %c256_210 = arith.constant 256 : index
    %254 = vector.load %arg30[%c0_209, %c256_210] : memref<16x576xbf16, #tpu.memory_space<vmem>>, vector<16x64xbf16>
    tpu.vector_store %arg30[%c0_209, %c256_210], %236 {strides = array<i32>} : memref<16x576xbf16, #tpu.memory_space<vmem>>, vector<16x64xbf16>,
    %c15_i32_211 = arith.constant 15 : i32
    %255 = tpu.dynamic_rotate %241 by %c15_i32_211 dim 0 : vector<16x64xf32>, i32 -> vector<16x64xf32>
    %256 = arith.truncf %255 : vector<16x64xf32> to vector<16x64xbf16>
    %c0_212 = arith.constant 0 : index
    %c320 = arith.constant 320 : index
    %257 = vector.load %arg30[%c0_212, %c320] : memref<16x576xbf16, #tpu.memory_space<vmem>>, vector<16x64xbf16>
    tpu.vector_store %arg30[%c0_212, %c320], %256 {strides = array<i32>} : memref<16x576xbf16, #tpu.memory_space<vmem>>, vector<16x64xbf16>,
    %c13_i32 = arith.constant 13 : i32
    %258 = tpu.dynamic_rotate %241 by %c13_i32 dim 0 : vector<16x64xf32>, i32 -> vector<16x64xf32>
    %259 = arith.truncf %258 : vector<16x64xf32> to vector<16x64xbf16>
    %c0_213 = arith.constant 0 : index
    %c384 = arith.constant 384 : index
    %260 = vector.load %arg30[%c0_213, %c384] : memref<16x576xbf16, #tpu.memory_space<vmem>>, vector<16x64xbf16>
    tpu.vector_store %arg30[%c0_213, %c384], %259 {strides = array<i32>} : memref<16x576xbf16, #tpu.memory_space<vmem>>, vector<16x64xbf16>,
    %c12_i32 = arith.constant 12 : i32
    %261 = tpu.dynamic_rotate %241 by %c12_i32 dim 0 : vector<16x64xf32>, i32 -> vector<16x64xf32>
    %262 = arith.truncf %261 : vector<16x64xf32> to vector<16x64xbf16>
    %c0_214 = arith.constant 0 : index
    %c448 = arith.constant 448 : index
    %263 = vector.load %arg30[%c0_214, %c448] : memref<16x576xbf16, #tpu.memory_space<vmem>>, vector<16x64xbf16>
    tpu.vector_store %arg30[%c0_214, %c448], %262 {strides = array<i32>} : memref<16x576xbf16, #tpu.memory_space<vmem>>, vector<16x64xbf16>,
    %c11_i32 = arith.constant 11 : i32
    %264 = tpu.dynamic_rotate %241 by %c11_i32 dim 0 : vector<16x64xf32>, i32 -> vector<16x64xf32>
    %265 = arith.truncf %264 : vector<16x64xf32> to vector<16x64xbf16>
    %c0_215 = arith.constant 0 : index
    %c512 = arith.constant 512 : index
    %266 = vector.load %arg30[%c0_215, %c512] : memref<16x576xbf16, #tpu.memory_space<vmem>>, vector<16x64xbf16>
    tpu.vector_store %arg30[%c0_215, %c512], %265 {strides = array<i32>} : memref<16x576xbf16, #tpu.memory_space<vmem>>, vector<16x64xbf16>,
    %c0_216 = arith.constant 0 : index
    %c0_217 = arith.constant 0 : index
    %267 = vector.load %arg30[%c0_216, %c0_217] : memref<16x576xbf16, #tpu.memory_space<vmem>>, vector<16x576xbf16>
    %c0_218 = arith.constant 0 : index
    %c0_219 = arith.constant 0 : index
    %268 = vector.load %arg5[%c0_218, %c0_219] : memref<16x576xbf16, #tpu.memory_space<vmem>>, vector<16x576xbf16>
    %269 = arith.mulf %267, %268 : vector<16x576xbf16>
    %c0_220 = arith.constant 0 : index
    %c0_221 = arith.constant 0 : index
    %270 = vector.load %arg22[%c0_220, %c0_221] : memref<576x64xbf16, #tpu.memory_space<vmem>>, vector<576x64xbf16>
    %cst_222 = arith.constant dense<0.000000e+00> : vector<16x64xf32>
    %271 = tpu.matmul %269, %270, %cst_222 {dimension_numbers = #tpu.dot_dimension_numbers<[1], [0], [0], [1], [0, 0, 1, 1], [], []>} : vector<16x576xbf16>, vector<576x64xbf16>, vector<16x64xf32> -> vector<16x64xf32>
    %c0_223 = arith.constant 0 : index
    %c0_224 = arith.constant 0 : index
    %272 = vector.load %arg23[%c0_223, %c0_224] : memref<1x64xf32, #tpu.memory_space<vmem>>, vector<1x64xf32>
    %273 = vector.broadcast %272 : vector<1x64xf32> to vector<16x64xf32>
    %274 = arith.addf %271, %273 : vector<16x64xf32>
    %275 = arith.addf %274, %240 : vector<16x64xf32>
    %cst_225 = arith.constant 0.000000e+00 : f32
    %276 = vector.broadcast %cst_225 : f32 to vector<16x64xf32>
    %277 = arith.maximumf %275, %276 : vector<16x64xf32>
    %278 = arith.truncf %277 : vector<16x64xf32> to vector<16x64xbf16>
    %279 = arith.extf %278 : vector<16x64xbf16> to vector<16x64xf32>
    %cst_226 = arith.constant dense<0.000000e+00> : vector<64xf32>
    %280 = vector.multi_reduction <add>, %279, %cst_226 [0] : vector<16x64xf32> to vector<64xf32>
    %281 = vector.shape_cast %280 : vector<64xf32> to vector<1x64xf32>
    %cst_227 = arith.constant 1.600000e+01 : f32
    %282 = vector.broadcast %cst_227 : f32 to vector<1x64xf32>
    %283 = arith.divf %281, %282 : vector<1x64xf32>
    %284 = arith.truncf %283 : vector<1x64xf32> to vector<1x64xbf16>
    %c0_228 = arith.constant 0 : index
    %c0_229 = arith.constant 0 : index
    %285 = vector.load %arg24[%c0_228, %c0_229] : memref<64x10xbf16, #tpu.memory_space<vmem>>, vector<64x10xbf16>
    %cst_230 = arith.constant dense<0.000000e+00> : vector<1x10xf32>
    %286 = tpu.matmul %284, %285, %cst_230 {dimension_numbers = #tpu.dot_dimension_numbers<[1], [0], [0], [1], [0, 0, 1, 1], [], []>} : vector<1x64xbf16>, vector<64x10xbf16>, vector<1x10xf32> -> vector<1x10xf32>
    %c0_231 = arith.constant 0 : index
    %c0_232 = arith.constant 0 : index
    %287 = vector.load %arg25[%c0_231, %c0_232] : memref<1x10xf32, #tpu.memory_space<vmem>>, vector<1x10xf32>
    %288 = arith.addf %286, %287 : vector<1x10xf32>
    %c0_233 = arith.constant 0 : index
    %c0_234 = arith.constant 0 : index
    %c0_235 = arith.constant 0 : index
    %289 = vector.load %arg26[%c0_233, %c0_234, %c0_235] : memref<1x1x10xf32, #tpu.memory_space<vmem>>, vector<1x1x10xf32>
    %290 = vector.shape_cast %289 : vector<1x1x10xf32> to vector<1x10xf32>
    %291 = vector.shape_cast %288 : vector<1x10xf32> to vector<1x1x10xf32>
    tpu.vector_store %arg26[%c0_233, %c0_234, %c0_235], %291 {strides = array<i32>} : memref<1x1x10xf32, #tpu.memory_space<vmem>>, vector<1x1x10xf32>,
    return
  }
  func.func @transform_0(%arg0: i32) -> (i32, i32, i32) {
    %c0_i32 = arith.constant 0 : i32
    %c0_i32_0 = arith.constant 0 : i32
    %c0_i32_1 = arith.constant 0 : i32
    return %arg0, %c0_i32, %c0_i32_0 : i32, i32, i32
  }
  func.func @transform_1(%arg0: i32) -> (i32, i32) {
    %c0_i32 = arith.constant 0 : i32
    %c0_i32_0 = arith.constant 0 : i32
    %c0_i32_1 = arith.constant 0 : i32
    return %c0_i32, %c0_i32_0 : i32, i32
  }
  func.func @transform_2(%arg0: i32) -> (i32, i32) {
    %c0_i32 = arith.constant 0 : i32
    %c0_i32_0 = arith.constant 0 : i32
    %c0_i32_1 = arith.constant 0 : i32
    return %c0_i32, %c0_i32_0 : i32, i32
  }
  func.func @transform_3(%arg0: i32) -> (i32, i32) {
    %c0_i32 = arith.constant 0 : i32
    %c0_i32_0 = arith.constant 0 : i32
    %c0_i32_1 = arith.constant 0 : i32
    return %c0_i32, %c0_i32_0 : i32, i32
  }
  func.func @transform_4(%arg0: i32) -> (i32, i32) {
    %c0_i32 = arith.constant 0 : i32
    %c0_i32_0 = arith.constant 0 : i32
    %c0_i32_1 = arith.constant 0 : i32
    return %c0_i32, %c0_i32_0 : i32, i32
  }
  func.func @transform_5(%arg0: i32) -> (i32, i32) {
    %c0_i32 = arith.constant 0 : i32
    %c0_i32_0 = arith.constant 0 : i32
    %c0_i32_1 = arith.constant 0 : i32
    return %c0_i32, %c0_i32_0 : i32, i32
  }
  func.func @transform_6(%arg0: i32) -> (i32, i32) {
    %c0_i32 = arith.constant 0 : i32
    %c0_i32_0 = arith.constant 0 : i32
    %c0_i32_1 = arith.constant 0 : i32
    return %c0_i32, %c0_i32_0 : i32, i32
  }
  func.func @transform_7(%arg0: i32) -> (i32, i32) {
    %c0_i32 = arith.constant 0 : i32
    %c0_i32_0 = arith.constant 0 : i32
    %c0_i32_1 = arith.constant 0 : i32
    return %c0_i32, %c0_i32_0 : i32, i32
  }
  func.func @transform_8(%arg0: i32) -> (i32, i32) {
    %c0_i32 = arith.constant 0 : i32
    %c0_i32_0 = arith.constant 0 : i32
    %c0_i32_1 = arith.constant 0 : i32
    return %c0_i32, %c0_i32_0 : i32, i32
  }
  func.func @transform_9(%arg0: i32) -> (i32, i32) {
    %c0_i32 = arith.constant 0 : i32
    %c0_i32_0 = arith.constant 0 : i32
    %c0_i32_1 = arith.constant 0 : i32
    return %c0_i32, %c0_i32_0 : i32, i32
  }
  func.func @transform_10(%arg0: i32) -> (i32, i32) {
    %c0_i32 = arith.constant 0 : i32
    %c0_i32_0 = arith.constant 0 : i32
    %c0_i32_1 = arith.constant 0 : i32
    return %c0_i32, %c0_i32_0 : i32, i32
  }
  func.func @transform_11(%arg0: i32) -> (i32, i32) {
    %c0_i32 = arith.constant 0 : i32
    %c0_i32_0 = arith.constant 0 : i32
    %c0_i32_1 = arith.constant 0 : i32
    return %c0_i32, %c0_i32_0 : i32, i32
  }
  func.func @transform_12(%arg0: i32) -> (i32, i32) {
    %c0_i32 = arith.constant 0 : i32
    %c0_i32_0 = arith.constant 0 : i32
    %c0_i32_1 = arith.constant 0 : i32
    return %c0_i32, %c0_i32_0 : i32, i32
  }
  func.func @transform_13(%arg0: i32) -> (i32, i32) {
    %c0_i32 = arith.constant 0 : i32
    %c0_i32_0 = arith.constant 0 : i32
    %c0_i32_1 = arith.constant 0 : i32
    return %c0_i32, %c0_i32_0 : i32, i32
  }
  func.func @transform_14(%arg0: i32) -> (i32, i32) {
    %c0_i32 = arith.constant 0 : i32
    %c0_i32_0 = arith.constant 0 : i32
    %c0_i32_1 = arith.constant 0 : i32
    return %c0_i32, %c0_i32_0 : i32, i32
  }
  func.func @transform_15(%arg0: i32) -> (i32, i32) {
    %c0_i32 = arith.constant 0 : i32
    %c0_i32_0 = arith.constant 0 : i32
    %c0_i32_1 = arith.constant 0 : i32
    return %c0_i32, %c0_i32_0 : i32, i32
  }
  func.func @transform_16(%arg0: i32) -> (i32, i32) {
    %c0_i32 = arith.constant 0 : i32
    %c0_i32_0 = arith.constant 0 : i32
    %c0_i32_1 = arith.constant 0 : i32
    return %c0_i32, %c0_i32_0 : i32, i32
  }
  func.func @transform_17(%arg0: i32) -> (i32, i32) {
    %c0_i32 = arith.constant 0 : i32
    %c0_i32_0 = arith.constant 0 : i32
    %c0_i32_1 = arith.constant 0 : i32
    return %c0_i32, %c0_i32_0 : i32, i32
  }
  func.func @transform_18(%arg0: i32) -> (i32, i32) {
    %c0_i32 = arith.constant 0 : i32
    %c0_i32_0 = arith.constant 0 : i32
    %c0_i32_1 = arith.constant 0 : i32
    return %c0_i32, %c0_i32_0 : i32, i32
  }
  func.func @transform_19(%arg0: i32) -> (i32, i32) {
    %c0_i32 = arith.constant 0 : i32
    %c0_i32_0 = arith.constant 0 : i32
    %c0_i32_1 = arith.constant 0 : i32
    return %c0_i32, %c0_i32_0 : i32, i32
  }
  func.func @transform_20(%arg0: i32) -> (i32, i32) {
    %c0_i32 = arith.constant 0 : i32
    %c0_i32_0 = arith.constant 0 : i32
    %c0_i32_1 = arith.constant 0 : i32
    return %c0_i32, %c0_i32_0 : i32, i32
  }
  func.func @transform_21(%arg0: i32) -> (i32, i32) {
    %c0_i32 = arith.constant 0 : i32
    %c0_i32_0 = arith.constant 0 : i32
    %c0_i32_1 = arith.constant 0 : i32
    return %c0_i32, %c0_i32_0 : i32, i32
  }
  func.func @transform_22(%arg0: i32) -> (i32, i32) {
    %c0_i32 = arith.constant 0 : i32
    %c0_i32_0 = arith.constant 0 : i32
    %c0_i32_1 = arith.constant 0 : i32
    return %c0_i32, %c0_i32_0 : i32, i32
  }
  func.func @transform_23(%arg0: i32) -> (i32, i32) {
    %c0_i32 = arith.constant 0 : i32
    %c0_i32_0 = arith.constant 0 : i32
    %c0_i32_1 = arith.constant 0 : i32
    return %c0_i32, %c0_i32_0 : i32, i32
  }
  func.func @transform_24(%arg0: i32) -> (i32, i32) {
    %c0_i32 = arith.constant 0 : i32
    %c0_i32_0 = arith.constant 0 : i32
    %c0_i32_1 = arith.constant 0 : i32
    return %c0_i32, %c0_i32_0 : i32, i32
  }
  func.func @transform_25(%arg0: i32) -> (i32, i32, i32) {
    %c0_i32 = arith.constant 0 : i32
    %c0_i32_0 = arith.constant 0 : i32
    %c0_i32_1 = arith.constant 0 : i32
    return %arg0, %c0_i32, %c0_i32_0 : i32, i32, i32
  }
}

</mosaic_0001>

<bundles_post_ra>
// kernel: _lambda_.1
= control target key start
LH: loop header
LB: loop body
LE: loop exit
PB: predicated region body
PF: predicated region fallthrough
CT: control target
= control target key end

     0   :  { %s14435_s0 = inlined_call_operand.vmem [shape: bf16[2,256,8], index: 0, kind: input, shape index: {}]   ;;  %s14436_s1 = inlined_call_operand.vmem [shape: bf16[256,72], index: 1, kind: input, shape index: {}]   ;;  %s14437_s2 = inlined_call_operand.vmem [shape: bf16[256,144], index: 2, kind: input, shape index: {}]   ;;  %s14438_s3 = inlined_call_operand.vmem [shape: bf16[64,288], index: 3, kind: input, shape index: {}]   ;;  %s14439_s4 = inlined_call_operand.vmem [shape: bf16[16,576], index: 4, kind: input, shape index: {}]   ;;  %s14440_s5 = inlined_call_operand.vmem [shape: bf16[64,256], index: 5, kind: input, shape index: {}]   ;;  %s14441_s6 = inlined_call_operand.vmem [shape: bf16[16,64], index: 6, kind: input, shape index: {}]   ;;  %s14442_s7 = inlined_call_operand.vmem [shape: bf16[16,32], index: 7, kind: input, shape index: {}]   ;;  %s14443_s8 = inlined_call_operand.vmem [shape: bf16[32,64], index: 8, kind: input, shape index: {}]   ;;  %s14444_s9 = inlined_call_operand.vmem [shape: bf16[72,16], index: 9, kind: input, shape index: {}]   ;;  %s14445_s10 = inlined_call_operand.vmem [shape: f32[1,16], index: 10, kind: input, shape index: {}, may-alias: {10,12,14}]   ;;  %s14446_s11 = inlined_call_operand.vmem [shape: bf16[144,16], index: 11, kind: input, shape index: {}]   ;;  %s14447_s12 = inlined_call_operand.vmem [shape: f32[1,16], index: 12, kind: input, shape index: {}, may-alias: {10,12,14}]   ;;  %s14448_s13 = inlined_call_operand.vmem [shape: bf16[144,16], index: 13, kind: input, shape index: {}]   ;;  %s14449_s14 = inlined_call_operand.vmem [shape: f32[1,16], index: 14, kind: input, shape index: {}, may-alias: {10,12,14}]   ;;  %s14450_s15 = inlined_call_operand.vmem [shape: bf16[144,32], index: 15, kind: input, shape index: {}]   ;;  %s14451_s16 = inlined_call_operand.vmem [shape: f32[1,32], index: 16, kind: input, shape index: {}, may-alias: {16,18}]   ;;  %s14452_s17 = inlined_call_operand.vmem [shape: bf16[288,32], index: 17, kind: input, shape index: {}]   ;;  %s14453_s18 = inlined_call_operand.vmem [shape: f32[1,32], index: 18, kind: input, shape index: {}, may-alias: {16,18}]   ;;  %s14454_s19 = inlined_call_operand.vmem [shape: bf16[288,64], index: 19, kind: input, shape index: {}]   ;;  %s14455_s20 = inlined_call_operand.vmem [shape: f32[1,64], index: 20, kind: input, shape index: {}, may-alias: {20,22}]   ;;  %s14456_s21 = inlined_call_operand.vmem [shape: bf16[576,64], index: 21, kind: input, shape index: {}]   ;;  %s14457_s22 = inlined_call_operand.vmem [shape: f32[1,64], index: 22, kind: input, shape index: {}, may-alias: {20,22}]   ;;  %s14458_s23 = inlined_call_operand.vmem [shape: bf16[64,10], index: 23, kind: input, shape index: {}]   ;;  %s14459_s24 = inlined_call_operand.vmem [shape: f32[1,10], index: 24, kind: input, shape index: {}]   ;;  %s14460_s25 = inlined_call_operand.hbm [shape: f32[2,1,10], index: 25, kind: output, shape index: {}]  }
   0x1   :  { %14535 = sst [smem:[#allocation44_spill]] %s14435_s0 }
   0x2   :  { %14536 = sst [smem:[#allocation45_spill]] %s14436_s1 }
   0x3   :  { %14537 = sst [smem:[#allocation46_spill]] %s14437_s2 }
   0x4   :  { %14538 = sst [smem:[#allocation47_spill]] %s14438_s3 }
   0x5   :  { %14539 = sst [smem:[#allocation48_spill]] %s14439_s4 }
   0x6   :  { %14540 = sst [smem:[#allocation49_spill]] %s14440_s5 }
   0x7   :  { %14541 = sst [smem:[#allocation50_spill]] %s14441_s6 }
   0x8   :  { %14542 = sst [smem:[#allocation51_spill]] %s14442_s7 }
   0x9   :  { %14543 = sst [smem:[#allocation52_spill]] %s14443_s8 }
   0xa   :  { %14544 = sst [smem:[#allocation53_spill]] %s14444_s9 }
   0xb   :  { %14545 = sst [smem:[#allocation54_spill]] %s14459_s24 }
   0xc   :  { %14546 = sst [smem:[#allocation55_spill]] %s14460_s25 }
   0xd   :  { %30 = vsyncpa [#allocation7], 0 }
   0xe   :  { %32 = vsyncpa [#allocation7 + $0x1], 0  ;;  %s9894_s29 = smov 0   ;;  %s9896_s2 = smov 0  }
   0xf   :  { %s9898_s6 = smov 0   ;;  %s9900_s30 = smov 0  }
  0x10 LB: > { %14547 = sst [smem:[#allocation9_spill]] %s9735_s29  ;;  %s9915_s7 = sadd.s32 4294967295, %s9747_s30   ;;  %s9747_s30 = sphi %s9900_s30, %s14651_s30   ;;  %s9743_s6 = sphi %s9898_s6, %s14656_s6   ;;  %s9739_s2 = sphi %s9896_s2, %s14655_s2   ;;  %s9735_s29 = sphi %s9894_s29, %s14654_s29  }
  0x11   : > { %14548 = sst [smem:[#allocation10_spill]] %s9743_s6  ;;  %s8528_s3 = sadd.s32 4294967294, %s9747_s30  }
  0x12   : > { %14549 = sst [smem:[#allocation11_spill]] %s9747_s30  ;;  %s9919_s26 = sadd.s32 1, %s9747_s30  }
  0x13   : > { %14550 = sst [smem:[#allocation12_spill]] %s9919_s26  ;;  %s575_s1 = sadd.s32 1, %s9743_s6 }
  0x14   : > { %s572_s8 = ssub.s32 %s9747_s30, %s9919_s26  ;;  %p585_p0 = scmp.ne.s32.totalorder %s9743_s6, %s9739_s2 }
  0x15   : > { %p573_p1 = scmp.eq.s32.totalorder %s572_s8, 0  ;;  %p586_p2 = scmp.eq.s32.totalorder %s9915_s7, 1 }
  0x16   : > { %p591_p3 = scmp.ne.s32.totalorder %s9739_s2, %s9735_s29  ;;  %p592_p4 = scmp.eq.s32.totalorder %s8528_s3, 1 }
  0x17   : > { %s9930_s27 = scalar_select %p573_p1, %s9743_s6, %s575_s1  }
  0x18   : > { %p9932_p5 = por %p586_p2, %p585_p0  ;;  %p9936_p6 = por %p592_p4, %p591_p3 }
  0x19   : > { %14551 = sst [smem:[#allocation13_spill]] %s9930_s27  ;;  %p8531_p7 = scmp.ge.s32.totalorder %s9747_s30, 1 }
  0x1a   : > { %s14552_s4 = scalar_select %p9932_p5, 1, 0 }
  0x1b   : > { %s14554_s28 = scalar_select %p9936_p6, 1, 0 }
  0x1c   : > { %14553 = sst [smem:[#allocation14_spill]] %s14552_s4  ;;  %p690_p8 = scmp.lt.s32.totalorder %s9747_s30, 3 }
  0x1d   : > { %14555 = sst [smem:[#allocation15_spill]] %s14554_s28 }
  0x1e   : > { %p691_p9 = pnand %p8531_p7, %p690_p8 }
  0x20   : > { %694 = sbr.rel (%p691_p9) target bundleno = 3928 (0xf58), region = 120 }
  0x27   : > { %p757_p10 = scmp.lt.s32.totalorder %s9915_s7, 1  ;;  %v859_v0 = vlaneseq  ;;  %s14556_s1 = sld [smem:[#allocation44_spill]]  ;;  %vm910_vm1 = vcmask 64512   ;;  %vm1924_vm3 = vcmask 1043456   ;;  %vm1007_vm4 = vcmask 130112  }
  0x28   : > { %s14472_s0 = smov 16   ;;  %s14480_s3 = smov 64   ;;  %vm1169_vm5 = vcmask 195712   ;;  %vm1250_vm6 = vcmask 261312   ;;  %vm1395_vm7 = vcmask 326912   ;;  %vm1460_vm8 = vcmask 392512  }
  0x29   : > { %s758_s9 = scalar_select %p757_p10, %s9915_s7, 1  ;;  %v9944_v1 = vshrl.u32 %v859_v0, 7  ;;  %vm1525_vm9 = vcmask 458112   ;;  %vm1590_vm10 = vcmask 523712   ;;  %vm1655_vm11 = vcmask 589312  }
  0x2a   : > { %s14563_s27 = smov 48   ;;  %s14564_s6 = smov 56   ;;  %vm1875_vm12 = vcmask 588800   ;;  %vm2249_vm13 = vcmask 130048   ;;  %vm2346_vm14 = vcmask 261248   ;;  %vm2507_vm15 = vcmask 392448  }
  0x2b   : > { %s8918_s5 = sshll.u32 %s758_s9, 7  ;;  %vm1056_vm0 = vcmp.lt.s32.totalorder %v9944_v1, 7  ;;  %vm861_vm2 = vcmp.lt.s32.totalorder %v9944_v1, 1  ;;  %s14470_s9 = smov 8  }
  0x2c   : > { %s14565_s26 = smov 64   ;;  %s14566_s30 = sld [smem:[#allocation45_spill]] }
  0x2d   : > { %s9949_s8 = scalar_lea.vmem %s14556_s1, %s8918_s5  ;;  %s14468_s5 = smov 32  }
  0x2e   : > { %v9952_v2 = vld [vmem:[%s9949_s8 + $0x78] sm:$0xff]   ;;  %v9955_v3 = vld [vmem:[%s9949_s8 + $0x8] sm:$0xff]   ;;  %v9962_v7 = vld [vmem:[%s9949_s8] sm:$0xff]   ;;  %s14559_s1 = smov 16   ;;  %s14529_s4 = smov 96  }
  0x2f   : > { %v826_v4 = vunpack.c.h.bf16 %v9952_v2  ;;  %v825_v5 = vunpack.c.l.bf16 %v9952_v2  ;;  %v798_v6 = vunpack.c.h.bf16 %v9955_v3  ;;  %v797_v8 = vunpack.c.l.bf16 %v9955_v3  ;;  %959 = vrot.lane.b32.xlu0 %v9952_v2, %s14470_s9  ;;  %v9976_v13 = vld [vmem:[%s9949_s8 + $0x10] sm:$0xff]   ;;  %1349 = vrot.lane.b32.xlu1 %v9955_v3, %s14468_s5  ;;  %v9995_v29 = vld [vmem:[%s9949_s8 + $0x18] sm:$0xff]   ;;  %s14573_s24 = sld [smem:[#allocation46_spill]]  ;;  %s14639_s28 = sld [smem:[#allocation47_spill]] }
  0x30   : > { %v796_v9 = vunpack.c.h.bf16 %v9962_v7  ;;  %v795_v20 = vunpack.c.l.bf16 %v9962_v7  ;;  %v799_v23 = vunpack.c.l.bf16 %v9976_v13  ;;  %v800_v24 = vunpack.c.h.bf16 %v9976_v13  ;;  %v10002_v34 = vld [vmem:[%s9949_s8 + $0x20] sm:$0xff]   ;;  %v10040_v51 = vld [vmem:[%s9949_s8 + $0x28] sm:$0xff]   ;;  %v10060_v57 = vld [vmem:[%s9949_s8 + $0x30] sm:$0xff]   ;;  %s755_s29 = sand.u32 1, %s9739_s2  }
  0x31   : > { %v9967_v10 = vrot.slane %v826_v4, 7  ;;  %v1055_v11 = vrot.slane %v826_v4, 1  ;;  %v9973_v12 = vrot.slane %v825_v5, 1  ;;  %v830_v14 = vrot.slane %v798_v6, 7  ;;  %v10079_v4 = vld [vmem:[%s9949_s8 + $0x38] sm:$0xff]  }
  0x32   : > { %v1027_v15 = vrot.slane %v798_v6, 1  ;;  %v829_v16 = vrot.slane %v797_v8, 7  ;;  %v1026_v17 = vrot.slane %v797_v8, 1  ;;  %v828_v18 = vrot.slane %v796_v9, 7  ;;  %s14567_s25 = smov %s14566_s30 }
  0x33   : > { %v1025_v19 = vrot.slane %v796_v9, 1  ;;  %v1057_v21 = vsel %vm1056_vm0, %v9973_v12, %v1055_v11  ;;  %961 = vrot.lane.b32.xlu0 %v9962_v7, %s14470_s9  ;;  %v827_v25 = vrot.slane %v795_v20, 7  ;;  %v1024_v26 = vrot.slane %v795_v20, 1  ;;  %s14474_s9 = smov 24   ;;  %v10106_v20 = vld [vmem:[%s9949_s8 + $0x40] sm:$0xff]  }
  0x34   : > { %v890_v22 = vsel %vm861_vm2, %v829_v16, %v830_v14  ;;  %v891_v28 = vsel %vm861_vm2, %v828_v18, %v829_v16  ;;  %v9999_v31 = vrot.slane %v799_v23, 1  ;;  %v831_v32 = vrot.slane %v799_v23, 7 }
  0x35   : > { %v1086_v27 = vsel %vm1056_vm0, %v1025_v19, %v1026_v17  ;;  %v9997_v30 = vpack.c.bf16 %v890_v22, %v891_v28  ;;  %v832_v33 = vrot.slane %v800_v24, 7  ;;  %v1088_v35 = vsel %vm1056_vm0, %v1055_v11, %v1024_v26 }
  0x36   : > { %v1087_v36 = vsel %vm1056_vm0, %v1024_v26, %v1025_v19  ;;  %v892_v37 = vsel %vm861_vm2, %v827_v25, %v828_v18  ;;  %v893_v38 = vsel %vm861_vm2, %v9967_v10, %v827_v25  ;;  %v10013_v39 = vpack.c.bf16 %v1088_v35, %v1057_v21 }
  0x37   : > { %v10015_v40 = vpack.c.bf16 %v892_v37, %v893_v38  ;;  %913 = vst.msk [vmem:[#allocation2 + $0x10] sm:$0xff] %vm910_vm1, %v9997_v30  ;;  %1347 = vrot.lane.b32.xlu0 %v9962_v7, %s14468_s5  ;;  %v888_v41 = vsel %vm861_vm2, %v831_v32, %v832_v33  ;;  %v889_v42 = vsel %vm861_vm2, %v830_v14, %v831_v32  ;;  %v801_v45 = vunpack.c.l.bf16 %v9995_v29  ;;  %s14557_s5 = sld [smem:[#allocation53_spill]] }
  0x38   : > { %1121 = vrot.lane.b32.xlu1 %v10013_v39, %s14472_s0  ;;  %v10027_v43 = vpack.c.bf16 %v1086_v27, %v1087_v36  ;;  %v10029_v44 = vpack.c.bf16 %v888_v41, %v889_v42  ;;  %v802_v46 = vunpack.c.h.bf16 %v9995_v29  ;;  %v803_v47 = vunpack.c.l.bf16 %v10002_v34 }
  0x39   : > { %912 = vst.msk [vmem:[#allocation2 + $0x8] sm:$0xff] %vm910_vm1, %v10015_v40  ;;  %v804_v48 = vunpack.c.h.bf16 %v10002_v34  ;;  %v833_v49 = vrot.slane %v801_v45, 7  ;;  %v1084_v58 = vsel %vm1056_vm0, %v1027_v15, %v9999_v31  ;;  %v1085_v59 = vsel %vm1056_vm0, %v1026_v17, %v1027_v15 }
  0x3a   : > { %v834_v50 = vrot.slane %v802_v46, 7  ;;  %914 = vst.msk [vmem:[#allocation2 + $0x18] sm:$0xff] %vm910_vm1, %v10029_v44  ;;  %v835_v53 = vrot.slane %v803_v47, 7  ;;  %v805_v61 = vunpack.c.l.bf16 %v10040_v51  ;;  %v10072_v62 = vrot.slane %v825_v5, 7 }
  0x3b   : > { %1202 = vrot.lane.b32.xlu0 %v10015_v40, %s14474_s9  ;;  %v836_v54 = vrot.slane %v804_v48, 7  ;;  %v887_v56 = vsel %vm861_vm2, %v832_v33, %v833_v49  ;;  %v1029_v8 = vrot.slane %v800_v24, 1  ;;  %v806_v9 = vunpack.c.h.bf16 %v10040_v51  ;;  %v10113_v24 = vld [vmem:[%s9949_s8 + $0x74] sm:$0xf] }
  0x3c   : > { %1123 = vrot.lane.b32.xlu1 %v10027_v43, %s14472_s0  ;;  %v886_v55 = vsel %vm861_vm2, %v833_v49, %v834_v50  ;;  %v885_v0 = vsel %vm861_vm2, %v834_v50, %v835_v53  ;;  %s14476_s0 = smov 40   ;;  %v837_v11 = vrot.slane %v805_v61, 7  ;;  %v10095_v14 = vpack.c.bf16 %v1084_v58, %v1085_v59  ;;  %v10167_v59 = vld [vmem:[%s9949_s8 + $0x48] sm:$0xff]  }
  0x3d   : > { %v9401_v52 = vld [vmem:[%s14557_s5] sm:$0xff]   ;;  %v10067_v60 = vpack.c.bf16 %v886_v55, %v887_v56  ;;  %v884_v63 = vsel %vm861_vm2, %v835_v53, %v836_v54  ;;  %v9402_v6 = vld [vmem:[%s14557_s5 + $0x8] sm:$0xff]   ;;  %v807_v15 = vunpack.c.l.bf16 %v10060_v57  ;;  %v808_v16 = vunpack.c.h.bf16 %v10060_v57  ;;  %v9403_v25 = vld [vmem:[%s14557_s5 + $0x10] sm:$0xff]  }
  0x3e   : > { %9184 = vmatprep.subr.bf16.mxu0 %v9401_v52  ;;  %v10086_v5 = vpack.c.bf16 %v884_v63, %v885_v0  ;;  %v10099_v17 = vrot.slane %v801_v45, 1  ;;  %v838_v18 = vrot.slane %v806_v9, 7  ;;  %v883_v19 = vsel %vm861_vm2, %v836_v54, %v837_v11 }
  0x3f   : > { %9185 = vmatpush3.bf16.msra.mxu0 %v9401_v52  ;;  %1412 = vrot.lane.b32.xlu0 %v10027_v43, %s14476_s0  ;;  %915 = vst.msk [vmem:[#allocation2 + $0x20] sm:$0xff] %vm910_vm1, %v10067_v60  ;;  %v10110_v21 = vrot.slane %v807_v15, 1  ;;  %v839_v22 = vrot.slane %v807_v15, 7  ;;  %v840_v23 = vrot.slane %v808_v16, 7  ;;  %v809_v27 = vunpack.c.l.bf16 %v10079_v4 }
  0x40   : > { %1204 = vrot.lane.b32.xlu1 %v9997_v30, %s14474_s9  ;;  %9186 = vmatprep.subr.bf16.mxu0 %v9402_v6  ;;  %916 = vst.msk [vmem:[#allocation2 + $0x28] sm:$0xff] %vm910_vm1, %v10086_v5  ;;  %s14482_s9 = smov 48   ;;  %v882_v26 = vsel %vm861_vm2, %v837_v11, %v838_v18  ;;  %v1037_v36 = vrot.slane %v808_v16, 1  ;;  %v1082_v38 = vsel %vm1056_vm0, %v1029_v8, %v10099_v17  ;;  %v810_v41 = vunpack.c.h.bf16 %v10079_v4 }
  0x41   : > { %v10125_v28 = vpack.c.bf16 %v882_v26, %v883_v19  ;;  %v880_v32 = vsel %vm861_vm2, %v839_v22, %v840_v23  ;;  %v881_v33 = vsel %vm861_vm2, %v838_v18, %v839_v22  ;;  %v1038_v37 = vrot.slane %v809_v27, 1 }
  0x42   : > { %v10134_v35 = vpack.c.bf16 %v880_v32, %v881_v33  ;;  %v841_v42 = vrot.slane %v809_v27, 7  ;;  %v811_v45 = vunpack.c.l.bf16 %v10106_v20  ;;  %v1075_v50 = vsel %vm1056_vm0, %v10110_v21, %v1037_v36  ;;  %v10200_v32 = vld [vmem:[%s9949_s8 + $0x50] sm:$0xff]  }
  0x43   : > { %9187 = vmatpush3.bf16.msra.mxu0 %v9402_v6  ;;  %1477 = vrot.lane.b32.xlu0 %v9997_v30, %s14482_s9  ;;  %v1083_v30 = vsel %vm1056_vm0, %v9999_v31, %v1029_v8  ;;  %917 = vst.msk [vmem:[#allocation2 + $0x30] sm:$0xff] %vm910_vm1, %v10125_v28  ;;  %v9404_v31 = vld [vmem:[%s14557_s5 + $0x18] sm:$0xff]   ;;  %v1074_v49 = vsel %vm1056_vm0, %v1037_v36, %v1038_v37  ;;  %v824_v52 = vunpack.c.l.bf16 %v10113_v24  ;;  %v842_v55 = vrot.slane %v810_v41, 7  ;;  %v9684_v24 = vld [vmem:[%s9949_s8 + $0x74] sm:$0xf] }
  0x44   : > { %1414 = vrot.lane.b32.xlu1 %v10095_v14, %s14476_s0  ;;  %9188 = vmatprep.subr.bf16.mxu0 %v9403_v25  ;;  %s14478_s0 = smov 56   ;;  %v862_v53 = vsel %vm861_vm2, %v10072_v62, %v9967_v10  ;;  %918 = vst.msk [vmem:[#allocation2 + $0x38] sm:$0xff] %vm910_vm1, %v10134_v35  ;;  %v10162_v54 = vpack.c.bf16 %v1074_v49, %v1075_v50  ;;  %v1039_v58 = vrot.slane %v810_v41, 1  ;;  %v1040_v63 = vrot.slane %v811_v45, 1 }
  0x45   : > { %v879_v56 = vsel %vm861_vm2, %v840_v23, %v841_v42  ;;  %v10171_v10 = vrot.slane %v824_v52, 7  ;;  %v812_v0 = vunpack.c.h.bf16 %v10106_v20  ;;  %v843_v6 = vrot.slane %v811_v45, 7 }
  0x46   : > { %v10174_v8 = vpack.c.bf16 %v1082_v38, %v1083_v30  ;;  %v878_v11 = vsel %vm861_vm2, %v841_v42, %v842_v55  ;;  %v1073_v15 = vsel %vm1056_vm0, %v1038_v37, %v1039_v58  ;;  %v1072_v18 = vsel %vm1056_vm0, %v1039_v58, %v1040_v63  ;;  %v9405_v30 = vld [vmem:[%s14557_s5 + $0x20] ss:$0 sps:$4 sm:$0xff]   ;;  %s14562_s5 = smov 40  }
  0x47   : > { %9189 = vmatpush3.bf16.msra.mxu0 %v9403_v25  ;;  %1542 = vrot.lane.b32.xlu0 %v9955_v3, %s14478_s0  ;;  %v10182_v16 = vpack.c.bf16 %v878_v11, %v879_v56  ;;  %v863_v19 = vsel %vm861_vm2, %v10171_v10, %v10072_v62  ;;  %v844_v22 = vrot.slane %v812_v0, 7  ;;  %v10192_v23 = vpack.c.bf16 %v1072_v18, %v1073_v15 }
  0x48   : > { %1479 = vrot.lane.b32.xlu1 %v10029_v44, %s14482_s9  ;;  %9190 = vmatprep.subr.bf16.mxu0 %v9404_v31  ;;  %v10194_v25 = vpack.c.bf16 %v862_v53, %v863_v19  ;;  %v877_v26 = vsel %vm861_vm2, %v842_v55, %v843_v6  ;;  %v813_v27 = vunpack.c.l.bf16 %v10167_v59  ;;  %v1041_v33 = vrot.slane %v812_v0, 1  ;;  %v10228_v53 = vld [vmem:[%s9949_s8 + $0x58] sm:$0xff]   ;;  %s14561_s9 = smov 32  }
  0x49   : > { %919 = vst.msk [vmem:[#allocation2 + $0x40] sm:$0xff] %vm910_vm1, %v10182_v16  ;;  %v876_v62 = vsel %vm861_vm2, %v843_v6, %v844_v22  ;;  %v814_v38 = vunpack.c.h.bf16 %v10167_v59  ;;  %v1031_v41 = vrot.slane %v802_v46, 1  ;;  %v815_v50 = vunpack.c.l.bf16 %v10200_v32 }
  0x4a   : > { %911 = vst.msk [vmem:[#allocation2] sm:$0xff] %vm910_vm1, %v10194_v25  ;;  %v10211_v36 = vpack.c.bf16 %v876_v62, %v877_v26  ;;  %v1042_v37 = vrot.slane %v813_v27, 1  ;;  %v1071_v42 = vsel %vm1056_vm0, %v1040_v63, %v1041_v33  ;;  %v845_v45 = vrot.slane %v813_v27, 7 }
  0x4b   : > { %9191 = vmatpush3.bf16.msra.mxu0 %v9404_v31  ;;  %1607 = vrot.lane.b32.xlu0 %v10095_v14, %s14480_s3  ;;  %v846_v49 = vrot.slane %v814_v38, 7  ;;  %v1043_v56 = vrot.slane %v814_v38, 1  ;;  %v816_v58 = vunpack.c.h.bf16 %v10200_v32  ;;  %v1044_v63 = vrot.slane %v815_v50, 1 }
  0x4c   : > { %1544 = vrot.lane.b32.xlu1 %v9976_v13, %s14478_s0  ;;  %s14558_s0 = smov 8   ;;  %920 = vst.msk [vmem:[#allocation2 + $0x48] sm:$0xff] %vm910_vm1, %v10211_v36  ;;  %v1070_v31 = vsel %vm1056_vm0, %v1041_v33, %v1042_v37  ;;  %v875_v46 = vsel %vm861_vm2, %v844_v22, %v845_v45  ;;  %v847_v0 = vrot.slane %v815_v50, 7  ;;  %9338 = vmatprep.subr.msk.bf16.mxu0 %vm1924_vm3, %v9405_v30  ;;  %v1032_v18 = vrot.slane %v803_v47, 1 }
  0x4d   : > { %v10230_v55 = vpack.c.bf16 %v1070_v31, %v1071_v42  ;;  %v1069_v11 = vsel %vm1056_vm0, %v1042_v37, %v1043_v56  ;;  %v848_v15 = vrot.slane %v816_v58, 7  ;;  %v1068_v19 = vsel %vm1056_vm0, %v1043_v56, %v1044_v63 }
  0x4e   : > { %v873_v22 = vsel %vm861_vm2, %v846_v49, %v847_v0  ;;  %v10253_v26 = vpack.c.bf16 %v1068_v19, %v1069_v11  ;;  %v817_v62 = vunpack.c.l.bf16 %v10228_v53  ;;  %v1045_v33 = vrot.slane %v816_v58, 1 }
  0x4f   : > { %1609 = vrot.lane.b32.xlu0 %v10174_v8, %s14480_s3  ;;  %v872_v27 = vsel %vm861_vm2, %v847_v0, %v848_v15  ;;  %v818_v37 = vunpack.c.h.bf16 %v10228_v53  ;;  %s14560_s3 = smov 24   ;;  %v1033_v56 = vrot.slane %v804_v48, 1  ;;  %v1034_v58 = vrot.slane %v805_v61, 1 }
  0x50   : > { %963 = vrot.lane.b32.xlu1 %v9955_v3, %s14558_s0  ;;  %v874_v3 = vsel %vm861_vm2, %v845_v45, %v846_v49  ;;  %v10258_v47 = vpack.c.bf16 %v872_v27, %v873_v22  ;;  %v1067_v38 = vsel %vm1056_vm0, %v1044_v63, %v1045_v33  ;;  %v849_v42 = vrot.slane %v817_v62, 7 }
  0x51   : > { %v10239_v6 = vpack.c.bf16 %v874_v3, %v875_v46  ;;  %v850_v45 = vrot.slane %v818_v37, 7  ;;  %v10288_v3 = vld [vmem:[%s9949_s8 + $0x60] sm:$0xff]   ;;  %v1080_v63 = vsel %vm1056_vm0, %v1031_v41, %v1032_v18  ;;  %v1047_v48 = vrot.slane %v818_v37, 1 }
  0x52   : > { %922 = vst.msk [vmem:[#allocation2 + $0x58] sm:$0xff] %vm910_vm1, %v10258_v47  ;;  %v871_v49 = vsel %vm861_vm2, %v848_v15, %v849_v42  ;;  %v819_v0 = vunpack.c.l.bf16 %v10288_v3 }
  0x53   : > { %1125 = vrot.lane.b32.xlu0 %v10095_v14, %s14559_s1  ;;  %v1926_v14 = vsel %vm1924_vm3, %v9405_v30, 0  ;;  %921 = vst.msk [vmem:[#allocation2 + $0x50] sm:$0xff] %vm910_vm1, %v10239_v6  ;;  %v1046_v30 = vrot.slane %v817_v62, 1  ;;  %v870_v50 = vsel %vm861_vm2, %v849_v42, %v850_v45  ;;  %vm2669_vm3 = vcmask 654848  }
  0x54   : > { %965 = vrot.lane.b32.xlu1 %v9976_v13, %s14558_s0  ;;  %9193 = vmatpush3.bf16.msra.mxu0 %v1926_v14  ;;  %v10279_v46 = vpack.c.bf16 %v870_v50, %v871_v49  ;;  %v1048_v11 = vrot.slane %v819_v0, 1 }
  0x55   : > { %v1066_v31 = vsel %vm1056_vm0, %v1045_v33, %v1046_v30  ;;  %v1079_v33 = vsel %vm1056_vm0, %v1032_v18, %v1033_v56  ;;  %v1035_v18 = vrot.slane %v806_v9, 1 }
  0x56   : > { %923 = vst.msk [vmem:[#allocation2 + $0x60] sm:$0xff] %vm910_vm1, %v10279_v46  ;;  %v1064_v15 = vsel %vm1056_vm0, %v1047_v48, %v1048_v11 }
  0x57   : > { %1206 = vrot.lane.b32.xlu0 %v10029_v44, %s14560_s3  ;;  %v10273_v44 = vpack.c.bf16 %v1066_v31, %v1067_v38 }
  0x58   : > { %1127 = vrot.lane.b32.xlu1 %v10174_v8, %s14559_s1 }
  0x5b   : > { %1351 = vrot.lane.b32.xlu0 %v9976_v13, %s14561_s9  ;;  %v1081_v13 = vsel %vm1056_vm0, %v10099_v17, %v1031_v41  ;;  %v1065_v17 = vsel %vm1056_vm0, %v1046_v30, %v1047_v48  ;;  %v820_v41 = vunpack.c.h.bf16 %v10288_v3  ;;  %v10330_v30 = vld [vmem:[%s9949_s8 + $0x68] sm:$0xff]   ;;  %v1076_v48 = vsel %vm1056_vm0, %v1035_v18, %v10110_v21 }
  0x5c   : > { %1208 = vrot.lane.b32.xlu1 %v10067_v60, %s14560_s3  ;;  %v1093_v61 = vpack.c.bf16 %v1080_v63, %v1081_v13  ;;  %v10307_v19 = vpack.c.bf16 %v1064_v15, %v1065_v17  ;;  %v821_v38 = vunpack.c.l.bf16 %v10330_v30 }
  0x5d   : > { %v852_v22 = vrot.slane %v820_v41, 7  ;;  %v1049_v42 = vrot.slane %v820_v41, 1 }
  0x5f   : > { %1416 = vrot.lane.b32.xlu0 %v10174_v8, %s14562_s5  ;;  %v851_v8 = vrot.slane %v819_v0, 7  ;;  %v1063_v49 = vsel %vm1056_vm0, %v1048_v11, %v1049_v42  ;;  %v1077_v11 = vsel %vm1056_vm0, %v1034_v58, %v1035_v18 }
  0x60   : > { %1353 = vrot.lane.b32.xlu1 %v9995_v29, %s14561_s9  ;;  %v1095_v17 = vpack.c.bf16 %v1076_v48, %v1077_v11 }
  0x61   : > { %v868_v14 = vsel %vm861_vm2, %v851_v8, %v852_v22  ;;  %v869_v27 = vsel %vm861_vm2, %v850_v45, %v851_v8  ;;  %v1050_v45 = vrot.slane %v821_v38, 1 }
  0x62   : > { %v10316_v62 = vpack.c.bf16 %v868_v14, %v869_v27 }
  0x63   : > { %1481 = vrot.lane.b32.xlu0 %v10067_v60, %s14563_s27  ;;  %v1078_v60 = vsel %vm1056_vm0, %v1033_v56, %v1034_v58  ;;  %v1062_v31 = vsel %vm1056_vm0, %v1049_v42, %v1050_v45  ;;  %v822_v56 = vunpack.c.h.bf16 %v10330_v30 }
  0x64   : > { %1418 = vrot.lane.b32.xlu1 %v1093_v61, %s14562_s5  ;;  %924 = vst.msk [vmem:[#allocation2 + $0x68] sm:$0xff] %vm910_vm1, %v10316_v62  ;;  %v1094_v37 = vpack.c.bf16 %v1078_v60, %v1079_v33  ;;  %v10344_v50 = vpack.c.bf16 %v1062_v31, %v1063_v49 }
  0x65   : > { %v854_v9 = vrot.slane %v822_v56, 7 }
  0x67   : > { %1546 = vrot.lane.b32.xlu0 %v9995_v29, %s14564_s6 }
  0x68   : > { %1483 = vrot.lane.b32.xlu1 %v10086_v5, %s14563_s27 }
  0x6b   : > { %1611 = vrot.lane.b32.xlu0 %v1093_v61, %s14565_s26 }
  0x6c   : > { %1548 = vrot.lane.b32.xlu1 %v10002_v34, %s14564_s6 }
  0x6f   : > { %1613 = vrot.lane.b32.xlu0 %v1094_v37, %s14565_s26 }
  0x70   : > { %967 = vrot.lane.b32.xlu1 %v9995_v29, %s14558_s0  ;;  %v853_v29 = vrot.slane %v821_v38, 7 }
  0x72   : > { %v866_v63 = vsel %vm861_vm2, %v853_v29, %v854_v9  ;;  %v867_v13 = vsel %vm861_vm2, %v852_v22, %v853_v29  ;;  %v9407_v29 = vld [vmem:[%s14567_s25 + $0x8] sm:$0xff]  }
  0x73   : > { %1129 = vrot.lane.b32.xlu0 %v1093_v61, %s14559_s1  ;;  %v10357_v0 = vpack.c.bf16 %v866_v63, %v867_v13 }
  0x74   : > { %969 = vrot.lane.b32.xlu1 %v10002_v34, %s14558_s0 }
  0x75   : > { %925 = vst.msk [vmem:[#allocation2 + $0x70] sm:$0xff] %vm910_vm1, %v10357_v0 }
  0x77   : > { %1210 = vrot.lane.b32.xlu0 %v10086_v5, %s14560_s3  ;;  %v10366_v5 = vld [vmem:[%s9949_s8 + $0x70] sm:$0xf] }
  0x78   : > { %1131 = vrot.lane.b32.xlu1 %v1094_v37, %s14559_s1  ;;  %v823_v61 = vunpack.c.l.bf16 %v10366_v5 }
  0x7a   : > { %v10375_v15 = vrot.slane %v823_v61, 1  ;;  %v855_v58 = vrot.slane %v823_v61, 7 }
  0x7b   : > { %1355 = vrot.lane.b32.xlu0 %v10002_v34, %s14561_s9  ;;  %v1051_v34 = vrot.slane %v822_v56, 1 }
  0x7c   : > { %1212 = vrot.lane.b32.xlu1 %v10125_v28, %s14560_s3  ;;  %v864_v22 = vsel %vm861_vm2, %v855_v58, %v10171_v10  ;;  %v865_v14 = vsel %vm861_vm2, %v854_v9, %v855_v58 }
  0x7d   : > { %v1060_v41 = vsel %vm1056_vm0, %v1051_v34, %v10375_v15  ;;  %v1061_v21 = vsel %vm1056_vm0, %v1050_v45, %v1051_v34  ;;  %v10394_v27 = vpack.c.bf16 %v864_v22, %v865_v14 }
  0x7e   : > { %v10384_v8 = vpack.c.bf16 %v1060_v41, %v1061_v21 }
  0x7f   : > { %1420 = vrot.lane.b32.xlu0 %v1094_v37, %s14562_s5  ;;  %926 = vst.msk [vmem:[#allocation2 + $0x78] sm:$0xff] %vm910_vm1, %v10394_v27  ;;  %vm2588_vm1 = vcmask 523648  }
  0x80   : > { %1357 = vrot.lane.b32.xlu1 %v10040_v51, %s14561_s9 }
  0x83   : > { %1485 = vrot.lane.b32.xlu0 %v10125_v28, %s14563_s27 }
  0x84   : > { %1422 = vrot.lane.b32.xlu1 %v1095_v17, %s14562_s5 }
  0x87   : > { %1550 = vrot.lane.b32.xlu0 %v10040_v51, %s14564_s6 }
  0x88   : > { %1487 = vrot.lane.b32.xlu1 %v10134_v35, %s14563_s27 }
  0x8b   : > { %1615 = vrot.lane.b32.xlu0 %v1095_v17, %s14565_s26 }
  0x8c   : > { %1552 = vrot.lane.b32.xlu1 %v10060_v57, %s14564_s6 }
  0x8f   : > { %1617 = vrot.lane.b32.xlu0 %v10162_v54, %s14565_s26 }
  0x90   : > { %971 = vrot.lane.b32.xlu1 %v10040_v51, %s14558_s0 }
  0x93   : > { %1133 = vrot.lane.b32.xlu0 %v1095_v17, %s14559_s1 }
  0x94   : > { %973 = vrot.lane.b32.xlu1 %v10060_v57, %s14558_s0 }
  0x97   : > { %1214 = vrot.lane.b32.xlu0 %v10134_v35, %s14560_s3 }
  0x98   : > { %1135 = vrot.lane.b32.xlu1 %v10162_v54, %s14559_s1 }
  0x9b   : > { %1359 = vrot.lane.b32.xlu0 %v10060_v57, %s14561_s9 }
  0x9c   : > { %1216 = vrot.lane.b32.xlu1 %v10182_v16, %s14560_s3 }
  0x9f   : > { %1424 = vrot.lane.b32.xlu0 %v10162_v54, %s14562_s5 }
  0xa0   : > { %1361 = vrot.lane.b32.xlu1 %v10079_v4, %s14561_s9 }
  0xa1   : > { %v960_v51 = vpop.permute.xlu0 %959  ;;  %v1350_v57 = vpop.permute.xlu1 %1349 }
  0xa2   : > { %1008 = vst.msk [vmem:[#allocation2] sm:$0xff] %vm1007_vm4, %v960_v51 }
  0xa3   : > { %1489 = vrot.lane.b32.xlu0 %v10182_v16, %s14563_s27 }
  0xa4   : > { %1426 = vrot.lane.b32.xlu1 %v10192_v23, %s14562_s5 }
  0xa5   : > { %v962_v28 = vpop.permute.xlu0 %961 }
  0xa6   : > { %1009 = vst.msk [vmem:[#allocation2 + $0x8] sm:$0xff] %vm1007_vm4, %v962_v28  ;;  %v9409_v28 = vld [vmem:[%s14567_s25 + $0x18] sm:$0xff]  }
  0xa7   : > { %1554 = vrot.lane.b32.xlu0 %v10079_v4, %s14564_s6 }
  0xa8   : > { %1491 = vrot.lane.b32.xlu1 %v10211_v36, %s14563_s27 }
  0xa9   : > { %v1348_v35 = vpop.permute.xlu0 %1347 }
  0xaa   : > { %v1122_v54 = vpop.permute.xlu1 %1121 }
  0xab   : > { %1170 = vst.msk [vmem:[#allocation2] sm:$0xff] %vm1169_vm5, %v1122_v54  ;;  %1619 = vrot.lane.b32.xlu0 %v10192_v23, %s14565_s26 }
  0xac   : > { %1556 = vrot.lane.b32.xlu1 %v10106_v20, %s14564_s6 }
  0xad   : > { %v1203_v10 = vpop.permute.xlu0 %1202 }
  0xae   : > { %v1124_v16 = vpop.permute.xlu1 %1123  ;;  %1251 = vst.msk [vmem:[#allocation2] sm:$0xff] %vm1250_vm6, %v1203_v10 }
  0xaf   : > { %1171 = vst.msk [vmem:[#allocation2 + $0x8] sm:$0xff] %vm1169_vm5, %v1124_v16  ;;  %1621 = vrot.lane.b32.xlu0 %v10230_v55, %s14565_s26 }
  0xb0   : > { %1396 = vst.msk [vmem:[#allocation2] sm:$0xff] %vm1395_vm7, %v1348_v35  ;;  %975 = vrot.lane.b32.xlu1 %v10079_v4, %s14558_s0 }
  0xb1   : > { %v1413_v60 = vpop.permute.xlu0 %1412 }
  0xb2   : > { %v1205_v33 = vpop.permute.xlu1 %1204  ;;  %1461 = vst.msk [vmem:[#allocation2] sm:$0xff] %vm1460_vm8, %v1413_v60 }
  0xb3   : > { %1252 = vst.msk [vmem:[#allocation2 + $0x8] sm:$0xff] %vm1250_vm6, %v1205_v33  ;;  %1137 = vrot.lane.b32.xlu0 %v10192_v23, %s14559_s1 }
  0xb4   : > { %977 = vrot.lane.b32.xlu1 %v10106_v20, %s14558_s0  ;;  %1397 = vst.msk [vmem:[#allocation2 + $0x8] sm:$0xff] %vm1395_vm7, %v1350_v57 }
  0xb5   : > { %v1478_v37 = vpop.permute.xlu0 %1477 }
  0xb6   : > { %v1415_v38 = vpop.permute.xlu1 %1414  ;;  %1526 = vst.msk [vmem:[#allocation2] sm:$0xff] %vm1525_vm9, %v1478_v37 }
  0xb7   : > { %1462 = vst.msk [vmem:[#allocation2 + $0x8] sm:$0xff] %vm1460_vm8, %v1415_v38  ;;  %1218 = vrot.lane.b32.xlu0 %v10211_v36, %s14560_s3 }
  0xb8   : > { %1139 = vrot.lane.b32.xlu1 %v10230_v55, %s14559_s1 }
  0xb9   : > { %v1543_v4 = vpop.permute.xlu0 %1542 }
  0xba   : > { %v1480_v23 = vpop.permute.xlu1 %1479  ;;  %1591 = vst.msk [vmem:[#allocation2] sm:$0xff] %vm1590_vm10, %v1543_v4 }
  0xbb   : > { %1527 = vst.msk [vmem:[#allocation2 + $0x8] sm:$0xff] %vm1525_vm9, %v1480_v23  ;;  %1363 = vrot.lane.b32.xlu0 %v10106_v20, %s14561_s9  ;;  %v9406_v20 = vld [vmem:[%s14566_s30] sm:$0xff]   ;;  %s14641_s30 = sld [smem:[#allocation52_spill]] }
  0xbc   : > { %1220 = vrot.lane.b32.xlu1 %v10239_v6, %s14560_s3 }
  0xbd   : > { %v1608_v42 = vpop.permute.xlu0 %1607 }
  0xbe   : > { %v1545_v45 = vpop.permute.xlu1 %1544  ;;  %1656 = vst.msk [vmem:[#allocation2] sm:$0xff] %vm1655_vm11, %v1608_v42 }
  0xbf   : > { %1592 = vst.msk [vmem:[#allocation2 + $0x8] sm:$0xff] %vm1590_vm10, %v1545_v45  ;;  %1428 = vrot.lane.b32.xlu0 %v10230_v55, %s14562_s5 }
  0xc0   : > { %1365 = vrot.lane.b32.xlu1 %v10167_v59, %s14561_s9 }
  0xc1   : > { %v1610_v36 = vpop.permute.xlu0 %1609 }
  0xc2   : > { %v964_v18 = vpop.permute.xlu1 %963  ;;  %1657 = vst.msk [vmem:[#allocation2 + $0x8] sm:$0xff] %vm1655_vm11, %v1610_v36 }
  0xc3   : > { %1010 = vst.msk [vmem:[#allocation2 + $0x10] sm:$0xff] %vm1007_vm4, %v964_v18  ;;  %1493 = vrot.lane.b32.xlu0 %v10239_v6, %s14563_s27 }
  0xc4   : > { %1430 = vrot.lane.b32.xlu1 %v10253_v26, %s14562_s5 }
  0xc5   : > { %v1126_v55 = vpop.permute.xlu0 %1125  ;;  %v1672_v31 = vld [vmem:[#allocation2] sm:$0xff] }
  0xc6   : > { %v966_v49 = vpop.permute.xlu1 %965  ;;  %1172 = vst.msk [vmem:[#allocation2 + $0x10] sm:$0xff] %vm1169_vm5, %v1126_v55  ;;  %v1816_v56 = vmul.bf16 %v9406_v20, %v1672_v31  ;;  %v9411_v31 = vld [vmem:[%s14567_s25 + $0x28] sm:$0xff]  }
  0xc7   : > { %1011 = vst.msk [vmem:[#allocation2 + $0x18] sm:$0xff] %vm1007_vm4, %v966_v49  ;;  %1558 = vrot.lane.b32.xlu0 %v10167_v59, %s14564_s6 }
  0xc8   : > { %1495 = vrot.lane.b32.xlu1 %v10258_v47, %s14563_s27  ;;  %9194 = vmatprep.mubr.msk.bf16.mxu0 %vm1875_vm12, %v1816_v56 }
  0xc9   : > { %v1207_v6 = vpop.permute.xlu0 %1206  ;;  %v1673_v9 = vld [vmem:[#allocation2 + $0x8] sm:$0xff] }
  0xca   : > { %v1128_v63 = vpop.permute.xlu1 %1127  ;;  %1253 = vst.msk [vmem:[#allocation2 + $0x10] sm:$0xff] %vm1250_vm6, %v1207_v6  ;;  %v1817_v13 = vmul.bf16 %v9407_v29, %v1673_v9 }
  0xcb   : > { %1173 = vst.msk [vmem:[#allocation2 + $0x18] sm:$0xff] %vm1169_vm5, %v1128_v63  ;;  %1623 = vrot.lane.b32.xlu0 %v10253_v26, %s14565_s26 }
  0xcc   : > { %1560 = vrot.lane.b32.xlu1 %v10200_v32, %s14564_s6  ;;  %9195 = vmatmul.mubr.msk.bf16.vlgmr.msra.gmra.mrb[0].mxu0 %vm1875_vm12, %v1817_v13 }
  0xcd   : > { %v1352_v48 = vpop.permute.xlu0 %1351 }
  0xce   : > { %v1209_v11 = vpop.permute.xlu1 %1208  ;;  %1398 = vst.msk [vmem:[#allocation2 + $0x10] sm:$0xff] %vm1395_vm7, %v1352_v48 }
  0xcf   : > { %1254 = vst.msk [vmem:[#allocation2 + $0x18] sm:$0xff] %vm1250_vm6, %v1209_v11  ;;  %1625 = vrot.lane.b32.xlu0 %v10273_v44, %s14565_s26 }
  0xd0   : > { %979 = vrot.lane.b32.xlu1 %v10167_v59, %s14558_s0 }
  0xd1   : > { %v1417_v61 = vpop.permute.xlu0 %1416 }
  0xd2   : > { %v1354_v34 = vpop.permute.xlu1 %1353  ;;  %1463 = vst.msk [vmem:[#allocation2 + $0x10] sm:$0xff] %vm1460_vm8, %v1417_v61 }
  0xd3   : > { %1399 = vst.msk [vmem:[#allocation2 + $0x18] sm:$0xff] %vm1395_vm7, %v1354_v34  ;;  %1141 = vrot.lane.b32.xlu0 %v10253_v26, %s14559_s1 }
  0xd4   : > { %981 = vrot.lane.b32.xlu1 %v10200_v32, %s14558_s0 }
  0xd5   : > { %v1482_v17 = vpop.permute.xlu0 %1481 }
  0xd6   : > { %v1419_v41 = vpop.permute.xlu1 %1418  ;;  %1528 = vst.msk [vmem:[#allocation2 + $0x10] sm:$0xff] %vm1525_vm9, %v1482_v17 }
  0xd7   : > { %1464 = vst.msk [vmem:[#allocation2 + $0x18] sm:$0xff] %vm1460_vm8, %v1419_v41  ;;  %1222 = vrot.lane.b32.xlu0 %v10258_v47, %s14560_s3  ;;  %v9412_v41 = vld [vmem:[%s14567_s25 + $0x30] sm:$0xff]  }
  0xd8   : > { %1143 = vrot.lane.b32.xlu1 %v10273_v44, %s14559_s1 }
  0xd9   : > { %v1547_v59 = vpop.permute.xlu0 %1546 }
  0xda   : > { %v1484_v21 = vpop.permute.xlu1 %1483  ;;  %1593 = vst.msk [vmem:[#allocation2 + $0x10] sm:$0xff] %vm1590_vm10, %v1547_v59 }
  0xdb   : > { %1529 = vst.msk [vmem:[#allocation2 + $0x18] sm:$0xff] %vm1525_vm9, %v1484_v21  ;;  %1367 = vrot.lane.b32.xlu0 %v10200_v32, %s14561_s9  ;;  %v9408_v32 = vld [vmem:[%s14567_s25 + $0x10] sm:$0xff]  }
  0xdc   : > { %1224 = vrot.lane.b32.xlu1 %v10279_v46, %s14560_s3 }
  0xdd   : > { %v1612_v26 = vpop.permute.xlu0 %1611 }
  0xde   : > { %v1549_v58 = vpop.permute.xlu1 %1548  ;;  %1658 = vst.msk [vmem:[#allocation2 + $0x10] sm:$0xff] %vm1655_vm11, %v1612_v26 }
  0xdf   : > { %1594 = vst.msk [vmem:[#allocation2 + $0x18] sm:$0xff] %vm1590_vm10, %v1549_v58  ;;  %1432 = vrot.lane.b32.xlu0 %v10273_v44, %s14562_s5 }
  0xe0   : > { %1369 = vrot.lane.b32.xlu1 %v10228_v53, %s14561_s9 }
  0xe1   : > { %v1614_v47 = vpop.permute.xlu0 %1613 }
  0xe2   : > { %v968_v22 = vpop.permute.xlu1 %967  ;;  %1659 = vst.msk [vmem:[#allocation2 + $0x18] sm:$0xff] %vm1655_vm11, %v1614_v47  ;;  %v9413_v47 = vld [vmem:[%s14567_s25 + $0x38] sm:$0xff]  }
  0xe3   : > { %1012 = vst.msk [vmem:[#allocation2 + $0x20] sm:$0xff] %vm1007_vm4, %v968_v22  ;;  %1497 = vrot.lane.b32.xlu0 %v10279_v46, %s14563_s27 }
  0xe4   : > { %1434 = vrot.lane.b32.xlu1 %v10307_v19, %s14562_s5 }
  0xe5   : > { %v1130_v44 = vpop.permute.xlu0 %1129  ;;  %v1674_v14 = vld [vmem:[#allocation2 + $0x10] sm:$0xff] }
  0xe6   : > { %v970_v51 = vpop.permute.xlu1 %969  ;;  %1174 = vst.msk [vmem:[#allocation2 + $0x20] sm:$0xff] %vm1169_vm5, %v1130_v44  ;;  %v1818_v57 = vmul.bf16 %v9408_v32, %v1674_v14 }
  0xe7   : > { %1013 = vst.msk [vmem:[#allocation2 + $0x28] sm:$0xff] %vm1007_vm4, %v970_v51  ;;  %1562 = vrot.lane.b32.xlu0 %v10228_v53, %s14564_s6 }
  0xe8   : > { %1499 = vrot.lane.b32.xlu1 %v10316_v62, %s14563_s27  ;;  %9198 = vmatprep.mubr.msk.bf16.mxu0 %vm1875_vm12, %v1818_v57 }
  0xe9   : > { %v1211_v46 = vpop.permute.xlu0 %1210  ;;  %v1675_v35 = vld [vmem:[#allocation2 + $0x18] sm:$0xff] }
  0xea   : > { %v1132_v54 = vpop.permute.xlu1 %1131  ;;  %1255 = vst.msk [vmem:[#allocation2 + $0x20] sm:$0xff] %vm1250_vm6, %v1211_v46  ;;  %v1819_v10 = vmul.bf16 %v9409_v28, %v1675_v35 }
  0xeb   : > { %1175 = vst.msk [vmem:[#allocation2 + $0x28] sm:$0xff] %vm1169_vm5, %v1132_v54  ;;  %1627 = vrot.lane.b32.xlu0 %v10307_v19, %s14565_s26 }
  0xec   : > { %1564 = vrot.lane.b32.xlu1 %v10288_v3, %s14564_s6  ;;  %9199 = vmatmul.mubr.msk.bf16.gmra.mrb[4].mxu0 %vm1875_vm12, %v1819_v10  ;;  %v9414_v10 = vld [vmem:[%s14567_s25 + $0x40] sm:$0xff]  }
  0xed   : > { %v1356_v16 = vpop.permute.xlu0 %1355 }
  0xee   : > { %v1213_v60 = vpop.permute.xlu1 %1212  ;;  %1400 = vst.msk [vmem:[#allocation2 + $0x20] sm:$0xff] %vm1395_vm7, %v1356_v16 }
  0xef   : > { %1256 = vst.msk [vmem:[#allocation2 + $0x28] sm:$0xff] %vm1250_vm6, %v1213_v60  ;;  %1629 = vrot.lane.b32.xlu0 %v10344_v50, %s14565_s26 }
  0xf0   : > { %983 = vrot.lane.b32.xlu1 %v10228_v53, %s14558_s0 }
  0xf1   : > { %v1421_v33 = vpop.permute.xlu0 %1420 }
  0xf2   : > { %v1358_v37 = vpop.permute.xlu1 %1357  ;;  %1465 = vst.msk [vmem:[#allocation2 + $0x20] sm:$0xff] %vm1460_vm8, %v1421_v33 }
  0xf3   : > { %1401 = vst.msk [vmem:[#allocation2 + $0x28] sm:$0xff] %vm1395_vm7, %v1358_v37  ;;  %1145 = vrot.lane.b32.xlu0 %v10307_v19, %s14559_s1 }
  0xf4   : > { %985 = vrot.lane.b32.xlu1 %v10288_v3, %s14558_s0 }
  0xf5   : > { %v1486_v38 = vpop.permute.xlu0 %1485 }
  0xf6   : > { %v1423_v4 = vpop.permute.xlu1 %1422  ;;  %1530 = vst.msk [vmem:[#allocation2 + $0x20] sm:$0xff] %vm1525_vm9, %v1486_v38  ;;  %v9415_v38 = vld [vmem:[%s14567_s25 + $0x48] sm:$0xff]  }
  0xf7   : > { %1466 = vst.msk [vmem:[#allocation2 + $0x28] sm:$0xff] %vm1460_vm8, %v1423_v4  ;;  %1226 = vrot.lane.b32.xlu0 %v10316_v62, %s14560_s3 }
  0xf8   : > { %1147 = vrot.lane.b32.xlu1 %v10344_v50, %s14559_s1 }
  0xf9   : > { %v1551_v53 = vpop.permute.xlu0 %1550 }
  0xfa   : > { %v1488_v23 = vpop.permute.xlu1 %1487  ;;  %1595 = vst.msk [vmem:[#allocation2 + $0x20] sm:$0xff] %vm1590_vm10, %v1551_v53 }
  0xfb   : > { %1531 = vst.msk [vmem:[#allocation2 + $0x28] sm:$0xff] %vm1525_vm9, %v1488_v23  ;;  %1371 = vrot.lane.b32.xlu0 %v10288_v3, %s14561_s9  ;;  %v9410_v3 = vld [vmem:[%s14567_s25 + $0x20] sm:$0xff]  }
  0xfc   : > { %1228 = vrot.lane.b32.xlu1 %v10357_v0, %s14560_s3 }
  0xfd   : > { %v1616_v19 = vpop.permute.xlu0 %1615 }
  0xfe   : > { %v1553_v42 = vpop.permute.xlu1 %1552  ;;  %1660 = vst.msk [vmem:[#allocation2 + $0x20] sm:$0xff] %vm1655_vm11, %v1616_v19 }
  0xff   : > { %1596 = vst.msk [vmem:[#allocation2 + $0x28] sm:$0xff] %vm1590_vm10, %v1553_v42  ;;  %1436 = vrot.lane.b32.xlu0 %v10344_v50, %s14562_s5  ;;  %v1053_v50 = vrot.slane %v824_v52, 1  ;;  %v8549_v52 = vcombine.low %v10366_v5, %v9684_v24 }
 0x100   : > { %1373 = vrot.lane.b32.xlu1 %v10330_v30, %s14561_s9 }
 0x101   : > { %v1618_v62 = vpop.permute.xlu0 %1617  ;;  %v1059_v49 = vsel %vm1056_vm0, %v10375_v15, %v1053_v50 }
 0x102   : > { %v972_v45 = vpop.permute.xlu1 %971  ;;  %1661 = vst.msk [vmem:[#allocation2 + $0x28] sm:$0xff] %vm1655_vm11, %v1618_v62 }
 0x103   : > { %1014 = vst.msk [vmem:[#allocation2 + $0x30] sm:$0xff] %vm1007_vm4, %v972_v45  ;;  %1501 = vrot.lane.b32.xlu0 %v10357_v0, %s14563_s27  ;;  %v1058_v0 = vsel %vm1056_vm0, %v1053_v50, %v9973_v12 }
 0x104   : > { %1438 = vrot.lane.b32.xlu1 %v10384_v8, %s14562_s5  ;;  %v1104_v5 = vpack.c.bf16 %v1058_v0, %v1059_v49  ;;  %v9416_v0 = vld [vmem:[%s14567_s25 + $0x50] sm:$0xff]  }
 0x105   : > { %v1134_v36 = vpop.permute.xlu0 %1133  ;;  %v1676_v18 = vld [vmem:[#allocation2 + $0x20] sm:$0xff] }
 0x106   : > { %v974_v20 = vpop.permute.xlu1 %973  ;;  %1176 = vst.msk [vmem:[#allocation2 + $0x30] sm:$0xff] %vm1169_vm5, %v1134_v36  ;;  %v1820_v55 = vmul.bf16 %v9410_v3, %v1676_v18 }
 0x107   : > { %1015 = vst.msk [vmem:[#allocation2 + $0x38] sm:$0xff] %vm1007_vm4, %v974_v20  ;;  %1566 = vrot.lane.b32.xlu0 %v10330_v30, %s14564_s6 }
 0x108   : > { %1503 = vrot.lane.b32.xlu1 %v10394_v27, %s14563_s27  ;;  %9202 = vmatprep.mubr.msk.bf16.mxu0 %vm1875_vm12, %v1820_v55 }
 0x109   : > { %v1215_v56 = vpop.permute.xlu0 %1214  ;;  %v1677_v29 = vld [vmem:[#allocation2 + $0x28] sm:$0xff] }
 0x10a   : > { %v1136_v6 = vpop.permute.xlu1 %1135  ;;  %1257 = vst.msk [vmem:[#allocation2 + $0x30] sm:$0xff] %vm1250_vm6, %v1215_v56  ;;  %v1821_v9 = vmul.bf16 %v9411_v31, %v1677_v29 }
 0x10b   : > { %1177 = vst.msk [vmem:[#allocation2 + $0x38] sm:$0xff] %vm1169_vm5, %v1136_v6  ;;  %1631 = vrot.lane.b32.xlu0 %v10384_v8, %s14565_s26 }
 0x10c   : > { %1568 = vrot.lane.b32.xlu1 %v8549_v52, %s14564_s6  ;;  %9203 = vmatmul.mubr.msk.bf16.gmra.mrb[8].mxu0 %vm1875_vm12, %v1821_v9  ;;  %v9417_v9 = vld [vmem:[%s14567_s25 + $0x58] sm:$0xff]  }
 0x10d   : > { %v1360_v12 = vpop.permute.xlu0 %1359 }
 0x10e   : > { %v1217_v63 = vpop.permute.xlu1 %1216  ;;  %1402 = vst.msk [vmem:[#allocation2 + $0x30] sm:$0xff] %vm1395_vm7, %v1360_v12 }
 0x10f   : > { %1258 = vst.msk [vmem:[#allocation2 + $0x38] sm:$0xff] %vm1250_vm6, %v1217_v63  ;;  %1633 = vrot.lane.b32.xlu0 %v1104_v5, %s14565_s26 }
 0x110   : > { %987 = vrot.lane.b32.xlu1 %v10330_v30, %s14558_s0 }
 0x111   : > { %v1425_v15 = vpop.permute.xlu0 %1424 }
 0x112   : > { %v1362_v13 = vpop.permute.xlu1 %1361  ;;  %1467 = vst.msk [vmem:[#allocation2 + $0x30] sm:$0xff] %vm1460_vm8, %v1425_v15 }
 0x113   : > { %1403 = vst.msk [vmem:[#allocation2 + $0x38] sm:$0xff] %vm1395_vm7, %v1362_v13  ;;  %1149 = vrot.lane.b32.xlu0 %v10384_v8, %s14559_s1 }
 0x114   : > { %989 = vrot.lane.b32.xlu1 %v8549_v52, %s14558_s0  ;;  %s14637_s0 = sld [smem:[#allocation51_spill]] }
 0x115   : > { %v1490_v48 = vpop.permute.xlu0 %1489 }
 0x116   : > { %v1427_v11 = vpop.permute.xlu1 %1426  ;;  %1532 = vst.msk [vmem:[#allocation2 + $0x30] sm:$0xff] %vm1525_vm9, %v1490_v48 }
 0x117   : > { %1468 = vst.msk [vmem:[#allocation2 + $0x38] sm:$0xff] %vm1460_vm8, %v1427_v11  ;;  %1230 = vrot.lane.b32.xlu0 %v10394_v27, %s14560_s3 }
 0x118   : > { %1151 = vrot.lane.b32.xlu1 %v1104_v5, %s14559_s1 }
 0x119   : > { %v1555_v30 = vpop.permute.xlu0 %1554 }
 0x11a   : > { %v1492_v61 = vpop.permute.xlu1 %1491  ;;  %1597 = vst.msk [vmem:[#allocation2 + $0x30] sm:$0xff] %vm1590_vm10, %v1555_v30 }
 0x11b   : > { %1533 = vst.msk [vmem:[#allocation2 + $0x38] sm:$0xff] %vm1525_vm9, %v1492_v61  ;;  %1375 = vrot.lane.b32.xlu0 %v8549_v52, %s14561_s9 }
 0x11c   : > { %1232 = vrot.lane.b32.xlu1 %v10194_v25, %s14560_s3  ;;  %s9757_s3 = smov 112  }
 0x11d   : > { %v1620_v8 = vpop.permute.xlu0 %1619 }
 0x11e   : > { %v1557_v34 = vpop.permute.xlu1 %1556  ;;  %1662 = vst.msk [vmem:[#allocation2 + $0x30] sm:$0xff] %vm1655_vm11, %v1620_v8 }
 0x11f   : > { %1598 = vst.msk [vmem:[#allocation2 + $0x38] sm:$0xff] %vm1590_vm10, %v1557_v34  ;;  %1440 = vrot.lane.b32.xlu0 %v1104_v5, %s14562_s5 }
 0x120   : > { %1377 = vrot.lane.b32.xlu1 %v9952_v2, %s14561_s9 }
 0x121   : > { %v1622_v27 = vpop.permute.xlu0 %1621 }
 0x122   : > { %v976_v17 = vpop.permute.xlu1 %975  ;;  %1663 = vst.msk [vmem:[#allocation2 + $0x38] sm:$0xff] %vm1655_vm11, %v1622_v27 }
 0x123   : > { %1016 = vst.msk [vmem:[#allocation2 + $0x40] sm:$0xff] %vm1007_vm4, %v976_v17  ;;  %1505 = vrot.lane.b32.xlu0 %v10194_v25, %s14563_s27 }
 0x124   : > { %1442 = vrot.lane.b32.xlu1 %v10013_v39, %s14562_s5 }
 0x125   : > { %v1138_v59 = vpop.permute.xlu0 %1137  ;;  %v1678_v21 = vld [vmem:[#allocation2 + $0x30] sm:$0xff] }
 0x126   : > { %v978_v26 = vpop.permute.xlu1 %977  ;;  %1178 = vst.msk [vmem:[#allocation2 + $0x40] sm:$0xff] %vm1169_vm5, %v1138_v59  ;;  %v1822_v58 = vmul.bf16 %v9412_v41, %v1678_v21 }
 0x127   : > { %1017 = vst.msk [vmem:[#allocation2 + $0x48] sm:$0xff] %vm1007_vm4, %v978_v26  ;;  %1570 = vrot.lane.b32.xlu0 %v9952_v2, %s14564_s6  ;;  %v9418_v26 = vld [vmem:[%s14567_s25 + $0x60] sm:$0xff]  }
 0x128   : > { %1507 = vrot.lane.b32.xlu1 %v10015_v40, %s14563_s27  ;;  %9206 = vmatprep.mubr.msk.bf16.mxu0 %vm1875_vm12, %v1822_v58 }
 0x129   : > { %v1219_v25 = vpop.permute.xlu0 %1218  ;;  %v1679_v22 = vld [vmem:[#allocation2 + $0x38] sm:$0xff] }
 0x12a   : > { %v1140_v32 = vpop.permute.xlu1 %1139  ;;  %1259 = vst.msk [vmem:[#allocation2 + $0x40] sm:$0xff] %vm1250_vm6, %v1219_v25  ;;  %v1823_v44 = vmul.bf16 %v9413_v47, %v1679_v22 }
 0x12b   : > { %1179 = vst.msk [vmem:[#allocation2 + $0x48] sm:$0xff] %vm1169_vm5, %v1140_v32  ;;  %1635 = vrot.lane.b32.xlu0 %v10013_v39, %s14565_s26  ;;  %v9419_v32 = vld [vmem:[%s14567_s25 + $0x68] sm:$0xff]  }
 0x12c   : > { %1572 = vrot.lane.b32.xlu1 %v9962_v7, %s14564_s6  ;;  %9207 = vmatmul.mubr.msk.bf16.gmra.mrb[12].mxu0 %vm1875_vm12, %v1823_v44  ;;  %s9759_s6 = smov 80  }
 0x12d   : > { %v1364_v2 = vpop.permute.xlu0 %1363 }
 0x12e   : > { %v1221_v40 = vpop.permute.xlu1 %1220  ;;  %1404 = vst.msk [vmem:[#allocation2 + $0x40] sm:$0xff] %vm1395_vm7, %v1364_v2 }
 0x12f   : > { %1260 = vst.msk [vmem:[#allocation2 + $0x48] sm:$0xff] %vm1250_vm6, %v1221_v40 }
 0x130   : > { %1637 = vrot.lane.b32.xlu1 %v10027_v43, %s14565_s26 }
 0x131   : > { %v1429_v14 = vpop.permute.xlu0 %1428 }
 0x132   : > { %v1366_v51 = vpop.permute.xlu1 %1365  ;;  %1469 = vst.msk [vmem:[#allocation2 + $0x40] sm:$0xff] %vm1460_vm8, %v1429_v14 }
 0x133   : > { %1405 = vst.msk [vmem:[#allocation2 + $0x48] sm:$0xff] %vm1395_vm7, %v1366_v51 }
 0x135   : > { %v1494_v39 = vpop.permute.xlu0 %1493 }
 0x136   : > { %v1431_v57 = vpop.permute.xlu1 %1430  ;;  %1534 = vst.msk [vmem:[#allocation2 + $0x40] sm:$0xff] %vm1525_vm9, %v1494_v39 }
 0x137   : > { %1470 = vst.msk [vmem:[#allocation2 + $0x48] sm:$0xff] %vm1460_vm8, %v1431_v57 }
 0x139   : > { %v1559_v7 = vpop.permute.xlu0 %1558 }
 0x13a   : > { %v1496_v28 = vpop.permute.xlu1 %1495  ;;  %1599 = vst.msk [vmem:[#allocation2 + $0x40] sm:$0xff] %vm1590_vm10, %v1559_v7 }
 0x13b   : > { %1535 = vst.msk [vmem:[#allocation2 + $0x48] sm:$0xff] %vm1525_vm9, %v1496_v28 }
 0x13d   : > { %v1624_v46 = vpop.permute.xlu0 %1623 }
 0x13e   : > { %v1561_v43 = vpop.permute.xlu1 %1560  ;;  %1664 = vst.msk [vmem:[#allocation2 + $0x40] sm:$0xff] %vm1655_vm11, %v1624_v46 }
 0x13f   : > { %1600 = vst.msk [vmem:[#allocation2 + $0x48] sm:$0xff] %vm1590_vm10, %v1561_v43 }
 0x141   : > { %v1626_v35 = vpop.permute.xlu0 %1625 }
 0x142   : > { %v980_v54 = vpop.permute.xlu1 %979  ;;  %1665 = vst.msk [vmem:[#allocation2 + $0x48] sm:$0xff] %vm1655_vm11, %v1626_v35 }
 0x143   : > { %1018 = vst.msk [vmem:[#allocation2 + $0x50] sm:$0xff] %vm1007_vm4, %v980_v54 }
 0x145   : > { %v1142_v16 = vpop.permute.xlu0 %1141  ;;  %v1680_v60 = vld [vmem:[#allocation2 + $0x40] sm:$0xff] }
 0x146   : > { %v982_v33 = vpop.permute.xlu1 %981  ;;  %1180 = vst.msk [vmem:[#allocation2 + $0x50] sm:$0xff] %vm1169_vm5, %v1142_v16  ;;  %v1824_v37 = vmul.bf16 %v9414_v10, %v1680_v60  ;;  %v10754_v10 = vld [vmem:[%s14445_s10] ss:$0 sm:$0xff] }
 0x147   : > { %1019 = vst.msk [vmem:[#allocation2 + $0x58] sm:$0xff] %vm1007_vm4, %v982_v33 }
 0x148   : > { %9210 = vmatprep.mubr.msk.bf16.mxu0 %vm1875_vm12, %v1824_v37 }
 0x149   : > { %v1223_v4 = vpop.permute.xlu0 %1222  ;;  %v1681_v53 = vld [vmem:[#allocation2 + $0x48] sm:$0xff] }
 0x14a   : > { %v1144_v23 = vpop.permute.xlu1 %1143  ;;  %1261 = vst.msk [vmem:[#allocation2 + $0x50] sm:$0xff] %vm1250_vm6, %v1223_v4  ;;  %v1825_v19 = vmul.bf16 %v9415_v38, %v1681_v53 }
 0x14b   : > { %1181 = vst.msk [vmem:[#allocation2 + $0x58] sm:$0xff] %vm1169_vm5, %v1144_v23 }
 0x14c   : > { %9211 = vmatmul.mubr.msk.bf16.gmra.mrb[16].mxu0 %vm1875_vm12, %v1825_v19 }
 0x14d   : > { %v1368_v42 = vpop.permute.xlu0 %1367 }
 0x14e   : > { %v1225_v62 = vpop.permute.xlu1 %1224  ;;  %1406 = vst.msk [vmem:[#allocation2 + $0x50] sm:$0xff] %vm1395_vm7, %v1368_v42  ;;  %v9420_v42 = vld [vmem:[%s14567_s25 + $0x70] sm:$0xff]  }
 0x14f   : > { %1262 = vst.msk [vmem:[#allocation2 + $0x58] sm:$0xff] %vm1250_vm6, %v1225_v62 }
 0x151   : > { %v1433_v45 = vpop.permute.xlu0 %1432 }
 0x152   : > { %v1370_v3 = vpop.permute.xlu1 %1369  ;;  %1471 = vst.msk [vmem:[#allocation2 + $0x50] sm:$0xff] %vm1460_vm8, %v1433_v45 }
 0x153   : > { %1407 = vst.msk [vmem:[#allocation2 + $0x58] sm:$0xff] %vm1395_vm7, %v1370_v3 }
 0x155   : > { %v1498_v50 = vpop.permute.xlu0 %1497 }
 0x156   : > { %v1435_v36 = vpop.permute.xlu1 %1434  ;;  %1536 = vst.msk [vmem:[#allocation2 + $0x50] sm:$0xff] %vm1525_vm9, %v1498_v50 }
 0x157   : > { %1472 = vst.msk [vmem:[#allocation2 + $0x58] sm:$0xff] %vm1460_vm8, %v1435_v36 }
 0x159   : > { %v1563_v18 = vpop.permute.xlu0 %1562 }
 0x15a   : > { %v1500_v20 = vpop.permute.xlu1 %1499  ;;  %1601 = vst.msk [vmem:[#allocation2 + $0x50] sm:$0xff] %vm1590_vm10, %v1563_v18 }
 0x15b   : > { %1537 = vst.msk [vmem:[#allocation2 + $0x58] sm:$0xff] %vm1525_vm9, %v1500_v20 }
 0x15d   : > { %v1628_v55 = vpop.permute.xlu0 %1627 }
 0x15e   : > { %v1565_v31 = vpop.permute.xlu1 %1564  ;;  %1666 = vst.msk [vmem:[#allocation2 + $0x50] sm:$0xff] %vm1655_vm11, %v1628_v55 }
 0x15f   : > { %1602 = vst.msk [vmem:[#allocation2 + $0x58] sm:$0xff] %vm1590_vm10, %v1565_v31 }
 0x161   : > { %v1630_v24 = vpop.permute.xlu0 %1629 }
 0x162   : > { %v984_v52 = vpop.permute.xlu1 %983  ;;  %1667 = vst.msk [vmem:[#allocation2 + $0x58] sm:$0xff] %vm1655_vm11, %v1630_v24  ;;  %v9421_v24 = vld [vmem:[%s14567_s25 + $0x78] sm:$0xff]  }
 0x163   : > { %1020 = vst.msk [vmem:[#allocation2 + $0x60] sm:$0xff] %vm1007_vm4, %v984_v52 }
 0x165   : > { %v1146_v49 = vpop.permute.xlu0 %1145  ;;  %v1682_v56 = vld [vmem:[#allocation2 + $0x50] sm:$0xff] }
 0x166   : > { %v986_v29 = vpop.permute.xlu1 %985  ;;  %1182 = vst.msk [vmem:[#allocation2 + $0x60] sm:$0xff] %vm1169_vm5, %v1146_v49  ;;  %v1826_v6 = vmul.bf16 %v9416_v0, %v1682_v56 }
 0x167   : > { %1021 = vst.msk [vmem:[#allocation2 + $0x68] sm:$0xff] %vm1007_vm4, %v986_v29 }
 0x168   : > { %9214 = vmatprep.mubr.msk.bf16.mxu0 %vm1875_vm12, %v1826_v6 }
 0x169   : > { %v1227_v5 = vpop.permute.xlu0 %1226  ;;  %v1683_v12 = vld [vmem:[#allocation2 + $0x58] sm:$0xff] }
 0x16a   : > { %v1148_v63 = vpop.permute.xlu1 %1147  ;;  %1263 = vst.msk [vmem:[#allocation2 + $0x60] sm:$0xff] %vm1250_vm6, %v1227_v5  ;;  %v1827_v15 = vmul.bf16 %v9417_v9, %v1683_v12 }
 0x16b   : > { %1183 = vst.msk [vmem:[#allocation2 + $0x68] sm:$0xff] %vm1169_vm5, %v1148_v63 }
 0x16c   : > { %9215 = vmatmul.mubr.msk.bf16.gmra.mrb[20].mxu0 %vm1875_vm12, %v1827_v15 }
 0x16d   : > { %v1372_v13 = vpop.permute.xlu0 %1371 }
 0x16e   : > { %v1229_v48 = vpop.permute.xlu1 %1228  ;;  %1408 = vst.msk [vmem:[#allocation2 + $0x60] sm:$0xff] %vm1395_vm7, %v1372_v13 }
 0x16f   : > { %1264 = vst.msk [vmem:[#allocation2 + $0x68] sm:$0xff] %vm1250_vm6, %v1229_v48 }
 0x171   : > { %v1437_v11 = vpop.permute.xlu0 %1436 }
 0x172   : > { %v1374_v30 = vpop.permute.xlu1 %1373  ;;  %1473 = vst.msk [vmem:[#allocation2 + $0x60] sm:$0xff] %vm1460_vm8, %v1437_v11 }
 0x173   : > { %1409 = vst.msk [vmem:[#allocation2 + $0x68] sm:$0xff] %vm1395_vm7, %v1374_v30 }
 0x175   : > { %v1502_v61 = vpop.permute.xlu0 %1501 }
 0x176   : > { %v1439_v8 = vpop.permute.xlu1 %1438  ;;  %1538 = vst.msk [vmem:[#allocation2 + $0x60] sm:$0xff] %vm1525_vm9, %v1502_v61 }
 0x177   : > { %1474 = vst.msk [vmem:[#allocation2 + $0x68] sm:$0xff] %vm1460_vm8, %v1439_v8 }
 0x179   : > { %v1567_v34 = vpop.permute.xlu0 %1566 }
 0x17a   : > { %v1504_v27 = vpop.permute.xlu1 %1503  ;;  %1603 = vst.msk [vmem:[#allocation2 + $0x60] sm:$0xff] %vm1590_vm10, %v1567_v34 }
 0x17b   : > { %1539 = vst.msk [vmem:[#allocation2 + $0x68] sm:$0xff] %vm1525_vm9, %v1504_v27 }
 0x17d   : > { %v1632_v17 = vpop.permute.xlu0 %1631 }
 0x17e   : > { %v1569_v41 = vpop.permute.xlu1 %1568  ;;  %1668 = vst.msk [vmem:[#allocation2 + $0x60] sm:$0xff] %vm1655_vm11, %v1632_v17 }
 0x17f   : > { %1604 = vst.msk [vmem:[#allocation2 + $0x68] sm:$0xff] %vm1590_vm10, %v1569_v41 }
 0x181   : > { %v1634_v59 = vpop.permute.xlu0 %1633 }
 0x182   : > { %v988_v21 = vpop.permute.xlu1 %987  ;;  %1669 = vst.msk [vmem:[#allocation2 + $0x68] sm:$0xff] %vm1655_vm11, %v1634_v59 }
 0x183   : > { %1022 = vst.msk [vmem:[#allocation2 + $0x70] sm:$0xff] %vm1007_vm4, %v988_v21 }
 0x185   : > { %v1150_v58 = vpop.permute.xlu0 %1149  ;;  %v1684_v47 = vld [vmem:[#allocation2 + $0x60] sm:$0xff] }
 0x186   : > { %v990_v25 = vpop.permute.xlu1 %989  ;;  %1184 = vst.msk [vmem:[#allocation2 + $0x70] sm:$0xff] %vm1169_vm5, %v1150_v58  ;;  %v1828_v22 = vmul.bf16 %v9418_v26, %v1684_v47 }
 0x187   : > { %1023 = vst.msk [vmem:[#allocation2 + $0x78] sm:$0xff] %vm1007_vm4, %v990_v25  ;;  %vm2734_vm4 = vcmask 786048  }
 0x188   : > { %9218 = vmatprep.mubr.msk.bf16.mxu0 %vm1875_vm12, %v1828_v22 }
 0x189   : > { %v1231_v44 = vpop.permute.xlu0 %1230  ;;  %v1685_v2 = vld [vmem:[#allocation2 + $0x68] sm:$0xff] }
 0x18a   : > { %v1152_v40 = vpop.permute.xlu1 %1151  ;;  %1265 = vst.msk [vmem:[#allocation2 + $0x70] sm:$0xff] %vm1250_vm6, %v1231_v44  ;;  %v1829_v14 = vmul.bf16 %v9419_v32, %v1685_v2 }
 0x18b   : > { %1185 = vst.msk [vmem:[#allocation2 + $0x78] sm:$0xff] %vm1169_vm5, %v1152_v40  ;;  %vm2799_vm5 = vcmask 917248  }
 0x18c   : > { %9219 = vmatmul.mubr.msk.bf16.gmra.mrb[24].mxu0 %vm1875_vm12, %v1829_v14 }
 0x18d   : > { %v1376_v51 = vpop.permute.xlu0 %1375 }
 0x18e   : > { %v1233_v39 = vpop.permute.xlu1 %1232  ;;  %1410 = vst.msk [vmem:[#allocation2 + $0x70] sm:$0xff] %vm1395_vm7, %v1376_v51 }
 0x18f   : > { %1266 = vst.msk [vmem:[#allocation2 + $0x78] sm:$0xff] %vm1250_vm6, %v1233_v39  ;;  %vm2864_vm6 = vcmask 1048448  }
 0x191   : > { %v1441_v57 = vpop.permute.xlu0 %1440 }
 0x192   : > { %v1378_v7 = vpop.permute.xlu1 %1377  ;;  %1475 = vst.msk [vmem:[#allocation2 + $0x70] sm:$0xff] %vm1460_vm8, %v1441_v57 }
 0x193   : > { %1411 = vst.msk [vmem:[#allocation2 + $0x78] sm:$0xff] %vm1395_vm7, %v1378_v7  ;;  %vm6508_vm7 = vcmask 261120  }
 0x195   : > { %v1506_v28 = vpop.permute.xlu0 %1505 }
 0x196   : > { %v1443_v46 = vpop.permute.xlu1 %1442  ;;  %1540 = vst.msk [vmem:[#allocation2 + $0x70] sm:$0xff] %vm1525_vm9, %v1506_v28 }
 0x197   : > { %1476 = vst.msk [vmem:[#allocation2 + $0x78] sm:$0xff] %vm1460_vm8, %v1443_v46  ;;  %vm6533_vm8 = vcmask 523520  }
 0x199   : > { %v1571_v43 = vpop.permute.xlu0 %1570 }
 0x19a   : > { %v1508_v35 = vpop.permute.xlu1 %1507  ;;  %1605 = vst.msk [vmem:[#allocation2 + $0x70] sm:$0xff] %vm1590_vm10, %v1571_v43 }
 0x19b   : > { %1541 = vst.msk [vmem:[#allocation2 + $0x78] sm:$0xff] %vm1525_vm9, %v1508_v35  ;;  %vm6574_vm9 = vcmask 785920  }
 0x19d   : > { %v1636_v54 = vpop.permute.xlu0 %1635 }
 0x19e   : > { %v1573_v16 = vpop.permute.xlu1 %1572  ;;  %1670 = vst.msk [vmem:[#allocation2 + $0x70] sm:$0xff] %vm1655_vm11, %v1636_v54 }
 0x19f   : > { %1606 = vst.msk [vmem:[#allocation2 + $0x78] sm:$0xff] %vm1590_vm10, %v1573_v16  ;;  %v9196_v60 = vpop.f32.mrb[0].mxu0  ;;  %vm6599_vm10 = vcmask 1048320  }
 0x1a0   : > { %v1971_v33 = vadd.f32 %v9196_v60, %v10754_v10  ;;  %v1962_v37 = vpop.f32.mrb[1].mxu0 }
 0x1a1   : > { %v1963_v38 = vadd.f32 %v10754_v10, %v1962_v37  ;;  %v9197_v4 = vpop.f32.mrb[2].mxu0 }
 0x1a2   : > { %v1638_v53 = vpop.permute.xlu1 %1637  ;;  %v1974_v23 = vadd.f32 %v9197_v4, %v10754_v10  ;;  %v1965_v19 = vpop.f32.mrb[3].mxu0  ;;  %v2091_v45 = vmax.f32 %v1971_v33, 0.0 }
 0x1a3   : > { %1671 = vst.msk [vmem:[#allocation2 + $0x78] sm:$0xff] %vm1655_vm11, %v1638_v53  ;;  %v1966_v62 = vadd.f32 %v10754_v10, %v1965_v19  ;;  %v2089_v50 = vmax.f32 %v1963_v38, 0.0  ;;  %vm9762_vm11 = vmmov 0  }
 0x1a4   : > { %v2092_v3 = vmax.f32 %v1974_v23, 0.0 }
 0x1a5   : > { %v2090_v36 = vmax.f32 %v1966_v62, 0.0  ;;  %v1686_v18 = vld [vmem:[#allocation2 + $0x70] sm:$0xff] }
 0x1a6   : > { %v2122_v20 = vpack.c.bf16 %v2092_v3, %v2091_v45  ;;  %v1830_v55 = vmul.bf16 %v9420_v42, %v1686_v18 }
 0x1a7   : > { %v10766_v31 = vpack.c.bf16 %v2090_v36, %v2089_v50  ;;  %v9424_v36 = vld [vmem:[%s14573_s24 + $0x4] ss:$8 sps:$4 sm:$0xff]  }
 0x1a8   : > { %v10771_v52 = vunpack.c.l.bf16 %v2122_v20  ;;  %v10773_v0 = vunpack.c.h.bf16 %v2122_v20  ;;  %9222 = vmatprep.mubr.msk.bf16.mxu0 %vm1875_vm12, %v1830_v55  ;;  %2816 = vrot.lane.b32.xlu0 %v2122_v20, %s9757_s3 }
 0x1a9   : > { %v10778_v49 = vunpack.c.l.bf16 %v10766_v31  ;;  %v10781_v56 = vunpack.c.h.bf16 %v10766_v31  ;;  %2621 = vrot.lane.b32.xlu1 %v10766_v31, %s14565_s26 }
 0x1aa   : > { %14568 = vst [vmem:[#allocation16_spill] sm:$0xff] %v10773_v0  ;;  %v1687_v29 = vld [vmem:[#allocation2 + $0x78] sm:$0xff]  ;;  %v2171_v6 = vrot.slane %v10771_v52, 7  ;;  %v2172_v9 = vrot.slane %v10773_v0, 7  ;;  %v2365_v5 = vrot.slane %v10771_v52, 1  ;;  %v2366_v39 = vrot.slane %v10773_v0, 1 }
 0x1ab   : > { %v1831_v12 = vmul.bf16 %v9421_v24, %v1687_v29  ;;  %v14495_v63 = vrot.slane %v10781_v56, 7  ;;  %v14494_v15 = vrot.slane %v10778_v49, 1  ;;  %v2364_v13 = vrot.slane %v10781_v56, 1 }
 0x1ac   : > { %2623 = vrot.lane.b32.xlu0 %v2122_v20, %s14565_s26  ;;  %v2229_v48 = vsel %vm861_vm2, %v2171_v6, %v2172_v9  ;;  %v2423_v33 = vsel %vm1056_vm0, %v2365_v5, %v2366_v39 }
 0x1ad   : > { %9223 = vmatmul.mubr.msk.bf16.gmra.mrb[28].mxu0 %vm1875_vm12, %v1831_v12  ;;  %2300 = vrot.lane.b32.xlu1 %v10766_v31, %s14559_s1  ;;  %v2230_v11 = vsel %vm861_vm2, %v14495_v63, %v2171_v6  ;;  %v2424_v30 = vsel %vm1056_vm0, %v2364_v13, %v2365_v5  ;;  %v2425_v61 = vsel %vm1056_vm0, %v14494_v15, %v2364_v13  ;;  %vm7693_vm12 = vcmask 523264  }
 0x1ae   : > { %v2235_v8 = vpack.c.bf16 %v2229_v48, %v2230_v11  ;;  %v2428_v34 = vpack.c.bf16 %v2424_v30, %v2425_v61 }
 0x1b0   : > { %2302 = vrot.lane.b32.xlu0 %v2122_v20, %s14559_s1  ;;  %2896 = vst.msk [vmem:[#allocation3 + $0xf8] sm:$0xff] %vm2249_vm13, %v2428_v34  ;;  %2252 = vst.msk [vmem:[#allocation3 + $0x20] sm:$0xff] %vm2249_vm13, %v2235_v8 }
 0x1b1   : > { %2751 = vrot.lane.b32.xlu1 %v2235_v8, %s14529_s4 }
 0x1b4   : > { %2686 = vrot.lane.b32.xlu0 %v2428_v34, %s9759_s6 }
 0x1b5   : > { %2542 = vrot.lane.b32.xlu1 %v2235_v8, %s14563_s27 }
 0x1b8   : > { %2461 = vrot.lane.b32.xlu0 %v2428_v34, %s14561_s9 }
 0x1bf   : > { %v9200_v27 = vpop.f32.mrb[4].mxu0 }
 0x1c0   : > { %v1987_v17 = vadd.f32 %v9200_v27, %v10754_v10  ;;  %v1978_v41 = vpop.f32.mrb[5].mxu0 }
 0x1c1   : > { %v1979_v59 = vadd.f32 %v10754_v10, %v1978_v41  ;;  %v9201_v21 = vpop.f32.mrb[6].mxu0 }
 0x1c2   : > { %v1990_v26 = vadd.f32 %v9201_v21, %v10754_v10  ;;  %v1981_v58 = vpop.f32.mrb[7].mxu0  ;;  %v2095_v25 = vmax.f32 %v1987_v17, 0.0 }
 0x1c3   : > { %v1982_v47 = vadd.f32 %v10754_v10, %v1981_v58  ;;  %v2093_v32 = vmax.f32 %v1979_v59, 0.0 }
 0x1c4   : > { %v2096_v22 = vmax.f32 %v1990_v26, 0.0 }
 0x1c5   : > { %v2094_v44 = vmax.f32 %v1982_v47, 0.0 }
 0x1c6   : > { %v2124_v2 = vpack.c.bf16 %v2096_v22, %v2095_v25 }
 0x1c7   : > { %v2123_v40 = vpack.c.bf16 %v2094_v44, %v2093_v32 }
 0x1c8   : > { %v10818_v14 = vunpack.c.l.bf16 %v2124_v2  ;;  %v10820_v51 = vunpack.c.h.bf16 %v2124_v2  ;;  %2820 = vrot.lane.b32.xlu0 %v2124_v2, %s9757_s3 }
 0x1c9   : > { %v10824_v57 = vunpack.c.l.bf16 %v2123_v40  ;;  %v10826_v7 = vunpack.c.h.bf16 %v2123_v40  ;;  %2818 = vrot.lane.b32.xlu1 %v2123_v40, %s9757_s3 }
 0x1ca   : > { %14569 = vst [vmem:[#allocation17_spill] sm:$0xff] %v10818_v14  ;;  %14570 = vst [vmem:[#allocation18_spill] sm:$0xff] %v10820_v51  ;;  %v2369_v28 = vrot.slane %v10818_v14, 1  ;;  %v2175_v46 = vrot.slane %v10818_v14, 7  ;;  %v2176_v43 = vrot.slane %v10820_v51, 7  ;;  %v2370_v41 = vrot.slane %v10820_v51, 1 }
 0x1cb   : > { %14571 = vst [vmem:[#allocation19_spill] sm:$0xff] %v10824_v57  ;;  %14572 = vst [vmem:[#allocation20_spill] sm:$0xff] %v10826_v7  ;;  %v2173_v35 = vrot.slane %v10824_v57, 7  ;;  %v2174_v54 = vrot.slane %v10826_v7, 7  ;;  %v2367_v16 = vrot.slane %v10824_v57, 1  ;;  %v2368_v60 = vrot.slane %v10826_v7, 1 }
 0x1cc   : > { %2627 = vrot.lane.b32.xlu0 %v2124_v2, %s14565_s26  ;;  %v2225_v37 = vsel %vm861_vm2, %v2175_v46, %v2176_v43 }
 0x1cd   : > { %2625 = vrot.lane.b32.xlu1 %v2123_v40, %s14565_s26  ;;  %v2227_v38 = vsel %vm861_vm2, %v2173_v35, %v2174_v54  ;;  %v2228_v4 = vsel %vm861_vm2, %v2172_v9, %v2173_v35  ;;  %v2422_v53 = vsel %vm1056_vm0, %v2366_v39, %v2367_v16  ;;  %v2420_v23 = vsel %vm1056_vm0, %v2368_v60, %v2369_v28 }
 0x1ce   : > { %v2236_v19 = vpack.c.bf16 %v2227_v38, %v2228_v4  ;;  %v2429_v42 = vpack.c.bf16 %v2422_v53, %v2423_v33  ;;  %v2421_v62 = vsel %vm1056_vm0, %v2367_v16, %v2368_v60  ;;  %v2226_v45 = vsel %vm861_vm2, %v2174_v54, %v2175_v46 }
 0x1cf   : > { %v2430_v3 = vpack.c.bf16 %v2420_v23, %v2421_v62  ;;  %v2237_v50 = vpack.c.bf16 %v2225_v37, %v2226_v45 }
 0x1d0   : > { %2306 = vrot.lane.b32.xlu0 %v2124_v2, %s14559_s1  ;;  %2253 = vst.msk [vmem:[#allocation3 + $0x30] sm:$0xff] %vm2249_vm13, %v2236_v19  ;;  %2881 = vst.msk [vmem:[#allocation3 + $0x8] sm:$0xff] %vm2249_vm13, %v2429_v42  ;;  %v2419_v2 = vsel %vm1056_vm0, %v2369_v28, %v2370_v41 }
 0x1d1   : > { %2304 = vrot.lane.b32.xlu1 %v2123_v40, %s14559_s1  ;;  %2882 = vst.msk [vmem:[#allocation3 + $0x18] sm:$0xff] %vm2249_vm13, %v2430_v3  ;;  %2254 = vst.msk [vmem:[#allocation3 + $0x40] sm:$0xff] %vm2249_vm13, %v2237_v50 }
 0x1d4   : > { %2753 = vrot.lane.b32.xlu0 %v2236_v19, %s14529_s4 }
 0x1d5   : > { %2688 = vrot.lane.b32.xlu1 %v2429_v42, %s9759_s6 }
 0x1d7   : > { %v2898_v18 = vld [vmem:[#allocation3 + $0x8] sm:$0xff] }
 0x1d8   : > { %2544 = vrot.lane.b32.xlu0 %v2236_v19, %s14563_s27  ;;  %v3122_v20 = vmul.bf16 %v9424_v36, %v2898_v18 }
 0x1d9   : > { %2463 = vrot.lane.b32.xlu1 %v2429_v42, %s14561_s9 }
 0x1da   : > { %8646 = vmatprep.mubr.msk.bf16.mxu1 %vm2249_vm13, %v3122_v20 }
 0x1dc   : > { %2690 = vrot.lane.b32.xlu0 %v2430_v3, %s9759_s6 }
 0x1dd   : > { %2755 = vrot.lane.b32.xlu1 %v2237_v50, %s14529_s4 }
 0x1df   : > { %v9204_v55 = vpop.f32.mrb[8].mxu0 }
 0x1e0   : > { %v2003_v24 = vadd.f32 %v9204_v55, %v10754_v10  ;;  %v1994_v29 = vpop.f32.mrb[9].mxu0  ;;  %2465 = vrot.lane.b32.xlu0 %v2430_v3, %s14561_s9 }
 0x1e1   : > { %v1995_v6 = vadd.f32 %v10754_v10, %v1994_v29  ;;  %v9205_v9 = vpop.f32.mrb[10].mxu0  ;;  %2546 = vrot.lane.b32.xlu1 %v2237_v50, %s14563_s27 }
 0x1e2   : > { %v2006_v5 = vadd.f32 %v9205_v9, %v10754_v10  ;;  %v1997_v12 = vpop.f32.mrb[11].mxu0  ;;  %v2099_v48 = vmax.f32 %v2003_v24, 0.0 }
 0x1e3   : > { %v1998_v13 = vadd.f32 %v10754_v10, %v1997_v12  ;;  %v2097_v30 = vmax.f32 %v1995_v6, 0.0 }
 0x1e4   : > { %v2100_v11 = vmax.f32 %v2006_v5, 0.0 }
 0x1e5   : > { %v2098_v61 = vmax.f32 %v1998_v13, 0.0 }
 0x1e6   : > { %v2126_v8 = vpack.c.bf16 %v2100_v11, %v2099_v48 }
 0x1e7   : > { %v2125_v34 = vpack.c.bf16 %v2098_v61, %v2097_v30 }
 0x1e8   : > { %v10880_v27 = vunpack.c.l.bf16 %v2126_v8  ;;  %v10882_v17 = vunpack.c.h.bf16 %v2126_v8  ;;  %2824 = vrot.lane.b32.xlu0 %v2126_v8, %s9757_s3 }
 0x1e9   : > { %v10886_v59 = vunpack.c.l.bf16 %v2125_v34  ;;  %v10888_v21 = vunpack.c.h.bf16 %v2125_v34  ;;  %2822 = vrot.lane.b32.xlu1 %v2125_v34, %s9757_s3 }
 0x1ea   : > { %14574 = vst [vmem:[#allocation21_spill] sm:$0xff] %v10880_v27  ;;  %14575 = vst [vmem:[#allocation22_spill] sm:$0xff] %v10882_v17  ;;  %v2373_v26 = vrot.slane %v10880_v27, 1  ;;  %v2179_v58 = vrot.slane %v10880_v27, 7  ;;  %v2180_v47 = vrot.slane %v10882_v17, 7  ;;  %v2374_v6 = vrot.slane %v10882_v17, 1 }
 0x1eb   : > { %14576 = vst [vmem:[#allocation23_spill] sm:$0xff] %v10886_v59  ;;  %14577 = vst [vmem:[#allocation24_spill] sm:$0xff] %v10888_v21  ;;  %v2177_v25 = vrot.slane %v10886_v59, 7  ;;  %v2178_v22 = vrot.slane %v10888_v21, 7  ;;  %v2371_v32 = vrot.slane %v10886_v59, 1  ;;  %v2372_v44 = vrot.slane %v10888_v21, 1 }
 0x1ec   : > { %2631 = vrot.lane.b32.xlu0 %v2126_v8, %s14565_s26  ;;  %v2221_v40 = vsel %vm861_vm2, %v2179_v58, %v2180_v47  ;;  %v14517_v21 = vmov 0  }
 0x1ed   : > { %2629 = vrot.lane.b32.xlu1 %v2125_v34, %s14565_s26  ;;  %v2223_v39 = vsel %vm861_vm2, %v2177_v25, %v2178_v22  ;;  %v2224_v46 = vsel %vm861_vm2, %v2176_v43, %v2177_v25  ;;  %v2418_v35 = vsel %vm1056_vm0, %v2370_v41, %v2371_v32  ;;  %v2416_v28 = vsel %vm1056_vm0, %v2372_v44, %v2373_v26 }
 0x1ee   : > { %v2238_v54 = vpack.c.bf16 %v2223_v39, %v2224_v46  ;;  %v2431_v16 = vpack.c.bf16 %v2418_v35, %v2419_v2  ;;  %v2417_v60 = vsel %vm1056_vm0, %v2371_v32, %v2372_v44  ;;  %v2222_v33 = vsel %vm861_vm2, %v2178_v22, %v2179_v58  ;;  %3280 = vmatprep.subr.bf16.mxu1 %v14517_v21 }
 0x1ef   : > { %v2432_v37 = vpack.c.bf16 %v2416_v28, %v2417_v60  ;;  %v2239_v38 = vpack.c.bf16 %v2221_v40, %v2222_v33 }
 0x1f0   : > { %2310 = vrot.lane.b32.xlu0 %v2126_v8, %s14559_s1  ;;  %2255 = vst.msk [vmem:[#allocation3 + $0x50] sm:$0xff] %vm2249_vm13, %v2238_v54  ;;  %2883 = vst.msk [vmem:[#allocation3 + $0x28] sm:$0xff] %vm2249_vm13, %v2431_v16 }
 0x1f1   : > { %2308 = vrot.lane.b32.xlu1 %v2125_v34, %s14559_s1  ;;  %2884 = vst.msk [vmem:[#allocation3 + $0x38] sm:$0xff] %vm2249_vm13, %v2432_v37  ;;  %2256 = vst.msk [vmem:[#allocation3 + $0x60] sm:$0xff] %vm2249_vm13, %v2239_v38  ;;  %v2415_v34 = vsel %vm1056_vm0, %v2373_v26, %v2374_v6 }
 0x1f4   : > { %2757 = vrot.lane.b32.xlu0 %v2238_v54, %s14529_s4 }
 0x1f5   : > { %2692 = vrot.lane.b32.xlu1 %v2431_v16, %s9759_s6 }
 0x1f8   : > { %2548 = vrot.lane.b32.xlu0 %v2238_v54, %s14563_s27 }
 0x1f9   : > { %2467 = vrot.lane.b32.xlu1 %v2431_v16, %s14561_s9 }
 0x1fc   : > { %2694 = vrot.lane.b32.xlu0 %v2432_v37, %s9759_s6 }
 0x1fd   : > { %2759 = vrot.lane.b32.xlu1 %v2239_v38, %s14529_s4 }
 0x1ff   : > { %v9208_v43 = vpop.f32.mrb[12].mxu0 }
 0x200   : > { %v2019_v4 = vadd.f32 %v9208_v43, %v10754_v10  ;;  %v2010_v53 = vpop.f32.mrb[13].mxu0  ;;  %2469 = vrot.lane.b32.xlu0 %v2432_v37, %s14561_s9 }
 0x201   : > { %v2011_v23 = vadd.f32 %v10754_v10, %v2010_v53  ;;  %v9209_v19 = vpop.f32.mrb[14].mxu0  ;;  %2550 = vrot.lane.b32.xlu1 %v2239_v38, %s14563_s27 }
 0x202   : > { %v2022_v42 = vadd.f32 %v9209_v19, %v10754_v10  ;;  %v2013_v62 = vpop.f32.mrb[15].mxu0  ;;  %v2103_v3 = vmax.f32 %v2019_v4, 0.0 }
 0x203   : > { %v2014_v45 = vadd.f32 %v10754_v10, %v2013_v62  ;;  %v2101_v36 = vmax.f32 %v2011_v23, 0.0 }
 0x204   : > { %v2104_v50 = vmax.f32 %v2022_v42, 0.0 }
 0x205   : > { %v2102_v18 = vmax.f32 %v2014_v45, 0.0 }
 0x206   : > { %v10942_v20 = vpack.c.bf16 %v2104_v50, %v2103_v3 }
 0x207   : > { %v10944_v55 = vpack.c.bf16 %v2102_v18, %v2101_v36 }
 0x208   : > { %v10947_v24 = vunpack.c.l.bf16 %v10942_v20  ;;  %v10950_v29 = vunpack.c.h.bf16 %v10942_v20  ;;  %2828 = vrot.lane.b32.xlu0 %v10942_v20, %s9757_s3 }
 0x209   : > { %v10956_v9 = vunpack.c.l.bf16 %v10944_v55  ;;  %v10959_v5 = vunpack.c.h.bf16 %v10944_v55  ;;  %2826 = vrot.lane.b32.xlu1 %v10944_v55, %s9757_s3 }
 0x20a   : > { %14578 = vst [vmem:[#allocation25_spill] sm:$0xff] %v10947_v24  ;;  %14579 = vst [vmem:[#allocation26_spill] sm:$0xff] %v10950_v29  ;;  %v2377_v12 = vrot.slane %v10947_v24, 1  ;;  %v2183_v13 = vrot.slane %v10947_v24, 7  ;;  %v2184_v48 = vrot.slane %v10950_v29, 7  ;;  %v2378_v18 = vrot.slane %v10950_v29, 1 }
 0x20b   : > { %14580 = vst [vmem:[#allocation27_spill] sm:$0xff] %v10956_v9  ;;  %14581 = vst [vmem:[#allocation28_spill] sm:$0xff] %v10959_v5  ;;  %v2181_v11 = vrot.slane %v10956_v9, 7  ;;  %v2182_v30 = vrot.slane %v10959_v5, 7  ;;  %v2375_v61 = vrot.slane %v10956_v9, 1  ;;  %v2376_v8 = vrot.slane %v10959_v5, 1 }
 0x20c   : > { %v2217_v41 = vsel %vm861_vm2, %v2183_v13, %v2184_v48 }
 0x20d   : > { %2633 = vrot.lane.b32.xlu1 %v10944_v55, %s14565_s26  ;;  %v2219_v58 = vsel %vm861_vm2, %v2181_v11, %v2182_v30  ;;  %v2220_v25 = vsel %vm861_vm2, %v2180_v47, %v2181_v11  ;;  %v2414_v22 = vsel %vm1056_vm0, %v2374_v6, %v2375_v61  ;;  %v2412_v26 = vsel %vm1056_vm0, %v2376_v8, %v2377_v12 }
 0x20e   : > { %v2240_v32 = vpack.c.bf16 %v2219_v58, %v2220_v25  ;;  %v2433_v44 = vpack.c.bf16 %v2414_v22, %v2415_v34  ;;  %v2413_v2 = vsel %vm1056_vm0, %v2375_v61, %v2376_v8  ;;  %v2218_v40 = vsel %vm861_vm2, %v2182_v30, %v2183_v13 }
 0x20f   : > { %v10996_v39 = vpack.c.bf16 %v2412_v26, %v2413_v2  ;;  %v10998_v46 = vpack.c.bf16 %v2217_v41, %v2218_v40  ;;  %v2411_v22 = vsel %vm1056_vm0, %v2377_v12, %v2378_v18 }
 0x210   : > { %2761 = vrot.lane.b32.xlu0 %v2240_v32, %s14529_s4  ;;  %2257 = vst.msk [vmem:[#allocation3 + $0x70] sm:$0xff] %vm2249_vm13, %v2240_v32  ;;  %2885 = vst.msk [vmem:[#allocation3 + $0x48] sm:$0xff] %vm2249_vm13, %v2433_v44 }
 0x211   : > { %2696 = vrot.lane.b32.xlu1 %v2433_v44, %s9759_s6  ;;  %2886 = vst.msk [vmem:[#allocation3 + $0x58] sm:$0xff] %vm2249_vm13, %v10996_v39  ;;  %2258 = vst.msk [vmem:[#allocation3 + $0x80] sm:$0xff] %vm2249_vm13, %v10998_v46 }
 0x214   : > { %2552 = vrot.lane.b32.xlu0 %v2240_v32, %s14563_s27 }
 0x215   : > { %2471 = vrot.lane.b32.xlu1 %v2433_v44, %s14561_s9 }
 0x218   : > { %2698 = vrot.lane.b32.xlu0 %v10996_v39, %s9759_s6 }
 0x219   : > { %2763 = vrot.lane.b32.xlu1 %v10998_v46, %s14529_s4 }
 0x21a   : > { %v11014_v47 = vpop.permute.xlu0 %2816 }
 0x21b   : > { %v11023_v19 = vpop.permute.xlu1 %2621 }
 0x21e   : > { %v11016_v35 = vpop.permute.xlu0 %2623 }
 0x21f   : > { %v9212_v28 = vpop.f32.mrb[16].mxu0  ;;  %v11045_v8 = vpop.permute.xlu1 %2300 }
 0x220   : > { %v2035_v54 = vadd.f32 %v9212_v28, %v10754_v10  ;;  %v2026_v16 = vpop.f32.mrb[17].mxu0 }
 0x221   : > { %v2027_v60 = vadd.f32 %v10754_v10, %v2026_v16  ;;  %v9213_v33 = vpop.f32.mrb[18].mxu0 }
 0x222   : > { %v2038_v37 = vadd.f32 %v9213_v33, %v10754_v10  ;;  %v2303_v38 = vpop.permute.xlu0 %2302  ;;  %v2029_v43 = vpop.f32.mrb[19].mxu0  ;;  %v2107_v53 = vmax.f32 %v2035_v54, 0.0 }
 0x223   : > { %2349 = vst.msk [vmem:[#allocation3 + $0x20] sm:$0xff] %vm2346_vm14, %v2303_v38  ;;  %v2030_v4 = vadd.f32 %v10754_v10, %v2029_v43  ;;  %v2105_v42 = vmax.f32 %v2027_v60, 0.0 }
 0x224   : > { %v2108_v23 = vmax.f32 %v2038_v37, 0.0  ;;  %v11089_v37 = vpop.permute.xlu1 %2751 }
 0x225   : > { %v2106_v62 = vmax.f32 %v2030_v4, 0.0 }
 0x226   : > { %v11025_v45 = vpack.c.bf16 %v2108_v23, %v2107_v53 }
 0x227   : > { %v11027_v3 = vpack.c.bf16 %v2106_v62, %v2105_v42 }
 0x228   : > { %v11030_v50 = vunpack.c.l.bf16 %v11025_v45  ;;  %v11033_v36 = vunpack.c.h.bf16 %v11025_v45  ;;  %v11097_v43 = vpop.permute.xlu1 %2542 }
 0x229   : > { %v11037_v6 = vunpack.c.l.bf16 %v11027_v3  ;;  %v11040_v13 = vunpack.c.h.bf16 %v11027_v3 }
 0x22a   : > { %14582 = vst [vmem:[#allocation29_spill] sm:$0xff] %v11030_v50  ;;  %14583 = vst [vmem:[#allocation30_spill] sm:$0xff] %v11033_v36  ;;  %v2381_v11 = vrot.slane %v11030_v50, 1  ;;  %v2187_v30 = vrot.slane %v11030_v50, 7  ;;  %v14496_v61 = vrot.slane %v11033_v36, 7 }
 0x22b   : > { %14584 = vst [vmem:[#allocation31_spill] sm:$0xff] %v11037_v6  ;;  %14585 = vst [vmem:[#allocation32_spill] sm:$0xff] %v11040_v13  ;;  %v2379_v34 = vrot.slane %v11037_v6, 1  ;;  %v2185_v41 = vrot.slane %v11037_v6, 7  ;;  %v2186_v58 = vrot.slane %v11040_v13, 7  ;;  %v2380_v25 = vrot.slane %v11040_v13, 1 }
 0x22c   : > { %v2213_v26 = vsel %vm861_vm2, %v2187_v30, %v14496_v61 }
 0x22d   : > { %v2410_v32 = vsel %vm1056_vm0, %v2378_v18, %v2379_v34  ;;  %v2215_v44 = vsel %vm861_vm2, %v2185_v41, %v2186_v58  ;;  %v2216_v2 = vsel %vm861_vm2, %v2184_v48, %v2185_v41  ;;  %v2408_v12 = vsel %vm1056_vm0, %v2380_v25, %v2381_v11  ;;  %v11083_v48 = vpop.permute.xlu0 %2686 }
 0x22e   : > { %v11071_v40 = vpack.c.bf16 %v2410_v32, %v2411_v22  ;;  %v11073_v28 = vpack.c.bf16 %v2215_v44, %v2216_v2  ;;  %v2409_v54 = vsel %vm1056_vm0, %v2379_v34, %v2380_v25  ;;  %v2214_v16 = vsel %vm861_vm2, %v2186_v58, %v2187_v30 }
 0x22f   : > { %v11079_v60 = vpack.c.bf16 %v2408_v12, %v2409_v54  ;;  %v11081_v33 = vpack.c.bf16 %v2213_v26, %v2214_v16 }
 0x230   : > { %2887 = vst.msk [vmem:[#allocation3 + $0x68] sm:$0xff] %vm2249_vm13, %v11071_v40  ;;  %2259 = vst.msk [vmem:[#allocation3 + $0x90] sm:$0xff] %vm2249_vm13, %v11073_v28 }
 0x231   : > { %2888 = vst.msk [vmem:[#allocation3 + $0x78] sm:$0xff] %vm2249_vm13, %v11079_v60  ;;  %2260 = vst.msk [vmem:[#allocation3 + $0xa0] sm:$0xff] %vm2249_vm13, %v11081_v33  ;;  %v11095_v38 = vpop.permute.xlu0 %2461 }
 0x23a   : > { %v11099_v4 = vpop.permute.xlu0 %2820 }
 0x23b   : > { %v11101_v53 = vpop.permute.xlu1 %2818 }
 0x23e   : > { %v11103_v23 = vpop.permute.xlu0 %2627 }
 0x23f   : > { %v9216_v42 = vpop.f32.mrb[20].mxu0  ;;  %v2626_v62 = vpop.permute.xlu1 %2625 }
 0x240   : > { %v2051_v18 = vadd.f32 %v9216_v42, %v10754_v10  ;;  %v2042_v30 = vpop.f32.mrb[21].mxu0 }
 0x241   : > { %v2043_v34 = vadd.f32 %v10754_v10, %v2042_v30  ;;  %v9217_v41 = vpop.f32.mrb[22].mxu0 }
 0x242   : > { %v2054_v58 = vadd.f32 %v9217_v41, %v10754_v10  ;;  %v2045_v25 = vpop.f32.mrb[23].mxu0  ;;  %v2307_v22 = vpop.permute.xlu0 %2306  ;;  %v2111_v44 = vmax.f32 %v2051_v18, 0.0  ;;  %v2382_v18 = vrot.slane %v11033_v36, 1 }
 0x243   : > { %v2046_v26 = vadd.f32 %v10754_v10, %v2045_v25  ;;  %2351 = vst.msk [vmem:[#allocation3 + $0x40] sm:$0xff] %vm2346_vm14, %v2307_v22  ;;  %v2305_v32 = vpop.permute.xlu1 %2304  ;;  %v2109_v12 = vmax.f32 %v2043_v34, 0.0 }
 0x244   : > { %v2112_v2 = vmax.f32 %v2054_v58, 0.0  ;;  %2350 = vst.msk [vmem:[#allocation3 + $0x30] sm:$0xff] %vm2346_vm14, %v2305_v32 }
 0x245   : > { %v2110_v54 = vmax.f32 %v2046_v26, 0.0  ;;  %v2407_v26 = vsel %vm1056_vm0, %v2381_v11, %v2382_v18 }
 0x246   : > { %v11111_v16 = vpack.c.bf16 %v2112_v2, %v2111_v44  ;;  %v11113_v42 = vpop.permute.xlu0 %2753 }
 0x247   : > { %v11115_v30 = vpack.c.bf16 %v2110_v54, %v2109_v12  ;;  %v11117_v41 = vpop.permute.xlu1 %2688 }
 0x248   : > { %v11120_v15 = vunpack.c.l.bf16 %v11111_v16  ;;  %v11123_v25 = vunpack.c.h.bf16 %v11111_v16 }
 0x249   : > { %v11127_v34 = vunpack.c.l.bf16 %v11115_v30  ;;  %v11130_v58 = vunpack.c.h.bf16 %v11115_v30 }
 0x24a   : > { %14586 = vst [vmem:[#allocation33_spill] sm:$0xff] %v11120_v15  ;;  %14587 = vst [vmem:[#allocation34_spill] sm:$0xff] %v11123_v25  ;;  %v2545_v22 = vpop.permute.xlu0 %2544  ;;  %v2191_v32 = vrot.slane %v11120_v15, 7  ;;  %v14502_v44 = vrot.slane %v11123_v25, 7  ;;  %v14591_v11 = vrot.slane %v11120_v15, 1 }
 0x24b   : > { %14588 = vst [vmem:[#allocation35_spill] sm:$0xff] %v11127_v34  ;;  %14589 = vst [vmem:[#allocation36_spill] sm:$0xff] %v11130_v58  ;;  %v2464_v2 = vpop.permute.xlu1 %2463  ;;  %v2383_v12 = vrot.slane %v11127_v34, 1  ;;  %v2189_v54 = vrot.slane %v11127_v34, 7  ;;  %v2190_v63 = vrot.slane %v11130_v58, 7  ;;  %v2384_v61 = vrot.slane %v11130_v58, 1 }
 0x24c   : > { %2510 = vst.msk [vmem:[#allocation3 + $0x20] sm:$0xff] %vm2507_vm15, %v2464_v2  ;;  %v2209_v13 = vsel %vm861_vm2, %v2191_v32, %v14502_v44  ;;  %v14590_v58 = vrot.slane %v11033_v36, 7 }
 0x24d   : > { %2591 = vst.msk [vmem:[#allocation3 + $0x20] sm:$0xff] %vm2588_vm1, %v2545_v22  ;;  %v2406_v34 = vsel %vm1056_vm0, %v2382_v18, %v2383_v12  ;;  %v2211_v2 = vsel %vm861_vm2, %v2189_v54, %v2190_v63  ;;  %v2404_v6 = vsel %vm1056_vm0, %v2384_v61, %v14591_v11  ;;  %v2405_v18 = vsel %vm1056_vm0, %v2383_v12, %v2384_v61 }
 0x24e   : > { %v2212_v50 = vsel %vm861_vm2, %v14590_v58, %v2189_v54  ;;  %2672 = vst.msk [vmem:[#allocation3 + $0x20] sm:$0xff] %vm2669_vm3, %v2626_v62  ;;  %v2691_v44 = vpop.permute.xlu0 %2690  ;;  %v11162_v22 = vpack.c.bf16 %v2406_v34, %v2407_v26  ;;  %v2210_v36 = vsel %vm861_vm2, %v2190_v63, %v2191_v32  ;;  %v11171_v54 = vpack.c.bf16 %v2404_v6, %v2405_v18 }
 0x24f   : > { %v11164_v29 = vpack.c.bf16 %v2211_v2, %v2212_v50  ;;  %2737 = vst.msk [vmem:[#allocation3 + $0x20] sm:$0xff] %vm2734_vm4, %v2691_v44  ;;  %v2756_v58 = vpop.permute.xlu1 %2755  ;;  %v11173_v24 = vpack.c.bf16 %v2209_v13, %v2210_v36 }
 0x250   : > { %2802 = vst.msk [vmem:[#allocation3 + $0x20] sm:$0xff] %vm2799_vm5, %v2756_v58 }
 0x251   : > { %2889 = vst.msk [vmem:[#allocation3 + $0x88] sm:$0xff] %vm2249_vm13, %v11162_v22  ;;  %2261 = vst.msk [vmem:[#allocation3 + $0xb0] sm:$0xff] %vm2249_vm13, %v11164_v29 }
 0x252   : > { %2867 = vst.msk [vmem:[#allocation3 + $0x20] sm:$0xff] %vm2864_vm6, %v11099_v4  ;;  %v2466_v63 = vpop.permute.xlu0 %2465 }
 0x253   : > { %2890 = vst.msk [vmem:[#allocation3 + $0x98] sm:$0xff] %vm2249_vm13, %v11171_v54  ;;  %2262 = vst.msk [vmem:[#allocation3 + $0xc0] sm:$0xff] %vm2249_vm13, %v11173_v24  ;;  %v2547_v50 = vpop.permute.xlu1 %2546 }
 0x254   : > { %2511 = vst.msk [vmem:[#allocation3 + $0x30] sm:$0xff] %vm2507_vm15, %v2466_v63 }
 0x255   : > { %2592 = vst.msk [vmem:[#allocation3 + $0x30] sm:$0xff] %vm2588_vm1, %v2547_v50 }
 0x256   : > { %2673 = vst.msk [vmem:[#allocation3 + $0x30] sm:$0xff] %vm2669_vm3, %v11103_v23 }
 0x25a   : > { %v11190_v36 = vpop.permute.xlu0 %2824 }
 0x25b   : > { %v2823_v6 = vpop.permute.xlu1 %2822 }
 0x25e   : > { %v11192_v13 = vpop.permute.xlu0 %2631 }
 0x25f   : > { %v9220_v61 = vpop.f32.mrb[24].mxu0  ;;  %v2630_v4 = vpop.permute.xlu1 %2629 }
 0x260   : > { %v2067_v62 = vadd.f32 %v9220_v61, %v10754_v10  ;;  %v2058_v34 = vpop.f32.mrb[25].mxu0 }
 0x261   : > { %v2059_v26 = vadd.f32 %v10754_v10, %v2058_v34  ;;  %v9221_v32 = vpop.f32.mrb[26].mxu0 }
 0x262   : > { %v2070_v44 = vadd.f32 %v9221_v32, %v10754_v10  ;;  %v2061_v12 = vpop.f32.mrb[27].mxu0  ;;  %v2311_v2 = vpop.permute.xlu0 %2310  ;;  %v2115_v18 = vmax.f32 %v2067_v62, 0.0  ;;  %v2386_v62 = vrot.slane %v11123_v25, 1 }
 0x263   : > { %v2062_v11 = vadd.f32 %v10754_v10, %v2061_v12  ;;  %2353 = vst.msk [vmem:[#allocation3 + $0x60] sm:$0xff] %vm2346_vm14, %v2311_v2  ;;  %v2309_v23 = vpop.permute.xlu1 %2308  ;;  %v2113_v63 = vmax.f32 %v2059_v26, 0.0 }
 0x264   : > { %v2116_v58 = vmax.f32 %v2070_v44, 0.0  ;;  %2352 = vst.msk [vmem:[#allocation3 + $0x50] sm:$0xff] %vm2346_vm14, %v2309_v23 }
 0x265   : > { %v2114_v50 = vmax.f32 %v2062_v11, 0.0 }
 0x266   : > { %v11200_v61 = vpack.c.bf16 %v2116_v58, %v2115_v18  ;;  %v2758_v5 = vpop.permute.xlu0 %2757 }
 0x267   : > { %v11202_v34 = vpack.c.bf16 %v2114_v50, %v2113_v63  ;;  %v2693_v9 = vpop.permute.xlu1 %2692 }
 0x268   : > { %v11205_v32 = vunpack.c.l.bf16 %v11200_v61  ;;  %v11208_v12 = vunpack.c.h.bf16 %v11200_v61  ;;  %2738 = vst.msk [vmem:[#allocation3 + $0x30] sm:$0xff] %vm2734_vm4, %v2693_v9 }
 0x269   : > { %v11213_v44 = vunpack.c.l.bf16 %v11202_v34  ;;  %v11216_v26 = vunpack.c.h.bf16 %v11202_v34  ;;  %2803 = vst.msk [vmem:[#allocation3 + $0x30] sm:$0xff] %vm2799_vm5, %v2758_v5  ;;  %v14595_v5 = vrot.slane %v11120_v15, 1  ;;  %v14596_v15 = vrot.slane %v11123_v25, 7 }
 0x26a   : > { %14592 = vst [vmem:[#allocation37_spill] sm:$0xff] %v11205_v32  ;;  %2868 = vst.msk [vmem:[#allocation3 + $0x30] sm:$0xff] %vm2864_vm6, %v2823_v6  ;;  %v2549_v2 = vpop.permute.xlu0 %2548  ;;  %v2195_v23 = vrot.slane %v11205_v32, 7  ;;  %v14513_v18 = vrot.slane %v11208_v12, 7  ;;  %v14597_v27 = vrot.slane %v11205_v32, 1  ;;  %v2390_v51 = vrot.slane %v11208_v12, 1 }
 0x26b   : > { %14593 = vst [vmem:[#allocation38_spill] sm:$0xff] %v11213_v44  ;;  %14594 = vst [vmem:[#allocation39_spill] sm:$0xff] %v11216_v26  ;;  %v2468_v9 = vpop.permute.xlu1 %2467  ;;  %v2387_v58 = vrot.slane %v11213_v44, 1  ;;  %v2193_v63 = vrot.slane %v11213_v44, 7  ;;  %v2194_v50 = vrot.slane %v11216_v26, 7  ;;  %v2388_v17 = vrot.slane %v11216_v26, 1 }
 0x26c   : > { %2512 = vst.msk [vmem:[#allocation3 + $0x40] sm:$0xff] %vm2507_vm15, %v2468_v9  ;;  %v2403_v6 = vsel %vm1056_vm0, %v14595_v5, %v2386_v62  ;;  %v2205_v11 = vsel %vm861_vm2, %v2195_v23, %v14513_v18  ;;  %v9425_v44 = vld [vmem:[%s14446_s11] sm:$0xff]  }
 0x26d   : > { %2593 = vst.msk [vmem:[#allocation3 + $0x40] sm:$0xff] %vm2588_vm1, %v2549_v2  ;;  %v2402_v26 = vsel %vm1056_vm0, %v2386_v62, %v2387_v58  ;;  %v2207_v9 = vsel %vm861_vm2, %v2193_v63, %v2194_v50  ;;  %v2208_v5 = vsel %vm861_vm2, %v14596_v15, %v2193_v63  ;;  %v2400_v18 = vsel %vm1056_vm0, %v2388_v17, %v14597_v27 }
 0x26e   : > { %2674 = vst.msk [vmem:[#allocation3 + $0x40] sm:$0xff] %vm2669_vm3, %v2630_v4  ;;  %v2695_v2 = vpop.permute.xlu0 %2694  ;;  %v11254_v62 = vpack.c.bf16 %v2402_v26, %v2403_v6  ;;  %v11256_v59 = vpack.c.bf16 %v2207_v9, %v2208_v5  ;;  %v2401_v25 = vsel %vm1056_vm0, %v2387_v58, %v2388_v17  ;;  %v2206_v15 = vsel %vm861_vm2, %v2194_v50, %v2195_v23  ;;  %v9426_v17 = vld [vmem:[%s14446_s11 + $0x8] sm:$0xff]   ;;  %v9427_v26 = vld [vmem:[%s14446_s11 + $0x10] sm:$0xff]   ;;  %v9429_v23 = vld [vmem:[%s14446_s11 + $0x20] sm:$0xff]  }
 0x26f   : > { %3281 = vmatpush1.bf16.msra.mxu1 %v9425_v44  ;;  %2739 = vst.msk [vmem:[#allocation3 + $0x40] sm:$0xff] %vm2734_vm4, %v2695_v2  ;;  %v2760_v27 = vpop.permute.xlu1 %2759  ;;  %v11263_v63 = vpack.c.bf16 %v2400_v18, %v2401_v25  ;;  %v11265_v21 = vpack.c.bf16 %v2205_v11, %v2206_v15  ;;  %v14598_v4 = vmov 0  }
 0x270   : > { %3282 = vmatprep.subr.bf16.mxu1 %v14598_v4  ;;  %4624 = vmatprep.subr.bf16.mxu0 %v14598_v4  ;;  %2804 = vst.msk [vmem:[#allocation3 + $0x40] sm:$0xff] %vm2799_vm5, %v2760_v27 }
 0x271   : > { %2891 = vst.msk [vmem:[#allocation3 + $0xa8] sm:$0xff] %vm2249_vm13, %v11254_v62  ;;  %2263 = vst.msk [vmem:[#allocation3 + $0xd0] sm:$0xff] %vm2249_vm13, %v11256_v59 }
 0x272   : > { %2869 = vst.msk [vmem:[#allocation3 + $0x40] sm:$0xff] %vm2864_vm6, %v11190_v36  ;;  %v2470_v25 = vpop.permute.xlu0 %2469  ;;  %v9428_v36 = vld [vmem:[%s14446_s11 + $0x18] sm:$0xff]  }
 0x273   : > { %2892 = vst.msk [vmem:[#allocation3 + $0xb8] sm:$0xff] %vm2249_vm13, %v11263_v63  ;;  %2264 = vst.msk [vmem:[#allocation3 + $0xe0] sm:$0xff] %vm2249_vm13, %v11265_v21  ;;  %3283 = vmatpush1.bf16.msra.mxu1 %v9426_v17  ;;  %v2551_v44 = vpop.permute.xlu1 %2550 }
 0x274   : > { %2513 = vst.msk [vmem:[#allocation3 + $0x50] sm:$0xff] %vm2507_vm15, %v2470_v25  ;;  %3284 = vmatprep.subr.bf16.mxu1 %v14598_v4  ;;  %v9430_v25 = vld [vmem:[%s14446_s11 + $0x28] sm:$0xff]  }
 0x275   : > { %2594 = vst.msk [vmem:[#allocation3 + $0x50] sm:$0xff] %vm2588_vm1, %v2551_v44 }
 0x276   : > { %2675 = vst.msk [vmem:[#allocation3 + $0x50] sm:$0xff] %vm2669_vm3, %v11192_v13 }
 0x277   : > { %3285 = vmatpush1.bf16.msra.mxu1 %v9427_v26 }
 0x278   : > { %3286 = vmatprep.subr.bf16.mxu1 %v14598_v4 }
 0x27a   : > { %v2829_v18 = vpop.permute.xlu0 %2828 }
 0x27b   : > { %3287 = vmatpush1.bf16.msra.mxu1 %v9428_v36  ;;  %v2827_v11 = vpop.permute.xlu1 %2826 }
 0x27c   : > { %3288 = vmatprep.subr.bf16.mxu1 %v14598_v4 }
 0x27f   : > { %3289 = vmatpush1.bf16.msra.mxu1 %v9429_v23  ;;  %v2634_v58 = vpop.permute.xlu1 %2633 }
 0x280   : > { %3290 = vmatprep.subr.bf16.mxu1 %v14598_v4  ;;  %v9224_v13 = vpop.f32.mrb[28].mxu0 }
 0x281   : > { %v2083_v50 = vadd.f32 %v9224_v13, %v10754_v10  ;;  %v2074_v6 = vpop.f32.mrb[29].mxu0 }
 0x282   : > { %v2075_v9 = vadd.f32 %v10754_v10, %v2074_v6  ;;  %v9225_v5 = vpop.f32.mrb[30].mxu0  ;;  %v2762_v2 = vpop.permute.xlu0 %2761 }
 0x283   : > { %v2086_v15 = vadd.f32 %v9225_v5, %v10754_v10  ;;  %v2077_v27 = vpop.f32.mrb[31].mxu0  ;;  %v2697_v17 = vpop.permute.xlu1 %2696  ;;  %v2119_v26 = vmax.f32 %v2083_v50, 0.0  ;;  %3291 = vmatpush1.bf16.msra.mxu1 %v9430_v25  ;;  %v2169_v5 = vrot.slane %v10778_v49, 7  ;;  %v9431_v50 = vld [vmem:[%s14446_s11 + $0x30] sm:$0xff]   ;;  %v14603_v25 = vrot.slane %v10781_v56, 7 }
 0x284   : > { %v2078_v44 = vadd.f32 %v10754_v10, %v2077_v27  ;;  %2740 = vst.msk [vmem:[#allocation3 + $0x50] sm:$0xff] %vm2734_vm4, %v2697_v17  ;;  %v2117_v23 = vmax.f32 %v2075_v9, 0.0  ;;  %3292 = vmatprep.subr.bf16.mxu1 %v14598_v4 }
 0x285   : > { %v2120_v36 = vmax.f32 %v2086_v15, 0.0  ;;  %2805 = vst.msk [vmem:[#allocation3 + $0x50] sm:$0xff] %vm2799_vm5, %v2762_v2 }
 0x286   : > { %v2118_v13 = vmax.f32 %v2078_v44, 0.0  ;;  %2870 = vst.msk [vmem:[#allocation3 + $0x50] sm:$0xff] %vm2864_vm6, %v2827_v11  ;;  %v2553_v6 = vpop.permute.xlu0 %2552  ;;  %v2231_v44 = vsel %vm861_vm2, %v2169_v5, %v14603_v25 }
 0x287   : > { %v11313_v14 = vpack.c.bf16 %v2120_v36, %v2119_v26  ;;  %v2472_v10 = vpop.permute.xlu1 %2471  ;;  %3293 = vmatpush1.bf16.msra.mxu1 %v9431_v50  ;;  %v14604_v26 = vrot.slane %v11205_v32, 1  ;;  %v9432_v50 = vld [vmem:[%s14446_s11 + $0x38] sm:$0xff]  }
 0x288   : > { %v11318_v2 = vpack.c.bf16 %v2118_v13, %v2117_v23  ;;  %2514 = vst.msk [vmem:[#allocation3 + $0x60] sm:$0xff] %vm2507_vm15, %v2472_v10  ;;  %3294 = vmatprep.subr.bf16.mxu1 %v14598_v4 }
 0x289   : > { %v11322_v11 = vunpack.c.l.bf16 %v11313_v14  ;;  %v11325_v9 = vunpack.c.h.bf16 %v11313_v14  ;;  %2298 = vrot.lane.b32.xlu0 %v11313_v14, %s14559_s1  ;;  %2595 = vst.msk [vmem:[#allocation3 + $0x60] sm:$0xff] %vm2588_vm1, %v2553_v6  ;;  %v2399_v36 = vsel %vm1056_vm0, %v14604_v26, %v2390_v51 }
 0x28a   : > { %v11331_v15 = vunpack.c.l.bf16 %v11318_v2  ;;  %v11334_v27 = vunpack.c.h.bf16 %v11318_v2  ;;  %2676 = vst.msk [vmem:[#allocation3 + $0x60] sm:$0xff] %vm2669_vm3, %v2634_v58  ;;  %v2699_v17 = vpop.permute.xlu0 %2698 }
 0x28b   : > { %14599 = vst [vmem:[#allocation40_spill] sm:$0xff] %v11322_v11  ;;  %14600 = vst [vmem:[#allocation41_spill] sm:$0xff] %v11325_v9  ;;  %v2764_v23 = vpop.permute.xlu1 %2763  ;;  %v2393_v13 = vrot.slane %v11322_v11, 1  ;;  %v2394_v58 = vrot.slane %v11325_v9, 1  ;;  %v2200_v6 = vrot.slane %v11325_v9, 7  ;;  %v2199_v10 = vrot.slane %v11322_v11, 7  ;;  %3295 = vmatpush1.bf16.msra.mxu1 %v9432_v50 }
 0x28c   : > { %14601 = vst [vmem:[#allocation42_spill] sm:$0xff] %v11331_v15  ;;  %14602 = vst [vmem:[#allocation43_spill] sm:$0xff] %v11334_v27  ;;  %v2391_v25 = vrot.slane %v11331_v15, 1  ;;  %v2197_v26 = vrot.slane %v11331_v15, 7  ;;  %v2392_v32 = vrot.slane %v11334_v27, 1  ;;  %v14605_v11 = vrot.slane %v10778_v49, 1  ;;  %3296 = vmatprep.subr.bf16.mxu1 %v14598_v4 }
 0x28d   : > { %2741 = vst.msk [vmem:[#allocation3 + $0x60] sm:$0xff] %vm2734_vm4, %v2699_v17  ;;  %v2198_v17 = vrot.slane %v11334_v27, 7  ;;  %v2395_v9 = vsel %vm1056_vm0, %v2393_v13, %v2394_v58  ;;  %v2201_v15 = vsel %vm861_vm2, %v2199_v10, %v2200_v6 }
 0x28e   : > { %2806 = vst.msk [vmem:[#allocation3 + $0x60] sm:$0xff] %vm2799_vm5, %v2764_v23  ;;  %v2426_v7 = vsel %vm1056_vm0, %v2394_v58, %v14605_v11  ;;  %v2232_v23 = vsel %vm861_vm2, %v2200_v6, %v2169_v5  ;;  %v14606_v5 = vrot.slane %v11208_v12, 7 }
 0x28f   : > { %2871 = vst.msk [vmem:[#allocation3 + $0x60] sm:$0xff] %vm2864_vm6, %v2829_v18  ;;  %v11370_v57 = vpack.c.bf16 %v2426_v7, %v2395_v9  ;;  %v11372_v27 = vpack.c.bf16 %v2231_v44, %v2232_v23  ;;  %v2398_v18 = vsel %vm1056_vm0, %v2390_v51, %v2391_v25  ;;  %v2203_v0 = vsel %vm861_vm2, %v2197_v26, %v2198_v17  ;;  %v9433_v51 = vld [vmem:[%s14446_s11 + $0x40] sm:$0xff]  }
 0x290   : > { %v11379_v11 = vpack.c.bf16 %v2398_v18, %v2399_v36  ;;  %v2204_v58 = vsel %vm861_vm2, %v14606_v5, %v2197_v26  ;;  %v2202_v7 = vsel %vm861_vm2, %v2198_v17, %v2199_v10  ;;  %v2396_v9 = vsel %vm1056_vm0, %v2392_v32, %v2393_v13  ;;  %3297 = vmatpush1.bf16.msra.mxu1 %v9433_v51  ;;  %v2903_v26 = vld [vmem:[#allocation3 + $0x30] sm:$0xff]  ;;  %v9440_v17 = vld [vmem:[%s14573_s24 + $0x44] ss:$8 sps:$4 sm:$0xff]  }
 0x291   : > { %2459 = vrot.lane.b32.xlu1 %v11370_v57, %s14561_s9  ;;  %2895 = vst.msk [vmem:[#allocation3 + $0xe8] sm:$0xff] %vm2249_vm13, %v11370_v57  ;;  %2540 = vrot.lane.b32.xlu0 %v11372_v27, %s14563_s27  ;;  %2251 = vst.msk [vmem:[#allocation3 + $0x10] sm:$0xff] %vm2249_vm13, %v11372_v27  ;;  %v11400_v44 = vpack.c.bf16 %v2203_v0, %v2204_v58  ;;  %v11402_v36 = vpack.c.bf16 %v2201_v15, %v2202_v7  ;;  %v2936_v15 = vld [vmem:[%s14573_s24 + $0x38] sm:$0xff]  ;;  %v2937_v58 = vld [vmem:[%s14573_s24 + $0x40] sm:$0xff] }
 0x292   : > { %v2397_v13 = vsel %vm1056_vm0, %v2391_v25, %v2392_v32  ;;  %2348 = vst.msk [vmem:[#allocation3 + $0x10] sm:$0xff] %vm2346_vm14, %v11045_v8  ;;  %6008 = vmatprep.subr.bf16.mxu1 %v14598_v4  ;;  %v2938_v7 = vld [vmem:[%s14573_s24 + $0x48] sm:$0xff] }
 0x293   : > { %2893 = vst.msk [vmem:[#allocation3 + $0xc8] sm:$0xff] %vm2249_vm13, %v11379_v11  ;;  %v11410_v6 = vpack.c.bf16 %v2396_v9, %v2397_v13  ;;  %2265 = vst.msk [vmem:[#allocation3 + $0xf0] sm:$0xff] %vm2249_vm13, %v11400_v44  ;;  %v2905_v13 = vld [vmem:[#allocation3 + $0x40] sm:$0xff] }
 0x294   : > { %2509 = vst.msk [vmem:[#allocation3 + $0x10] sm:$0xff] %vm2507_vm15, %v11095_v38  ;;  %v2902_v38 = vld [vmem:[#allocation3 + $0x28] sm:$0xff] }
 0x295   : > { %2250 = vst.msk [vmem:[#allocation3] sm:$0xff] %vm2249_vm13, %v11402_v36  ;;  %2894 = vst.msk [vmem:[#allocation3 + $0xd8] sm:$0xff] %vm2249_vm13, %v11410_v6  ;;  %2312 = vrot.lane.b32.xlu1 %v10944_v55, %s14559_s1  ;;  %2473 = vrot.lane.b32.xlu0 %v10996_v39, %s14561_s9  ;;  %v9422_v39 = vld [vmem:[%s14573_s24] ss:$8 sps:$4 sm:$0xff]  }
 0x296   : > { %2590 = vst.msk [vmem:[#allocation3 + $0x10] sm:$0xff] %vm2588_vm1, %v11097_v43 }
 0x297   : > { %2671 = vst.msk [vmem:[#allocation3 + $0x10] sm:$0xff] %vm2669_vm3, %v11016_v35  ;;  %v2900_v35 = vld [vmem:[#allocation3 + $0x18] sm:$0xff] }
 0x298   : > { %2736 = vst.msk [vmem:[#allocation3 + $0x10] sm:$0xff] %vm2734_vm4, %v11117_v41 }
 0x299   : > { %2801 = vst.msk [vmem:[#allocation3 + $0x10] sm:$0xff] %vm2799_vm5, %v11113_v42  ;;  %2554 = vrot.lane.b32.xlu1 %v10998_v46, %s14563_s27  ;;  %2635 = vrot.lane.b32.xlu0 %v10942_v20, %s14565_s26 }
 0x29a   : > { %2866 = vst.msk [vmem:[#allocation3 + $0x10] sm:$0xff] %vm2864_vm6, %v11101_v53  ;;  %v2933_v53 = vld [vmem:[%s14573_s24 + $0x20] sm:$0xff] }
 0x29d   : > { %2700 = vrot.lane.b32.xlu1 %v11071_v40, %s9759_s6  ;;  %2765 = vrot.lane.b32.xlu0 %v11073_v28, %s14529_s4 }
 0x2a1   : > { %2830 = vrot.lane.b32.xlu1 %v11027_v3, %s9757_s3  ;;  %2314 = vrot.lane.b32.xlu0 %v10942_v20, %s14559_s1 }
 0x2a5   : > { %2475 = vrot.lane.b32.xlu1 %v11071_v40, %s14561_s9  ;;  %2556 = vrot.lane.b32.xlu0 %v11073_v28, %s14563_s27 }
 0x2a9   : > { %2637 = vrot.lane.b32.xlu1 %v11027_v3, %s14565_s26  ;;  %2702 = vrot.lane.b32.xlu0 %v11079_v60, %s9759_s6 }
 0x2ad   : > { %2767 = vrot.lane.b32.xlu1 %v11081_v33, %s14529_s4  ;;  %2832 = vrot.lane.b32.xlu0 %v11025_v45, %s9757_s3 }
 0x2b1   : > { %2316 = vrot.lane.b32.xlu1 %v11027_v3, %s14559_s1  ;;  %2477 = vrot.lane.b32.xlu0 %v11079_v60, %s14561_s9  ;;  %v2932_v3 = vld [vmem:[%s14573_s24 + $0x18] sm:$0xff]  ;;  %v2899_v60 = vld [vmem:[#allocation3 + $0x10] sm:$0xff] }
 0x2b5   : > { %2558 = vrot.lane.b32.xlu1 %v11081_v33, %s14563_s27  ;;  %2639 = vrot.lane.b32.xlu0 %v11025_v45, %s14565_s26  ;;  %v9436_v33 = vld [vmem:[%s14573_s24 + $0x24] ss:$8 sps:$4 sm:$0xff]  }
 0x2b6   : > { %v3126_v42 = vmul.bf16 %v9436_v33, %v2902_v38 }
 0x2b9   : > { %2704 = vrot.lane.b32.xlu1 %v11162_v22, %s9759_s6  ;;  %2769 = vrot.lane.b32.xlu0 %v11164_v29, %s14529_s4 }
 0x2bd   : > { %2834 = vrot.lane.b32.xlu1 %v11115_v30, %s9757_s3  ;;  %2318 = vrot.lane.b32.xlu0 %v11025_v45, %s14559_s1 }
 0x2c1   : > { %2479 = vrot.lane.b32.xlu1 %v11162_v22, %s14561_s9  ;;  %2560 = vrot.lane.b32.xlu0 %v11164_v29, %s14563_s27 }
 0x2c5   : > { %2641 = vrot.lane.b32.xlu1 %v11115_v30, %s14565_s26  ;;  %2706 = vrot.lane.b32.xlu0 %v11171_v54, %s9759_s6 }
 0x2c9   : > { %2771 = vrot.lane.b32.xlu1 %v11173_v24, %s14529_s4  ;;  %2836 = vrot.lane.b32.xlu0 %v11111_v16, %s9757_s3 }
 0x2cd   : > { %2320 = vrot.lane.b32.xlu1 %v11115_v30, %s14559_s1  ;;  %2481 = vrot.lane.b32.xlu0 %v11171_v54, %s14561_s9  ;;  %v2901_v54 = vld [vmem:[#allocation3 + $0x20] sm:$0xff] }
 0x2d1   : > { %2562 = vrot.lane.b32.xlu1 %v11173_v24, %s14563_s27  ;;  %2643 = vrot.lane.b32.xlu0 %v11111_v16, %s14565_s26 }
 0x2d5   : > { %2708 = vrot.lane.b32.xlu1 %v11254_v62, %s9759_s6  ;;  %2773 = vrot.lane.b32.xlu0 %v11256_v59, %s14529_s4 }
 0x2d9   : > { %2838 = vrot.lane.b32.xlu1 %v11202_v34, %s9757_s3  ;;  %2322 = vrot.lane.b32.xlu0 %v11111_v16, %s14559_s1  ;;  %v2934_v16 = vld [vmem:[%s14573_s24 + $0x28] sm:$0xff] }
 0x2da   : > { %v8608_v22 = vcombine.low %v2933_v53, %v2934_v16  ;;  %v2912_v53 = vld [vmem:[#allocation3 + $0x78] sm:$0xff] }
 0x2dd   : > { %2483 = vrot.lane.b32.xlu1 %v11254_v62, %s14561_s9  ;;  %2564 = vrot.lane.b32.xlu0 %v11256_v59, %s14563_s27  ;;  %v2904_v62 = vld [vmem:[#allocation3 + $0x38] sm:$0xff] }
 0x2e1   : > { %2645 = vrot.lane.b32.xlu1 %v11202_v34, %s14565_s26  ;;  %2710 = vrot.lane.b32.xlu0 %v11263_v63, %s9759_s6 }
 0x2e5   : > { %2775 = vrot.lane.b32.xlu1 %v11265_v21, %s14529_s4  ;;  %2840 = vrot.lane.b32.xlu0 %v11200_v61, %s9757_s3 }
 0x2e9   : > { %2324 = vrot.lane.b32.xlu1 %v11202_v34, %s14559_s1  ;;  %2485 = vrot.lane.b32.xlu0 %v11263_v63, %s14561_s9  ;;  %v3125_v63 = vmul.bf16 %v8608_v22, %v2901_v54 }
 0x2ed   : > { %2566 = vrot.lane.b32.xlu1 %v11265_v21, %s14563_s27  ;;  %2647 = vrot.lane.b32.xlu0 %v11200_v61, %s14565_s26 }
 0x2f1   : > { %2712 = vrot.lane.b32.xlu1 %v11379_v11, %s9759_s6  ;;  %2777 = vrot.lane.b32.xlu0 %v11400_v44, %s14529_s4 }
 0x2f5   : > { %2842 = vrot.lane.b32.xlu1 %v11318_v2, %s9757_s3  ;;  %2326 = vrot.lane.b32.xlu0 %v11200_v61, %s14559_s1  ;;  %v9438_v61 = vld [vmem:[%s14573_s24 + $0x34] ss:$8 sps:$4 sm:$0xff]  }
 0x2f9   : > { %2487 = vrot.lane.b32.xlu1 %v11379_v11, %s14561_s9  ;;  %2568 = vrot.lane.b32.xlu0 %v11400_v44, %s14563_s27  ;;  %v2906_v11 = vld [vmem:[#allocation3 + $0x48] sm:$0xff] }
 0x2fa   : > { %v3130_v9 = vmul.bf16 %v9440_v17, %v2906_v11 }
 0x2fb   : > { %v2299_v0 = vpop.permute.xlu0 %2298 }
 0x2fc   : > { %2347 = vst.msk [vmem:[#allocation3] sm:$0xff] %vm2346_vm14, %v2299_v0 }
 0x2fd   : > { %2649 = vrot.lane.b32.xlu1 %v11318_v2, %s14565_s26  ;;  %2714 = vrot.lane.b32.xlu0 %v11410_v6, %s9759_s6 }
 0x301   : > { %2779 = vrot.lane.b32.xlu1 %v11402_v36, %s14529_s4  ;;  %2844 = vrot.lane.b32.xlu0 %v11313_v14, %s9757_s3 }
 0x303   : > { %v2460_v59 = vpop.permute.xlu1 %2459  ;;  %v2541_v21 = vpop.permute.xlu0 %2540 }
 0x304   : > { %2508 = vst.msk [vmem:[#allocation3] sm:$0xff] %vm2507_vm15, %v2460_v59 }
 0x305   : > { %2589 = vst.msk [vmem:[#allocation3] sm:$0xff] %vm2588_vm1, %v2541_v21  ;;  %2328 = vrot.lane.b32.xlu1 %v11318_v2, %s14559_s1  ;;  %2489 = vrot.lane.b32.xlu0 %v11410_v6, %s14561_s9  ;;  %v2935_v2 = vld [vmem:[%s14573_s24 + $0x30] sm:$0xff]  ;;  %v2908_v21 = vld [vmem:[#allocation3 + $0x58] sm:$0xff] }
 0x306   : > { %2670 = vst.msk [vmem:[#allocation3] sm:$0xff] %vm2669_vm3, %v11023_v19  ;;  %v8610_v25 = vcombine.low %v2935_v2, %v2936_v15  ;;  %v9442_v6 = vld [vmem:[%s14573_s24 + $0x54] ss:$8 sps:$4 sm:$0xff]   ;;  %v2914_v2 = vld [vmem:[#allocation3 + $0x88] sm:$0xff] }
 0x307   : > { %2735 = vst.msk [vmem:[#allocation3] sm:$0xff] %vm2734_vm4, %v11083_v48  ;;  %v2313_v20 = vpop.permute.xlu1 %2312  ;;  %v2474_v55 = vpop.permute.xlu0 %2473 }
 0x308   : > { %2800 = vst.msk [vmem:[#allocation3] sm:$0xff] %vm2799_vm5, %v11089_v37  ;;  %v3127_v5 = vmul.bf16 %v8610_v25, %v2903_v26 }
 0x309   : > { %2354 = vst.msk [vmem:[#allocation3 + $0x70] sm:$0xff] %vm2346_vm14, %v2313_v20  ;;  %2570 = vrot.lane.b32.xlu1 %v11402_v36, %s14563_s27  ;;  %2651 = vrot.lane.b32.xlu0 %v11313_v14, %s14565_s26  ;;  %v9434_v14 = vld [vmem:[%s14573_s24 + $0x14] ss:$8 sps:$4 sm:$0xff]   ;;  %v8612_v36 = vcombine.low %v2937_v58, %v2938_v7 }
 0x30a   : > { %2865 = vst.msk [vmem:[#allocation3] sm:$0xff] %vm2864_vm6, %v11014_v47  ;;  %v3124_v8 = vmul.bf16 %v9434_v14, %v2900_v35  ;;  %v9444_v35 = vld [vmem:[%s14573_s24 + $0x64] ss:$8 sps:$4 sm:$0xff]   ;;  %v2916_v58 = vld [vmem:[#allocation3 + $0x98] sm:$0xff] }
 0x30b   : > { %2515 = vst.msk [vmem:[#allocation3 + $0x70] sm:$0xff] %vm2507_vm15, %v2474_v55  ;;  %v2555_v24 = vpop.permute.xlu1 %2554  ;;  %v2636_v29 = vpop.permute.xlu0 %2635  ;;  %v3129_v20 = vmul.bf16 %v8612_v36, %v2905_v13  ;;  %v2939_v55 = vld [vmem:[%s14573_s24 + $0x50] sm:$0xff] }
 0x30c   : > { %2596 = vst.msk [vmem:[#allocation3 + $0x70] sm:$0xff] %vm2588_vm1, %v2555_v24  ;;  %v2940_v24 = vld [vmem:[%s14573_s24 + $0x58] sm:$0xff] }
 0x30d   : > { %2677 = vst.msk [vmem:[#allocation3 + $0x70] sm:$0xff] %vm2669_vm3, %v2636_v29  ;;  %2716 = vrot.lane.b32.xlu1 %v11370_v57, %s9759_s6  ;;  %2781 = vrot.lane.b32.xlu0 %v11372_v27, %s14529_s4  ;;  %v2931_v57 = vld [vmem:[%s14573_s24 + $0x10] sm:$0xff]  ;;  %v3128_v27 = vmul.bf16 %v9438_v61, %v2904_v62  ;;  %v3132_v29 = vmul.bf16 %v9442_v6, %v2908_v21 }
 0x30f   : > { %v2701_v46 = vpop.permute.xlu1 %2700  ;;  %v2766_v47 = vpop.permute.xlu0 %2765 }
 0x310   : > { %2742 = vst.msk [vmem:[#allocation3 + $0x70] sm:$0xff] %vm2734_vm4, %v2701_v46  ;;  %v8614_v46 = vcombine.low %v2939_v55, %v2940_v24  ;;  %v2918_v55 = vld [vmem:[#allocation3 + $0xa8] sm:$0xff] }
 0x311   : > { %v2897_v19 = vld [vmem:[#allocation3] sm:$0xff]  ;;  %2807 = vst.msk [vmem:[#allocation3 + $0x70] sm:$0xff] %vm2799_vm5, %v2766_v47  ;;  %2846 = vrot.lane.b32.xlu1 %v10766_v31, %s9757_s3  ;;  %v8606_v31 = vcombine.low %v2931_v57, %v2932_v3  ;;  %v2907_v47 = vld [vmem:[#allocation3 + $0x50] sm:$0xff]  ;;  %v2910_v57 = vld [vmem:[#allocation3 + $0x68] sm:$0xff] }
 0x312   : > { %v3121_v45 = vmul.bf16 %v9422_v39, %v2897_v19  ;;  %v3131_v3 = vmul.bf16 %v8614_v46, %v2907_v47 }
 0x313   : > { %v2831_v40 = vpop.permute.xlu1 %2830  ;;  %v2315_v28 = vpop.permute.xlu0 %2314  ;;  %v3123_v43 = vmul.bf16 %v8606_v31, %v2899_v60 }
 0x314   : > { %3313 = vmatmul.mubr.bf16.vlgmr.msra.gmra.mrb[0].mxu1 %v3121_v45  ;;  %2872 = vst.msk [vmem:[#allocation3 + $0x70] sm:$0xff] %vm2864_vm6, %v2831_v40  ;;  %v2942_v40 = vld [vmem:[%s14573_s24 + $0x68] sm:$0xff] }
 0x315   : > { %2355 = vst.msk [vmem:[#allocation3 + $0x80] sm:$0xff] %vm2346_vm14, %v2315_v28  ;;  %8647 = vmatprep.mubr.msk.bf16.mxu1 %vm2249_vm13, %v3124_v8  ;;  %v2941_v8 = vld [vmem:[%s14573_s24 + $0x60] sm:$0xff]  ;;  %v3134_v28 = vmul.bf16 %v9444_v35, %v2910_v57 }
 0x316   : > { %v8616_v33 = vcombine.low %v2941_v8, %v2942_v40  ;;  %v2920_v8 = vld [vmem:[#allocation3 + $0xb8] sm:$0xff] }
 0x317   : > { %v2476_v48 = vpop.permute.xlu1 %2475  ;;  %v2557_v37 = vpop.permute.xlu0 %2556 }
 0x318   : > { %2516 = vst.msk [vmem:[#allocation3 + $0x80] sm:$0xff] %vm2507_vm15, %v2476_v48  ;;  %v2909_v48 = vld [vmem:[#allocation3 + $0x60] sm:$0xff] }
 0x319   : > { %2597 = vst.msk [vmem:[#allocation3 + $0x80] sm:$0xff] %vm2588_vm1, %v2557_v37  ;;  %v9446_v37 = vld [vmem:[%s14573_s24 + $0x74] ss:$8 sps:$4 sm:$0xff]   ;;  %v3133_v16 = vmul.bf16 %v8616_v33, %v2909_v48 }
 0x31b   : > { %v2638_v30 = vpop.permute.xlu1 %2637  ;;  %v2703_v41 = vpop.permute.xlu0 %2702 }
 0x31c   : > { %3321 = vmatmul.mubr.bf16.gmra.mrb[4].mxu1 %v3123_v43  ;;  %2678 = vst.msk [vmem:[#allocation3 + $0x80] sm:$0xff] %vm2669_vm3, %v2638_v30  ;;  %v2944_v30 = vld [vmem:[%s14573_s24 + $0x78] sm:$0xff] }
 0x31d   : > { %8648 = vmatprep.mubr.msk.bf16.mxu1 %vm2249_vm13, %v3126_v42  ;;  %2743 = vst.msk [vmem:[#allocation3 + $0x80] sm:$0xff] %vm2734_vm4, %v2703_v41  ;;  %v2943_v42 = vld [vmem:[%s14573_s24 + $0x70] sm:$0xff]  ;;  %v3136_v41 = vmul.bf16 %v9446_v37, %v2912_v53 }
 0x31e   : > { %v8618_v61 = vcombine.low %v2943_v42, %v2944_v30  ;;  %v2922_v42 = vld [vmem:[#allocation3 + $0xc8] sm:$0xff] }
 0x31f   : > { %v2768_v34 = vpop.permute.xlu1 %2767  ;;  %v2833_v32 = vpop.permute.xlu0 %2832 }
 0x320   : > { %2808 = vst.msk [vmem:[#allocation3 + $0x80] sm:$0xff] %vm2799_vm5, %v2768_v34  ;;  %v2911_v34 = vld [vmem:[#allocation3 + $0x70] sm:$0xff] }
 0x321   : > { %2873 = vst.msk [vmem:[#allocation3 + $0x80] sm:$0xff] %vm2864_vm6, %v2833_v32  ;;  %v9448_v32 = vld [vmem:[%s14573_s24 + $0x84] ss:$8 sps:$4 sm:$0xff]   ;;  %v3135_v15 = vmul.bf16 %v8618_v61, %v2911_v34 }
 0x323   : > { %v2317_v10 = vpop.permute.xlu1 %2316  ;;  %v2478_v50 = vpop.permute.xlu0 %2477 }
 0x324   : > { %3329 = vmatmul.mubr.bf16.gmra.mrb[8].mxu1 %v3125_v63  ;;  %2356 = vst.msk [vmem:[#allocation3 + $0x90] sm:$0xff] %vm2346_vm14, %v2317_v10  ;;  %v2946_v10 = vld [vmem:[%s14573_s24 + $0x88] sm:$0xff] }
 0x325   : > { %8649 = vmatprep.mubr.msk.bf16.mxu1 %vm2249_vm13, %v3128_v27  ;;  %2517 = vst.msk [vmem:[#allocation3 + $0x90] sm:$0xff] %vm2507_vm15, %v2478_v50  ;;  %v2945_v27 = vld [vmem:[%s14573_s24 + $0x80] sm:$0xff]  ;;  %v3138_v50 = vmul.bf16 %v9448_v32, %v2914_v2 }
 0x326   : > { %v8620_v17 = vcombine.low %v2945_v27, %v2946_v10  ;;  %v2924_v27 = vld [vmem:[#allocation3 + $0xd8] sm:$0xff] }
 0x327   : > { %v2559_v23 = vpop.permute.xlu1 %2558  ;;  %v2640_v18 = vpop.permute.xlu0 %2639 }
 0x328   : > { %2598 = vst.msk [vmem:[#allocation3 + $0x90] sm:$0xff] %vm2588_vm1, %v2559_v23  ;;  %v2913_v23 = vld [vmem:[#allocation3 + $0x80] sm:$0xff] }
 0x329   : > { %2679 = vst.msk [vmem:[#allocation3 + $0x90] sm:$0xff] %vm2669_vm3, %v2640_v18  ;;  %v9450_v18 = vld [vmem:[%s14573_s24 + $0x94] ss:$8 sps:$4 sm:$0xff]   ;;  %v3137_v7 = vmul.bf16 %v8620_v17, %v2913_v23 }
 0x32b   : > { %v2705_v51 = vpop.permute.xlu1 %2704  ;;  %v2770_v44 = vpop.permute.xlu0 %2769 }
 0x32c   : > { %3337 = vmatmul.mubr.bf16.gmra.mrb[12].mxu1 %v3127_v5  ;;  %2744 = vst.msk [vmem:[#allocation3 + $0x90] sm:$0xff] %vm2734_vm4, %v2705_v51  ;;  %v2948_v51 = vld [vmem:[%s14573_s24 + $0x98] sm:$0xff] }
 0x32d   : > { %8650 = vmatprep.mubr.msk.bf16.mxu1 %vm2249_vm13, %v3130_v9  ;;  %2809 = vst.msk [vmem:[#allocation3 + $0x90] sm:$0xff] %vm2799_vm5, %v2770_v44  ;;  %v2947_v9 = vld [vmem:[%s14573_s24 + $0x90] sm:$0xff]  ;;  %v3140_v44 = vmul.bf16 %v9450_v18, %v2916_v58 }
 0x32e   : > { %v8622_v6 = vcombine.low %v2947_v9, %v2948_v51  ;;  %v2926_v9 = vld [vmem:[#allocation3 + $0xe8] sm:$0xff] }
 0x32f   : > { %v2835_v0 = vpop.permute.xlu1 %2834  ;;  %v2319_v59 = vpop.permute.xlu0 %2318 }
 0x330   : > { %2874 = vst.msk [vmem:[#allocation3 + $0x90] sm:$0xff] %vm2864_vm6, %v2835_v0 }
 0x331   : > { %2357 = vst.msk [vmem:[#allocation3 + $0xa0] sm:$0xff] %vm2346_vm14, %v2319_v59  ;;  %v9452_v59 = vld [vmem:[%s14573_s24 + $0xa4] ss:$8 sps:$4 sm:$0xff]  }
 0x333   : > { %v2480_v39 = vpop.permute.xlu1 %2479  ;;  %v2561_v14 = vpop.permute.xlu0 %2560 }
 0x334   : > { %3345 = vmatmul.mubr.bf16.gmra.mrb[16].mxu1 %v3129_v20  ;;  %2518 = vst.msk [vmem:[#allocation3 + $0xa0] sm:$0xff] %vm2507_vm15, %v2480_v39  ;;  %v2950_v39 = vld [vmem:[%s14573_s24 + $0xa8] sm:$0xff] }
 0x335   : > { %8651 = vmatprep.mubr.msk.bf16.mxu1 %vm2249_vm13, %v3132_v29  ;;  %2599 = vst.msk [vmem:[#allocation3 + $0xa0] sm:$0xff] %vm2588_vm1, %v2561_v14  ;;  %v2949_v29 = vld [vmem:[%s14573_s24 + $0xa0] sm:$0xff]  ;;  %v3142_v14 = vmul.bf16 %v9452_v59, %v2918_v55 }
 0x336   : > { %v8624_v35 = vcombine.low %v2949_v29, %v2950_v39  ;;  %v2928_v29 = vld [vmem:[#allocation3 + $0xf8] sm:$0xff] }
 0x337   : > { %v2642_v19 = vpop.permute.xlu1 %2641  ;;  %v2707_v45 = vpop.permute.xlu0 %2706  ;;  %v2915_v0 = vld [vmem:[#allocation3 + $0x90] sm:$0xff] }
 0x338   : > { %2680 = vst.msk [vmem:[#allocation3 + $0xa0] sm:$0xff] %vm2669_vm3, %v2642_v19  ;;  %v3139_v24 = vmul.bf16 %v8622_v6, %v2915_v0 }
 0x339   : > { %2745 = vst.msk [vmem:[#allocation3 + $0xa0] sm:$0xff] %vm2734_vm4, %v2707_v45  ;;  %v9454_v45 = vld [vmem:[%s14573_s24 + $0xb4] ss:$8 sps:$4 sm:$0xff]  }
 0x33b   : > { %v2772_v31 = vpop.permute.xlu1 %2771  ;;  %v2837_v60 = vpop.permute.xlu0 %2836 }
 0x33c   : > { %3353 = vmatmul.mubr.bf16.gmra.mrb[20].mxu1 %v3131_v3  ;;  %2810 = vst.msk [vmem:[#allocation3 + $0xa0] sm:$0xff] %vm2799_vm5, %v2772_v31  ;;  %v2952_v31 = vld [vmem:[%s14573_s24 + $0xb8] sm:$0xff] }
 0x33d   : > { %8652 = vmatprep.mubr.msk.bf16.mxu1 %vm2249_vm13, %v3134_v28  ;;  %2875 = vst.msk [vmem:[#allocation3 + $0xa0] sm:$0xff] %vm2864_vm6, %v2837_v60  ;;  %v2951_v28 = vld [vmem:[%s14573_s24 + $0xb0] sm:$0xff]  ;;  %v3144_v60 = vmul.bf16 %v9454_v45, %v2920_v8  ;;  %v11784_v45 = vld [vmem:[%s14447_s12] ss:$0 sm:$0xff] }
 0x33e   : > { %v8626_v37 = vcombine.low %v2951_v28, %v2952_v31 }
 0x33f   : > { %v2321_v38 = vpop.permute.xlu1 %2320  ;;  %v2482_v43 = vpop.permute.xlu0 %2481 }
 0x340   : > { %2358 = vst.msk [vmem:[#allocation3 + $0xb0] sm:$0xff] %vm2346_vm14, %v2321_v38 }
 0x341   : > { %2519 = vst.msk [vmem:[#allocation3 + $0xb0] sm:$0xff] %vm2507_vm15, %v2482_v43  ;;  %v9456_v43 = vld [vmem:[%s14573_s24 + $0xc4] ss:$8 sps:$4 sm:$0xff]  }
 0x343   : > { %v2563_v22 = vpop.permute.xlu1 %2562  ;;  %v2644_v54 = vpop.permute.xlu0 %2643 }
 0x344   : > { %3361 = vmatmul.mubr.bf16.gmra.mrb[24].mxu1 %v3133_v16  ;;  %2600 = vst.msk [vmem:[#allocation3 + $0xb0] sm:$0xff] %vm2588_vm1, %v2563_v22  ;;  %v2917_v19 = vld [vmem:[#allocation3 + $0xa0] sm:$0xff]  ;;  %v2954_v22 = vld [vmem:[%s14573_s24 + $0xc8] sm:$0xff] }
 0x345   : > { %8653 = vmatprep.mubr.msk.bf16.mxu1 %vm2249_vm13, %v3136_v41  ;;  %2681 = vst.msk [vmem:[#allocation3 + $0xb0] sm:$0xff] %vm2669_vm3, %v2644_v54  ;;  %v3141_v40 = vmul.bf16 %v8624_v35, %v2917_v19  ;;  %v2953_v41 = vld [vmem:[%s14573_s24 + $0xc0] sm:$0xff]  ;;  %v3146_v54 = vmul.bf16 %v9456_v43, %v2922_v42 }
 0x346   : > { %v8628_v32 = vcombine.low %v2953_v41, %v2954_v22 }
 0x347   : > { %v2709_v62 = vpop.permute.xlu1 %2708  ;;  %v2774_v63 = vpop.permute.xlu0 %2773 }
 0x348   : > { %2746 = vst.msk [vmem:[#allocation3 + $0xb0] sm:$0xff] %vm2734_vm4, %v2709_v62 }
 0x349   : > { %2811 = vst.msk [vmem:[#allocation3 + $0xb0] sm:$0xff] %vm2799_vm5, %v2774_v63  ;;  %v9458_v63 = vld [vmem:[%s14573_s24 + $0xd4] ss:$8 sps:$4 sm:$0xff]  }
 0x34b   : > { %v2839_v25 = vpop.permute.xlu1 %2838  ;;  %v2323_v26 = vpop.permute.xlu0 %2322 }
 0x34c   : > { %3369 = vmatmul.mubr.bf16.gmra.mrb[28].mxu1 %v3135_v15  ;;  %2876 = vst.msk [vmem:[#allocation3 + $0xb0] sm:$0xff] %vm2864_vm6, %v2839_v25  ;;  %v2956_v25 = vld [vmem:[%s14573_s24 + $0xd8] sm:$0xff] }
 0x34d   : > { %2359 = vst.msk [vmem:[#allocation3 + $0xc0] sm:$0xff] %vm2346_vm14, %v2323_v26  ;;  %8654 = vmatprep.mubr.msk.bf16.mxu1 %vm2249_vm13, %v3138_v50  ;;  %v2955_v50 = vld [vmem:[%s14573_s24 + $0xd0] sm:$0xff]  ;;  %v3148_v26 = vmul.bf16 %v9458_v63, %v2924_v27 }
 0x34e   : > { %v8630_v18 = vcombine.low %v2955_v50, %v2956_v25 }
 0x34f   : > { %v2484_v11 = vpop.permute.xlu1 %2483  ;;  %v2565_v5 = vpop.permute.xlu0 %2564 }
 0x350   : > { %2520 = vst.msk [vmem:[#allocation3 + $0xc0] sm:$0xff] %vm2507_vm15, %v2484_v11 }
 0x351   : > { %2601 = vst.msk [vmem:[#allocation3 + $0xc0] sm:$0xff] %vm2588_vm1, %v2565_v5  ;;  %v9460_v5 = vld [vmem:[%s14573_s24 + $0xe4] ss:$8 sps:$4 sm:$0xff]  }
 0x353   : > { %v2646_v36 = vpop.permute.xlu1 %2645  ;;  %v2711_v13 = vpop.permute.xlu0 %2710  ;;  %v2919_v38 = vld [vmem:[#allocation3 + $0xb0] sm:$0xff] }
 0x354   : > { %3377 = vmatmul.mubr.bf16.gmra.mrb[32].mxu1 %v3137_v7  ;;  %2682 = vst.msk [vmem:[#allocation3 + $0xc0] sm:$0xff] %vm2669_vm3, %v2646_v36  ;;  %v3143_v30 = vmul.bf16 %v8626_v37, %v2919_v38  ;;  %v2958_v36 = vld [vmem:[%s14573_s24 + $0xe8] sm:$0xff] }
 0x355   : > { %8655 = vmatprep.mubr.msk.bf16.mxu1 %vm2249_vm13, %v3140_v44  ;;  %2747 = vst.msk [vmem:[#allocation3 + $0xc0] sm:$0xff] %vm2734_vm4, %v2711_v13  ;;  %v2957_v44 = vld [vmem:[%s14573_s24 + $0xe0] sm:$0xff]  ;;  %v3150_v13 = vmul.bf16 %v9460_v5, %v2926_v9 }
 0x356   : > { %v8632_v59 = vcombine.low %v2957_v44, %v2958_v36 }
 0x357   : > { %v2776_v21 = vpop.permute.xlu1 %2775  ;;  %v2841_v20 = vpop.permute.xlu0 %2840 }
 0x358   : > { %2812 = vst.msk [vmem:[#allocation3 + $0xc0] sm:$0xff] %vm2799_vm5, %v2776_v21 }
 0x359   : > { %2877 = vst.msk [vmem:[#allocation3 + $0xc0] sm:$0xff] %vm2864_vm6, %v2841_v20  ;;  %v9462_v20 = vld [vmem:[%s14573_s24 + $0xf4] ss:$8 sps:$4 sm:$0xff]  }
 0x35b   : > { %v2325_v46 = vpop.permute.xlu1 %2324  ;;  %v2486_v47 = vpop.permute.xlu0 %2485 }
 0x35c   : > { %3385 = vmatmul.mubr.bf16.gmra.mrb[36].mxu1 %v3139_v24  ;;  %2360 = vst.msk [vmem:[#allocation3 + $0xd0] sm:$0xff] %vm2346_vm14, %v2325_v46 }
 0x35d   : > { %8656 = vmatprep.mubr.msk.bf16.mxu1 %vm2249_vm13, %v3142_v14  ;;  %2521 = vst.msk [vmem:[#allocation3 + $0xd0] sm:$0xff] %vm2507_vm15, %v2486_v47  ;;  %v3152_v14 = vmul.bf16 %v9462_v20, %v2928_v29  ;;  %v9464_v47 = vld [vmem:[%s14573_s24 + $0xf0] ss:$8 sps:$4 sm:$0xff]  }
 0x35f   : > { %v2567_v57 = vpop.permute.xlu1 %2566  ;;  %v2648_v3 = vpop.permute.xlu0 %2647 }
 0x360   : > { %2602 = vst.msk [vmem:[#allocation3 + $0xd0] sm:$0xff] %vm2588_vm1, %v2567_v57  ;;  %v2921_v62 = vld [vmem:[#allocation3 + $0xc0] sm:$0xff] }
 0x361   : > { %2683 = vst.msk [vmem:[#allocation3 + $0xd0] sm:$0xff] %vm2669_vm3, %v2648_v3  ;;  %v3145_v10 = vmul.bf16 %v8628_v32, %v2921_v62 }
 0x363   : > { %v2713_v33 = vpop.permute.xlu1 %2712  ;;  %v2778_v48 = vpop.permute.xlu0 %2777 }
 0x364   : > { %3393 = vmatmul.mubr.bf16.gmra.mrb[40].mxu1 %v3141_v40  ;;  %2748 = vst.msk [vmem:[#allocation3 + $0xd0] sm:$0xff] %vm2734_vm4, %v2713_v33 }
 0x365   : > { %8657 = vmatprep.mubr.msk.bf16.mxu1 %vm2249_vm13, %v3144_v60  ;;  %2813 = vst.msk [vmem:[#allocation3 + $0xd0] sm:$0xff] %vm2799_vm5, %v2778_v48 }
 0x367   : > { %v2843_v53 = vpop.permute.xlu1 %2842  ;;  %v2327_v16 = vpop.permute.xlu0 %2326 }
 0x368   : > { %2878 = vst.msk [vmem:[#allocation3 + $0xd0] sm:$0xff] %vm2864_vm6, %v2843_v53 }
 0x369   : > { %2361 = vst.msk [vmem:[#allocation3 + $0xe0] sm:$0xff] %vm2346_vm14, %v2327_v16 }
 0x36b   : > { %v2488_v61 = vpop.permute.xlu1 %2487  ;;  %v2569_v34 = vpop.permute.xlu0 %2568 }
 0x36c   : > { %3401 = vmatmul.mubr.bf16.gmra.mrb[44].mxu1 %v3143_v30  ;;  %2522 = vst.msk [vmem:[#allocation3 + $0xe0] sm:$0xff] %vm2507_vm15, %v2488_v61 }
 0x36d   : > { %8658 = vmatprep.mubr.msk.bf16.mxu1 %vm2249_vm13, %v3146_v54  ;;  %2603 = vst.msk [vmem:[#allocation3 + $0xe0] sm:$0xff] %vm2588_vm1, %v2569_v34 }
 0x36f   : > { %v2650_v2 = vpop.permute.xlu1 %2649  ;;  %v2715_v15 = vpop.permute.xlu0 %2714  ;;  %v2923_v11 = vld [vmem:[#allocation3 + $0xd0] sm:$0xff] }
 0x370   : > { %2684 = vst.msk [vmem:[#allocation3 + $0xe0] sm:$0xff] %vm2669_vm3, %v2650_v2  ;;  %v3147_v51 = vmul.bf16 %v8630_v18, %v2923_v11 }
 0x371   : > { %2749 = vst.msk [vmem:[#allocation3 + $0xe0] sm:$0xff] %vm2734_vm4, %v2715_v15 }
 0x373   : > { %v2780_v17 = vpop.permute.xlu1 %2779  ;;  %v2845_v23 = vpop.permute.xlu0 %2844 }
 0x374   : > { %3409 = vmatmul.mubr.bf16.gmra.mrb[48].mxu1 %v3145_v10  ;;  %2814 = vst.msk [vmem:[#allocation3 + $0xe0] sm:$0xff] %vm2799_vm5, %v2780_v17 }
 0x375   : > { %8659 = vmatprep.mubr.msk.bf16.mxu1 %vm2249_vm13, %v3148_v26  ;;  %2879 = vst.msk [vmem:[#allocation3 + $0xe0] sm:$0xff] %vm2864_vm6, %v2845_v23 }
 0x377   : > { %v2329_v58 = vpop.permute.xlu1 %2328  ;;  %v2490_v7 = vpop.permute.xlu0 %2489 }
 0x378   : > { %2362 = vst.msk [vmem:[#allocation3 + $0xf0] sm:$0xff] %vm2346_vm14, %v2329_v58 }
 0x379   : > { %2523 = vst.msk [vmem:[#allocation3 + $0xf0] sm:$0xff] %vm2507_vm15, %v2490_v7 }
 0x37b   : > { %v2571_v6 = vpop.permute.xlu1 %2570  ;;  %v2652_v0 = vpop.permute.xlu0 %2651 }
 0x37c   : > { %3417 = vmatmul.mubr.bf16.gmra.mrb[52].mxu1 %v3147_v51  ;;  %2604 = vst.msk [vmem:[#allocation3 + $0xf0] sm:$0xff] %vm2588_vm1, %v2571_v6  ;;  %v2925_v21 = vld [vmem:[#allocation3 + $0xe0] sm:$0xff] }
 0x37d   : > { %8660 = vmatprep.mubr.msk.bf16.mxu1 %vm2249_vm13, %v3150_v13  ;;  %2685 = vst.msk [vmem:[#allocation3 + $0xf0] sm:$0xff] %vm2669_vm3, %v2652_v0  ;;  %v3149_v39 = vmul.bf16 %v8632_v59, %v2925_v21 }
 0x37f   : > { %v2717_v55 = vpop.permute.xlu1 %2716  ;;  %v2782_v24 = vpop.permute.xlu0 %2781 }
 0x380   : > { %2750 = vst.msk [vmem:[#allocation3 + $0xf0] sm:$0xff] %vm2734_vm4, %v2717_v55 }
 0x381   : > { %2815 = vst.msk [vmem:[#allocation3 + $0xf0] sm:$0xff] %vm2799_vm5, %v2782_v24 }
 0x383   : > { %v2847_v46 = vpop.permute.xlu1 %2846 }
 0x384   : > { %3425 = vmatmul.mubr.bf16.gmra.mrb[56].mxu1 %v3149_v39  ;;  %2880 = vst.msk [vmem:[#allocation3 + $0xf0] sm:$0xff] %vm2864_vm6, %v2847_v46 }
 0x385   : > { %8661 = vmatprep.mubr.msk.bf16.mxu1 %vm2249_vm13, %v3152_v14 }
 0x38b   : > { %v2927_v35 = vld [vmem:[#allocation3 + $0xf0] sm:$0xff] }
 0x38c   : > { %v3151_v19 = vmul.bf16 %v9464_v47, %v2927_v35 }
 0x38e   : > { %3433 = vmatmul.mubr.bf16.gmra.mrb[60].mxu1 %v3151_v19 }
 0x3e7   : > { %v3314_v57 = vpop.f32.mrb[0].mxu1 }
 0x3e8   : > { %v3315_v3 = vadd.f32 %v11784_v45, %v3314_v57  ;;  %v3316_v8 = vpop.f32.mrb[1].mxu1 }
 0x3e9   : > { %v3317_v40 = vpop.f32.mrb[2].mxu1 }
 0x3ea   : > { %v11787_v28 = vmax.f32 %v3315_v3, 0.0  ;;  %v3318_v31 = vadd.f32 %v11784_v45, %v3317_v40  ;;  %v3319_v60 = vpop.f32.mrb[3].mxu1 }
 0x3ec   : > { %v3442_v33 = vmax.f32 %v3318_v31, 0.0  ;;  %v3521_v48 = vrot.slane %v11787_v28, 7  ;;  %v3713_v63 = vrot.slane %v11787_v28, 1 }
 0x3ee   : > { %v11792_v37 = vpack.c.bf16 %v3442_v33, %v11787_v28  ;;  %v3522_v38 = vrot.slane %v3442_v33, 7  ;;  %v3714_v61 = vrot.slane %v3442_v33, 1  ;;  %v9467_v33 = vld [vmem:[%s14573_s24 + $0x4] ss:$8 sps:$4 sm:$0xff]  }
 0x3ef   : > { %v3322_v43 = vpop.f32.mrb[4].mxu1  ;;  %v9476_v28 = vld [vmem:[%s14448_s13 + $0x40] sm:$0xff]  }
 0x3f0   : > { %v11798_v53 = vsel %vm861_vm2, %v3521_v48, %v3522_v38  ;;  %v3323_v16 = vadd.f32 %v11784_v45, %v3322_v43  ;;  %3969 = vrot.lane.b32.xlu1 %v11792_v37, %s14565_s26  ;;  %v3324_v42 = vpop.f32.mrb[5].mxu1  ;;  %v3775_v26 = vsel %vm1056_vm0, %v3713_v63, %v3714_v61 }
 0x3f1   : > { %v3325_v30 = vpop.f32.mrb[6].mxu1 }
 0x3f2   : > { %v3443_v41 = vmax.f32 %v3323_v16, 0.0  ;;  %v3326_v22 = vadd.f32 %v11784_v45, %v3325_v30  ;;  %v3327_v54 = vpop.f32.mrb[7].mxu1 }
 0x3f4   : > { %v3523_v34 = vrot.slane %v3443_v41, 7  ;;  %v3715_v32 = vrot.slane %v3443_v41, 1  ;;  %v3444_v62 = vmax.f32 %v3326_v22, 0.0  ;;  %3651 = vrot.lane.b32.xlu1 %v11792_v37, %s14559_s1 }
 0x3f6   : > { %v3474_v2 = vpack.c.bf16 %v3444_v62, %v3443_v41  ;;  %v3524_v15 = vrot.slane %v3444_v62, 7  ;;  %v3716_v27 = vrot.slane %v3444_v62, 1  ;;  %v3582_v10 = vsel %vm861_vm2, %v3522_v38, %v3523_v34 }
 0x3f7   : > { %v3330_v50 = vpop.f32.mrb[8].mxu1  ;;  %v3774_v25 = vsel %vm1056_vm0, %v3714_v61, %v3715_v32 }
 0x3f8   : > { %v3773_v17 = vsel %vm1056_vm0, %v3715_v32, %v3716_v27  ;;  %v3331_v23 = vadd.f32 %v11784_v45, %v3330_v50  ;;  %v3332_v18 = vpop.f32.mrb[9].mxu1  ;;  %4161 = vrot.lane.b32.xlu0 %v3474_v2, %s9757_s3  ;;  %v3581_v11 = vsel %vm861_vm2, %v3523_v34, %v3524_v15  ;;  %v3778_v5 = vpack.c.bf16 %v3774_v25, %v3775_v26 }
 0x3f9   : > { %v3333_v58 = vpop.f32.mrb[10].mxu1  ;;  %v3587_v7 = vpack.c.bf16 %v3581_v11, %v3582_v10 }
 0x3fa   : > { %v3445_v9 = vmax.f32 %v3331_v23, 0.0  ;;  %v3334_v51 = vadd.f32 %v11784_v45, %v3333_v58  ;;  %v3335_v44 = vpop.f32.mrb[11].mxu1  ;;  %4240 = vst.msk [vmem:[#allocation3 + $0xf8] sm:$0xff] %vm2249_vm13, %v3778_v5 }
 0x3fb   : > { %4097 = vrot.lane.b32.xlu1 %v3587_v7, %s14529_s4  ;;  %3603 = vst.msk [vmem:[#allocation3 + $0x20] sm:$0xff] %vm2249_vm13, %v3587_v7 }
 0x3fc   : > { %v3525_v36 = vrot.slane %v3445_v9, 7  ;;  %v3717_v13 = vrot.slane %v3445_v9, 1  ;;  %v3446_v6 = vmax.f32 %v3334_v51, 0.0  ;;  %3971 = vrot.lane.b32.xlu0 %v3474_v2, %s14565_s26 }
 0x3fe   : > { %v3772_v0 = vsel %vm1056_vm0, %v3716_v27, %v3717_v13  ;;  %v3475_v59 = vpack.c.bf16 %v3446_v6, %v3445_v9  ;;  %v3526_v21 = vrot.slane %v3446_v6, 7  ;;  %v3718_v20 = vrot.slane %v3446_v6, 1 }
 0x3ff   : > { %v11828_v55 = vpack.c.bf16 %v3772_v0, %v3773_v17  ;;  %v3338_v24 = vpop.f32.mrb[12].mxu1  ;;  %3891 = vrot.lane.b32.xlu1 %v3587_v7, %s14563_s27  ;;  %v3580_v29 = vsel %vm861_vm2, %v3524_v15, %v3525_v36 }
 0x400   : > { %v3339_v39 = vadd.f32 %v11784_v45, %v3338_v24  ;;  %v3340_v14 = vpop.f32.mrb[13].mxu1  ;;  %3653 = vrot.lane.b32.xlu0 %v3474_v2, %s14559_s1  ;;  %v3579_v46 = vsel %vm861_vm2, %v3525_v36, %v3526_v21  ;;  %v3771_v47 = vsel %vm1056_vm0, %v3717_v13, %v3718_v20 }
 0x401   : > { %4225 = vst.msk [vmem:[#allocation3 + $0x8] sm:$0xff] %vm2249_vm13, %v11828_v55  ;;  %v3341_v35 = vpop.f32.mrb[14].mxu1  ;;  %v3588_v19 = vpack.c.bf16 %v3579_v46, %v3580_v29 }
 0x402   : > { %v3447_v57 = vmax.f32 %v3339_v39, 0.0  ;;  %v3342_v3 = vadd.f32 %v11784_v45, %v3341_v35  ;;  %v3343_v8 = vpop.f32.mrb[15].mxu1 }
 0x403   : > { %4163 = vrot.lane.b32.xlu1 %v3475_v59, %s9757_s3  ;;  %3604 = vst.msk [vmem:[#allocation3 + $0x30] sm:$0xff] %vm2249_vm13, %v3588_v19 }
 0x404   : > { %v3527_v40 = vrot.slane %v3447_v57, 7  ;;  %v3719_v31 = vrot.slane %v3447_v57, 1  ;;  %v3448_v60 = vmax.f32 %v3342_v3, 0.0  ;;  %4033 = vrot.lane.b32.xlu0 %v3778_v5, %s9759_s6 }
 0x406   : > { %v11848_v38 = vpack.c.bf16 %v3448_v60, %v3447_v57  ;;  %v3528_v43 = vrot.slane %v3448_v60, 7  ;;  %v3720_v16 = vrot.slane %v3448_v60, 1  ;;  %v3578_v42 = vsel %vm861_vm2, %v3526_v21, %v3527_v40 }
 0x407   : > { %v3346_v30 = vpop.f32.mrb[16].mxu1  ;;  %3973 = vrot.lane.b32.xlu1 %v3475_v59, %s14565_s26  ;;  %v3770_v41 = vsel %vm1056_vm0, %v3718_v20, %v3719_v31 }
 0x408   : > { %v3347_v22 = vadd.f32 %v11784_v45, %v3346_v30  ;;  %v3348_v54 = vpop.f32.mrb[17].mxu1  ;;  %3811 = vrot.lane.b32.xlu0 %v3778_v5, %s14561_s9  ;;  %v4242_v61 = vld [vmem:[#allocation3 + $0x8] sm:$0xff]  ;;  %v3577_v34 = vsel %vm861_vm2, %v3527_v40, %v3528_v43  ;;  %v11859_v32 = vpack.c.bf16 %v3770_v41, %v3771_v47  ;;  %v3769_v62 = vsel %vm1056_vm0, %v3719_v31, %v3720_v16 }
 0x409   : > { %v3349_v2 = vpop.f32.mrb[18].mxu1  ;;  %v4466_v15 = vmul.bf16 %v9467_v33, %v4242_v61  ;;  %v3589_v27 = vpack.c.bf16 %v3577_v34, %v3578_v42 }
 0x40a   : > { %v3449_v10 = vmax.f32 %v3347_v22, 0.0  ;;  %v3350_v50 = vadd.f32 %v11784_v45, %v3349_v2  ;;  %v3351_v25 = vpop.f32.mrb[19].mxu1  ;;  %4226 = vst.msk [vmem:[#allocation3 + $0x18] sm:$0xff] %vm2249_vm13, %v11859_v32 }
 0x40b   : > { %8704 = vmatprep.mubr.msk.bf16.mxu0 %vm2249_vm13, %v4466_v15  ;;  %3655 = vrot.lane.b32.xlu1 %v3475_v59, %s14559_s1  ;;  %3605 = vst.msk [vmem:[#allocation3 + $0x40] sm:$0xff] %vm2249_vm13, %v3589_v27 }
 0x40c   : > { %v3529_v26 = vrot.slane %v3449_v10, 7  ;;  %v3721_v17 = vrot.slane %v3449_v10, 1  ;;  %v3450_v23 = vmax.f32 %v3350_v50, 0.0  ;;  %4099 = vrot.lane.b32.xlu0 %v3588_v19, %s14529_s4 }
 0x40e   : > { %v11870_v18 = vpack.c.bf16 %v3450_v23, %v3449_v10  ;;  %v3530_v11 = vrot.slane %v3450_v23, 7  ;;  %v3722_v5 = vrot.slane %v3450_v23, 1  ;;  %v3576_v58 = vsel %vm861_vm2, %v3528_v43, %v3529_v26 }
 0x40f   : > { %v3354_v7 = vpop.f32.mrb[20].mxu1  ;;  %4035 = vrot.lane.b32.xlu1 %v11828_v55, %s9759_s6  ;;  %v3768_v9 = vsel %vm1056_vm0, %v3720_v16, %v3721_v17 }
 0x410   : > { %v3355_v51 = vadd.f32 %v11784_v45, %v3354_v7  ;;  %v3356_v44 = vpop.f32.mrb[21].mxu1  ;;  %3893 = vrot.lane.b32.xlu0 %v3588_v19, %s14563_s27  ;;  %v3575_v36 = vsel %vm861_vm2, %v3529_v26, %v3530_v11  ;;  %v11882_v13 = vpack.c.bf16 %v3768_v9, %v3769_v62  ;;  %v3767_v6 = vsel %vm1056_vm0, %v3721_v17, %v3722_v5 }
 0x411   : > { %v3357_v0 = vpop.f32.mrb[22].mxu1  ;;  %v11886_v59 = vpack.c.bf16 %v3575_v36, %v3576_v58 }
 0x412   : > { %v3451_v21 = vmax.f32 %v3355_v51, 0.0  ;;  %v3358_v20 = vadd.f32 %v11784_v45, %v3357_v0  ;;  %v3359_v24 = vpop.f32.mrb[23].mxu1  ;;  %4227 = vst.msk [vmem:[#allocation3 + $0x28] sm:$0xff] %vm2249_vm13, %v11882_v13 }
 0x413   : > { %3813 = vrot.lane.b32.xlu1 %v11828_v55, %s14561_s9  ;;  %3606 = vst.msk [vmem:[#allocation3 + $0x50] sm:$0xff] %vm2249_vm13, %v11886_v59 }
 0x414   : > { %v3531_v29 = vrot.slane %v3451_v21, 7  ;;  %v3723_v39 = vrot.slane %v3451_v21, 1  ;;  %v3452_v14 = vmax.f32 %v3358_v20, 0.0  ;;  %4165 = vrot.lane.b32.xlu0 %v11848_v38, %s9757_s3 }
 0x416   : > { %v11897_v46 = vpack.c.bf16 %v3452_v14, %v3451_v21  ;;  %v3532_v47 = vrot.slane %v3452_v14, 7  ;;  %v3724_v35 = vrot.slane %v3452_v14, 1  ;;  %v3574_v19 = vsel %vm861_vm2, %v3530_v11, %v3531_v29 }
 0x417   : > { %v3362_v57 = vpop.f32.mrb[24].mxu1  ;;  %4101 = vrot.lane.b32.xlu1 %v3589_v27, %s14529_s4  ;;  %v3766_v55 = vsel %vm1056_vm0, %v3722_v5, %v3723_v39 }
 0x418   : > { %v3363_v3 = vadd.f32 %v11784_v45, %v3362_v57  ;;  %v3364_v8 = vpop.f32.mrb[25].mxu1  ;;  %3975 = vrot.lane.b32.xlu0 %v11848_v38, %s14565_s26  ;;  %v3573_v40 = vsel %vm861_vm2, %v3531_v29, %v3532_v47  ;;  %v11909_v31 = vpack.c.bf16 %v3766_v55, %v3767_v6  ;;  %v3765_v60 = vsel %vm1056_vm0, %v3723_v39, %v3724_v35 }
 0x419   : > { %v3365_v33 = vpop.f32.mrb[26].mxu1  ;;  %v11913_v43 = vpack.c.bf16 %v3573_v40, %v3574_v19 }
 0x41a   : > { %v3453_v16 = vmax.f32 %v3363_v3, 0.0  ;;  %v3366_v42 = vadd.f32 %v11784_v45, %v3365_v33  ;;  %v3367_v30 = vpop.f32.mrb[27].mxu1  ;;  %4228 = vst.msk [vmem:[#allocation3 + $0x38] sm:$0xff] %vm2249_vm13, %v11909_v31 }
 0x41b   : > { %3895 = vrot.lane.b32.xlu1 %v3589_v27, %s14563_s27  ;;  %3607 = vst.msk [vmem:[#allocation3 + $0x60] sm:$0xff] %vm2249_vm13, %v11913_v43 }
 0x41c   : > { %v3533_v41 = vrot.slane %v3453_v16, 7  ;;  %v3725_v22 = vrot.slane %v3453_v16, 1  ;;  %v3454_v54 = vmax.f32 %v3366_v42, 0.0  ;;  %3657 = vrot.lane.b32.xlu0 %v11848_v38, %s14559_s1 }
 0x41e   : > { %v11923_v61 = vpack.c.bf16 %v3454_v54, %v3453_v16  ;;  %v3534_v34 = vrot.slane %v3454_v54, 7  ;;  %v3726_v62 = vrot.slane %v3454_v54, 1  ;;  %v3764_v2 = vsel %vm1056_vm0, %v3724_v35, %v3725_v22 }
 0x41f   : > { %v3370_v15 = vpop.f32.mrb[28].mxu1  ;;  %4167 = vrot.lane.b32.xlu1 %v11870_v18, %s9757_s3  ;;  %v11929_v27 = vpack.c.bf16 %v3764_v2, %v3765_v60  ;;  %v3572_v10 = vsel %vm861_vm2, %v3532_v47, %v3533_v41 }
 0x420   : > { %v3371_v50 = vadd.f32 %v11784_v45, %v3370_v15  ;;  %v3372_v25 = vpop.f32.mrb[29].mxu1  ;;  %4037 = vrot.lane.b32.xlu0 %v11859_v32, %s9759_s6  ;;  %v3571_v38 = vsel %vm861_vm2, %v3533_v41, %v3534_v34  ;;  %v3763_v26 = vsel %vm1056_vm0, %v3725_v22, %v3726_v62 }
 0x421   : > { %v3373_v17 = vpop.f32.mrb[30].mxu1  ;;  %4229 = vst.msk [vmem:[#allocation3 + $0x48] sm:$0xff] %vm2249_vm13, %v11929_v27  ;;  %v11942_v23 = vpack.c.bf16 %v3571_v38, %v3572_v10 }
 0x422   : > { %v3455_v11 = vmax.f32 %v3371_v50, 0.0  ;;  %v3374_v5 = vadd.f32 %v11784_v45, %v3373_v17  ;;  %v3375_v58 = vpop.f32.mrb[31].mxu1 }
 0x423   : > { %3977 = vrot.lane.b32.xlu1 %v11870_v18, %s14565_s26  ;;  %3608 = vst.msk [vmem:[#allocation3 + $0x70] sm:$0xff] %vm2249_vm13, %v11942_v23 }
 0x424   : > { %v3535_v7 = vrot.slane %v3455_v11, 7  ;;  %v3727_v9 = vrot.slane %v3455_v11, 1  ;;  %v3456_v51 = vmax.f32 %v3374_v5, 0.0  ;;  %3815 = vrot.lane.b32.xlu0 %v11859_v32, %s14561_s9 }
 0x426   : > { %v11951_v44 = vpack.c.bf16 %v3456_v51, %v3455_v11  ;;  %v3536_v36 = vrot.slane %v3456_v51, 7  ;;  %v3728_v6 = vrot.slane %v3456_v51, 1  ;;  %v3570_v0 = vsel %vm861_vm2, %v3534_v34, %v3535_v7 }
 0x427   : > { %v3378_v21 = vpop.f32.mrb[32].mxu1  ;;  %3659 = vrot.lane.b32.xlu1 %v11870_v18, %s14559_s1  ;;  %v3762_v20 = vsel %vm1056_vm0, %v3726_v62, %v3727_v9 }
 0x428   : > { %v3379_v24 = vadd.f32 %v11784_v45, %v3378_v21  ;;  %v3380_v29 = vpop.f32.mrb[33].mxu1  ;;  %4103 = vrot.lane.b32.xlu0 %v11886_v59, %s14529_s4  ;;  %v3569_v32 = vsel %vm861_vm2, %v3535_v7, %v3536_v36  ;;  %v11964_v39 = vpack.c.bf16 %v3762_v20, %v3763_v26  ;;  %v3761_v14 = vsel %vm1056_vm0, %v3727_v9, %v3728_v6 }
 0x429   : > { %v3381_v47 = vpop.f32.mrb[34].mxu1  ;;  %v11968_v35 = vpack.c.bf16 %v3569_v32, %v3570_v0 }
 0x42a   : > { %v3457_v18 = vmax.f32 %v3379_v24, 0.0  ;;  %v3382_v19 = vadd.f32 %v11784_v45, %v3381_v47  ;;  %v3383_v57 = vpop.f32.mrb[35].mxu1  ;;  %4230 = vst.msk [vmem:[#allocation3 + $0x58] sm:$0xff] %vm2249_vm13, %v11964_v39 }
 0x42b   : > { %4039 = vrot.lane.b32.xlu1 %v11882_v13, %s9759_s6  ;;  %3609 = vst.msk [vmem:[#allocation3 + $0x80] sm:$0xff] %vm2249_vm13, %v11968_v35 }
 0x42c   : > { %v3537_v55 = vrot.slane %v3457_v18, 7  ;;  %v3729_v3 = vrot.slane %v3457_v18, 1  ;;  %v3458_v8 = vmax.f32 %v3382_v19, 0.0  ;;  %3897 = vrot.lane.b32.xlu0 %v11886_v59, %s14563_s27 }
 0x42e   : > { %v11979_v40 = vpack.c.bf16 %v3458_v8, %v3457_v18  ;;  %v3538_v60 = vrot.slane %v3458_v8, 7  ;;  %v3730_v33 = vrot.slane %v3458_v8, 1  ;;  %v3760_v16 = vsel %vm1056_vm0, %v3728_v6, %v3729_v3 }
 0x42f   : > { %v3386_v42 = vpop.f32.mrb[36].mxu1  ;;  %3817 = vrot.lane.b32.xlu1 %v11882_v13, %s14561_s9  ;;  %v11985_v30 = vpack.c.bf16 %v3760_v16, %v3761_v14  ;;  %v3568_v41 = vsel %vm861_vm2, %v3536_v36, %v3537_v55 }
 0x430   : > { %v3387_v22 = vadd.f32 %v11784_v45, %v3386_v42  ;;  %v3388_v54 = vpop.f32.mrb[37].mxu1  ;;  %4169 = vrot.lane.b32.xlu0 %v11897_v46, %s9757_s3  ;;  %v3567_v59 = vsel %vm861_vm2, %v3537_v55, %v3538_v60  ;;  %v3759_v34 = vsel %vm1056_vm0, %v3729_v3, %v3730_v33 }
 0x431   : > { %v3389_v62 = vpop.f32.mrb[38].mxu1  ;;  %4231 = vst.msk [vmem:[#allocation3 + $0x68] sm:$0xff] %vm2249_vm13, %v11985_v30  ;;  %v11998_v13 = vpack.c.bf16 %v3567_v59, %v3568_v41 }
 0x432   : > { %v3459_v2 = vmax.f32 %v3387_v22, 0.0  ;;  %v3390_v15 = vadd.f32 %v11784_v45, %v3389_v62  ;;  %v3391_v10 = vpop.f32.mrb[39].mxu1 }
 0x433   : > { %4105 = vrot.lane.b32.xlu1 %v11913_v43, %s14529_s4  ;;  %3610 = vst.msk [vmem:[#allocation3 + $0x90] sm:$0xff] %vm2249_vm13, %v11998_v13 }
 0x434   : > { %v3539_v50 = vrot.slane %v3459_v2, 7  ;;  %v3731_v25 = vrot.slane %v3459_v2, 1  ;;  %v3460_v38 = vmax.f32 %v3390_v15, 0.0  ;;  %3979 = vrot.lane.b32.xlu0 %v11897_v46, %s14565_s26 }
 0x436   : > { %v12007_v26 = vpack.c.bf16 %v3460_v38, %v3459_v2  ;;  %v3540_v17 = vrot.slane %v3460_v38, 7  ;;  %v3732_v11 = vrot.slane %v3460_v38, 1  ;;  %v3758_v5 = vsel %vm1056_vm0, %v3730_v33, %v3731_v25 }
 0x437   : > { %v3394_v58 = vpop.f32.mrb[40].mxu1  ;;  %3899 = vrot.lane.b32.xlu1 %v11913_v43, %s14563_s27  ;;  %v12013_v7 = vpack.c.bf16 %v3758_v5, %v3759_v34  ;;  %v3566_v9 = vsel %vm861_vm2, %v3538_v60, %v3539_v50 }
 0x438   : > { %v3395_v51 = vadd.f32 %v11784_v45, %v3394_v58  ;;  %v3396_v36 = vpop.f32.mrb[41].mxu1  ;;  %3661 = vrot.lane.b32.xlu0 %v11897_v46, %s14559_s1  ;;  %v3565_v6 = vsel %vm861_vm2, %v3539_v50, %v3540_v17  ;;  %v3757_v0 = vsel %vm1056_vm0, %v3731_v25, %v3732_v11 }
 0x439   : > { %v3397_v21 = vpop.f32.mrb[42].mxu1  ;;  %4232 = vst.msk [vmem:[#allocation3 + $0x78] sm:$0xff] %vm2249_vm13, %v12013_v7  ;;  %v12026_v43 = vpack.c.bf16 %v3565_v6, %v3566_v9 }
 0x43a   : > { %v3461_v20 = vmax.f32 %v3395_v51, 0.0  ;;  %v3398_v24 = vadd.f32 %v11784_v45, %v3397_v21  ;;  %v3399_v29 = vpop.f32.mrb[43].mxu1 }
 0x43b   : > { %4171 = vrot.lane.b32.xlu1 %v11923_v61, %s9757_s3  ;;  %3611 = vst.msk [vmem:[#allocation3 + $0xa0] sm:$0xff] %vm2249_vm13, %v12026_v43 }
 0x43c   : > { %v3541_v46 = vrot.slane %v3461_v20, 7  ;;  %v3733_v32 = vrot.slane %v3461_v20, 1  ;;  %v3462_v14 = vmax.f32 %v3398_v24, 0.0  ;;  %4041 = vrot.lane.b32.xlu0 %v11909_v31, %s9759_s6 }
 0x43e   : > { %v12035_v47 = vpack.c.bf16 %v3462_v14, %v3461_v20  ;;  %v3542_v18 = vrot.slane %v3462_v14, 7  ;;  %v3734_v19 = vrot.slane %v3462_v14, 1  ;;  %v3756_v57 = vsel %vm1056_vm0, %v3732_v11, %v3733_v32 }
 0x43f   : > { %v3402_v55 = vpop.f32.mrb[44].mxu1  ;;  %3981 = vrot.lane.b32.xlu1 %v11923_v61, %s14565_s26  ;;  %v12041_v3 = vpack.c.bf16 %v3756_v57, %v3757_v0  ;;  %v3564_v8 = vsel %vm861_vm2, %v3540_v17, %v3541_v46 }
 0x440   : > { %v3403_v60 = vadd.f32 %v11784_v45, %v3402_v55  ;;  %v3404_v33 = vpop.f32.mrb[45].mxu1  ;;  %3819 = vrot.lane.b32.xlu0 %v11909_v31, %s14561_s9  ;;  %v3563_v16 = vsel %vm861_vm2, %v3541_v46, %v3542_v18  ;;  %v3755_v42 = vsel %vm1056_vm0, %v3733_v32, %v3734_v19 }
 0x441   : > { %v3405_v41 = vpop.f32.mrb[46].mxu1  ;;  %4233 = vst.msk [vmem:[#allocation3 + $0x88] sm:$0xff] %vm2249_vm13, %v12041_v3  ;;  %v12054_v22 = vpack.c.bf16 %v3563_v16, %v3564_v8  ;;  %v9469_v8 = vld [vmem:[%s14448_s13 + $0x8] sm:$0xff]  }
 0x442   : > { %v3463_v54 = vmax.f32 %v3403_v60, 0.0  ;;  %v3406_v59 = vadd.f32 %v11784_v45, %v3405_v41  ;;  %v3407_v34 = vpop.f32.mrb[47].mxu1 }
 0x443   : > { %4043 = vrot.lane.b32.xlu1 %v11929_v27, %s9759_s6  ;;  %3612 = vst.msk [vmem:[#allocation3 + $0xb0] sm:$0xff] %vm2249_vm13, %v12054_v22 }
 0x444   : > { %v3543_v31 = vrot.slane %v3463_v54, 7  ;;  %v3735_v62 = vrot.slane %v3463_v54, 1  ;;  %v3464_v2 = vmax.f32 %v3406_v59, 0.0  ;;  %4107 = vrot.lane.b32.xlu0 %v11942_v23, %s14529_s4 }
 0x446   : > { %v12063_v15 = vpack.c.bf16 %v3464_v2, %v3463_v54  ;;  %v3544_v10 = vrot.slane %v3464_v2, 7  ;;  %v3736_v50 = vrot.slane %v3464_v2, 1  ;;  %v3754_v25 = vsel %vm1056_vm0, %v3734_v19, %v3735_v62 }
 0x447   : > { %v3410_v38 = vpop.f32.mrb[48].mxu1  ;;  %3821 = vrot.lane.b32.xlu1 %v11929_v27, %s14561_s9  ;;  %v12069_v17 = vpack.c.bf16 %v3754_v25, %v3755_v42  ;;  %v3562_v11 = vsel %vm861_vm2, %v3542_v18, %v3543_v31 }
 0x448   : > { %v3411_v5 = vadd.f32 %v11784_v45, %v3410_v38  ;;  %v3412_v58 = vpop.f32.mrb[49].mxu1  ;;  %3901 = vrot.lane.b32.xlu0 %v11942_v23, %s14563_s27  ;;  %v3561_v9 = vsel %vm861_vm2, %v3543_v31, %v3544_v10  ;;  %v3753_v51 = vsel %vm1056_vm0, %v3735_v62, %v3736_v50  ;;  %v9468_v23 = vld [vmem:[%s14448_s13] sm:$0xff]   ;;  %v9470_v62 = vld [vmem:[%s14448_s13 + $0x10] sm:$0xff]  }
 0x449   : > { %v3413_v36 = vpop.f32.mrb[50].mxu1  ;;  %4234 = vst.msk [vmem:[#allocation3 + $0x98] sm:$0xff] %vm2249_vm13, %v12069_v17  ;;  %v12082_v27 = vpack.c.bf16 %v3561_v9, %v3562_v11  ;;  %4625 = vmatpush1.bf16.msra.mxu0 %v9468_v23 }
 0x44a   : > { %v3465_v6 = vmax.f32 %v3411_v5, 0.0  ;;  %v3414_v0 = vadd.f32 %v11784_v45, %v3413_v36  ;;  %v3415_v21 = vpop.f32.mrb[51].mxu1  ;;  %4626 = vmatprep.subr.bf16.mxu0 %v14598_v4  ;;  %v9471_v36 = vld [vmem:[%s14448_s13 + $0x18] sm:$0xff]  }
 0x44b   : > { %4109 = vrot.lane.b32.xlu1 %v11968_v35, %s14529_s4  ;;  %3613 = vst.msk [vmem:[#allocation3 + $0xc0] sm:$0xff] %vm2249_vm13, %v12082_v27 }
 0x44c   : > { %v3545_v20 = vrot.slane %v3465_v6, 7  ;;  %v3737_v24 = vrot.slane %v3465_v6, 1  ;;  %v3466_v29 = vmax.f32 %v3414_v0, 0.0  ;;  %4173 = vrot.lane.b32.xlu0 %v11951_v44, %s9757_s3 }
 0x44d   : > { %4627 = vmatpush1.bf16.msra.mxu0 %v9469_v8 }
 0x44e   : > { %v12094_v46 = vpack.c.bf16 %v3466_v29, %v3465_v6  ;;  %v3546_v32 = vrot.slane %v3466_v29, 7  ;;  %v3738_v14 = vrot.slane %v3466_v29, 1  ;;  %v3752_v18 = vsel %vm1056_vm0, %v3736_v50, %v3737_v24  ;;  %4628 = vmatprep.subr.bf16.mxu0 %v14598_v4 }
 0x44f   : > { %v3418_v19 = vpop.f32.mrb[52].mxu1  ;;  %v12099_v57 = vpack.c.bf16 %v3752_v18, %v3753_v51  ;;  %v3560_v55 = vsel %vm861_vm2, %v3544_v10, %v3545_v20  ;;  %v9472_v18 = vld [vmem:[%s14448_s13 + $0x20] sm:$0xff]  }
 0x450   : > { %v3419_v60 = vadd.f32 %v11784_v45, %v3418_v19  ;;  %v3420_v33 = vpop.f32.mrb[53].mxu1  ;;  %4045 = vrot.lane.b32.xlu0 %v11964_v39, %s9759_s6  ;;  %v3559_v16 = vsel %vm861_vm2, %v3545_v20, %v3546_v32  ;;  %v3751_v42 = vsel %vm1056_vm0, %v3737_v24, %v3738_v14 }
 0x451   : > { %v3421_v41 = vpop.f32.mrb[54].mxu1  ;;  %4235 = vst.msk [vmem:[#allocation3 + $0xa8] sm:$0xff] %vm2249_vm13, %v12099_v57  ;;  %v12115_v54 = vpack.c.bf16 %v3559_v16, %v3560_v55  ;;  %4629 = vmatpush1.bf16.msra.mxu0 %v9470_v62 }
 0x452   : > { %v3467_v59 = vmax.f32 %v3419_v60, 0.0  ;;  %v3422_v34 = vadd.f32 %v11784_v45, %v3421_v41  ;;  %v3423_v31 = vpop.f32.mrb[55].mxu1  ;;  %4630 = vmatprep.subr.bf16.mxu0 %v14598_v4 }
 0x453   : > { %3614 = vst.msk [vmem:[#allocation3 + $0xd0] sm:$0xff] %vm2249_vm13, %v12115_v54 }
 0x454   : > { %v3547_v2 = vrot.slane %v3467_v59, 7  ;;  %v3739_v10 = vrot.slane %v3467_v59, 1  ;;  %v3468_v50 = vmax.f32 %v3422_v34, 0.0 }
 0x455   : > { %4631 = vmatpush1.bf16.msra.mxu0 %v9471_v36 }
 0x456   : > { %v12124_v25 = vpack.c.bf16 %v3468_v50, %v3467_v59  ;;  %v3548_v38 = vrot.slane %v3468_v50, 7  ;;  %v3740_v11 = vrot.slane %v3468_v50, 1  ;;  %v3750_v5 = vsel %vm1056_vm0, %v3738_v14, %v3739_v10  ;;  %4632 = vmatprep.subr.bf16.mxu0 %v14598_v4 }
 0x457   : > { %v3426_v58 = vpop.f32.mrb[56].mxu1  ;;  %v12129_v9 = vpack.c.bf16 %v3750_v5, %v3751_v42  ;;  %v3558_v51 = vsel %vm861_vm2, %v3546_v32, %v3547_v2 }
 0x458   : > { %v3427_v6 = vadd.f32 %v11784_v45, %v3426_v58  ;;  %v3428_v0 = vpop.f32.mrb[57].mxu1  ;;  %v3557_v21 = vsel %vm861_vm2, %v3547_v2, %v3548_v38  ;;  %v3749_v23 = vsel %vm1056_vm0, %v3739_v10, %v3740_v11  ;;  %v9473_v2 = vld [vmem:[%s14448_s13 + $0x28] sm:$0xff]  }
 0x459   : > { %v3429_v20 = vpop.f32.mrb[58].mxu1  ;;  %4236 = vst.msk [vmem:[#allocation3 + $0xb8] sm:$0xff] %vm2249_vm13, %v12129_v9  ;;  %v12143_v24 = vpack.c.bf16 %v3557_v21, %v3558_v51  ;;  %4633 = vmatpush1.bf16.msra.mxu0 %v9472_v18 }
 0x45a   : > { %v3469_v29 = vmax.f32 %v3427_v6, 0.0  ;;  %v3430_v32 = vadd.f32 %v11784_v45, %v3429_v20  ;;  %v3431_v14 = vpop.f32.mrb[59].mxu1  ;;  %4634 = vmatprep.subr.bf16.mxu0 %v14598_v4  ;;  %v9474_v6 = vld [vmem:[%s14448_s13 + $0x30] sm:$0xff]  }
 0x45b   : > { %3615 = vst.msk [vmem:[#allocation3 + $0xe0] sm:$0xff] %vm2249_vm13, %v12143_v24 }
 0x45c   : > { %v3549_v19 = vrot.slane %v3469_v29, 7  ;;  %v3741_v55 = vrot.slane %v3469_v29, 1  ;;  %v3470_v8 = vmax.f32 %v3430_v32, 0.0 }
 0x45d   : > { %4635 = vmatpush1.bf16.msra.mxu0 %v9473_v2 }
 0x45e   : > { %v12152_v60 = vpack.c.bf16 %v3470_v8, %v3469_v29  ;;  %v3550_v33 = vrot.slane %v3470_v8, 7  ;;  %v3742_v16 = vrot.slane %v3470_v8, 1  ;;  %v3748_v42 = vsel %vm1056_vm0, %v3740_v11, %v3741_v55  ;;  %4636 = vmatprep.subr.bf16.mxu0 %v14598_v4 }
 0x45f   : > { %v12157_v41 = vpack.c.bf16 %v3748_v42, %v3749_v23  ;;  %v3556_v59 = vsel %vm861_vm2, %v3548_v38, %v3549_v19 }
 0x460   : > { %v3555_v34 = vsel %vm861_vm2, %v3549_v19, %v3550_v33  ;;  %v3747_v31 = vsel %vm1056_vm0, %v3741_v55, %v3742_v16 }
 0x461   : > { %4237 = vst.msk [vmem:[#allocation3 + $0xc8] sm:$0xff] %vm2249_vm13, %v12157_v41  ;;  %v12167_v62 = vpack.c.bf16 %v3555_v34, %v3556_v59  ;;  %v3434_v10 = vpop.f32.mrb[60].mxu1  ;;  %4637 = vmatpush1.bf16.msra.mxu0 %v9474_v6 }
 0x462   : > { %v12172_v50 = vpop.permute.xlu1 %3969  ;;  %v3435_v38 = vadd.f32 %v11784_v45, %v3434_v10  ;;  %v3436_v11 = vpop.f32.mrb[61].mxu1  ;;  %4638 = vmatprep.subr.bf16.mxu0 %v14598_v4 }
 0x463   : > { %3616 = vst.msk [vmem:[#allocation3 + $0xf0] sm:$0xff] %vm2249_vm13, %v12167_v62  ;;  %v3437_v5 = vpop.f32.mrb[62].mxu1 }
 0x464   : > { %v3471_v58 = vmax.f32 %v3435_v38, 0.0  ;;  %v3438_v51 = vadd.f32 %v11784_v45, %v3437_v5  ;;  %v3439_v36 = vpop.f32.mrb[63].mxu1  ;;  %v9475_v45 = vld [vmem:[%s14448_s13 + $0x38] sm:$0xff]  }
 0x465   : > { %4639 = vmatpush1.bf16.msra.mxu0 %v9475_v45 }
 0x466   : > { %v3551_v0 = vrot.slane %v3471_v58, 7  ;;  %v3743_v21 = vrot.slane %v3471_v58, 1  ;;  %v3472_v23 = vmax.f32 %v3438_v51, 0.0  ;;  %v3652_v18 = vpop.permute.xlu1 %3651  ;;  %4640 = vmatprep.subr.bf16.mxu0 %v14598_v4 }
 0x468   : > { %v3554_v20 = vsel %vm861_vm2, %v3550_v33, %v3551_v0  ;;  %v12185_v29 = vpack.c.bf16 %v3472_v23, %v3471_v58  ;;  %v3552_v32 = vrot.slane %v3472_v23, 7  ;;  %v3744_v14 = vrot.slane %v3472_v23, 1 }
 0x469   : > { %v3746_v55 = vsel %vm1056_vm0, %v3742_v16, %v3743_v21  ;;  %4641 = vmatpush1.bf16.msra.mxu0 %v9476_v28 }
 0x46a   : > { %v12190_v19 = vpop.permute.xlu0 %4161  ;;  %v3553_v8 = vsel %vm861_vm2, %v3551_v0, %v3552_v32  ;;  %v3584_v33 = vsel %vm861_vm2, %v3552_v32, %v3521_v48  ;;  %3649 = vrot.lane.b32.xlu0 %v12185_v29, %s14559_s1  ;;  %v3745_v42 = vsel %vm1056_vm0, %v3743_v21, %v3744_v14  ;;  %v3776_v59 = vsel %vm1056_vm0, %v3744_v14, %v3713_v63 }
 0x46b   : > { %v12208_v16 = vpack.c.bf16 %v3553_v8, %v3554_v20  ;;  %v12211_v34 = vpack.c.bf16 %v11798_v53, %v3584_v33  ;;  %v12213_v2 = vpack.c.bf16 %v3776_v59, %v3745_v42  ;;  %v12215_v10 = vpack.c.bf16 %v3746_v55, %v3747_v31 }
 0x46d   : > { %v12217_v48 = vpop.permute.xlu1 %4097  ;;  %3601 = vst.msk [vmem:[#allocation3] sm:$0xff] %vm2249_vm13, %v12208_v16  ;;  %3602 = vst.msk [vmem:[#allocation3 + $0x10] sm:$0xff] %vm2249_vm13, %v12211_v34  ;;  %3809 = vrot.lane.b32.xlu1 %v12213_v2, %s14561_s9 }
 0x46e   : > { %4239 = vst.msk [vmem:[#allocation3 + $0xe8] sm:$0xff] %vm2249_vm13, %v12213_v2  ;;  %v3972_v53 = vpop.permute.xlu0 %3971  ;;  %4238 = vst.msk [vmem:[#allocation3 + $0xd8] sm:$0xff] %vm2249_vm13, %v12215_v10  ;;  %3889 = vrot.lane.b32.xlu0 %v12211_v34, %s14563_s27 }
 0x46f   : > { %3698 = vst.msk [vmem:[#allocation3 + $0x10] sm:$0xff] %vm2346_vm14, %v3652_v18 }
 0x471   : > { %v3892_v63 = vpop.permute.xlu1 %3891  ;;  %3663 = vrot.lane.b32.xlu1 %v11923_v61, %s14559_s1 }
 0x472   : > { %v3654_v31 = vpop.permute.xlu0 %3653  ;;  %3823 = vrot.lane.b32.xlu0 %v11964_v39, %s14561_s9 }
 0x473   : > { %3699 = vst.msk [vmem:[#allocation3 + $0x20] sm:$0xff] %vm2346_vm14, %v3654_v31 }
 0x475   : > { %v4164_v38 = vpop.permute.xlu1 %4163  ;;  %3903 = vrot.lane.b32.xlu1 %v11968_v35, %s14563_s27 }
 0x476   : > { %v12243_v11 = vpop.permute.xlu0 %4033  ;;  %3983 = vrot.lane.b32.xlu0 %v11951_v44, %s14565_s26 }
 0x479   : > { %v3974_v5 = vpop.permute.xlu1 %3973  ;;  %4047 = vrot.lane.b32.xlu1 %v11985_v30, %s9759_s6 }
 0x47a   : > { %v3812_v61 = vpop.permute.xlu0 %3811  ;;  %4111 = vrot.lane.b32.xlu0 %v11998_v13, %s14529_s4 }
 0x47b   : > { %3858 = vst.msk [vmem:[#allocation3 + $0x10] sm:$0xff] %vm2507_vm15, %v3812_v61 }
 0x47c   : > { %3938 = vst.msk [vmem:[#allocation3 + $0x10] sm:$0xff] %vm2588_vm1, %v3892_v63 }
 0x47d   : > { %4018 = vst.msk [vmem:[#allocation3 + $0x10] sm:$0xff] %vm2669_vm3, %v3972_v53  ;;  %v3656_v39 = vpop.permute.xlu1 %3655  ;;  %4175 = vrot.lane.b32.xlu1 %v11979_v40, %s9757_s3 }
 0x47e   : > { %3700 = vst.msk [vmem:[#allocation3 + $0x30] sm:$0xff] %vm2346_vm14, %v3656_v39  ;;  %v4100_v35 = vpop.permute.xlu0 %4099  ;;  %3665 = vrot.lane.b32.xlu0 %v11951_v44, %s14559_s1  ;;  %v4246_v39 = vld [vmem:[#allocation3 + $0x28] sm:$0xff] }
 0x481   : > { %v4036_v58 = vpop.permute.xlu1 %4035  ;;  %3825 = vrot.lane.b32.xlu1 %v11985_v30, %s14561_s9 }
 0x482   : > { %4082 = vst.msk [vmem:[#allocation3 + $0x10] sm:$0xff] %vm2734_vm4, %v4036_v58  ;;  %v3894_v51 = vpop.permute.xlu0 %3893  ;;  %3905 = vrot.lane.b32.xlu0 %v11998_v13, %s14563_s27 }
 0x483   : > { %4146 = vst.msk [vmem:[#allocation3 + $0x10] sm:$0xff] %vm2799_vm5, %v4100_v35 }
 0x484   : > { %4210 = vst.msk [vmem:[#allocation3 + $0x10] sm:$0xff] %vm2864_vm6, %v4164_v38 }
 0x485   : > { %v3814_v36 = vpop.permute.xlu1 %3813  ;;  %3985 = vrot.lane.b32.xlu1 %v11979_v40, %s14565_s26 }
 0x486   : > { %3859 = vst.msk [vmem:[#allocation3 + $0x20] sm:$0xff] %vm2507_vm15, %v3814_v36  ;;  %v4166_v44 = vpop.permute.xlu0 %4165  ;;  %4049 = vrot.lane.b32.xlu0 %v12013_v7, %s9759_s6  ;;  %v4278_v36 = vld [vmem:[%s14573_s24 + $0x28] sm:$0xff] }
 0x487   : > { %3939 = vst.msk [vmem:[#allocation3 + $0x20] sm:$0xff] %vm2588_vm1, %v3894_v51  ;;  %v4277_v51 = vld [vmem:[%s14573_s24 + $0x20] sm:$0xff] }
 0x488   : > { %4019 = vst.msk [vmem:[#allocation3 + $0x20] sm:$0xff] %vm2669_vm3, %v3974_v5  ;;  %v9479_v5 = vld [vmem:[%s14573_s24 + $0x24] ss:$8 sps:$4 sm:$0xff]  }
 0x489   : > { %v4102_v30 = vpop.permute.xlu1 %4101  ;;  %4113 = vrot.lane.b32.xlu1 %v12026_v43, %s14529_s4 }
 0x48a   : > { %v3976_v13 = vpop.permute.xlu0 %3975  ;;  %4177 = vrot.lane.b32.xlu0 %v12007_v26, %s9757_s3 }
 0x48d   : > { %v3896_v6 = vpop.permute.xlu1 %3895  ;;  %3667 = vrot.lane.b32.xlu1 %v11979_v40, %s14559_s1 }
 0x48e   : > { %v3658_v0 = vpop.permute.xlu0 %3657  ;;  %3827 = vrot.lane.b32.xlu0 %v12013_v7, %s14561_s9 }
 0x48f   : > { %3701 = vst.msk [vmem:[#allocation3 + $0x40] sm:$0xff] %vm2346_vm14, %v3658_v0 }
 0x491   : > { %v4168_v21 = vpop.permute.xlu1 %4167  ;;  %3907 = vrot.lane.b32.xlu1 %v12026_v43, %s14563_s27 }
 0x492   : > { %v4038_v23 = vpop.permute.xlu0 %4037  ;;  %3987 = vrot.lane.b32.xlu0 %v12007_v26, %s14565_s26 }
 0x493   : > { %4083 = vst.msk [vmem:[#allocation3 + $0x20] sm:$0xff] %vm2734_vm4, %v4038_v23 }
 0x494   : > { %4147 = vst.msk [vmem:[#allocation3 + $0x20] sm:$0xff] %vm2799_vm5, %v4102_v30 }
 0x495   : > { %4211 = vst.msk [vmem:[#allocation3 + $0x20] sm:$0xff] %vm2864_vm6, %v4166_v44  ;;  %v3978_v40 = vpop.permute.xlu1 %3977  ;;  %4051 = vrot.lane.b32.xlu1 %v12041_v3, %s9759_s6  ;;  %v4470_v44 = vmul.bf16 %v9479_v5, %v4246_v39  ;;  %v9489_v39 = vld [vmem:[%s14573_s24 + $0x74] ss:$8 sps:$4 sm:$0xff]  }
 0x496   : > { %v3816_v20 = vpop.permute.xlu0 %3815  ;;  %4115 = vrot.lane.b32.xlu0 %v12054_v22, %s14529_s4 }
 0x497   : > { %3860 = vst.msk [vmem:[#allocation3 + $0x30] sm:$0xff] %vm2507_vm15, %v3816_v20 }
 0x498   : > { %3940 = vst.msk [vmem:[#allocation3 + $0x30] sm:$0xff] %vm2588_vm1, %v3896_v6  ;;  %v8666_v6 = vcombine.low %v4277_v51, %v4278_v36 }
 0x499   : > { %4020 = vst.msk [vmem:[#allocation3 + $0x30] sm:$0xff] %vm2669_vm3, %v3976_v13  ;;  %v3660_v7 = vpop.permute.xlu1 %3659  ;;  %4179 = vrot.lane.b32.xlu1 %v12035_v47, %s9757_s3 }
 0x49a   : > { %3702 = vst.msk [vmem:[#allocation3 + $0x50] sm:$0xff] %vm2346_vm14, %v3660_v7  ;;  %v4104_v43 = vpop.permute.xlu0 %4103  ;;  %3669 = vrot.lane.b32.xlu0 %v12007_v26, %s14559_s1 }
 0x49c   : > { %v4245_v0 = vld [vmem:[#allocation3 + $0x20] sm:$0xff] }
 0x49d   : > { %v4040_v32 = vpop.permute.xlu1 %4039  ;;  %3829 = vrot.lane.b32.xlu1 %v12041_v3, %s14561_s9  ;;  %v4469_v7 = vmul.bf16 %v8666_v6, %v4245_v0 }
 0x49e   : > { %4084 = vst.msk [vmem:[#allocation3 + $0x30] sm:$0xff] %vm2734_vm4, %v4040_v32  ;;  %v3898_v14 = vpop.permute.xlu0 %3897  ;;  %3909 = vrot.lane.b32.xlu0 %v12054_v22, %s14563_s27  ;;  %v4280_v32 = vld [vmem:[%s14573_s24 + $0x38] sm:$0xff] }
 0x49f   : > { %4148 = vst.msk [vmem:[#allocation3 + $0x30] sm:$0xff] %vm2799_vm5, %v4104_v43  ;;  %v4279_v43 = vld [vmem:[%s14573_s24 + $0x30] sm:$0xff] }
 0x4a0   : > { %4212 = vst.msk [vmem:[#allocation3 + $0x30] sm:$0xff] %vm2864_vm6, %v4168_v21  ;;  %v9481_v21 = vld [vmem:[%s14573_s24 + $0x34] ss:$8 sps:$4 sm:$0xff]  }
 0x4a1   : > { %v3818_v18 = vpop.permute.xlu1 %3817  ;;  %3989 = vrot.lane.b32.xlu1 %v12035_v47, %s14565_s26 }
 0x4a2   : > { %3861 = vst.msk [vmem:[#allocation3 + $0x40] sm:$0xff] %vm2507_vm15, %v3818_v18  ;;  %v4170_v26 = vpop.permute.xlu0 %4169  ;;  %4053 = vrot.lane.b32.xlu0 %v12069_v17, %s9759_s6 }
 0x4a3   : > { %3941 = vst.msk [vmem:[#allocation3 + $0x40] sm:$0xff] %vm2588_vm1, %v3898_v14 }
 0x4a4   : > { %4021 = vst.msk [vmem:[#allocation3 + $0x40] sm:$0xff] %vm2669_vm3, %v3978_v40  ;;  %v4248_v40 = vld [vmem:[#allocation3 + $0x38] sm:$0xff] }
 0x4a5   : > { %v4106_v3 = vpop.permute.xlu1 %4105  ;;  %4117 = vrot.lane.b32.xlu1 %v12082_v27, %s14529_s4  ;;  %v4472_v14 = vmul.bf16 %v9481_v21, %v4248_v40  ;;  %v9491_v40 = vld [vmem:[%s14573_s24 + $0x84] ss:$8 sps:$4 sm:$0xff]  }
 0x4a6   : > { %v3980_v22 = vpop.permute.xlu0 %3979  ;;  %4181 = vrot.lane.b32.xlu0 %v12063_v15, %s9757_s3 }
 0x4a9   : > { %v3900_v45 = vpop.permute.xlu1 %3899  ;;  %3671 = vrot.lane.b32.xlu1 %v12035_v47, %s14559_s1 }
 0x4aa   : > { %v3662_v55 = vpop.permute.xlu0 %3661  ;;  %3831 = vrot.lane.b32.xlu0 %v12069_v17, %s14561_s9 }
 0x4ab   : > { %3703 = vst.msk [vmem:[#allocation3 + $0x60] sm:$0xff] %vm2346_vm14, %v3662_v55 }
 0x4ad   : > { %v4172_v8 = vpop.permute.xlu1 %4171  ;;  %3911 = vrot.lane.b32.xlu1 %v12082_v27, %s14563_s27 }
 0x4ae   : > { %v4042_v33 = vpop.permute.xlu0 %4041  ;;  %3991 = vrot.lane.b32.xlu0 %v12063_v15, %s14565_s26 }
 0x4af   : > { %4085 = vst.msk [vmem:[#allocation3 + $0x40] sm:$0xff] %vm2734_vm4, %v4042_v33 }
 0x4b0   : > { %4149 = vst.msk [vmem:[#allocation3 + $0x40] sm:$0xff] %vm2799_vm5, %v4106_v3  ;;  %v8668_v3 = vcombine.low %v4279_v43, %v4280_v32 }
 0x4b1   : > { %4213 = vst.msk [vmem:[#allocation3 + $0x40] sm:$0xff] %vm2864_vm6, %v4170_v26  ;;  %v3982_v47 = vpop.permute.xlu1 %3981  ;;  %4055 = vrot.lane.b32.xlu1 %v12099_v57, %s9759_s6 }
 0x4b2   : > { %v3820_v42 = vpop.permute.xlu0 %3819  ;;  %4119 = vrot.lane.b32.xlu0 %v12115_v54, %s14529_s4 }
 0x4b3   : > { %3862 = vst.msk [vmem:[#allocation3 + $0x50] sm:$0xff] %vm2507_vm15, %v3820_v42  ;;  %v4281_v42 = vld [vmem:[%s14573_s24 + $0x40] sm:$0xff] }
 0x4b4   : > { %3942 = vst.msk [vmem:[#allocation3 + $0x50] sm:$0xff] %vm2588_vm1, %v3900_v45  ;;  %v9483_v45 = vld [vmem:[%s14573_s24 + $0x44] ss:$8 sps:$4 sm:$0xff]  }
 0x4b5   : > { %4022 = vst.msk [vmem:[#allocation3 + $0x50] sm:$0xff] %vm2669_vm3, %v3980_v22  ;;  %v4044_v17 = vpop.permute.xlu1 %4043  ;;  %4183 = vrot.lane.b32.xlu1 %v12094_v46, %s9757_s3  ;;  %v4247_v22 = vld [vmem:[#allocation3 + $0x30] sm:$0xff] }
 0x4b6   : > { %4086 = vst.msk [vmem:[#allocation3 + $0x50] sm:$0xff] %vm2734_vm4, %v4044_v17  ;;  %v4108_v27 = vpop.permute.xlu0 %4107  ;;  %3673 = vrot.lane.b32.xlu0 %v12063_v15, %s14559_s1  ;;  %v4282_v17 = vld [vmem:[%s14573_s24 + $0x48] sm:$0xff] }
 0x4b7   : > { %4150 = vst.msk [vmem:[#allocation3 + $0x50] sm:$0xff] %vm2799_vm5, %v4108_v27 }
 0x4b8   : > { %4214 = vst.msk [vmem:[#allocation3 + $0x50] sm:$0xff] %vm2864_vm6, %v4172_v8  ;;  %v4250_v8 = vld [vmem:[#allocation3 + $0x48] sm:$0xff] }
 0x4b9   : > { %v3822_v59 = vpop.permute.xlu1 %3821  ;;  %3833 = vrot.lane.b32.xlu1 %v12099_v57, %s14561_s9  ;;  %v4474_v27 = vmul.bf16 %v9483_v45, %v4250_v8  ;;  %v9493_v8 = vld [vmem:[%s14573_s24 + $0x94] ss:$8 sps:$4 sm:$0xff]  }
 0x4ba   : > { %3863 = vst.msk [vmem:[#allocation3 + $0x60] sm:$0xff] %vm2507_vm15, %v3822_v59  ;;  %v3902_v28 = vpop.permute.xlu0 %3901  ;;  %3913 = vrot.lane.b32.xlu0 %v12115_v54, %s14563_s27 }
 0x4bb   : > { %3943 = vst.msk [vmem:[#allocation3 + $0x60] sm:$0xff] %vm2588_vm1, %v3902_v28 }
 0x4bc   : > { %4023 = vst.msk [vmem:[#allocation3 + $0x60] sm:$0xff] %vm2669_vm3, %v3982_v47  ;;  %v4471_v47 = vmul.bf16 %v8668_v3, %v4247_v22 }
 0x4bd   : > { %3993 = vrot.lane.b32.xlu1 %v12094_v46, %s14565_s26  ;;  %v4110_v57 = vpop.permute.xlu1 %4109 }
 0x4be   : > { %v4174_v15 = vpop.permute.xlu0 %4173  ;;  %4057 = vrot.lane.b32.xlu0 %v12129_v9, %s9759_s6 }
 0x4c1   : > { %4121 = vrot.lane.b32.xlu1 %v12143_v24, %s14529_s4 }
 0x4c2   : > { %v4046_v53 = vpop.permute.xlu0 %4045  ;;  %4185 = vrot.lane.b32.xlu0 %v12124_v25, %s9757_s3 }
 0x4c3   : > { %4087 = vst.msk [vmem:[#allocation3 + $0x60] sm:$0xff] %vm2734_vm4, %v4046_v53  ;;  %v4249_v53 = vld [vmem:[#allocation3 + $0x40] sm:$0xff] }
 0x4c4   : > { %4151 = vst.msk [vmem:[#allocation3 + $0x60] sm:$0xff] %vm2799_vm5, %v4110_v57  ;;  %v9485_v57 = vld [vmem:[%s14573_s24 + $0x54] ss:$8 sps:$4 sm:$0xff]  }
 0x4c5   : > { %4215 = vst.msk [vmem:[#allocation3 + $0x60] sm:$0xff] %vm2864_vm6, %v4174_v15  ;;  %3675 = vrot.lane.b32.xlu1 %v12094_v46, %s14559_s1  ;;  %v8670_v15 = vcombine.low %v4281_v42, %v4282_v17 }
 0x4c6   : > { %3835 = vrot.lane.b32.xlu0 %v12129_v9, %s14561_s9 }
 0x4c9   : > { %3915 = vrot.lane.b32.xlu1 %v12143_v24, %s14563_s27 }
 0x4ca   : > { %3995 = vrot.lane.b32.xlu0 %v12124_v25, %s14565_s26 }
 0x4cd   : > { %4059 = vrot.lane.b32.xlu1 %v12157_v41, %s9759_s6 }
 0x4ce   : > { %4123 = vrot.lane.b32.xlu0 %v12167_v62, %s14529_s4 }
 0x4d1   : > { %4187 = vrot.lane.b32.xlu1 %v12152_v60, %s9757_s3 }
 0x4d2   : > { %3677 = vrot.lane.b32.xlu0 %v12124_v25, %s14559_s1 }
 0x4d5   : > { %3837 = vrot.lane.b32.xlu1 %v12157_v41, %s14561_s9 }
 0x4d6   : > { %3917 = vrot.lane.b32.xlu0 %v12167_v62, %s14563_s27  ;;  %v9465_v62 = vld [vmem:[%s14573_s24] ss:$8 sps:$4 sm:$0xff]  }
 0x4d9   : > { %3997 = vrot.lane.b32.xlu1 %v12152_v60, %s14565_s26 }
 0x4da   : > { %4061 = vrot.lane.b32.xlu0 %v12215_v10, %s9759_s6 }
 0x4dc   : > { %v3650_v46 = vpop.permute.xlu0 %3649 }
 0x4dd   : > { %3697 = vst.msk [vmem:[#allocation3] sm:$0xff] %vm2346_vm14, %v3650_v46  ;;  %3679 = vrot.lane.b32.xlu1 %v12152_v60, %s14559_s1 }
 0x4de   : > { %4189 = vrot.lane.b32.xlu0 %v12185_v29, %s9757_s3 }
 0x4df   : > { %v3810_v54 = vpop.permute.xlu1 %3809 }
 0x4e0   : > { %3857 = vst.msk [vmem:[#allocation3] sm:$0xff] %vm2507_vm15, %v3810_v54  ;;  %v3890_v25 = vpop.permute.xlu0 %3889  ;;  %v4252_v54 = vld [vmem:[#allocation3 + $0x58] sm:$0xff] }
 0x4e1   : > { %3937 = vst.msk [vmem:[#allocation3] sm:$0xff] %vm2588_vm1, %v3890_v25  ;;  %4125 = vrot.lane.b32.xlu1 %v12208_v16, %s14529_s4 }
 0x4e2   : > { %4017 = vst.msk [vmem:[#allocation3] sm:$0xff] %vm2669_vm3, %v12172_v50  ;;  %3839 = vrot.lane.b32.xlu0 %v12215_v10, %s14561_s9  ;;  %v9477_v50 = vld [vmem:[%s14573_s24 + $0x14] ss:$8 sps:$4 sm:$0xff]  }
 0x4e3   : > { %4081 = vst.msk [vmem:[#allocation3] sm:$0xff] %vm2734_vm4, %v12243_v11  ;;  %v3664_v9 = vpop.permute.xlu1 %3663  ;;  %v4243_v11 = vld [vmem:[#allocation3 + $0x10] sm:$0xff] }
 0x4e4   : > { %4145 = vst.msk [vmem:[#allocation3] sm:$0xff] %vm2799_vm5, %v12217_v48  ;;  %v3824_v24 = vpop.permute.xlu0 %3823 }
 0x4e5   : > { %3704 = vst.msk [vmem:[#allocation3 + $0x70] sm:$0xff] %vm2346_vm14, %v3664_v9  ;;  %3919 = vrot.lane.b32.xlu1 %v12208_v16, %s14563_s27  ;;  %v4473_v9 = vmul.bf16 %v8670_v15, %v4249_v53 }
 0x4e6   : > { %4209 = vst.msk [vmem:[#allocation3] sm:$0xff] %vm2864_vm6, %v12190_v19  ;;  %3999 = vrot.lane.b32.xlu0 %v12185_v29, %s14565_s26  ;;  %v4244_v19 = vld [vmem:[#allocation3 + $0x18] sm:$0xff] }
 0x4e7   : > { %3864 = vst.msk [vmem:[#allocation3 + $0x70] sm:$0xff] %vm2507_vm15, %v3824_v24  ;;  %v3904_v60 = vpop.permute.xlu1 %3903  ;;  %v4468_v63 = vmul.bf16 %v9477_v50, %v4244_v19  ;;  %v4283_v24 = vld [vmem:[%s14573_s24 + $0x50] sm:$0xff] }
 0x4e8   : > { %3944 = vst.msk [vmem:[#allocation3 + $0x70] sm:$0xff] %vm2588_vm1, %v3904_v60  ;;  %v3984_v41 = vpop.permute.xlu0 %3983  ;;  %v4284_v60 = vld [vmem:[%s14573_s24 + $0x58] sm:$0xff]  ;;  %v4251_v19 = vld [vmem:[#allocation3 + $0x50] sm:$0xff] }
 0x4e9   : > { %4024 = vst.msk [vmem:[#allocation3 + $0x70] sm:$0xff] %vm2669_vm3, %v3984_v41  ;;  %4063 = vrot.lane.b32.xlu1 %v12213_v2, %s9759_s6  ;;  %v4276_v2 = vld [vmem:[%s14573_s24 + $0x18] sm:$0xff]  ;;  %v4476_v41 = vmul.bf16 %v9485_v57, %v4252_v54  ;;  %v9495_v54 = vld [vmem:[%s14573_s24 + $0xa4] ss:$8 sps:$4 sm:$0xff]  }
 0x4ea   : > { %4127 = vrot.lane.b32.xlu0 %v12211_v34, %s14529_s4  ;;  %v4275_v34 = vld [vmem:[%s14573_s24 + $0x10] sm:$0xff] }
 0x4eb   : > { %v4048_v29 = vpop.permute.xlu1 %4047 }
 0x4ec   : > { %4088 = vst.msk [vmem:[#allocation3 + $0x70] sm:$0xff] %vm2734_vm4, %v4048_v29  ;;  %v4112_v16 = vpop.permute.xlu0 %4111  ;;  %v8672_v29 = vcombine.low %v4283_v24, %v4284_v60 }
 0x4ed   : > { %v4241_v10 = vld [vmem:[#allocation3] sm:$0xff]  ;;  %4152 = vst.msk [vmem:[#allocation3 + $0x70] sm:$0xff] %vm2799_vm5, %v4112_v16  ;;  %4191 = vrot.lane.b32.xlu1 %v11792_v37, %s9757_s3  ;;  %v8664_v37 = vcombine.low %v4275_v34, %v4276_v2 }
 0x4ee   : > { %v4465_v48 = vmul.bf16 %v9465_v62, %v4241_v10  ;;  %v9487_v16 = vld [vmem:[%s14573_s24 + $0x64] ss:$8 sps:$4 sm:$0xff]   ;;  %v4475_v2 = vmul.bf16 %v8672_v29, %v4251_v19 }
 0x4ef   : > { %v4176_v31 = vpop.permute.xlu1 %4175  ;;  %v4467_v58 = vmul.bf16 %v8664_v37, %v4243_v11 }
 0x4f0   : > { %4657 = vmatmul.mubr.bf16.vlgmr.msra.gmra.mrb[32].mxu0 %v4465_v48  ;;  %4216 = vst.msk [vmem:[#allocation3 + $0x70] sm:$0xff] %vm2864_vm6, %v4176_v31  ;;  %v3666_v38 = vpop.permute.xlu0 %3665  ;;  %v4254_v48 = vld [vmem:[#allocation3 + $0x68] sm:$0xff] }
 0x4f1   : > { %8705 = vmatprep.mubr.msk.bf16.mxu0 %vm2249_vm13, %v4468_v63  ;;  %3705 = vst.msk [vmem:[#allocation3 + $0x80] sm:$0xff] %vm2346_vm14, %v3666_v38  ;;  %v4285_v63 = vld [vmem:[%s14573_s24 + $0x60] sm:$0xff]  ;;  %v4286_v31 = vld [vmem:[%s14573_s24 + $0x68] sm:$0xff]  ;;  %v4478_v38 = vmul.bf16 %v9487_v16, %v4254_v48  ;;  %v9497_v48 = vld [vmem:[%s14573_s24 + $0xb4] ss:$8 sps:$4 sm:$0xff]  }
 0x4f2   : > { %v8674_v5 = vcombine.low %v4285_v63, %v4286_v31 }
 0x4f3   : > { %v3826_v61 = vpop.permute.xlu1 %3825 }
 0x4f4   : > { %3865 = vst.msk [vmem:[#allocation3 + $0x80] sm:$0xff] %vm2507_vm15, %v3826_v61  ;;  %v3906_v35 = vpop.permute.xlu0 %3905  ;;  %v4253_v61 = vld [vmem:[#allocation3 + $0x60] sm:$0xff] }
 0x4f5   : > { %3945 = vst.msk [vmem:[#allocation3 + $0x80] sm:$0xff] %vm2588_vm1, %v3906_v35  ;;  %v4477_v36 = vmul.bf16 %v8674_v5, %v4253_v61 }
 0x4f7   : > { %v3986_v30 = vpop.permute.xlu1 %3985 }
 0x4f8   : > { %4665 = vmatmul.mubr.bf16.gmra.mrb[36].mxu0 %v4467_v58  ;;  %4025 = vst.msk [vmem:[#allocation3 + $0x80] sm:$0xff] %vm2669_vm3, %v3986_v30  ;;  %v4050_v13 = vpop.permute.xlu0 %4049  ;;  %v4256_v58 = vld [vmem:[#allocation3 + $0x78] sm:$0xff] }
 0x4f9   : > { %8706 = vmatprep.mubr.msk.bf16.mxu0 %vm2249_vm13, %v4470_v44  ;;  %4089 = vst.msk [vmem:[#allocation3 + $0x80] sm:$0xff] %vm2734_vm4, %v4050_v13  ;;  %v4287_v44 = vld [vmem:[%s14573_s24 + $0x70] sm:$0xff]  ;;  %v4288_v30 = vld [vmem:[%s14573_s24 + $0x78] sm:$0xff]  ;;  %v4480_v13 = vmul.bf16 %v9489_v39, %v4256_v58  ;;  %v9499_v58 = vld [vmem:[%s14573_s24 + $0xc4] ss:$8 sps:$4 sm:$0xff]  }
 0x4fa   : > { %v8676_v21 = vcombine.low %v4287_v44, %v4288_v30 }
 0x4fb   : > { %v4114_v23 = vpop.permute.xlu1 %4113 }
 0x4fc   : > { %4153 = vst.msk [vmem:[#allocation3 + $0x80] sm:$0xff] %vm2799_vm5, %v4114_v23  ;;  %v4178_v20 = vpop.permute.xlu0 %4177  ;;  %v4255_v23 = vld [vmem:[#allocation3 + $0x70] sm:$0xff] }
 0x4fd   : > { %4217 = vst.msk [vmem:[#allocation3 + $0x80] sm:$0xff] %vm2864_vm6, %v4178_v20  ;;  %v4479_v32 = vmul.bf16 %v8676_v21, %v4255_v23 }
 0x4ff   : > { %v3668_v18 = vpop.permute.xlu1 %3667 }
 0x500   : > { %4673 = vmatmul.mubr.bf16.gmra.mrb[40].mxu0 %v4469_v7  ;;  %3706 = vst.msk [vmem:[#allocation3 + $0x90] sm:$0xff] %vm2346_vm14, %v3668_v18  ;;  %v3828_v26 = vpop.permute.xlu0 %3827  ;;  %v4258_v7 = vld [vmem:[#allocation3 + $0x88] sm:$0xff] }
 0x501   : > { %8707 = vmatprep.mubr.msk.bf16.mxu0 %vm2249_vm13, %v4472_v14  ;;  %3866 = vst.msk [vmem:[#allocation3 + $0x90] sm:$0xff] %vm2507_vm15, %v3828_v26  ;;  %v4289_v14 = vld [vmem:[%s14573_s24 + $0x80] sm:$0xff]  ;;  %v4290_v18 = vld [vmem:[%s14573_s24 + $0x88] sm:$0xff]  ;;  %v4482_v26 = vmul.bf16 %v9491_v40, %v4258_v7  ;;  %v9501_v7 = vld [vmem:[%s14573_s24 + $0xd4] ss:$8 sps:$4 sm:$0xff]  }
 0x502   : > { %v8678_v45 = vcombine.low %v4289_v14, %v4290_v18 }
 0x503   : > { %v3908_v55 = vpop.permute.xlu1 %3907 }
 0x504   : > { %3946 = vst.msk [vmem:[#allocation3 + $0x90] sm:$0xff] %vm2588_vm1, %v3908_v55  ;;  %v3988_v33 = vpop.permute.xlu0 %3987  ;;  %v4257_v55 = vld [vmem:[#allocation3 + $0x80] sm:$0xff] }
 0x505   : > { %4026 = vst.msk [vmem:[#allocation3 + $0x90] sm:$0xff] %vm2669_vm3, %v3988_v33  ;;  %v4481_v17 = vmul.bf16 %v8678_v45, %v4257_v55 }
 0x507   : > { %v4052_v59 = vpop.permute.xlu1 %4051 }
 0x508   : > { %4681 = vmatmul.mubr.bf16.gmra.mrb[44].mxu0 %v4471_v47  ;;  %4090 = vst.msk [vmem:[#allocation3 + $0x90] sm:$0xff] %vm2734_vm4, %v4052_v59  ;;  %v4116_v28 = vpop.permute.xlu0 %4115  ;;  %v4260_v47 = vld [vmem:[#allocation3 + $0x98] sm:$0xff] }
 0x509   : > { %8708 = vmatprep.mubr.msk.bf16.mxu0 %vm2249_vm13, %v4474_v27  ;;  %4154 = vst.msk [vmem:[#allocation3 + $0x90] sm:$0xff] %vm2799_vm5, %v4116_v28  ;;  %v4291_v27 = vld [vmem:[%s14573_s24 + $0x90] sm:$0xff]  ;;  %v4292_v59 = vld [vmem:[%s14573_s24 + $0x98] sm:$0xff]  ;;  %v4484_v28 = vmul.bf16 %v9493_v8, %v4260_v47  ;;  %v9503_v47 = vld [vmem:[%s14573_s24 + $0xe4] ss:$8 sps:$4 sm:$0xff]  }
 0x50a   : > { %v8680_v57 = vcombine.low %v4291_v27, %v4292_v59 }
 0x50b   : > { %v4180_v46 = vpop.permute.xlu1 %4179 }
 0x50c   : > { %4218 = vst.msk [vmem:[#allocation3 + $0x90] sm:$0xff] %vm2864_vm6, %v4180_v46  ;;  %v3670_v25 = vpop.permute.xlu0 %3669 }
 0x50d   : > { %3707 = vst.msk [vmem:[#allocation3 + $0xa0] sm:$0xff] %vm2346_vm14, %v3670_v25 }
 0x50f   : > { %v3830_v62 = vpop.permute.xlu1 %3829 }
 0x510   : > { %4689 = vmatmul.mubr.bf16.gmra.mrb[48].mxu0 %v4473_v9  ;;  %3867 = vst.msk [vmem:[#allocation3 + $0xa0] sm:$0xff] %vm2507_vm15, %v3830_v62  ;;  %v3910_v50 = vpop.permute.xlu0 %3909  ;;  %v4262_v9 = vld [vmem:[#allocation3 + $0xa8] sm:$0xff] }
 0x511   : > { %8709 = vmatprep.mubr.msk.bf16.mxu0 %vm2249_vm13, %v4476_v41  ;;  %3947 = vst.msk [vmem:[#allocation3 + $0xa0] sm:$0xff] %vm2588_vm1, %v3910_v50  ;;  %v4293_v41 = vld [vmem:[%s14573_s24 + $0xa0] sm:$0xff]  ;;  %v4294_v62 = vld [vmem:[%s14573_s24 + $0xa8] sm:$0xff]  ;;  %v4486_v50 = vmul.bf16 %v9495_v54, %v4262_v9 }
 0x512   : > { %v8682_v16 = vcombine.low %v4293_v41, %v4294_v62 }
 0x513   : > { %v3990_v10 = vpop.permute.xlu1 %3989  ;;  %v4259_v46 = vld [vmem:[#allocation3 + $0x90] sm:$0xff] }
 0x514   : > { %4027 = vst.msk [vmem:[#allocation3 + $0xa0] sm:$0xff] %vm2669_vm3, %v3990_v10  ;;  %v4054_v34 = vpop.permute.xlu0 %4053  ;;  %v4483_v60 = vmul.bf16 %v8680_v57, %v4259_v46 }
 0x515   : > { %4091 = vst.msk [vmem:[#allocation3 + $0xa0] sm:$0xff] %vm2734_vm4, %v4054_v34 }
 0x517   : > { %v4118_v37 = vpop.permute.xlu1 %4117 }
 0x518   : > { %4697 = vmatmul.mubr.bf16.gmra.mrb[52].mxu0 %v4475_v2  ;;  %4155 = vst.msk [vmem:[#allocation3 + $0xa0] sm:$0xff] %vm2799_vm5, %v4118_v37  ;;  %v4182_v11 = vpop.permute.xlu0 %4181  ;;  %v4264_v2 = vld [vmem:[#allocation3 + $0xb8] sm:$0xff] }
 0x519   : > { %8710 = vmatprep.mubr.msk.bf16.mxu0 %vm2249_vm13, %v4478_v38  ;;  %4219 = vst.msk [vmem:[#allocation3 + $0xa0] sm:$0xff] %vm2864_vm6, %v4182_v11  ;;  %v4295_v38 = vld [vmem:[%s14573_s24 + $0xb0] sm:$0xff]  ;;  %v4296_v37 = vld [vmem:[%s14573_s24 + $0xb8] sm:$0xff]  ;;  %v4488_v11 = vmul.bf16 %v9497_v48, %v4264_v2  ;;  %v12632_v48 = vld [vmem:[%s14449_s14] ss:$0 sm:$0xff] }
 0x51a   : > { %v8684_v39 = vcombine.low %v4295_v38, %v4296_v37 }
 0x51b   : > { %v3672_v35 = vpop.permute.xlu1 %3671 }
 0x51c   : > { %3708 = vst.msk [vmem:[#allocation3 + $0xb0] sm:$0xff] %vm2346_vm14, %v3672_v35  ;;  %v3832_v51 = vpop.permute.xlu0 %3831 }
 0x51d   : > { %3868 = vst.msk [vmem:[#allocation3 + $0xb0] sm:$0xff] %vm2507_vm15, %v3832_v51 }
 0x51f   : > { %v3912_v6 = vpop.permute.xlu1 %3911 }
 0x520   : > { %4705 = vmatmul.mubr.bf16.gmra.mrb[56].mxu0 %v4477_v36  ;;  %3948 = vst.msk [vmem:[#allocation3 + $0xb0] sm:$0xff] %vm2588_vm1, %v3912_v6  ;;  %v3992_v0 = vpop.permute.xlu0 %3991  ;;  %v4261_v10 = vld [vmem:[#allocation3 + $0xa0] sm:$0xff]  ;;  %v4266_v36 = vld [vmem:[#allocation3 + $0xc8] sm:$0xff] }
 0x521   : > { %8711 = vmatprep.mubr.msk.bf16.mxu0 %vm2249_vm13, %v4480_v13  ;;  %4028 = vst.msk [vmem:[#allocation3 + $0xb0] sm:$0xff] %vm2669_vm3, %v3992_v0  ;;  %v4485_v31 = vmul.bf16 %v8682_v16, %v4261_v10  ;;  %v4297_v13 = vld [vmem:[%s14573_s24 + $0xc0] sm:$0xff]  ;;  %v4298_v6 = vld [vmem:[%s14573_s24 + $0xc8] sm:$0xff]  ;;  %v4490_v0 = vmul.bf16 %v9499_v58, %v4266_v36 }
 0x522   : > { %v8686_v40 = vcombine.low %v4297_v13, %v4298_v6 }
 0x523   : > { %v4056_v20 = vpop.permute.xlu1 %4055 }
 0x524   : > { %4092 = vst.msk [vmem:[#allocation3 + $0xb0] sm:$0xff] %vm2734_vm4, %v4056_v20  ;;  %v4120_v43 = vpop.permute.xlu0 %4119 }
 0x525   : > { %4156 = vst.msk [vmem:[#allocation3 + $0xb0] sm:$0xff] %vm2799_vm5, %v4120_v43 }
 0x527   : > { %v4184_v3 = vpop.permute.xlu1 %4183 }
 0x528   : > { %4713 = vmatmul.mubr.bf16.gmra.mrb[60].mxu0 %v4479_v32  ;;  %4220 = vst.msk [vmem:[#allocation3 + $0xb0] sm:$0xff] %vm2864_vm6, %v4184_v3  ;;  %v3674_v22 = vpop.permute.xlu0 %3673  ;;  %v4268_v32 = vld [vmem:[#allocation3 + $0xd8] sm:$0xff] }
 0x529   : > { %8712 = vmatprep.mubr.msk.bf16.mxu0 %vm2249_vm13, %v4482_v26  ;;  %3709 = vst.msk [vmem:[#allocation3 + $0xc0] sm:$0xff] %vm2346_vm14, %v3674_v22  ;;  %v4299_v26 = vld [vmem:[%s14573_s24 + $0xd0] sm:$0xff]  ;;  %v4300_v3 = vld [vmem:[%s14573_s24 + $0xd8] sm:$0xff]  ;;  %v4492_v22 = vmul.bf16 %v9501_v7, %v4268_v32 }
 0x52a   : > { %v8688_v8 = vcombine.low %v4299_v26, %v4300_v3 }
 0x52b   : > { %v3834_v33 = vpop.permute.xlu1 %3833 }
 0x52c   : > { %3869 = vst.msk [vmem:[#allocation3 + $0xc0] sm:$0xff] %vm2507_vm15, %v3834_v33  ;;  %v3914_v42 = vpop.permute.xlu0 %3913 }
 0x52d   : > { %3949 = vst.msk [vmem:[#allocation3 + $0xc0] sm:$0xff] %vm2588_vm1, %v3914_v42 }
 0x52f   : > { %v3994_v15 = vpop.permute.xlu1 %3993  ;;  %v4263_v35 = vld [vmem:[#allocation3 + $0xb0] sm:$0xff] }
 0x530   : > { %4721 = vmatmul.mubr.bf16.gmra.mrb[64].mxu0 %v4481_v17  ;;  %4029 = vst.msk [vmem:[#allocation3 + $0xc0] sm:$0xff] %vm2669_vm3, %v3994_v15  ;;  %v4058_v53 = vpop.permute.xlu0 %4057  ;;  %v4487_v30 = vmul.bf16 %v8684_v39, %v4263_v35  ;;  %v4270_v17 = vld [vmem:[#allocation3 + $0xe8] sm:$0xff] }
 0x531   : > { %8713 = vmatprep.mubr.msk.bf16.mxu0 %vm2249_vm13, %v4484_v28  ;;  %4093 = vst.msk [vmem:[#allocation3 + $0xc0] sm:$0xff] %vm2734_vm4, %v4058_v53  ;;  %v4301_v28 = vld [vmem:[%s14573_s24 + $0xe0] sm:$0xff]  ;;  %v4302_v15 = vld [vmem:[%s14573_s24 + $0xe8] sm:$0xff]  ;;  %v4494_v53 = vmul.bf16 %v9503_v47, %v4270_v17 }
 0x532   : > { %v8690_v54 = vcombine.low %v4301_v28, %v4302_v15  ;;  %v14608_v17 = vld [vmem:[#allocation19_spill] sm:$0xff] }
 0x533   : > { %v4122_v25 = vpop.permute.xlu1 %4121 }
 0x534   : > { %4157 = vst.msk [vmem:[#allocation3 + $0xc0] sm:$0xff] %vm2799_vm5, %v4122_v25  ;;  %v4186_v24 = vpop.permute.xlu0 %4185  ;;  %v9505_v25 = vld [vmem:[%s14573_s24 + $0xf4] ss:$8 sps:$4 sm:$0xff]  }
 0x535   : > { %4221 = vst.msk [vmem:[#allocation3 + $0xc0] sm:$0xff] %vm2864_vm6, %v4186_v24  ;;  %v4272_v24 = vld [vmem:[#allocation3 + $0xf8] sm:$0xff] }
 0x537   : > { %v3676_v29 = vpop.permute.xlu1 %3675 }
 0x538   : > { %4729 = vmatmul.mubr.bf16.gmra.mrb[68].mxu0 %v4483_v60  ;;  %3710 = vst.msk [vmem:[#allocation3 + $0xd0] sm:$0xff] %vm2346_vm14, %v3676_v29  ;;  %v3836_v19 = vpop.permute.xlu0 %3835 }
 0x539   : > { %8714 = vmatprep.mubr.msk.bf16.mxu0 %vm2249_vm13, %v4486_v50  ;;  %3870 = vst.msk [vmem:[#allocation3 + $0xd0] sm:$0xff] %vm2507_vm15, %v3836_v19  ;;  %v4496_v50 = vmul.bf16 %v9505_v25, %v4272_v24  ;;  %v9507_v19 = vld [vmem:[%s14573_s24 + $0xf0] ss:$8 sps:$4 sm:$0xff]  }
 0x53b   : > { %v3916_v34 = vpop.permute.xlu1 %3915 }
 0x53c   : > { %3950 = vst.msk [vmem:[#allocation3 + $0xd0] sm:$0xff] %vm2588_vm1, %v3916_v34  ;;  %v3996_v63 = vpop.permute.xlu0 %3995  ;;  %v4265_v20 = vld [vmem:[#allocation3 + $0xc0] sm:$0xff] }
 0x53d   : > { %4030 = vst.msk [vmem:[#allocation3 + $0xd0] sm:$0xff] %vm2669_vm3, %v3996_v63  ;;  %v4489_v18 = vmul.bf16 %v8686_v40, %v4265_v20 }
 0x53f   : > { %v4060_v5 = vpop.permute.xlu1 %4059 }
 0x540   : > { %4737 = vmatmul.mubr.bf16.gmra.mrb[72].mxu0 %v4485_v31  ;;  %4094 = vst.msk [vmem:[#allocation3 + $0xd0] sm:$0xff] %vm2734_vm4, %v4060_v5  ;;  %v4124_v61 = vpop.permute.xlu0 %4123 }
 0x541   : > { %8715 = vmatprep.mubr.msk.bf16.mxu0 %vm2249_vm13, %v4488_v11  ;;  %4158 = vst.msk [vmem:[#allocation3 + $0xd0] sm:$0xff] %vm2799_vm5, %v4124_v61 }
 0x543   : > { %v4188_v51 = vpop.permute.xlu1 %4187 }
 0x544   : > { %4222 = vst.msk [vmem:[#allocation3 + $0xd0] sm:$0xff] %vm2864_vm6, %v4188_v51  ;;  %v3678_v44 = vpop.permute.xlu0 %3677 }
 0x545   : > { %3711 = vst.msk [vmem:[#allocation3 + $0xe0] sm:$0xff] %vm2346_vm14, %v3678_v44 }
 0x547   : > { %v3838_v21 = vpop.permute.xlu1 %3837 }
 0x548   : > { %4745 = vmatmul.mubr.bf16.gmra.mrb[76].mxu0 %v4487_v30  ;;  %3871 = vst.msk [vmem:[#allocation3 + $0xe0] sm:$0xff] %vm2507_vm15, %v3838_v21  ;;  %v3918_v23 = vpop.permute.xlu0 %3917 }
 0x549   : > { %8716 = vmatprep.mubr.msk.bf16.mxu0 %vm2249_vm13, %v4490_v0  ;;  %3951 = vst.msk [vmem:[#allocation3 + $0xe0] sm:$0xff] %vm2588_vm1, %v3918_v23  ;;  %v14607_v23 = vld [vmem:[#allocation16_spill] sm:$0xff] }
 0x54b   : > { %v3998_v43 = vpop.permute.xlu1 %3997  ;;  %v4267_v33 = vld [vmem:[#allocation3 + $0xd0] sm:$0xff] }
 0x54c   : > { %4031 = vst.msk [vmem:[#allocation3 + $0xe0] sm:$0xff] %vm2669_vm3, %v3998_v43  ;;  %v4062_v14 = vpop.permute.xlu0 %4061  ;;  %v4491_v59 = vmul.bf16 %v8688_v8, %v4267_v33 }
 0x54d   : > { %4095 = vst.msk [vmem:[#allocation3 + $0xe0] sm:$0xff] %vm2734_vm4, %v4062_v14 }
 0x54f   : > { %v3680_v45 = vpop.permute.xlu1 %3679 }
 0x550   : > { %4753 = vmatmul.mubr.bf16.gmra.mrb[80].mxu0 %v4489_v18  ;;  %3712 = vst.msk [vmem:[#allocation3 + $0xf0] sm:$0xff] %vm2346_vm14, %v3680_v45  ;;  %v4190_v55 = vpop.permute.xlu0 %4189 }
 0x551   : > { %8717 = vmatprep.mubr.msk.bf16.mxu0 %vm2249_vm13, %v4492_v22 }
 0x553   : > { %v4126_v42 = vpop.permute.xlu1 %4125 }
 0x554   : > { %4159 = vst.msk [vmem:[#allocation3 + $0xe0] sm:$0xff] %vm2799_vm5, %v4126_v42  ;;  %v3840_v27 = vpop.permute.xlu0 %3839 }
 0x555   : > { %4223 = vst.msk [vmem:[#allocation3 + $0xe0] sm:$0xff] %vm2864_vm6, %v4190_v55 }
 0x556   : > { %3872 = vst.msk [vmem:[#allocation3 + $0xf0] sm:$0xff] %vm2507_vm15, %v3840_v27 }
 0x557   : > { %v3920_v57 = vpop.permute.xlu1 %3919 }
 0x558   : > { %4761 = vmatmul.mubr.bf16.gmra.mrb[84].mxu0 %v4491_v59  ;;  %3952 = vst.msk [vmem:[#allocation3 + $0xf0] sm:$0xff] %vm2588_vm1, %v3920_v57  ;;  %v4000_v46 = vpop.permute.xlu0 %3999 }
 0x559   : > { %8718 = vmatprep.mubr.msk.bf16.mxu0 %vm2249_vm13, %v4494_v53  ;;  %4032 = vst.msk [vmem:[#allocation3 + $0xf0] sm:$0xff] %vm2669_vm3, %v4000_v46 }
 0x55b   : > { %v4064_v9 = vpop.permute.xlu1 %4063 }
 0x55c   : > { %4096 = vst.msk [vmem:[#allocation3 + $0xf0] sm:$0xff] %vm2734_vm4, %v4064_v9  ;;  %v4128_v60 = vpop.permute.xlu0 %4127  ;;  %v4269_v41 = vld [vmem:[#allocation3 + $0xe0] sm:$0xff] }
 0x55d   : > { %4160 = vst.msk [vmem:[#allocation3 + $0xf0] sm:$0xff] %vm2799_vm5, %v4128_v60  ;;  %v4493_v62 = vmul.bf16 %v8690_v54, %v4269_v41  ;;  %v14609_v54 = vld [vmem:[#allocation20_spill] sm:$0xff] }
 0x55f   : > { %v4192_v29 = vpop.permute.xlu1 %4191 }
 0x560   : > { %4769 = vmatmul.mubr.bf16.gmra.mrb[88].mxu0 %v4493_v62  ;;  %4224 = vst.msk [vmem:[#allocation3 + $0xf0] sm:$0xff] %vm2864_vm6, %v4192_v29 }
 0x561   : > { %8719 = vmatprep.mubr.msk.bf16.mxu0 %vm2249_vm13, %v4496_v50 }
 0x567   : > { %v4271_v16 = vld [vmem:[#allocation3 + $0xf0] sm:$0xff] }
 0x568   : > { %v4495_v10 = vmul.bf16 %v9507_v19, %v4271_v16 }
 0x56a   : > { %4777 = vmatmul.mubr.bf16.gmra.mrb[92].mxu0 %v4495_v10 }
 0x5c3   : > { %v4658_v34 = vpop.f32.mrb[32].mxu0 }
 0x5c4   : > { %v4659_v2 = vadd.f32 %v12632_v48, %v4658_v34  ;;  %v4660_v63 = vpop.f32.mrb[33].mxu0 }
 0x5c5   : > { %v4661_v31 = vpop.f32.mrb[34].mxu0 }
 0x5c6   : > { %v4785_v38 = vadd.f32 %v4659_v2, %v10778_v49  ;;  %v4662_v37 = vadd.f32 %v12632_v48, %v4661_v31  ;;  %v4663_v11 = vpop.f32.mrb[35].mxu0  ;;  %v14610_v31 = vld [vmem:[#allocation17_spill] sm:$0xff] }
 0x5c8   : > { %v12637_v5 = vmax.f32 %v4785_v38, 0.0  ;;  %v4786_v61 = vadd.f32 %v4662_v37, %v10781_v56 }
 0x5ca   : > { %v4818_v39 = vmax.f32 %v4786_v61, 0.0  ;;  %v4905_v58 = vrot.slane %v12637_v5, 7  ;;  %v5097_v14 = vrot.slane %v12637_v5, 1 }
 0x5cb   : > { %v4666_v35 = vpop.f32.mrb[36].mxu0 }
 0x5cc   : > { %v4906_v51 = vrot.slane %v4818_v39, 7  ;;  %v4667_v36 = vadd.f32 %v12632_v48, %v4666_v35  ;;  %v4668_v44 = vpop.f32.mrb[37].mxu0  ;;  %v12643_v30 = vpack.c.bf16 %v4818_v39, %v12637_v5  ;;  %v5098_v20 = vrot.slane %v4818_v39, 1  ;;  %v9519_v5 = vld [vmem:[%s14450_s15 + $0x40] sm:$0xff]  }
 0x5cd   : > { %v4669_v13 = vpop.f32.mrb[38].mxu0 }
 0x5ce   : > { %v12649_v49 = vsel %vm861_vm2, %v4905_v58, %v4906_v51  ;;  %v4787_v56 = vadd.f32 %v4667_v36, %v10771_v52  ;;  %v4670_v6 = vadd.f32 %v12632_v48, %v4669_v13  ;;  %v4671_v0 = vpop.f32.mrb[39].mxu0  ;;  %5353 = vrot.lane.b32.xlu1 %v12643_v30, %s14565_s26  ;;  %v5159_v47 = vsel %vm1056_vm0, %v5097_v14, %v5098_v20  ;;  %v14611_v36 = vld [vmem:[#allocation18_spill] sm:$0xff] }
 0x5d0   : > { %v4819_v21 = vmax.f32 %v4787_v56, 0.0  ;;  %v4788_v40 = vadd.f32 %v4670_v6, %v14607_v23 }
 0x5d2   : > { %v4907_v7 = vrot.slane %v4819_v21, 7  ;;  %v5099_v43 = vrot.slane %v4819_v21, 1  ;;  %v4820_v32 = vmax.f32 %v4788_v40, 0.0  ;;  %5035 = vrot.lane.b32.xlu1 %v12643_v30, %s14559_s1 }
 0x5d3   : > { %v4674_v18 = vpop.f32.mrb[40].mxu0 }
 0x5d4   : > { %v4908_v52 = vrot.slane %v4820_v32, 7  ;;  %v5100_v26 = vrot.slane %v4820_v32, 1  ;;  %v4675_v3 = vadd.f32 %v12632_v48, %v4674_v18  ;;  %v4676_v22 = vpop.f32.mrb[41].mxu0  ;;  %v12660_v45 = vpack.c.bf16 %v4820_v32, %v4819_v21  ;;  %v9510_v21 = vld [vmem:[%s14573_s24 + $0x4] ss:$8 sps:$4 sm:$0xff]  }
 0x5d5   : > { %v4677_v55 = vpop.f32.mrb[42].mxu0  ;;  %v4966_v8 = vsel %vm861_vm2, %v4906_v51, %v4907_v7  ;;  %v5158_v33 = vsel %vm1056_vm0, %v5098_v20, %v5099_v43 }
 0x5d6   : > { %v5157_v42 = vsel %vm1056_vm0, %v5099_v43, %v5100_v26  ;;  %v4789_v27 = vadd.f32 %v4675_v3, %v14608_v17  ;;  %v4678_v59 = vadd.f32 %v12632_v48, %v4677_v55  ;;  %v4679_v28 = vpop.f32.mrb[43].mxu0  ;;  %5545 = vrot.lane.b32.xlu0 %v12660_v45, %s9757_s3  ;;  %v4965_v15 = vsel %vm861_vm2, %v4907_v7, %v4908_v52 }
 0x5d7   : > { %v4971_v53 = vpack.c.bf16 %v4965_v15, %v4966_v8  ;;  %v5162_v57 = vpack.c.bf16 %v5158_v33, %v5159_v47  ;;  %v14613_v28 = vld [vmem:[#allocation24_spill] sm:$0xff] }
 0x5d8   : > { %v4821_v46 = vmax.f32 %v4789_v27, 0.0  ;;  %v4790_v25 = vadd.f32 %v4678_v59, %v14609_v54 }
 0x5d9   : > { %5481 = vrot.lane.b32.xlu1 %v4971_v53, %s14529_s4  ;;  %4987 = vst.msk [vmem:[#allocation3 + $0x20] sm:$0xff] %vm2249_vm13, %v4971_v53  ;;  %5624 = vst.msk [vmem:[#allocation3 + $0xf8] sm:$0xff] %vm2249_vm13, %v5162_v57 }
 0x5da   : > { %v4909_v9 = vrot.slane %v4821_v46, 7  ;;  %v5101_v24 = vrot.slane %v4821_v46, 1  ;;  %v4822_v60 = vmax.f32 %v4790_v25, 0.0  ;;  %5355 = vrot.lane.b32.xlu0 %v12660_v45, %s14565_s26 }
 0x5db   : > { %v4682_v41 = vpop.f32.mrb[44].mxu0 }
 0x5dc   : > { %v5156_v62 = vsel %vm1056_vm0, %v5100_v26, %v5101_v24  ;;  %v4910_v50 = vrot.slane %v4822_v60, 7  ;;  %v5102_v29 = vrot.slane %v4822_v60, 1  ;;  %v4683_v19 = vadd.f32 %v12632_v48, %v4682_v41  ;;  %v4684_v16 = vpop.f32.mrb[45].mxu0  ;;  %v14612_v26 = vld [vmem:[#allocation23_spill] sm:$0xff] }
 0x5dd   : > { %v12687_v10 = vpack.c.bf16 %v5156_v62, %v5157_v42  ;;  %v4685_v34 = vpop.f32.mrb[46].mxu0  ;;  %5275 = vrot.lane.b32.xlu1 %v4971_v53, %s14563_s27  ;;  %v12690_v2 = vpack.c.bf16 %v4822_v60, %v4821_v46  ;;  %v4964_v63 = vsel %vm861_vm2, %v4908_v52, %v4909_v9 }
 0x5de   : > { %v4791_v38 = vadd.f32 %v4683_v19, %v14610_v31  ;;  %v4686_v37 = vadd.f32 %v12632_v48, %v4685_v34  ;;  %v4687_v11 = vpop.f32.mrb[47].mxu0  ;;  %5037 = vrot.lane.b32.xlu0 %v12660_v45, %s14559_s1  ;;  %v4963_v61 = vsel %vm861_vm2, %v4909_v9, %v4910_v50  ;;  %v5155_v39 = vsel %vm1056_vm0, %v5101_v24, %v5102_v29  ;;  %v14614_v19 = vld [vmem:[#allocation21_spill] sm:$0xff] }
 0x5df   : > { %5609 = vst.msk [vmem:[#allocation3 + $0x8] sm:$0xff] %vm2249_vm13, %v12687_v10  ;;  %v4972_v35 = vpack.c.bf16 %v4963_v61, %v4964_v63 }
 0x5e0   : > { %v4823_v51 = vmax.f32 %v4791_v38, 0.0  ;;  %v4792_v44 = vadd.f32 %v4686_v37, %v14611_v36 }
 0x5e1   : > { %5547 = vrot.lane.b32.xlu1 %v12690_v2, %s9757_s3  ;;  %4988 = vst.msk [vmem:[#allocation3 + $0x30] sm:$0xff] %vm2249_vm13, %v4972_v35 }
 0x5e2   : > { %v4911_v13 = vrot.slane %v4823_v51, 7  ;;  %v5103_v56 = vrot.slane %v4823_v51, 1  ;;  %v4824_v6 = vmax.f32 %v4792_v44, 0.0  ;;  %5417 = vrot.lane.b32.xlu0 %v5162_v57, %s9759_s6 }
 0x5e3   : > { %v4690_v0 = vpop.f32.mrb[48].mxu0 }
 0x5e4   : > { %v4912_v23 = vrot.slane %v4824_v6, 7  ;;  %v5104_v40 = vrot.slane %v4824_v6, 1  ;;  %v4691_v20 = vadd.f32 %v12632_v48, %v4690_v0  ;;  %v4692_v7 = vpop.f32.mrb[49].mxu0  ;;  %v12713_v43 = vpack.c.bf16 %v4824_v6, %v4823_v51 }
 0x5e5   : > { %v4693_v32 = vpop.f32.mrb[50].mxu0  ;;  %5357 = vrot.lane.b32.xlu1 %v12690_v2, %s14565_s26  ;;  %v4962_v18 = vsel %vm861_vm2, %v4910_v50, %v4911_v13  ;;  %v5154_v52 = vsel %vm1056_vm0, %v5102_v29, %v5103_v56  ;;  %v14616_v7 = vld [vmem:[#allocation27_spill] sm:$0xff] }
 0x5e6   : > { %v4793_v3 = vadd.f32 %v4691_v20, %v14612_v26  ;;  %v4694_v22 = vadd.f32 %v12632_v48, %v4693_v32  ;;  %v4695_v55 = vpop.f32.mrb[51].mxu0  ;;  %5195 = vrot.lane.b32.xlu0 %v5162_v57, %s14561_s9  ;;  %v5626_v8 = vld [vmem:[#allocation3 + $0x8] sm:$0xff]  ;;  %v4961_v33 = vsel %vm861_vm2, %v4911_v13, %v4912_v23  ;;  %v12726_v47 = vpack.c.bf16 %v5154_v52, %v5155_v39  ;;  %v14615_v39 = vld [vmem:[#allocation22_spill] sm:$0xff] }
 0x5e7   : > { %v5850_v42 = vmul.bf16 %v9510_v21, %v5626_v8  ;;  %v4973_v17 = vpack.c.bf16 %v4961_v33, %v4962_v18  ;;  %v5153_v27 = vsel %vm1056_vm0, %v5103_v56, %v5104_v40  ;;  %v14617_v33 = vld [vmem:[#allocation28_spill] sm:$0xff] }
 0x5e8   : > { %v4825_v59 = vmax.f32 %v4793_v3, 0.0  ;;  %v4794_v15 = vadd.f32 %v4694_v22, %v14613_v28  ;;  %5610 = vst.msk [vmem:[#allocation3 + $0x18] sm:$0xff] %vm2249_vm13, %v12726_v47 }
 0x5e9   : > { %8762 = vmatprep.mubr.msk.bf16.mxu1 %vm2249_vm13, %v5850_v42  ;;  %5039 = vrot.lane.b32.xlu1 %v12690_v2, %s14559_s1  ;;  %4989 = vst.msk [vmem:[#allocation3 + $0x40] sm:$0xff] %vm2249_vm13, %v4973_v17 }
 0x5ea   : > { %v4913_v53 = vrot.slane %v4825_v59, 7  ;;  %v5105_v57 = vrot.slane %v4825_v59, 1  ;;  %v4826_v46 = vmax.f32 %v4794_v15, 0.0  ;;  %5483 = vrot.lane.b32.xlu0 %v4972_v35, %s14529_s4 }
 0x5eb   : > { %v4698_v54 = vpop.f32.mrb[52].mxu0 }
 0x5ec   : > { %v4914_v25 = vrot.slane %v4826_v46, 7  ;;  %v5106_v9 = vrot.slane %v4826_v46, 1  ;;  %v4699_v24 = vadd.f32 %v12632_v48, %v4698_v54  ;;  %v4700_v60 = vpop.f32.mrb[53].mxu0  ;;  %v12739_v41 = vpack.c.bf16 %v4826_v46, %v4825_v59 }
 0x5ed   : > { %v4701_v62 = vpop.f32.mrb[54].mxu0  ;;  %5419 = vrot.lane.b32.xlu1 %v12687_v10, %s9759_s6  ;;  %v4960_v50 = vsel %vm861_vm2, %v4912_v23, %v4913_v53  ;;  %v5152_v29 = vsel %vm1056_vm0, %v5104_v40, %v5105_v57  ;;  %v14618_v60 = vld [vmem:[#allocation25_spill] sm:$0xff] }
 0x5ee   : > { %v4795_v16 = vadd.f32 %v4699_v24, %v14614_v19  ;;  %v4702_v34 = vadd.f32 %v12632_v48, %v4701_v62  ;;  %v4703_v63 = vpop.f32.mrb[55].mxu0  ;;  %5277 = vrot.lane.b32.xlu0 %v4972_v35, %s14563_s27  ;;  %v4959_v31 = vsel %vm861_vm2, %v4913_v53, %v4914_v25  ;;  %v12752_v38 = vpack.c.bf16 %v5152_v29, %v5153_v27 }
 0x5ef   : > { %v12754_v37 = vpack.c.bf16 %v4959_v31, %v4960_v50  ;;  %v5151_v11 = vsel %vm1056_vm0, %v5105_v57, %v5106_v9 }
 0x5f0   : > { %v4827_v61 = vmax.f32 %v4795_v16, 0.0  ;;  %v4796_v51 = vadd.f32 %v4702_v34, %v14615_v39  ;;  %5611 = vst.msk [vmem:[#allocation3 + $0x28] sm:$0xff] %vm2249_vm13, %v12752_v38 }
 0x5f1   : > { %5197 = vrot.lane.b32.xlu1 %v12687_v10, %s14561_s9  ;;  %4990 = vst.msk [vmem:[#allocation3 + $0x50] sm:$0xff] %vm2249_vm13, %v12754_v37 }
 0x5f2   : > { %v4915_v35 = vrot.slane %v4827_v61, 7  ;;  %v5107_v36 = vrot.slane %v4827_v61, 1  ;;  %v4828_v44 = vmax.f32 %v4796_v51, 0.0  ;;  %5549 = vrot.lane.b32.xlu0 %v12713_v43, %s9757_s3 }
 0x5f3   : > { %v4706_v13 = vpop.f32.mrb[56].mxu0 }
 0x5f4   : > { %v4916_v56 = vrot.slane %v4828_v44, 7  ;;  %v5108_v6 = vrot.slane %v4828_v44, 1  ;;  %v4707_v0 = vadd.f32 %v12632_v48, %v4706_v13  ;;  %v4708_v21 = vpop.f32.mrb[57].mxu0  ;;  %v12768_v23 = vpack.c.bf16 %v4828_v44, %v4827_v61 }
 0x5f5   : > { %v4709_v40 = vpop.f32.mrb[58].mxu0  ;;  %5485 = vrot.lane.b32.xlu1 %v4973_v17, %s14529_s4  ;;  %v4958_v10 = vsel %vm861_vm2, %v4914_v25, %v4915_v35  ;;  %v5150_v20 = vsel %vm1056_vm0, %v5106_v9, %v5107_v36 }
 0x5f6   : > { %v4797_v32 = vadd.f32 %v4707_v0, %v14616_v7  ;;  %v4710_v18 = vadd.f32 %v12632_v48, %v4709_v40  ;;  %v4711_v52 = vpop.f32.mrb[59].mxu0  ;;  %5359 = vrot.lane.b32.xlu0 %v12713_v43, %s14565_s26  ;;  %v4957_v26 = vsel %vm861_vm2, %v4915_v35, %v4916_v56  ;;  %v12781_v3 = vpack.c.bf16 %v5150_v20, %v5151_v11  ;;  %v14619_v11 = vld [vmem:[#allocation26_spill] sm:$0xff]  ;;  %v14620_v20 = vld [vmem:[#allocation31_spill] sm:$0xff] }
 0x5f7   : > { %v12783_v22 = vpack.c.bf16 %v4957_v26, %v4958_v10  ;;  %v5149_v55 = vsel %vm1056_vm0, %v5107_v36, %v5108_v6 }
 0x5f8   : > { %v4829_v8 = vmax.f32 %v4797_v32, 0.0  ;;  %v4798_v42 = vadd.f32 %v4710_v18, %v14617_v33  ;;  %5612 = vst.msk [vmem:[#allocation3 + $0x38] sm:$0xff] %vm2249_vm13, %v12781_v3  ;;  %v14621_v33 = vld [vmem:[#allocation32_spill] sm:$0xff] }
 0x5f9   : > { %5279 = vrot.lane.b32.xlu1 %v4973_v17, %s14563_s27  ;;  %4991 = vst.msk [vmem:[#allocation3 + $0x60] sm:$0xff] %vm2249_vm13, %v12783_v22 }
 0x5fa   : > { %v4917_v27 = vrot.slane %v4829_v8, 7  ;;  %v5109_v59 = vrot.slane %v4829_v8, 1  ;;  %v4830_v28 = vmax.f32 %v4798_v42, 0.0  ;;  %5041 = vrot.lane.b32.xlu0 %v12713_v43, %s14559_s1 }
 0x5fb   : > { %v4714_v15 = vpop.f32.mrb[60].mxu0 }
 0x5fc   : > { %v4918_v53 = vrot.slane %v4830_v28, 7  ;;  %v5110_v57 = vrot.slane %v4830_v28, 1  ;;  %v4715_v46 = vadd.f32 %v12632_v48, %v4714_v15  ;;  %v4716_v54 = vpop.f32.mrb[61].mxu0  ;;  %v12796_v25 = vpack.c.bf16 %v4830_v28, %v4829_v8 }
 0x5fd   : > { %5551 = vrot.lane.b32.xlu1 %v12739_v41, %s9757_s3  ;;  %v4717_v17 = vpop.f32.mrb[62].mxu0  ;;  %v5148_v9 = vsel %vm1056_vm0, %v5108_v6, %v5109_v59  ;;  %v4956_v24 = vsel %vm861_vm2, %v4916_v56, %v4917_v27 }
 0x5fe   : > { %v4799_v62 = vadd.f32 %v4715_v46, %v14618_v60  ;;  %v4718_v50 = vadd.f32 %v12632_v48, %v4717_v17  ;;  %5421 = vrot.lane.b32.xlu0 %v12726_v47, %s9759_s6  ;;  %v4719_v29 = vpop.f32.mrb[63].mxu0  ;;  %v12808_v19 = vpack.c.bf16 %v5148_v9, %v5149_v55  ;;  %v4955_v16 = vsel %vm861_vm2, %v4917_v27, %v4918_v53 }
 0x5ff   : > { %v12812_v34 = vpack.c.bf16 %v4955_v16, %v4956_v24  ;;  %v5147_v63 = vsel %vm1056_vm0, %v5109_v59, %v5110_v57 }
 0x600   : > { %v4831_v31 = vmax.f32 %v4799_v62, 0.0  ;;  %v4800_v61 = vadd.f32 %v4718_v50, %v14619_v11  ;;  %5613 = vst.msk [vmem:[#allocation3 + $0x48] sm:$0xff] %vm2249_vm13, %v12808_v19 }
 0x601   : > { %5361 = vrot.lane.b32.xlu1 %v12739_v41, %s14565_s26  ;;  %4992 = vst.msk [vmem:[#allocation3 + $0x70] sm:$0xff] %vm2249_vm13, %v12812_v34 }
 0x602   : > { %v4919_v39 = vrot.slane %v4831_v31, 7  ;;  %v5111_v51 = vrot.slane %v4831_v31, 1  ;;  %v4832_v35 = vmax.f32 %v4800_v61, 0.0  ;;  %5199 = vrot.lane.b32.xlu0 %v12726_v47, %s14561_s9  ;;  %v14623_v61 = vld [vmem:[#allocation30_spill] sm:$0xff] }
 0x603   : > { %v4722_v36 = vpop.f32.mrb[64].mxu0 }
 0x604   : > { %v4920_v44 = vrot.slane %v4832_v35, 7  ;;  %v5112_v13 = vrot.slane %v4832_v35, 1  ;;  %v4723_v56 = vadd.f32 %v12632_v48, %v4722_v36  ;;  %v4724_v6 = vpop.f32.mrb[65].mxu0  ;;  %v4954_v0 = vsel %vm861_vm2, %v4918_v53, %v4919_v39 }
 0x605   : > { %5043 = vrot.lane.b32.xlu1 %v12739_v41, %s14559_s1  ;;  %v4725_v21 = vpop.f32.mrb[66].mxu0  ;;  %v12830_v40 = vpack.c.bf16 %v4832_v35, %v4831_v31  ;;  %v5146_v10 = vsel %vm1056_vm0, %v5110_v57, %v5111_v51 }
 0x606   : > { %v4801_v47 = vadd.f32 %v4723_v56, %v14620_v20  ;;  %v4726_v7 = vadd.f32 %v12632_v48, %v4725_v21  ;;  %5487 = vrot.lane.b32.xlu0 %v12754_v37, %s14529_s4  ;;  %v4727_v32 = vpop.f32.mrb[67].mxu0  ;;  %v4953_v18 = vsel %vm861_vm2, %v4919_v39, %v4920_v44  ;;  %v12840_v52 = vpack.c.bf16 %v5146_v10, %v5147_v63 }
 0x607   : > { %v12842_v26 = vpack.c.bf16 %v4953_v18, %v4954_v0  ;;  %v5145_v55 = vsel %vm1056_vm0, %v5111_v51, %v5112_v13  ;;  %v14624_v18 = vld [vmem:[#allocation35_spill] sm:$0xff] }
 0x608   : > { %v4833_v8 = vmax.f32 %v4801_v47, 0.0  ;;  %v4802_v42 = vadd.f32 %v4726_v7, %v14621_v33  ;;  %5614 = vst.msk [vmem:[#allocation3 + $0x58] sm:$0xff] %vm2249_vm13, %v12840_v52 }
 0x609   : > { %5423 = vrot.lane.b32.xlu1 %v12752_v38, %s9759_s6  ;;  %4993 = vst.msk [vmem:[#allocation3 + $0x80] sm:$0xff] %vm2249_vm13, %v12842_v26 }
 0x60a   : > { %v4921_v27 = vrot.slane %v4833_v8, 7  ;;  %v5113_v59 = vrot.slane %v4833_v8, 1  ;;  %v4834_v28 = vmax.f32 %v4802_v42, 0.0  ;;  %5281 = vrot.lane.b32.xlu0 %v12754_v37, %s14563_s27  ;;  %v14622_v37 = vld [vmem:[#allocation29_spill] sm:$0xff] }
 0x60b   : > { %v4730_v15 = vpop.f32.mrb[68].mxu0 }
 0x60c   : > { %v4922_v53 = vrot.slane %v4834_v28, 7  ;;  %v5114_v57 = vrot.slane %v4834_v28, 1  ;;  %v4731_v46 = vadd.f32 %v12632_v48, %v4730_v15  ;;  %v4732_v54 = vpop.f32.mrb[69].mxu0  ;;  %v5144_v17 = vsel %vm1056_vm0, %v5112_v13, %v5113_v59  ;;  %v9511_v13 = vld [vmem:[%s14450_s15] sm:$0xff]  }
 0x60d   : > { %5201 = vrot.lane.b32.xlu1 %v12752_v38, %s14561_s9  ;;  %v4733_v9 = vpop.f32.mrb[70].mxu0  ;;  %v12860_v24 = vpack.c.bf16 %v5144_v17, %v5145_v55  ;;  %v4952_v60 = vsel %vm861_vm2, %v4920_v44, %v4921_v27  ;;  %v12864_v62 = vpack.c.bf16 %v4834_v28, %v4833_v8  ;;  %6009 = vmatpush1.bf16.msra.mxu1 %v9511_v13  ;;  %v14625_v28 = vld [vmem:[#allocation36_spill] sm:$0xff] }
 0x60e   : > { %v4803_v50 = vadd.f32 %v4731_v46, %v14622_v37  ;;  %v4734_v29 = vadd.f32 %v12632_v48, %v4733_v9  ;;  %5553 = vrot.lane.b32.xlu0 %v12768_v23, %s9757_s3  ;;  %v4735_v16 = vpop.f32.mrb[71].mxu0  ;;  %v4951_v63 = vsel %vm861_vm2, %v4921_v27, %v4922_v53  ;;  %v5143_v38 = vsel %vm1056_vm0, %v5113_v59, %v5114_v57 }
 0x60f   : > { %5615 = vst.msk [vmem:[#allocation3 + $0x68] sm:$0xff] %vm2249_vm13, %v12860_v24  ;;  %v12876_v31 = vpack.c.bf16 %v4951_v63, %v4952_v60  ;;  %6010 = vmatprep.subr.bf16.mxu1 %v14598_v4 }
 0x610   : > { %v4835_v11 = vmax.f32 %v4803_v50, 0.0  ;;  %v4804_v39 = vadd.f32 %v4734_v29, %v14623_v61 }
 0x611   : > { %5489 = vrot.lane.b32.xlu1 %v12783_v22, %s14529_s4  ;;  %4994 = vst.msk [vmem:[#allocation3 + $0x90] sm:$0xff] %vm2249_vm13, %v12876_v31 }
 0x612   : > { %v4923_v51 = vrot.slane %v4835_v11, 7  ;;  %v5115_v35 = vrot.slane %v4835_v11, 1  ;;  %v4836_v36 = vmax.f32 %v4804_v39, 0.0  ;;  %5363 = vrot.lane.b32.xlu0 %v12768_v23, %s14565_s26 }
 0x613   : > { %v4738_v44 = vpop.f32.mrb[72].mxu0 }
 0x614   : > { %v4924_v56 = vrot.slane %v4836_v36, 7  ;;  %v5116_v6 = vrot.slane %v4836_v36, 1  ;;  %v4739_v0 = vadd.f32 %v12632_v48, %v4738_v44  ;;  %v4740_v21 = vpop.f32.mrb[73].mxu0  ;;  %v5142_v10 = vsel %vm1056_vm0, %v5114_v57, %v5115_v35 }
 0x615   : > { %5283 = vrot.lane.b32.xlu1 %v12783_v22, %s14563_s27  ;;  %v4741_v20 = vpop.f32.mrb[74].mxu0  ;;  %v12893_v47 = vpack.c.bf16 %v5142_v10, %v5143_v38  ;;  %v4950_v7 = vsel %vm861_vm2, %v4922_v53, %v4923_v51  ;;  %v12897_v32 = vpack.c.bf16 %v4836_v36, %v4835_v11  ;;  %v14626_v11 = vld [vmem:[#allocation33_spill] sm:$0xff] }
 0x616   : > { %v4805_v55 = vadd.f32 %v4739_v0, %v14624_v18  ;;  %v4742_v8 = vadd.f32 %v12632_v48, %v4741_v20  ;;  %5045 = vrot.lane.b32.xlu0 %v12768_v23, %s14559_s1  ;;  %v4743_v33 = vpop.f32.mrb[75].mxu0  ;;  %v4949_v22 = vsel %vm861_vm2, %v4923_v51, %v4924_v56  ;;  %v5141_v42 = vsel %vm1056_vm0, %v5115_v35, %v5116_v6  ;;  %v9512_v20 = vld [vmem:[%s14450_s15 + $0x8] sm:$0xff]  }
 0x617   : > { %5616 = vst.msk [vmem:[#allocation3 + $0x78] sm:$0xff] %vm2249_vm13, %v12893_v47  ;;  %v12909_v27 = vpack.c.bf16 %v4949_v22, %v4950_v7  ;;  %6011 = vmatpush1.bf16.msra.mxu1 %v9512_v20 }
 0x618   : > { %v4837_v59 = vmax.f32 %v4805_v55, 0.0  ;;  %v4806_v15 = vadd.f32 %v4742_v8, %v14625_v28  ;;  %6012 = vmatprep.subr.bf16.mxu1 %v14598_v4 }
 0x619   : > { %5555 = vrot.lane.b32.xlu1 %v12796_v25, %s9757_s3  ;;  %4995 = vst.msk [vmem:[#allocation3 + $0xa0] sm:$0xff] %vm2249_vm13, %v12909_v27 }
 0x61a   : > { %v4925_v53 = vrot.slane %v4837_v59, 7  ;;  %v5117_v57 = vrot.slane %v4837_v59, 1  ;;  %v4838_v46 = vmax.f32 %v4806_v15, 0.0  ;;  %5425 = vrot.lane.b32.xlu0 %v12781_v3, %s9759_s6  ;;  %v14628_v15 = vld [vmem:[#allocation38_spill] sm:$0xff] }
 0x61b   : > { %v4746_v54 = vpop.f32.mrb[76].mxu0 }
 0x61c   : > { %v4926_v17 = vrot.slane %v4838_v46, 7  ;;  %v5118_v9 = vrot.slane %v4838_v46, 1  ;;  %v4747_v60 = vadd.f32 %v12632_v48, %v4746_v54  ;;  %v4748_v37 = vpop.f32.mrb[77].mxu0  ;;  %v5140_v50 = vsel %vm1056_vm0, %v5116_v6, %v5117_v57 }
 0x61d   : > { %5365 = vrot.lane.b32.xlu1 %v12796_v25, %s14565_s26  ;;  %v4749_v29 = vpop.f32.mrb[78].mxu0  ;;  %v12924_v16 = vpack.c.bf16 %v5140_v50, %v5141_v42  ;;  %v4948_v63 = vsel %vm861_vm2, %v4924_v56, %v4925_v53  ;;  %v12928_v38 = vpack.c.bf16 %v4838_v46, %v4837_v59  ;;  %v14627_v56 = vld [vmem:[#allocation34_spill] sm:$0xff] }
 0x61e   : > { %v4807_v61 = vadd.f32 %v4747_v60, %v14626_v11  ;;  %v4750_v39 = vadd.f32 %v12632_v48, %v4749_v29  ;;  %5203 = vrot.lane.b32.xlu0 %v12781_v3, %s14561_s9  ;;  %v4751_v51 = vpop.f32.mrb[79].mxu0  ;;  %v4947_v35 = vsel %vm861_vm2, %v4925_v53, %v4926_v17  ;;  %v5139_v36 = vsel %vm1056_vm0, %v5117_v57, %v5118_v9  ;;  %v14629_v60 = vld [vmem:[#allocation39_spill] sm:$0xff] }
 0x61f   : > { %5617 = vst.msk [vmem:[#allocation3 + $0x88] sm:$0xff] %vm2249_vm13, %v12924_v16  ;;  %v12940_v44 = vpack.c.bf16 %v4947_v35, %v4948_v63 }
 0x620   : > { %v4839_v13 = vmax.f32 %v4807_v61, 0.0  ;;  %v4808_v6 = vadd.f32 %v4750_v39, %v14627_v56 }
 0x621   : > { %5427 = vrot.lane.b32.xlu1 %v12808_v19, %s9759_s6  ;;  %4996 = vst.msk [vmem:[#allocation3 + $0xb0] sm:$0xff] %vm2249_vm13, %v12940_v44 }
 0x622   : > { %v4927_v3 = vrot.slane %v4839_v13, 7  ;;  %v5119_v0 = vrot.slane %v4839_v13, 1  ;;  %v4840_v21 = vmax.f32 %v4808_v6, 0.0  ;;  %5491 = vrot.lane.b32.xlu0 %v12812_v34, %s14529_s4 }
 0x623   : > { %v4754_v10 = vpop.f32.mrb[80].mxu0 }
 0x624   : > { %v4928_v7 = vrot.slane %v4840_v21, 7  ;;  %v5120_v18 = vrot.slane %v4840_v21, 1  ;;  %v4755_v55 = vadd.f32 %v12632_v48, %v4754_v10  ;;  %v4756_v8 = vpop.f32.mrb[81].mxu0  ;;  %v5138_v33 = vsel %vm1056_vm0, %v5118_v9, %v5119_v0 }
 0x625   : > { %5205 = vrot.lane.b32.xlu1 %v12808_v19, %s14561_s9  ;;  %v4757_v22 = vpop.f32.mrb[82].mxu0  ;;  %v12957_v42 = vpack.c.bf16 %v5138_v33, %v5139_v36  ;;  %v4946_v59 = vsel %vm861_vm2, %v4926_v17, %v4927_v3  ;;  %v12961_v28 = vpack.c.bf16 %v4840_v21, %v4839_v13 }
 0x626   : > { %v4809_v53 = vadd.f32 %v4755_v55, %v14628_v15  ;;  %v4758_v57 = vadd.f32 %v12632_v48, %v4757_v22  ;;  %5285 = vrot.lane.b32.xlu0 %v12812_v34, %s14563_s27  ;;  %v4759_v46 = vpop.f32.mrb[83].mxu0  ;;  %v4945_v19 = vsel %vm861_vm2, %v4927_v3, %v4928_v7  ;;  %v5137_v54 = vsel %vm1056_vm0, %v5119_v0, %v5120_v18  ;;  %v9513_v3 = vld [vmem:[%s14450_s15 + $0x10] sm:$0xff]  }
 0x627   : > { %5618 = vst.msk [vmem:[#allocation3 + $0x98] sm:$0xff] %vm2249_vm13, %v12957_v42  ;;  %v12973_v17 = vpack.c.bf16 %v4945_v19, %v4946_v59  ;;  %v14630_v0 = vld [vmem:[#allocation37_spill] sm:$0xff]  ;;  %6013 = vmatpush1.bf16.msra.mxu1 %v9513_v3 }
 0x628   : > { %v4841_v9 = vmax.f32 %v4809_v53, 0.0  ;;  %v4810_v37 = vadd.f32 %v4758_v57, %v14629_v60  ;;  %6014 = vmatprep.subr.bf16.mxu1 %v14598_v4 }
 0x629   : > { %5493 = vrot.lane.b32.xlu1 %v12842_v26, %s14529_s4  ;;  %4997 = vst.msk [vmem:[#allocation3 + $0xc0] sm:$0xff] %vm2249_vm13, %v12973_v17 }
 0x62a   : > { %v4929_v34 = vrot.slane %v4841_v9, 7  ;;  %v5121_v50 = vrot.slane %v4841_v9, 1  ;;  %v4842_v29 = vmax.f32 %v4810_v37, 0.0  ;;  %5557 = vrot.lane.b32.xlu0 %v12830_v40, %s9757_s3 }
 0x62b   : > { %v4762_v63 = vpop.f32.mrb[84].mxu0 }
 0x62c   : > { %v4930_v11 = vrot.slane %v4842_v29, 7  ;;  %v5122_v61 = vrot.slane %v4842_v29, 1  ;;  %v4763_v39 = vadd.f32 %v12632_v48, %v4762_v63  ;;  %v4764_v51 = vpop.f32.mrb[85].mxu0  ;;  %v5136_v35 = vsel %vm1056_vm0, %v5120_v18, %v5121_v50 }
 0x62d   : > { %v4765_v36 = vpop.f32.mrb[86].mxu0  ;;  %v12986_v13 = vpack.c.bf16 %v5136_v35, %v5137_v54  ;;  %v4944_v56 = vsel %vm861_vm2, %v4928_v7, %v4929_v34  ;;  %v12990_v6 = vpack.c.bf16 %v4842_v29, %v4841_v9  ;;  %v14631_v29 = vld [vmem:[#allocation42_spill] sm:$0xff] }
 0x62e   : > { %v4811_v21 = vadd.f32 %v4763_v39, %v14630_v0  ;;  %v4766_v10 = vadd.f32 %v12632_v48, %v4765_v36  ;;  %5429 = vrot.lane.b32.xlu0 %v12840_v52, %s9759_s6  ;;  %v4767_v20 = vpop.f32.mrb[87].mxu0  ;;  %v4943_v18 = vsel %vm861_vm2, %v4929_v34, %v4930_v11  ;;  %v5135_v7 = vsel %vm1056_vm0, %v5121_v50, %v5122_v61  ;;  %v9514_v50 = vld [vmem:[%s14450_s15 + $0x18] sm:$0xff]   ;;  %v9515_v0 = vld [vmem:[%s14450_s15 + $0x20] sm:$0xff]  }
 0x62f   : > { %5619 = vst.msk [vmem:[#allocation3 + $0xa8] sm:$0xff] %vm2249_vm13, %v12986_v13  ;;  %v13005_v55 = vpack.c.bf16 %v4943_v18, %v4944_v56  ;;  %6015 = vmatpush1.bf16.msra.mxu1 %v9514_v50  ;;  %v14632_v56 = vld [vmem:[#allocation43_spill] sm:$0xff] }
 0x630   : > { %v4843_v8 = vmax.f32 %v4811_v21, 0.0  ;;  %v4812_v33 = vadd.f32 %v4766_v10, %v11208_v12  ;;  %6016 = vmatprep.subr.bf16.mxu1 %v14598_v4 }
 0x631   : > { %4998 = vst.msk [vmem:[#allocation3 + $0xd0] sm:$0xff] %vm2249_vm13, %v13005_v55 }
 0x632   : > { %v4931_v22 = vrot.slane %v4843_v8, 7  ;;  %v5123_v59 = vrot.slane %v4843_v8, 1  ;;  %v4844_v15 = vmax.f32 %v4812_v33, 0.0 }
 0x633   : > { %v4770_v53 = vpop.f32.mrb[88].mxu0  ;;  %6017 = vmatpush1.bf16.msra.mxu1 %v9515_v0 }
 0x634   : > { %v4932_v57 = vrot.slane %v4844_v15, 7  ;;  %v5124_v46 = vrot.slane %v4844_v15, 1  ;;  %v4771_v19 = vadd.f32 %v12632_v48, %v4770_v53  ;;  %v4772_v54 = vpop.f32.mrb[89].mxu0  ;;  %v5134_v9 = vsel %vm1056_vm0, %v5122_v61, %v5123_v59  ;;  %6018 = vmatprep.subr.bf16.mxu1 %v14598_v4 }
 0x635   : > { %v4773_v60 = vpop.f32.mrb[90].mxu0  ;;  %v13014_v37 = vpack.c.bf16 %v5134_v9, %v5135_v7  ;;  %v4942_v12 = vsel %vm861_vm2, %v4930_v11, %v4931_v22  ;;  %v13018_v34 = vpack.c.bf16 %v4844_v15, %v4843_v8 }
 0x636   : > { %v4813_v63 = vadd.f32 %v4771_v19, %v14631_v29  ;;  %v4774_v39 = vadd.f32 %v12632_v48, %v4773_v60  ;;  %v4775_v51 = vpop.f32.mrb[91].mxu0  ;;  %v4941_v61 = vsel %vm861_vm2, %v4931_v22, %v4932_v57  ;;  %v5133_v35 = vsel %vm1056_vm0, %v5123_v59, %v5124_v46 }
 0x637   : > { %5620 = vst.msk [vmem:[#allocation3 + $0xb8] sm:$0xff] %vm2249_vm13, %v13014_v37  ;;  %v13031_v11 = vpack.c.bf16 %v4941_v61, %v4942_v12  ;;  %v14633_v12 = vld [vmem:[#allocation40_spill] sm:$0xff]  ;;  %v14634_v61 = vld [vmem:[#allocation41_spill] sm:$0xff] }
 0x638   : > { %v4845_v36 = vmax.f32 %v4813_v63, 0.0  ;;  %v4814_v3 = vadd.f32 %v4774_v39, %v14632_v56 }
 0x639   : > { %4999 = vst.msk [vmem:[#allocation3 + $0xe0] sm:$0xff] %vm2249_vm13, %v13031_v11 }
 0x63a   : > { %v4933_v21 = vrot.slane %v4845_v36, 7  ;;  %v5125_v10 = vrot.slane %v4845_v36, 1  ;;  %v4846_v20 = vmax.f32 %v4814_v3, 0.0 }
 0x63c   : > { %v4934_v18 = vrot.slane %v4846_v20, 7  ;;  %v5126_v7 = vrot.slane %v4846_v20, 1  ;;  %v5132_v8 = vsel %vm1056_vm0, %v5124_v46, %v5125_v10  ;;  %v4940_v33 = vsel %vm861_vm2, %v4932_v57, %v4933_v21  ;;  %v9516_v46 = vld [vmem:[%s14450_s15 + $0x28] sm:$0xff]  }
 0x63d   : > { %v13045_v22 = vpack.c.bf16 %v5132_v8, %v5133_v35  ;;  %v13047_v59 = vpack.c.bf16 %v4846_v20, %v4845_v36  ;;  %v4778_v15 = vpop.f32.mrb[92].mxu0  ;;  %6019 = vmatpush1.bf16.msra.mxu1 %v9516_v46  ;;  %v9517_v36 = vld [vmem:[%s14450_s15 + $0x30] sm:$0xff]  }
 0x63e   : > { %v4939_v53 = vsel %vm861_vm2, %v4933_v21, %v4934_v18  ;;  %v5131_v19 = vsel %vm1056_vm0, %v5125_v10, %v5126_v7  ;;  %v4779_v54 = vadd.f32 %v12632_v48, %v4778_v15  ;;  %v4780_v9 = vpop.f32.mrb[93].mxu0  ;;  %6020 = vmatprep.subr.bf16.mxu1 %v14598_v4 }
 0x63f   : > { %5621 = vst.msk [vmem:[#allocation3 + $0xc8] sm:$0xff] %vm2249_vm13, %v13045_v22  ;;  %v13056_v57 = vpack.c.bf16 %v4939_v53, %v4940_v33  ;;  %v4781_v60 = vpop.f32.mrb[94].mxu0  ;;  %v9518_v33 = vld [vmem:[%s14450_s15 + $0x38] sm:$0xff]  }
 0x640   : > { %v4815_v50 = vadd.f32 %v4779_v54, %v14633_v12  ;;  %v13062_v29 = vpop.permute.xlu1 %5353  ;;  %v4782_v63 = vadd.f32 %v12632_v48, %v4781_v60  ;;  %v4783_v39 = vpop.f32.mrb[95].mxu0 }
 0x641   : > { %5000 = vst.msk [vmem:[#allocation3 + $0xf0] sm:$0xff] %vm2249_vm13, %v13056_v57  ;;  %6021 = vmatpush1.bf16.msra.mxu1 %v9517_v36 }
 0x642   : > { %v4847_v51 = vmax.f32 %v4815_v50, 0.0  ;;  %v4816_v35 = vadd.f32 %v4782_v63, %v14634_v61  ;;  %6022 = vmatprep.subr.bf16.mxu1 %v14598_v4 }
 0x644   : > { %v4935_v56 = vrot.slane %v4847_v51, 7  ;;  %v5127_v3 = vrot.slane %v4847_v51, 1  ;;  %v4848_v0 = vmax.f32 %v4816_v35, 0.0  ;;  %v5036_v20 = vpop.permute.xlu1 %5035 }
 0x645   : > { %6023 = vmatpush1.bf16.msra.mxu1 %v9518_v33 }
 0x646   : > { %v4938_v48 = vsel %vm861_vm2, %v4934_v18, %v4935_v56  ;;  %v4936_v21 = vrot.slane %v4848_v0, 7  ;;  %v5128_v10 = vrot.slane %v4848_v0, 1  ;;  %v13075_v8 = vpack.c.bf16 %v4848_v0, %v4847_v51  ;;  %6024 = vmatprep.subr.bf16.mxu1 %v14598_v4 }
 0x647   : > { %v5130_v53 = vsel %vm1056_vm0, %v5126_v7, %v5127_v3 }
 0x648   : > { %v13080_v15 = vpop.permute.xlu0 %5545  ;;  %v4937_v54 = vsel %vm861_vm2, %v4935_v56, %v4936_v21  ;;  %v4968_v18 = vsel %vm861_vm2, %v4936_v21, %v4905_v58  ;;  %5033 = vrot.lane.b32.xlu0 %v13075_v8, %s14559_s1  ;;  %v5129_v9 = vsel %vm1056_vm0, %v5127_v3, %v5128_v10  ;;  %v5160_v46 = vsel %vm1056_vm0, %v5128_v10, %v5097_v14 }
 0x649   : > { %v13099_v7 = vpack.c.bf16 %v12649_v49, %v4968_v18  ;;  %v13101_v60 = vpack.c.bf16 %v5160_v46, %v5129_v9  ;;  %v13103_v12 = vpack.c.bf16 %v5130_v53, %v5131_v19  ;;  %v13105_v50 = vpack.c.bf16 %v4937_v54, %v4938_v48  ;;  %6025 = vmatpush1.bf16.msra.mxu1 %v9519_v5 }
 0x64b   : > { %v13107_v58 = vpop.permute.xlu1 %5481  ;;  %4986 = vst.msk [vmem:[#allocation3 + $0x10] sm:$0xff] %vm2249_vm13, %v13099_v7  ;;  %5193 = vrot.lane.b32.xlu1 %v13101_v60, %s14561_s9  ;;  %5623 = vst.msk [vmem:[#allocation3 + $0xe8] sm:$0xff] %vm2249_vm13, %v13101_v60 }
 0x64c   : > { %v5356_v49 = vpop.permute.xlu0 %5355  ;;  %5622 = vst.msk [vmem:[#allocation3 + $0xd8] sm:$0xff] %vm2249_vm13, %v13103_v12  ;;  %4985 = vst.msk [vmem:[#allocation3] sm:$0xff] %vm2249_vm13, %v13105_v50  ;;  %5273 = vrot.lane.b32.xlu0 %v13099_v7, %s14563_s27 }
 0x64d   : > { %5082 = vst.msk [vmem:[#allocation3 + $0x10] sm:$0xff] %vm2346_vm14, %v5036_v20 }
 0x64f   : > { %v5276_v4 = vpop.permute.xlu1 %5275  ;;  %5047 = vrot.lane.b32.xlu1 %v12796_v25, %s14559_s1 }
 0x650   : > { %v5038_v14 = vpop.permute.xlu0 %5037  ;;  %5207 = vrot.lane.b32.xlu0 %v12840_v52, %s14561_s9 }
 0x651   : > { %5083 = vst.msk [vmem:[#allocation3 + $0x20] sm:$0xff] %vm2346_vm14, %v5038_v14 }
 0x653   : > { %v5548_v19 = vpop.permute.xlu1 %5547  ;;  %5287 = vrot.lane.b32.xlu1 %v12842_v26, %s14563_s27 }
 0x654   : > { %v13133_v63 = vpop.permute.xlu0 %5417  ;;  %5367 = vrot.lane.b32.xlu0 %v12830_v40, %s14565_s26 }
 0x657   : > { %v5358_v39 = vpop.permute.xlu1 %5357  ;;  %5431 = vrot.lane.b32.xlu1 %v12860_v24, %s9759_s6 }
 0x658   : > { %v5196_v51 = vpop.permute.xlu0 %5195  ;;  %5495 = vrot.lane.b32.xlu0 %v12876_v31, %s14529_s4 }
 0x659   : > { %5242 = vst.msk [vmem:[#allocation3 + $0x10] sm:$0xff] %vm2507_vm15, %v5196_v51 }
 0x65a   : > { %5322 = vst.msk [vmem:[#allocation3 + $0x10] sm:$0xff] %vm2588_vm1, %v5276_v4 }
 0x65b   : > { %5402 = vst.msk [vmem:[#allocation3 + $0x10] sm:$0xff] %vm2669_vm3, %v5356_v49  ;;  %v5040_v52 = vpop.permute.xlu1 %5039  ;;  %5559 = vrot.lane.b32.xlu1 %v12864_v62, %s9757_s3 }
 0x65c   : > { %5084 = vst.msk [vmem:[#allocation3 + $0x30] sm:$0xff] %vm2346_vm14, %v5040_v52  ;;  %v5484_v26 = vpop.permute.xlu0 %5483  ;;  %5049 = vrot.lane.b32.xlu0 %v12830_v40, %s14559_s1 }
 0x65f   : > { %v5420_v61 = vpop.permute.xlu1 %5419  ;;  %5209 = vrot.lane.b32.xlu1 %v12860_v24, %s14561_s9 }
 0x660   : > { %5466 = vst.msk [vmem:[#allocation3 + $0x10] sm:$0xff] %vm2734_vm4, %v5420_v61  ;;  %v5278_v35 = vpop.permute.xlu0 %5277  ;;  %5289 = vrot.lane.b32.xlu0 %v12876_v31, %s14563_s27 }
 0x661   : > { %5530 = vst.msk [vmem:[#allocation3 + $0x10] sm:$0xff] %vm2799_vm5, %v5484_v26 }
 0x662   : > { %5594 = vst.msk [vmem:[#allocation3 + $0x10] sm:$0xff] %vm2864_vm6, %v5548_v19 }
 0x663   : > { %v5198_v36 = vpop.permute.xlu1 %5197  ;;  %5369 = vrot.lane.b32.xlu1 %v12864_v62, %s14565_s26 }
 0x664   : > { %5243 = vst.msk [vmem:[#allocation3 + $0x20] sm:$0xff] %vm2507_vm15, %v5198_v36  ;;  %v5550_v56 = vpop.permute.xlu0 %5549  ;;  %5433 = vrot.lane.b32.xlu0 %v12893_v47, %s9759_s6 }
 0x665   : > { %5323 = vst.msk [vmem:[#allocation3 + $0x20] sm:$0xff] %vm2588_vm1, %v5278_v35 }
 0x666   : > { %5403 = vst.msk [vmem:[#allocation3 + $0x20] sm:$0xff] %vm2669_vm3, %v5358_v39 }
 0x667   : > { %v5486_v24 = vpop.permute.xlu1 %5485  ;;  %5497 = vrot.lane.b32.xlu1 %v12909_v27, %s14529_s4 }
 0x668   : > { %v5360_v31 = vpop.permute.xlu0 %5359  ;;  %5561 = vrot.lane.b32.xlu0 %v12897_v32, %s9757_s3 }
 0x66b   : > { %v5280_v3 = vpop.permute.xlu1 %5279  ;;  %5051 = vrot.lane.b32.xlu1 %v12864_v62, %s14559_s1 }
 0x66c   : > { %v5042_v0 = vpop.permute.xlu0 %5041  ;;  %5211 = vrot.lane.b32.xlu0 %v12893_v47, %s14561_s9 }
 0x66d   : > { %5085 = vst.msk [vmem:[#allocation3 + $0x40] sm:$0xff] %vm2346_vm14, %v5042_v0  ;;  %v9522_v0 = vld [vmem:[%s14573_s24 + $0x24] ss:$8 sps:$4 sm:$0xff]  }
 0x66f   : > { %v5552_v48 = vpop.permute.xlu1 %5551  ;;  %5291 = vrot.lane.b32.xlu1 %v12909_v27, %s14563_s27 }
 0x670   : > { %v5422_v21 = vpop.permute.xlu0 %5421  ;;  %5371 = vrot.lane.b32.xlu0 %v12897_v32, %s14565_s26 }
 0x671   : > { %5467 = vst.msk [vmem:[#allocation3 + $0x20] sm:$0xff] %vm2734_vm4, %v5422_v21  ;;  %v5630_v21 = vld [vmem:[#allocation3 + $0x28] sm:$0xff] }
 0x672   : > { %5531 = vst.msk [vmem:[#allocation3 + $0x20] sm:$0xff] %vm2799_vm5, %v5486_v24 }
 0x673   : > { %5595 = vst.msk [vmem:[#allocation3 + $0x20] sm:$0xff] %vm2864_vm6, %v5550_v56  ;;  %v5362_v10 = vpop.permute.xlu1 %5361  ;;  %5435 = vrot.lane.b32.xlu1 %v12924_v16, %s9759_s6 }
 0x674   : > { %v5200_v20 = vpop.permute.xlu0 %5199  ;;  %5499 = vrot.lane.b32.xlu0 %v12940_v44, %s14529_s4 }
 0x675   : > { %5244 = vst.msk [vmem:[#allocation3 + $0x30] sm:$0xff] %vm2507_vm15, %v5200_v20 }
 0x676   : > { %5324 = vst.msk [vmem:[#allocation3 + $0x30] sm:$0xff] %vm2588_vm1, %v5280_v3  ;;  %v5627_v3 = vld [vmem:[#allocation3 + $0x10] sm:$0xff] }
 0x677   : > { %5404 = vst.msk [vmem:[#allocation3 + $0x30] sm:$0xff] %vm2669_vm3, %v5360_v31  ;;  %v5044_v47 = vpop.permute.xlu1 %5043  ;;  %5563 = vrot.lane.b32.xlu1 %v12928_v38, %s9757_s3 }
 0x678   : > { %5086 = vst.msk [vmem:[#allocation3 + $0x50] sm:$0xff] %vm2346_vm14, %v5044_v47  ;;  %v5488_v27 = vpop.permute.xlu0 %5487  ;;  %5053 = vrot.lane.b32.xlu0 %v12897_v32, %s14559_s1  ;;  %v5661_v47 = vld [vmem:[%s14573_s24 + $0x20] sm:$0xff] }
 0x67b   : > { %v5424_v33 = vpop.permute.xlu1 %5423  ;;  %5213 = vrot.lane.b32.xlu1 %v12924_v16, %s14561_s9 }
 0x67c   : > { %5468 = vst.msk [vmem:[#allocation3 + $0x30] sm:$0xff] %vm2734_vm4, %v5424_v33  ;;  %v5282_v53 = vpop.permute.xlu0 %5281  ;;  %5293 = vrot.lane.b32.xlu0 %v12940_v44, %s14563_s27  ;;  %v5854_v33 = vmul.bf16 %v9522_v0, %v5630_v21 }
 0x67d   : > { %5532 = vst.msk [vmem:[#allocation3 + $0x30] sm:$0xff] %vm2799_vm5, %v5488_v27  ;;  %v5662_v27 = vld [vmem:[%s14573_s24 + $0x28] sm:$0xff] }
 0x67e   : > { %5596 = vst.msk [vmem:[#allocation3 + $0x30] sm:$0xff] %vm2864_vm6, %v5552_v48 }
 0x67f   : > { %v5202_v54 = vpop.permute.xlu1 %5201  ;;  %5373 = vrot.lane.b32.xlu1 %v12928_v38, %s14565_s26 }
 0x680   : > { %5245 = vst.msk [vmem:[#allocation3 + $0x40] sm:$0xff] %vm2507_vm15, %v5202_v54  ;;  %v5554_v18 = vpop.permute.xlu0 %5553  ;;  %5437 = vrot.lane.b32.xlu0 %v12957_v42, %s9759_s6 }
 0x681   : > { %5325 = vst.msk [vmem:[#allocation3 + $0x40] sm:$0xff] %vm2588_vm1, %v5282_v53 }
 0x682   : > { %5405 = vst.msk [vmem:[#allocation3 + $0x40] sm:$0xff] %vm2669_vm3, %v5362_v10 }
 0x683   : > { %v5490_v16 = vpop.permute.xlu1 %5489  ;;  %5501 = vrot.lane.b32.xlu1 %v12973_v17, %s14529_s4 }
 0x684   : > { %v5364_v44 = vpop.permute.xlu0 %5363  ;;  %5565 = vrot.lane.b32.xlu0 %v12961_v28, %s9757_s3 }
 0x687   : > { %v5284_v9 = vpop.permute.xlu1 %5283  ;;  %5055 = vrot.lane.b32.xlu1 %v12928_v38, %s14559_s1 }
 0x688   : > { %v5046_v46 = vpop.permute.xlu0 %5045  ;;  %5215 = vrot.lane.b32.xlu0 %v12957_v42, %s14561_s9 }
 0x689   : > { %5087 = vst.msk [vmem:[#allocation3 + $0x60] sm:$0xff] %vm2346_vm14, %v5046_v46  ;;  %v5632_v46 = vld [vmem:[#allocation3 + $0x38] sm:$0xff] }
 0x68b   : > { %v5556_v5 = vpop.permute.xlu1 %5555  ;;  %5295 = vrot.lane.b32.xlu1 %v12973_v17, %s14563_s27 }
 0x68c   : > { %v5426_v49 = vpop.permute.xlu0 %5425  ;;  %5375 = vrot.lane.b32.xlu0 %v12961_v28, %s14565_s26 }
 0x68d   : > { %5469 = vst.msk [vmem:[#allocation3 + $0x40] sm:$0xff] %vm2734_vm4, %v5426_v49 }
 0x68e   : > { %5533 = vst.msk [vmem:[#allocation3 + $0x40] sm:$0xff] %vm2799_vm5, %v5490_v16  ;;  %v5629_v16 = vld [vmem:[#allocation3 + $0x20] sm:$0xff] }
 0x68f   : > { %5597 = vst.msk [vmem:[#allocation3 + $0x40] sm:$0xff] %vm2864_vm6, %v5554_v18  ;;  %v5366_v4 = vpop.permute.xlu1 %5365  ;;  %5439 = vrot.lane.b32.xlu1 %v12986_v13, %s9759_s6  ;;  %v8724_v18 = vcombine.low %v5661_v47, %v5662_v27  ;;  %v5669_v27 = vld [vmem:[%s14573_s24 + $0x60] sm:$0xff] }
 0x690   : > { %v5204_v14 = vpop.permute.xlu0 %5203  ;;  %5503 = vrot.lane.b32.xlu0 %v13005_v55, %s14529_s4 }
 0x691   : > { %5246 = vst.msk [vmem:[#allocation3 + $0x50] sm:$0xff] %vm2507_vm15, %v5204_v14  ;;  %v5853_v49 = vmul.bf16 %v8724_v18, %v5629_v16  ;;  %v5664_v14 = vld [vmem:[%s14573_s24 + $0x38] sm:$0xff] }
 0x692   : > { %5326 = vst.msk [vmem:[#allocation3 + $0x50] sm:$0xff] %vm2588_vm1, %v5284_v9 }
 0x693   : > { %5406 = vst.msk [vmem:[#allocation3 + $0x50] sm:$0xff] %vm2669_vm3, %v5364_v44  ;;  %v5428_v42 = vpop.permute.xlu1 %5427  ;;  %5567 = vrot.lane.b32.xlu1 %v12990_v6, %s9757_s3  ;;  %v9524_v44 = vld [vmem:[%s14573_s24 + $0x34] ss:$8 sps:$4 sm:$0xff]  }
 0x694   : > { %5470 = vst.msk [vmem:[#allocation3 + $0x50] sm:$0xff] %vm2734_vm4, %v5428_v42  ;;  %v5492_v17 = vpop.permute.xlu0 %5491  ;;  %5057 = vrot.lane.b32.xlu0 %v12961_v28, %s14559_s1  ;;  %v5856_v42 = vmul.bf16 %v9524_v44, %v5632_v46 }
 0x695   : > { %5534 = vst.msk [vmem:[#allocation3 + $0x50] sm:$0xff] %vm2799_vm5, %v5492_v17 }
 0x696   : > { %5598 = vst.msk [vmem:[#allocation3 + $0x50] sm:$0xff] %vm2864_vm6, %v5556_v5 }
 0x697   : > { %v5206_v19 = vpop.permute.xlu1 %5205  ;;  %5217 = vrot.lane.b32.xlu1 %v12986_v13, %s14561_s9 }
 0x698   : > { %5247 = vst.msk [vmem:[#allocation3 + $0x60] sm:$0xff] %vm2507_vm15, %v5206_v19  ;;  %v5286_v39 = vpop.permute.xlu0 %5285  ;;  %5297 = vrot.lane.b32.xlu0 %v13005_v55, %s14563_s27 }
 0x699   : > { %5327 = vst.msk [vmem:[#allocation3 + $0x60] sm:$0xff] %vm2588_vm1, %v5286_v39 }
 0x69a   : > { %5407 = vst.msk [vmem:[#allocation3 + $0x60] sm:$0xff] %vm2669_vm3, %v5366_v4  ;;  %v5663_v4 = vld [vmem:[%s14573_s24 + $0x30] sm:$0xff] }
 0x69b   : > { %5377 = vrot.lane.b32.xlu1 %v12990_v6, %s14565_s26  ;;  %v5494_v13 = vpop.permute.xlu1 %5493  ;;  %v8726_v39 = vcombine.low %v5663_v4, %v5664_v14  ;;  %v5671_v14 = vld [vmem:[%s14573_s24 + $0x70] sm:$0xff] }
 0x69c   : > { %v5558_v51 = vpop.permute.xlu0 %5557  ;;  %5441 = vrot.lane.b32.xlu0 %v13014_v37, %s9759_s6 }
 0x69d   : > { %v5635_v0 = vld [vmem:[#allocation3 + $0x50] sm:$0xff] }
 0x69f   : > { %5505 = vrot.lane.b32.xlu1 %v13031_v11, %s14529_s4 }
 0x6a0   : > { %v5430_v52 = vpop.permute.xlu0 %5429  ;;  %5569 = vrot.lane.b32.xlu0 %v13018_v34, %s9757_s3 }
 0x6a1   : > { %5471 = vst.msk [vmem:[#allocation3 + $0x60] sm:$0xff] %vm2734_vm4, %v5430_v52  ;;  %v9526_v52 = vld [vmem:[%s14573_s24 + $0x44] ss:$8 sps:$4 sm:$0xff]  }
 0x6a2   : > { %5535 = vst.msk [vmem:[#allocation3 + $0x60] sm:$0xff] %vm2799_vm5, %v5494_v13 }
 0x6a3   : > { %5599 = vst.msk [vmem:[#allocation3 + $0x60] sm:$0xff] %vm2864_vm6, %v5558_v51  ;;  %5059 = vrot.lane.b32.xlu1 %v12990_v6, %s14559_s1  ;;  %v5631_v51 = vld [vmem:[#allocation3 + $0x30] sm:$0xff] }
 0x6a4   : > { %5219 = vrot.lane.b32.xlu0 %v13014_v37, %s14561_s9 }
 0x6a7   : > { %5299 = vrot.lane.b32.xlu1 %v13031_v11, %s14563_s27 }
 0x6a8   : > { %5379 = vrot.lane.b32.xlu0 %v13018_v34, %s14565_s26 }
 0x6aa   : > { %v5637_v44 = vld [vmem:[#allocation3 + $0x60] sm:$0xff] }
 0x6ab   : > { %5443 = vrot.lane.b32.xlu1 %v13045_v22, %s9759_s6 }
 0x6ac   : > { %5507 = vrot.lane.b32.xlu0 %v13056_v57, %s14529_s4 }
 0x6af   : > { %5571 = vrot.lane.b32.xlu1 %v13047_v59, %s9757_s3 }
 0x6b0   : > { %5061 = vrot.lane.b32.xlu0 %v13018_v34, %s14559_s1 }
 0x6b3   : > { %5221 = vrot.lane.b32.xlu1 %v13045_v22, %s14561_s9 }
 0x6b4   : > { %5301 = vrot.lane.b32.xlu0 %v13056_v57, %s14563_s27 }
 0x6b7   : > { %5381 = vrot.lane.b32.xlu1 %v13047_v59, %s14565_s26 }
 0x6b8   : > { %5445 = vrot.lane.b32.xlu0 %v13103_v12, %s9759_s6 }
 0x6ba   : > { %v5034_v55 = vpop.permute.xlu0 %5033 }
 0x6bb   : > { %5081 = vst.msk [vmem:[#allocation3] sm:$0xff] %vm2346_vm14, %v5034_v55  ;;  %5063 = vrot.lane.b32.xlu1 %v13047_v59, %s14559_s1  ;;  %v5634_v55 = vld [vmem:[#allocation3 + $0x48] sm:$0xff]  ;;  %s14642_s1 = smov %s14641_s30 }
 0x6bc   : > { %5573 = vrot.lane.b32.xlu0 %v13075_v8, %s9757_s3 }
 0x6bd   : > { %v5194_v37 = vpop.permute.xlu1 %5193 }
 0x6be   : > { %5241 = vst.msk [vmem:[#allocation3] sm:$0xff] %vm2507_vm15, %v5194_v37  ;;  %v5274_v11 = vpop.permute.xlu0 %5273 }
 0x6bf   : > { %5321 = vst.msk [vmem:[#allocation3] sm:$0xff] %vm2588_vm1, %v5274_v11  ;;  %5509 = vrot.lane.b32.xlu1 %v13105_v50, %s14529_s4  ;;  %v5855_v11 = vmul.bf16 %v8726_v39, %v5631_v51 }
 0x6c0   : > { %5401 = vst.msk [vmem:[#allocation3] sm:$0xff] %vm2669_vm3, %v13062_v29  ;;  %5223 = vrot.lane.b32.xlu0 %v13103_v12, %s14561_s9 }
 0x6c1   : > { %5465 = vst.msk [vmem:[#allocation3] sm:$0xff] %vm2734_vm4, %v13133_v63  ;;  %v5048_v22 = vpop.permute.xlu1 %5047  ;;  %v5628_v63 = vld [vmem:[#allocation3 + $0x18] sm:$0xff] }
 0x6c2   : > { %5529 = vst.msk [vmem:[#allocation3] sm:$0xff] %vm2799_vm5, %v13107_v58  ;;  %v5208_v57 = vpop.permute.xlu0 %5207  ;;  %v9508_v58 = vld [vmem:[%s14573_s24] ss:$8 sps:$4 sm:$0xff]  }
 0x6c3   : > { %5088 = vst.msk [vmem:[#allocation3 + $0x70] sm:$0xff] %vm2346_vm14, %v5048_v22  ;;  %5303 = vrot.lane.b32.xlu1 %v13105_v50, %s14563_s27  ;;  %v5665_v22 = vld [vmem:[%s14573_s24 + $0x40] sm:$0xff]  ;;  %s14638_s27 = smov 96  }
 0x6c4   : > { %5593 = vst.msk [vmem:[#allocation3] sm:$0xff] %vm2864_vm6, %v13080_v15  ;;  %5383 = vrot.lane.b32.xlu0 %v13075_v8, %s14565_s26  ;;  %v9520_v15 = vld [vmem:[%s14573_s24 + $0x14] ss:$8 sps:$4 sm:$0xff]  }
 0x6c5   : > { %5248 = vst.msk [vmem:[#allocation3 + $0x70] sm:$0xff] %vm2507_vm15, %v5208_v57  ;;  %v5288_v29 = vpop.permute.xlu1 %5287  ;;  %v5852_v36 = vmul.bf16 %v9520_v15, %v5628_v63  ;;  %v5666_v57 = vld [vmem:[%s14573_s24 + $0x48] sm:$0xff]  ;;  %v9528_v63 = vld [vmem:[%s14573_s24 + $0x54] ss:$8 sps:$4 sm:$0xff]  }
 0x6c6   : > { %5328 = vst.msk [vmem:[#allocation3 + $0x70] sm:$0xff] %vm2588_vm1, %v5288_v29  ;;  %v5368_v12 = vpop.permute.xlu0 %5367  ;;  %v5858_v29 = vmul.bf16 %v9526_v52, %v5634_v55  ;;  %v8728_v15 = vcombine.low %v5665_v22, %v5666_v57  ;;  %v5673_v57 = vld [vmem:[%s14573_s24 + $0x80] sm:$0xff] }
 0x6c7   : > { %5408 = vst.msk [vmem:[#allocation3 + $0x70] sm:$0xff] %vm2669_vm3, %v5368_v12  ;;  %5447 = vrot.lane.b32.xlu1 %v13101_v60, %s9759_s6  ;;  %v5660_v60 = vld [vmem:[%s14573_s24 + $0x18] sm:$0xff]  ;;  %s14635_s6 = sld [smem:[#allocation49_spill]] }
 0x6c8   : > { %5511 = vrot.lane.b32.xlu0 %v13099_v7, %s14529_s4  ;;  %v5659_v7 = vld [vmem:[%s14573_s24 + $0x10] sm:$0xff]  ;;  %s9763_s4 = smov [#allocation6]  }
 0x6c9   : > { %v5432_v50 = vpop.permute.xlu1 %5431  ;;  %v8722_v31 = vcombine.low %v5659_v7, %v5660_v60  ;;  %v5667_v60 = vld [vmem:[%s14573_s24 + $0x50] sm:$0xff] }
 0x6ca   : > { %5472 = vst.msk [vmem:[#allocation3 + $0x70] sm:$0xff] %vm2734_vm4, %v5432_v50  ;;  %v5496_v26 = vpop.permute.xlu0 %5495  ;;  %v5633_v50 = vld [vmem:[#allocation3 + $0x40] sm:$0xff] }
 0x6cb   : > { %v5625_v61 = vld [vmem:[#allocation3] sm:$0xff]  ;;  %5536 = vst.msk [vmem:[#allocation3 + $0x70] sm:$0xff] %vm2799_vm5, %v5496_v26  ;;  %5575 = vrot.lane.b32.xlu1 %v12643_v30, %s9757_s3  ;;  %v5851_v20 = vmul.bf16 %v8722_v31, %v5627_v3  ;;  %v5857_v7 = vmul.bf16 %v8728_v15, %v5633_v50 }
 0x6cc   : > { %v5849_v35 = vmul.bf16 %v9508_v58, %v5625_v61  ;;  %v5636_v61 = vld [vmem:[#allocation3 + $0x58] sm:$0xff] }
 0x6cd   : > { %v5560_v56 = vpop.permute.xlu1 %5559  ;;  %s14636_s5 = smov %s14635_s6 }
 0x6ce   : > { %6041 = vmatmul.mubr.bf16.vlgmr.msra.gmra.mrb[64].mxu1 %v5849_v35  ;;  %5600 = vst.msk [vmem:[#allocation3 + $0x70] sm:$0xff] %vm2864_vm6, %v5560_v56  ;;  %v5050_v24 = vpop.permute.xlu0 %5049  ;;  %v5860_v56 = vmul.bf16 %v9528_v63, %v5636_v61 }
 0x6cf   : > { %8763 = vmatprep.mubr.msk.bf16.mxu1 %vm2249_vm13, %v5852_v36  ;;  %5089 = vst.msk [vmem:[#allocation3 + $0x80] sm:$0xff] %vm2346_vm14, %v5050_v24  ;;  %v5668_v36 = vld [vmem:[%s14573_s24 + $0x58] sm:$0xff] }
 0x6d0   : > { %v8730_v3 = vcombine.low %v5667_v60, %v5668_v36  ;;  %v5675_v36 = vld [vmem:[%s14573_s24 + $0x90] sm:$0xff] }
 0x6d1   : > { %v5210_v48 = vpop.permute.xlu1 %5209 }
 0x6d2   : > { %5249 = vst.msk [vmem:[#allocation3 + $0x80] sm:$0xff] %vm2507_vm15, %v5210_v48  ;;  %v5290_v10 = vpop.permute.xlu0 %5289  ;;  %v9530_v48 = vld [vmem:[%s14573_s24 + $0x64] ss:$8 sps:$4 sm:$0xff]   ;;  %v5859_v47 = vmul.bf16 %v8730_v3, %v5635_v0 }
 0x6d3   : > { %5329 = vst.msk [vmem:[#allocation3 + $0x80] sm:$0xff] %vm2588_vm1, %v5290_v10  ;;  %v5638_v10 = vld [vmem:[#allocation3 + $0x68] sm:$0xff] }
 0x6d5   : > { %v5370_v53 = vpop.permute.xlu1 %5369  ;;  %v5639_v52 = vld [vmem:[#allocation3 + $0x70] sm:$0xff] }
 0x6d6   : > { %6049 = vmatmul.mubr.bf16.gmra.mrb[68].mxu1 %v5851_v20  ;;  %5409 = vst.msk [vmem:[#allocation3 + $0x80] sm:$0xff] %vm2669_vm3, %v5370_v53  ;;  %v5434_v54 = vpop.permute.xlu0 %5433  ;;  %v5862_v53 = vmul.bf16 %v9530_v48, %v5638_v10 }
 0x6d7   : > { %8764 = vmatprep.mubr.msk.bf16.mxu1 %vm2249_vm13, %v5854_v33  ;;  %5473 = vst.msk [vmem:[#allocation3 + $0x80] sm:$0xff] %vm2734_vm4, %v5434_v54  ;;  %v5670_v33 = vld [vmem:[%s14573_s24 + $0x68] sm:$0xff] }
 0x6d8   : > { %v8732_v16 = vcombine.low %v5669_v27, %v5670_v33  ;;  %v5677_v33 = vld [vmem:[%s14573_s24 + $0xa0] sm:$0xff] }
 0x6d9   : > { %v5498_v9 = vpop.permute.xlu1 %5497 }
 0x6da   : > { %5537 = vst.msk [vmem:[#allocation3 + $0x80] sm:$0xff] %vm2799_vm5, %v5498_v9  ;;  %v5562_v5 = vpop.permute.xlu0 %5561  ;;  %v9532_v9 = vld [vmem:[%s14573_s24 + $0x74] ss:$8 sps:$4 sm:$0xff]   ;;  %v5861_v4 = vmul.bf16 %v8732_v16, %v5637_v44 }
 0x6db   : > { %5601 = vst.msk [vmem:[#allocation3 + $0x80] sm:$0xff] %vm2864_vm6, %v5562_v5  ;;  %v5640_v5 = vld [vmem:[#allocation3 + $0x78] sm:$0xff] }
 0x6dd   : > { %v5052_v17 = vpop.permute.xlu1 %5051 }
 0x6de   : > { %6057 = vmatmul.mubr.bf16.gmra.mrb[72].mxu1 %v5853_v49  ;;  %5090 = vst.msk [vmem:[#allocation3 + $0x90] sm:$0xff] %vm2346_vm14, %v5052_v17  ;;  %v5212_v19 = vpop.permute.xlu0 %5211  ;;  %v5864_v17 = vmul.bf16 %v9532_v9, %v5640_v5 }
 0x6df   : > { %8765 = vmatprep.mubr.msk.bf16.mxu1 %vm2249_vm13, %v5856_v42  ;;  %5250 = vst.msk [vmem:[#allocation3 + $0x90] sm:$0xff] %vm2507_vm15, %v5212_v19  ;;  %v5672_v42 = vld [vmem:[%s14573_s24 + $0x78] sm:$0xff] }
 0x6e0   : > { %v8734_v51 = vcombine.low %v5671_v14, %v5672_v42  ;;  %v5679_v42 = vld [vmem:[%s14573_s24 + $0xb0] sm:$0xff] }
 0x6e1   : > { %v5292_v13 = vpop.permute.xlu1 %5291 }
 0x6e2   : > { %5330 = vst.msk [vmem:[#allocation3 + $0x90] sm:$0xff] %vm2588_vm1, %v5292_v13  ;;  %v5372_v37 = vpop.permute.xlu0 %5371  ;;  %v9534_v13 = vld [vmem:[%s14573_s24 + $0x84] ss:$8 sps:$4 sm:$0xff]   ;;  %v5863_v22 = vmul.bf16 %v8734_v51, %v5639_v52 }
 0x6e3   : > { %5410 = vst.msk [vmem:[#allocation3 + $0x90] sm:$0xff] %vm2669_vm3, %v5372_v37  ;;  %v5642_v37 = vld [vmem:[#allocation3 + $0x88] sm:$0xff]  ;;  %v5641_v63 = vld [vmem:[#allocation3 + $0x80] sm:$0xff] }
 0x6e5   : > { %v5436_v12 = vpop.permute.xlu1 %5435 }
 0x6e6   : > { %6065 = vmatmul.mubr.bf16.gmra.mrb[76].mxu1 %v5855_v11  ;;  %5474 = vst.msk [vmem:[#allocation3 + $0x90] sm:$0xff] %vm2734_vm4, %v5436_v12  ;;  %v5500_v58 = vpop.permute.xlu0 %5499  ;;  %v5866_v12 = vmul.bf16 %v9534_v13, %v5642_v37 }
 0x6e7   : > { %8766 = vmatprep.mubr.msk.bf16.mxu1 %vm2249_vm13, %v5858_v29  ;;  %5538 = vst.msk [vmem:[#allocation3 + $0x90] sm:$0xff] %vm2799_vm5, %v5500_v58  ;;  %v5674_v29 = vld [vmem:[%s14573_s24 + $0x88] sm:$0xff] }
 0x6e8   : > { %v8736_v50 = vcombine.low %v5673_v57, %v5674_v29  ;;  %v5681_v29 = vld [vmem:[%s14573_s24 + $0xc0] sm:$0xff] }
 0x6e9   : > { %v5564_v26 = vpop.permute.xlu1 %5563 }
 0x6ea   : > { %5602 = vst.msk [vmem:[#allocation3 + $0x90] sm:$0xff] %vm2864_vm6, %v5564_v26  ;;  %v5054_v35 = vpop.permute.xlu0 %5053  ;;  %v9536_v26 = vld [vmem:[%s14573_s24 + $0x94] ss:$8 sps:$4 sm:$0xff]   ;;  %v5865_v60 = vmul.bf16 %v8736_v50, %v5641_v63 }
 0x6eb   : > { %5091 = vst.msk [vmem:[#allocation3 + $0xa0] sm:$0xff] %vm2346_vm14, %v5054_v35  ;;  %v5644_v35 = vld [vmem:[#allocation3 + $0x98] sm:$0xff] }
 0x6ed   : > { %v5214_v24 = vpop.permute.xlu1 %5213 }
 0x6ee   : > { %6073 = vmatmul.mubr.bf16.gmra.mrb[80].mxu1 %v5857_v7  ;;  %5251 = vst.msk [vmem:[#allocation3 + $0xa0] sm:$0xff] %vm2507_vm15, %v5214_v24  ;;  %v5294_v31 = vpop.permute.xlu0 %5293  ;;  %v5868_v24 = vmul.bf16 %v9536_v26, %v5644_v35 }
 0x6ef   : > { %8767 = vmatprep.mubr.msk.bf16.mxu1 %vm2249_vm13, %v5860_v56  ;;  %5331 = vst.msk [vmem:[#allocation3 + $0xa0] sm:$0xff] %vm2588_vm1, %v5294_v31  ;;  %v5676_v56 = vld [vmem:[%s14573_s24 + $0x98] sm:$0xff] }
 0x6f0   : > { %v8738_v0 = vcombine.low %v5675_v36, %v5676_v56  ;;  %v5683_v56 = vld [vmem:[%s14573_s24 + $0xd0] sm:$0xff] }
 0x6f1   : > { %v5374_v21 = vpop.permute.xlu1 %5373  ;;  %v5643_v48 = vld [vmem:[#allocation3 + $0x90] sm:$0xff] }
 0x6f2   : > { %5411 = vst.msk [vmem:[#allocation3 + $0xa0] sm:$0xff] %vm2669_vm3, %v5374_v21  ;;  %v5438_v20 = vpop.permute.xlu0 %5437  ;;  %v9538_v21 = vld [vmem:[%s14573_s24 + $0xa4] ss:$8 sps:$4 sm:$0xff]   ;;  %v5867_v27 = vmul.bf16 %v8738_v0, %v5643_v48 }
 0x6f3   : > { %5475 = vst.msk [vmem:[#allocation3 + $0xa0] sm:$0xff] %vm2734_vm4, %v5438_v20  ;;  %v5646_v20 = vld [vmem:[#allocation3 + $0xa8] sm:$0xff] }
 0x6f5   : > { %v5502_v54 = vpop.permute.xlu1 %5501 }
 0x6f6   : > { %6081 = vmatmul.mubr.bf16.gmra.mrb[84].mxu1 %v5859_v47  ;;  %5539 = vst.msk [vmem:[#allocation3 + $0xa0] sm:$0xff] %vm2799_vm5, %v5502_v54  ;;  %v5566_v18 = vpop.permute.xlu0 %5565  ;;  %v5870_v54 = vmul.bf16 %v9538_v21, %v5646_v20 }
 0x6f7   : > { %8768 = vmatprep.mubr.msk.bf16.mxu1 %vm2249_vm13, %v5862_v53  ;;  %5603 = vst.msk [vmem:[#allocation3 + $0xa0] sm:$0xff] %vm2864_vm6, %v5566_v18  ;;  %v5678_v53 = vld [vmem:[%s14573_s24 + $0xa8] sm:$0xff] }
 0x6f8   : > { %v8740_v44 = vcombine.low %v5677_v33, %v5678_v53  ;;  %v5685_v53 = vld [vmem:[%s14573_s24 + $0xe0] sm:$0xff] }
 0x6f9   : > { %v5056_v46 = vpop.permute.xlu1 %5055 }
 0x6fa   : > { %5092 = vst.msk [vmem:[#allocation3 + $0xb0] sm:$0xff] %vm2346_vm14, %v5056_v46  ;;  %v5216_v49 = vpop.permute.xlu0 %5215  ;;  %v9540_v46 = vld [vmem:[%s14573_s24 + $0xb4] ss:$8 sps:$4 sm:$0xff]  }
 0x6fb   : > { %5252 = vst.msk [vmem:[#allocation3 + $0xb0] sm:$0xff] %vm2507_vm15, %v5216_v49  ;;  %v5648_v49 = vld [vmem:[#allocation3 + $0xb8] sm:$0xff] }
 0x6fd   : > { %v5296_v19 = vpop.permute.xlu1 %5295 }
 0x6fe   : > { %6089 = vmatmul.mubr.bf16.gmra.mrb[88].mxu1 %v5861_v4  ;;  %5332 = vst.msk [vmem:[#allocation3 + $0xb0] sm:$0xff] %vm2588_vm1, %v5296_v19  ;;  %v5376_v39 = vpop.permute.xlu0 %5375  ;;  %v5645_v9 = vld [vmem:[#allocation3 + $0xa0] sm:$0xff]  ;;  %v5872_v19 = vmul.bf16 %v9540_v46, %v5648_v49  ;;  %v9548_v46 = vld [vmem:[%s14573_s24 + $0xf4] ss:$8 sps:$4 sm:$0xff]  }
 0x6ff   : > { %8769 = vmatprep.mubr.msk.bf16.mxu1 %vm2249_vm13, %v5864_v17  ;;  %5412 = vst.msk [vmem:[#allocation3 + $0xb0] sm:$0xff] %vm2669_vm3, %v5376_v39  ;;  %v5869_v14 = vmul.bf16 %v8740_v44, %v5645_v9  ;;  %v5680_v17 = vld [vmem:[%s14573_s24 + $0xb8] sm:$0xff] }
 0x700   : > { %v8742_v52 = vcombine.low %v5679_v42, %v5680_v17  ;;  %v5656_v49 = vld [vmem:[#allocation3 + $0xf8] sm:$0xff] }
 0x701   : > { %v5440_v55 = vpop.permute.xlu1 %5439  ;;  %v5880_v17 = vmul.bf16 %v9548_v46, %v5656_v49 }
 0x702   : > { %5476 = vst.msk [vmem:[#allocation3 + $0xb0] sm:$0xff] %vm2734_vm4, %v5440_v55  ;;  %v5504_v11 = vpop.permute.xlu0 %5503  ;;  %v9542_v55 = vld [vmem:[%s14573_s24 + $0xc4] ss:$8 sps:$4 sm:$0xff]  }
 0x703   : > { %5540 = vst.msk [vmem:[#allocation3 + $0xb0] sm:$0xff] %vm2799_vm5, %v5504_v11  ;;  %v5650_v11 = vld [vmem:[#allocation3 + $0xc8] sm:$0xff] }
 0x705   : > { %v5568_v58 = vpop.permute.xlu1 %5567 }
 0x706   : > { %6097 = vmatmul.mubr.bf16.gmra.mrb[92].mxu1 %v5863_v22  ;;  %5604 = vst.msk [vmem:[#allocation3 + $0xb0] sm:$0xff] %vm2864_vm6, %v5568_v58  ;;  %v5058_v15 = vpop.permute.xlu0 %5057  ;;  %v5874_v58 = vmul.bf16 %v9542_v55, %v5650_v11 }
 0x707   : > { %8770 = vmatprep.mubr.msk.bf16.mxu1 %vm2249_vm13, %v5866_v12  ;;  %5093 = vst.msk [vmem:[#allocation3 + $0xc0] sm:$0xff] %vm2346_vm14, %v5058_v15  ;;  %v5682_v12 = vld [vmem:[%s14573_s24 + $0xc8] sm:$0xff] }
 0x708   : > { %v8744_v63 = vcombine.low %v5681_v29, %v5682_v12 }
 0x709   : > { %v5218_v61 = vpop.permute.xlu1 %5217 }
 0x70a   : > { %5253 = vst.msk [vmem:[#allocation3 + $0xc0] sm:$0xff] %vm2507_vm15, %v5218_v61  ;;  %v5298_v7 = vpop.permute.xlu0 %5297  ;;  %v9544_v61 = vld [vmem:[%s14573_s24 + $0xd4] ss:$8 sps:$4 sm:$0xff]  }
 0x70b   : > { %5333 = vst.msk [vmem:[#allocation3 + $0xc0] sm:$0xff] %vm2588_vm1, %v5298_v7  ;;  %v5652_v7 = vld [vmem:[#allocation3 + $0xd8] sm:$0xff] }
 0x70d   : > { %v5378_v31 = vpop.permute.xlu1 %5377  ;;  %v5647_v13 = vld [vmem:[#allocation3 + $0xb0] sm:$0xff] }
 0x70e   : > { %6105 = vmatmul.mubr.bf16.gmra.mrb[96].mxu1 %v5865_v60  ;;  %5413 = vst.msk [vmem:[#allocation3 + $0xc0] sm:$0xff] %vm2669_vm3, %v5378_v31  ;;  %v5442_v3 = vpop.permute.xlu0 %5441  ;;  %v5871_v57 = vmul.bf16 %v8742_v52, %v5647_v13  ;;  %v5876_v31 = vmul.bf16 %v9544_v61, %v5652_v7  ;;  %v13522_v13 = vld [vmem:[%s14451_s16] ss:$0 sm:$0xff] }
 0x70f   : > { %8771 = vmatprep.mubr.msk.bf16.mxu1 %vm2249_vm13, %v5868_v24  ;;  %5477 = vst.msk [vmem:[#allocation3 + $0xc0] sm:$0xff] %vm2734_vm4, %v5442_v3  ;;  %v5684_v24 = vld [vmem:[%s14573_s24 + $0xd8] sm:$0xff] }
 0x710   : > { %v8746_v48 = vcombine.low %v5683_v56, %v5684_v24 }
 0x711   : > { %v5506_v10 = vpop.permute.xlu1 %5505 }
 0x712   : > { %5541 = vst.msk [vmem:[#allocation3 + $0xc0] sm:$0xff] %vm2799_vm5, %v5506_v10  ;;  %v5570_v47 = vpop.permute.xlu0 %5569  ;;  %v9546_v10 = vld [vmem:[%s14573_s24 + $0xe4] ss:$8 sps:$4 sm:$0xff]  }
 0x713   : > { %5605 = vst.msk [vmem:[#allocation3 + $0xc0] sm:$0xff] %vm2864_vm6, %v5570_v47  ;;  %v5654_v47 = vld [vmem:[#allocation3 + $0xe8] sm:$0xff] }
 0x715   : > { %v5060_v18 = vpop.permute.xlu1 %5059 }
 0x716   : > { %6113 = vmatmul.mubr.bf16.gmra.mrb[100].mxu1 %v5867_v27  ;;  %5094 = vst.msk [vmem:[#allocation3 + $0xd0] sm:$0xff] %vm2346_vm14, %v5060_v18  ;;  %v5220_v16 = vpop.permute.xlu0 %5219  ;;  %v5878_v18 = vmul.bf16 %v9546_v10, %v5654_v47 }
 0x717   : > { %8772 = vmatprep.mubr.msk.bf16.mxu1 %vm2249_vm13, %v5870_v54  ;;  %5254 = vst.msk [vmem:[#allocation3 + $0xd0] sm:$0xff] %vm2507_vm15, %v5220_v16  ;;  %v5686_v54 = vld [vmem:[%s14573_s24 + $0xe8] sm:$0xff] }
 0x718   : > { %v8748_v9 = vcombine.low %v5685_v53, %v5686_v54 }
 0x719   : > { %v5300_v5 = vpop.permute.xlu1 %5299 }
 0x71a   : > { %5334 = vst.msk [vmem:[#allocation3 + $0xd0] sm:$0xff] %vm2588_vm1, %v5300_v5  ;;  %v5380_v4 = vpop.permute.xlu0 %5379  ;;  %v5649_v26 = vld [vmem:[#allocation3 + $0xc0] sm:$0xff] }
 0x71b   : > { %5414 = vst.msk [vmem:[#allocation3 + $0xd0] sm:$0xff] %vm2669_vm3, %v5380_v4  ;;  %v5873_v36 = vmul.bf16 %v8744_v63, %v5649_v26 }
 0x71d   : > { %v5444_v39 = vpop.permute.xlu1 %5443 }
 0x71e   : > { %6121 = vmatmul.mubr.bf16.gmra.mrb[104].mxu1 %v5869_v14  ;;  %5478 = vst.msk [vmem:[#allocation3 + $0xd0] sm:$0xff] %vm2734_vm4, %v5444_v39  ;;  %v5508_v51 = vpop.permute.xlu0 %5507  ;;  %v9550_v39 = vld [vmem:[%s14573_s24 + $0xf0] ss:$8 sps:$4 sm:$0xff]  }
 0x71f   : > { %8773 = vmatprep.mubr.msk.bf16.mxu1 %vm2249_vm13, %v5872_v19  ;;  %5542 = vst.msk [vmem:[#allocation3 + $0xd0] sm:$0xff] %vm2799_vm5, %v5508_v51 }
 0x721   : > { %v5572_v37 = vpop.permute.xlu1 %5571 }
 0x722   : > { %5606 = vst.msk [vmem:[#allocation3 + $0xd0] sm:$0xff] %vm2864_vm6, %v5572_v37  ;;  %v5062_v22 = vpop.permute.xlu0 %5061 }
 0x723   : > { %5095 = vst.msk [vmem:[#allocation3 + $0xe0] sm:$0xff] %vm2346_vm14, %v5062_v22 }
 0x725   : > { %v5222_v15 = vpop.permute.xlu1 %5221 }
 0x726   : > { %6129 = vmatmul.mubr.bf16.gmra.mrb[108].mxu1 %v5871_v57  ;;  %5255 = vst.msk [vmem:[#allocation3 + $0xe0] sm:$0xff] %vm2507_vm15, %v5222_v15  ;;  %v5302_v50 = vpop.permute.xlu0 %5301  ;;  %v13529_v15 = vld [vmem:[%s14635_s6 + $0x4] ss:$8 sps:$4 sm:$0xff]  }
 0x727   : > { %8774 = vmatprep.mubr.msk.bf16.mxu1 %vm2249_vm13, %v5874_v58  ;;  %5335 = vst.msk [vmem:[#allocation3 + $0xe0] sm:$0xff] %vm2588_vm1, %v5302_v50  ;;  %6289 = vmatprep.mubr.bf16.mxu0 %v13529_v15 }
 0x729   : > { %v5382_v35 = vpop.permute.xlu1 %5381  ;;  %v5651_v21 = vld [vmem:[#allocation3 + $0xd0] sm:$0xff] }
 0x72a   : > { %5415 = vst.msk [vmem:[#allocation3 + $0xe0] sm:$0xff] %vm2669_vm3, %v5382_v35  ;;  %v5446_v60 = vpop.permute.xlu0 %5445  ;;  %v5875_v33 = vmul.bf16 %v8746_v48, %v5651_v21 }
 0x72b   : > { %5479 = vst.msk [vmem:[#allocation3 + $0xe0] sm:$0xff] %vm2734_vm4, %v5446_v60 }
 0x72d   : > { %v5064_v3 = vpop.permute.xlu1 %5063 }
 0x72e   : > { %6137 = vmatmul.mubr.bf16.gmra.mrb[112].mxu1 %v5873_v36  ;;  %5096 = vst.msk [vmem:[#allocation3 + $0xf0] sm:$0xff] %vm2346_vm14, %v5064_v3  ;;  %v5574_v0 = vpop.permute.xlu0 %5573  ;;  %vm7864_vm14 = vcmp.lt.s32.totalorder %v9944_v1, 3 }
 0x72f   : > { %8775 = vmatprep.mubr.msk.bf16.mxu1 %vm2249_vm13, %v5876_v31 }
 0x731   : > { %v5510_v20 = vpop.permute.xlu1 %5509 }
 0x732   : > { %5543 = vst.msk [vmem:[#allocation3 + $0xe0] sm:$0xff] %vm2799_vm5, %v5510_v20  ;;  %v5224_v27 = vpop.permute.xlu0 %5223 }
 0x733   : > { %5607 = vst.msk [vmem:[#allocation3 + $0xe0] sm:$0xff] %vm2864_vm6, %v5574_v0 }
 0x734   : > { %5256 = vst.msk [vmem:[#allocation3 + $0xf0] sm:$0xff] %vm2507_vm15, %v5224_v27  ;;  %vm7845_vm15 = vcmp.lt.s32.totalorder %v9944_v1, 5 }
 0x735   : > { %v5304_v16 = vpop.permute.xlu1 %5303 }
 0x736   : > { %6145 = vmatmul.mubr.bf16.gmra.mrb[116].mxu1 %v5875_v33  ;;  %5336 = vst.msk [vmem:[#allocation3 + $0xf0] sm:$0xff] %vm2588_vm1, %v5304_v16  ;;  %v5384_v44 = vpop.permute.xlu0 %5383 }
 0x737   : > { %8776 = vmatprep.mubr.msk.bf16.mxu1 %vm2249_vm13, %v5878_v18  ;;  %5416 = vst.msk [vmem:[#allocation3 + $0xf0] sm:$0xff] %vm2669_vm3, %v5384_v44 }
 0x739   : > { %v5448_v5 = vpop.permute.xlu1 %5447 }
 0x73a   : > { %5480 = vst.msk [vmem:[#allocation3 + $0xf0] sm:$0xff] %vm2734_vm4, %v5448_v5  ;;  %v5512_v4 = vpop.permute.xlu0 %5511  ;;  %v5653_v14 = vld [vmem:[#allocation3 + $0xe0] sm:$0xff] }
 0x73b   : > { %5544 = vst.msk [vmem:[#allocation3 + $0xf0] sm:$0xff] %vm2799_vm5, %v5512_v4  ;;  %v5877_v42 = vmul.bf16 %v8748_v9, %v5653_v14 }
 0x73d   : > { %v5576_v19 = vpop.permute.xlu1 %5575 }
 0x73e   : > { %6153 = vmatmul.mubr.bf16.gmra.mrb[120].mxu1 %v5877_v42  ;;  %5608 = vst.msk [vmem:[#allocation3 + $0xf0] sm:$0xff] %vm2864_vm6, %v5576_v19 }
 0x73f   : > { %8777 = vmatprep.mubr.msk.bf16.mxu1 %vm2249_vm13, %v5880_v17 }
 0x745   : > { %v5655_v51 = vld [vmem:[#allocation3 + $0xf0] sm:$0xff] }
 0x746   : > { %v5879_v52 = vmul.bf16 %v9550_v39, %v5655_v51 }
 0x748   : > { %6161 = vmatmul.mubr.bf16.gmra.mrb[124].mxu1 %v5879_v52 }
 0x7a1   : > { %v6042_v55 = vpop.f32.mrb[64].mxu1 }
 0x7a2   : > { %v6043_v37 = vadd.f32 %v13522_v13, %v6042_v55  ;;  %v6044_v11 = vpop.f32.mrb[65].mxu1 }
 0x7a3   : > { %v6045_v22 = vpop.f32.mrb[66].mxu1 }
 0x7a4   : > { %v6046_v57 = vadd.f32 %v13522_v13, %v6045_v22  ;;  %v6047_v29 = vpop.f32.mrb[67].mxu1  ;;  %v6169_v12 = vmax.f32 %v6043_v37, 0.0 }
 0x7a6   : > { %v6170_v58 = vmax.f32 %v6046_v57, 0.0 }
 0x7a8   : > { %v13531_v50 = vpack.c.bf16 %v6170_v58, %v6169_v12 }
 0x7a9   : > { %v6050_v63 = vpop.f32.mrb[68].mxu1 }
 0x7aa   : > { %v6051_v26 = vadd.f32 %v13522_v13, %v6050_v63  ;;  %v6052_v61 = vpop.f32.mrb[69].mxu1 }
 0x7ab   : > { %v6053_v35 = vpop.f32.mrb[70].mxu1 }
 0x7ac   : > { %v6054_v7 = vadd.f32 %v13522_v13, %v6053_v35  ;;  %v6055_v60 = vpop.f32.mrb[71].mxu1  ;;  %v6171_v36 = vmax.f32 %v6051_v26, 0.0 }
 0x7ae   : > { %v6172_v56 = vmax.f32 %v6054_v7, 0.0 }
 0x7b0   : > { %v13536_v24 = vpack.c.bf16 %v6172_v56, %v6171_v36 }
 0x7b1   : > { %v6058_v31 = vpop.f32.mrb[72].mxu1 }
 0x7b2   : > { %v6059_v3 = vadd.f32 %v13522_v13, %v6058_v31  ;;  %v6060_v0 = vpop.f32.mrb[73].mxu1 }
 0x7b3   : > { %v6061_v48 = vpop.f32.mrb[74].mxu1 }
 0x7b4   : > { %v6062_v21 = vadd.f32 %v13522_v13, %v6061_v48  ;;  %v6063_v10 = vpop.f32.mrb[75].mxu1  ;;  %v6173_v20 = vmax.f32 %v6059_v3, 0.0 }
 0x7b6   : > { %v6174_v47 = vmax.f32 %v6062_v21, 0.0 }
 0x7b8   : > { %v13540_v27 = vpack.c.bf16 %v6174_v47, %v6173_v20 }
 0x7b9   : > { %v6066_v33 = vpop.f32.mrb[76].mxu1 }
 0x7ba   : > { %v6067_v53 = vadd.f32 %v13522_v13, %v6066_v33  ;;  %v6068_v54 = vpop.f32.mrb[77].mxu1 }
 0x7bb   : > { %v6069_v18 = vpop.f32.mrb[78].mxu1 }
 0x7bc   : > { %v6070_v16 = vadd.f32 %v13522_v13, %v6069_v18  ;;  %v6071_v44 = vpop.f32.mrb[79].mxu1  ;;  %v6175_v9 = vmax.f32 %v6067_v53, 0.0 }
 0x7be   : > { %v6176_v46 = vmax.f32 %v6070_v16, 0.0 }
 0x7c0   : > { %v13544_v5 = vpack.c.bf16 %v6176_v46, %v6175_v9 }
 0x7c1   : > { %v6074_v49 = vpop.f32.mrb[80].mxu1 }
 0x7c2   : > { %v6075_v4 = vadd.f32 %v13522_v13, %v6074_v49  ;;  %v6076_v14 = vpop.f32.mrb[81].mxu1 }
 0x7c3   : > { %v6077_v42 = vpop.f32.mrb[82].mxu1 }
 0x7c4   : > { %v6078_v17 = vadd.f32 %v13522_v13, %v6077_v42  ;;  %v6079_v19 = vpop.f32.mrb[83].mxu1  ;;  %v6177_v39 = vmax.f32 %v6075_v4, 0.0 }
 0x7c6   : > { %v6178_v51 = vmax.f32 %v6078_v17, 0.0 }
 0x7c8   : > { %v13548_v52 = vpack.c.bf16 %v6178_v51, %v6177_v39 }
 0x7c9   : > { %v6082_v55 = vpop.f32.mrb[84].mxu1 }
 0x7ca   : > { %v6083_v37 = vadd.f32 %v13522_v13, %v6082_v55  ;;  %v6084_v11 = vpop.f32.mrb[85].mxu1 }
 0x7cb   : > { %v6085_v22 = vpop.f32.mrb[86].mxu1 }
 0x7cc   : > { %v6086_v57 = vadd.f32 %v13522_v13, %v6085_v22  ;;  %v6087_v29 = vpop.f32.mrb[87].mxu1  ;;  %v6179_v12 = vmax.f32 %v6083_v37, 0.0 }
 0x7ce   : > { %v6180_v58 = vmax.f32 %v6086_v57, 0.0 }
 0x7d0   : > { %v13552_v63 = vpack.c.bf16 %v6180_v58, %v6179_v12 }
 0x7d1   : > { %v6090_v26 = vpop.f32.mrb[88].mxu1 }
 0x7d2   : > { %v6091_v61 = vadd.f32 %v13522_v13, %v6090_v26  ;;  %v6092_v35 = vpop.f32.mrb[89].mxu1 }
 0x7d3   : > { %v6093_v7 = vpop.f32.mrb[90].mxu1 }
 0x7d4   : > { %v6094_v60 = vadd.f32 %v13522_v13, %v6093_v7  ;;  %v6095_v36 = vpop.f32.mrb[91].mxu1  ;;  %v6181_v56 = vmax.f32 %v6091_v61, 0.0 }
 0x7d6   : > { %v6182_v31 = vmax.f32 %v6094_v60, 0.0 }
 0x7d8   : > { %v13556_v3 = vpack.c.bf16 %v6182_v31, %v6181_v56 }
 0x7d9   : > { %v6098_v0 = vpop.f32.mrb[92].mxu1 }
 0x7da   : > { %v6099_v48 = vadd.f32 %v13522_v13, %v6098_v0  ;;  %v6100_v21 = vpop.f32.mrb[93].mxu1 }
 0x7db   : > { %v6101_v10 = vpop.f32.mrb[94].mxu1 }
 0x7dc   : > { %v6102_v20 = vadd.f32 %v13522_v13, %v6101_v10  ;;  %v6103_v47 = vpop.f32.mrb[95].mxu1  ;;  %v6183_v33 = vmax.f32 %v6099_v48, 0.0 }
 0x7de   : > { %v6184_v53 = vmax.f32 %v6102_v20, 0.0 }
 0x7e0   : > { %v13560_v54 = vpack.c.bf16 %v6184_v53, %v6183_v33 }
 0x7e1   : > { %v6106_v18 = vpop.f32.mrb[96].mxu1 }
 0x7e2   : > { %v6107_v16 = vadd.f32 %v13522_v13, %v6106_v18  ;;  %v6108_v44 = vpop.f32.mrb[97].mxu1 }
 0x7e3   : > { %v6109_v9 = vpop.f32.mrb[98].mxu1 }
 0x7e4   : > { %v6110_v46 = vadd.f32 %v13522_v13, %v6109_v9  ;;  %v6111_v49 = vpop.f32.mrb[99].mxu1  ;;  %v6185_v4 = vmax.f32 %v6107_v16, 0.0 }
 0x7e6   : > { %v6186_v14 = vmax.f32 %v6110_v46, 0.0 }
 0x7e8   : > { %v6209_v42 = vpack.c.bf16 %v6186_v14, %v6185_v4 }
 0x7e9   : > { %v6114_v17 = vpop.f32.mrb[100].mxu1 }
 0x7ea   : > { %v6115_v19 = vadd.f32 %v13522_v13, %v6114_v17  ;;  %v6116_v39 = vpop.f32.mrb[101].mxu1  ;;  %8940 = vmatprep.subr.bf16.mxu0 %v6209_v42 }
 0x7eb   : > { %v6117_v51 = vpop.f32.mrb[102].mxu1  ;;  %8941 = vmatpush3.bf16.msra.mxu0 %v13531_v50 }
 0x7ec   : > { %v6118_v55 = vadd.f32 %v13522_v13, %v6117_v51  ;;  %v6119_v37 = vpop.f32.mrb[103].mxu1  ;;  %v6187_v11 = vmax.f32 %v6115_v19, 0.0 }
 0x7ee   : > { %v6188_v22 = vmax.f32 %v6118_v55, 0.0 }
 0x7f0   : > { %v6210_v57 = vpack.c.bf16 %v6188_v22, %v6187_v11 }
 0x7f1   : > { %v6122_v29 = vpop.f32.mrb[104].mxu1 }
 0x7f2   : > { %v6123_v12 = vadd.f32 %v13522_v13, %v6122_v29  ;;  %v6124_v58 = vpop.f32.mrb[105].mxu1  ;;  %8942 = vmatprep.subr.bf16.mxu0 %v6210_v57 }
 0x7f3   : > { %v6125_v26 = vpop.f32.mrb[106].mxu1  ;;  %8943 = vmatpush3.bf16.msra.mxu0 %v13536_v24 }
 0x7f4   : > { %v6126_v61 = vadd.f32 %v13522_v13, %v6125_v26  ;;  %v6127_v35 = vpop.f32.mrb[107].mxu1  ;;  %v6189_v7 = vmax.f32 %v6123_v12, 0.0 }
 0x7f6   : > { %v6190_v60 = vmax.f32 %v6126_v61, 0.0 }
 0x7f8   : > { %v6211_v50 = vpack.c.bf16 %v6190_v60, %v6189_v7 }
 0x7f9   : > { %v6130_v36 = vpop.f32.mrb[108].mxu1 }
 0x7fa   : > { %v6131_v56 = vadd.f32 %v13522_v13, %v6130_v36  ;;  %v6132_v31 = vpop.f32.mrb[109].mxu1  ;;  %8944 = vmatprep.subr.bf16.mxu0 %v6211_v50 }
 0x7fb   : > { %v6133_v0 = vpop.f32.mrb[110].mxu1  ;;  %8945 = vmatpush3.bf16.msra.mxu0 %v13540_v27  ;;  %v9551_v31 = vld [vmem:[%s14636_s5] ss:$8 sps:$4 sm:$0xff]  }
 0x7fc   : > { %v6134_v48 = vadd.f32 %v13522_v13, %v6133_v0  ;;  %v6135_v21 = vpop.f32.mrb[111].mxu1  ;;  %v6191_v10 = vmax.f32 %v6131_v56, 0.0 }
 0x7fe   : > { %v6192_v20 = vmax.f32 %v6134_v48, 0.0 }
 0x800   : > { %v6212_v24 = vpack.c.bf16 %v6192_v20, %v6191_v10 }
 0x801   : > { %v6138_v47 = vpop.f32.mrb[112].mxu1 }
 0x802   : > { %v6139_v33 = vadd.f32 %v13522_v13, %v6138_v47  ;;  %v6140_v53 = vpop.f32.mrb[113].mxu1  ;;  %8946 = vmatprep.subr.bf16.mxu0 %v6212_v24 }
 0x803   : > { %v6141_v18 = vpop.f32.mrb[114].mxu1  ;;  %8947 = vmatpush3.bf16.msra.mxu0 %v13544_v5 }
 0x804   : > { %v6142_v16 = vadd.f32 %v13522_v13, %v6141_v18  ;;  %v6143_v44 = vpop.f32.mrb[115].mxu1  ;;  %v6193_v9 = vmax.f32 %v6139_v33, 0.0 }
 0x805   : > { %v9576_v44 = vld [vmem:[%s14452_s17 + $0x58] sm:$0xff]  }
 0x806   : > { %v6194_v46 = vmax.f32 %v6142_v16, 0.0 }
 0x808   : > { %v6213_v27 = vpack.c.bf16 %v6194_v46, %v6193_v9 }
 0x809   : > { %v6146_v49 = vpop.f32.mrb[116].mxu1 }
 0x80a   : > { %v6147_v4 = vadd.f32 %v13522_v13, %v6146_v49  ;;  %v6148_v14 = vpop.f32.mrb[117].mxu1  ;;  %8948 = vmatprep.subr.bf16.mxu0 %v6213_v27 }
 0x80b   : > { %v6149_v42 = vpop.f32.mrb[118].mxu1  ;;  %8949 = vmatpush3.bf16.msra.mxu0 %v13548_v52  ;;  %v9577_v14 = vld [vmem:[%s14452_s17 + $0x18] sm:$0xff]  }
 0x80c   : > { %v6150_v17 = vadd.f32 %v13522_v13, %v6149_v42  ;;  %v6151_v19 = vpop.f32.mrb[119].mxu1  ;;  %v6195_v39 = vmax.f32 %v6147_v4, 0.0 }
 0x80e   : > { %v6196_v51 = vmax.f32 %v6150_v17, 0.0 }
 0x810   : > { %v6214_v5 = vpack.c.bf16 %v6196_v51, %v6195_v39 }
 0x811   : > { %v6154_v55 = vpop.f32.mrb[120].mxu1 }
 0x812   : > { %v6155_v37 = vadd.f32 %v13522_v13, %v6154_v55  ;;  %v6156_v11 = vpop.f32.mrb[121].mxu1  ;;  %8950 = vmatprep.subr.bf16.mxu0 %v6214_v5 }
 0x813   : > { %v6157_v22 = vpop.f32.mrb[122].mxu1  ;;  %8951 = vmatpush3.bf16.msra.mxu0 %v13552_v63 }
 0x814   : > { %v6158_v57 = vadd.f32 %v13522_v13, %v6157_v22  ;;  %v6159_v29 = vpop.f32.mrb[123].mxu1  ;;  %v6197_v12 = vmax.f32 %v6155_v37, 0.0 }
 0x816   : > { %v6198_v58 = vmax.f32 %v6158_v57, 0.0 }
 0x818   : > { %v6215_v52 = vpack.c.bf16 %v6198_v58, %v6197_v12 }
 0x81a   : > { %8952 = vmatprep.subr.bf16.mxu0 %v6215_v52 }
 0x81b   : > { %8953 = vmatpush3.bf16.msra.mxu0 %v13556_v3  ;;  %v6162_v26 = vpop.f32.mrb[124].mxu1  ;;  %v9554_v3 = vld [vmem:[%s14636_s5 + $0x14] ss:$8 sps:$4 sm:$0xff]  }
 0x81c   : > { %v6163_v61 = vadd.f32 %v13522_v13, %v6162_v26  ;;  %v6164_v35 = vpop.f32.mrb[125].mxu1 }
 0x81d   : > { %v6165_v7 = vpop.f32.mrb[126].mxu1  ;;  %v9579_v35 = vld [vmem:[%s14452_s17 + $0x20] sm:$0xff]  }
 0x81e   : > { %v6166_v60 = vadd.f32 %v13522_v13, %v6165_v7  ;;  %v6167_v50 = vpop.f32.mrb[127].mxu1  ;;  %v6199_v36 = vmax.f32 %v6163_v61, 0.0  ;;  %v9556_v13 = vld [vmem:[%s14636_s5 + $0x10] ss:$8 sps:$4 sm:$0xff]   ;;  %v9578_v61 = vld [vmem:[%s14452_s17 + $0x60] sm:$0xff]  }
 0x820   : > { %v6200_v56 = vmax.f32 %v6166_v60, 0.0 }
 0x822   : > { %v6216_v63 = vpack.c.bf16 %v6200_v56, %v6199_v36 }
 0x824   : > { %8954 = vmatprep.subr.bf16.mxu0 %v6216_v63 }
 0x825   : > { %8955 = vmatpush3.bf16.msra.mxu0 %v13560_v54  ;;  %v9557_v54 = vld [vmem:[%s14636_s5 + $0x24] ss:$8 sps:$4 sm:$0xff]  }
 0x826   : > { %8980 = vmatprep.subr.bf16.mxu0 %v12864_v62  ;;  %v9573_v62 = vld [vmem:[%s14452_s17 + $0x8] sm:$0xff]  }
 0x828   : > { %6290 = vmatmul.mubr.bf16.vlgmr.msra.gmra.mrb[96].mxu0 %v9551_v31 }
 0x829   : > { %8981 = vmatpush3.bf16.msra.mxu0 %v12643_v30  ;;  %6297 = vmatprep.mubr.bf16.mxu0 %v9554_v3  ;;  %v9559_v30 = vld [vmem:[%s14636_s5 + $0x20] ss:$8 sps:$4 sm:$0xff]  }
 0x82a   : > { %8982 = vmatprep.subr.bf16.mxu0 %v12897_v32 }
 0x82d   : > { %8983 = vmatpush3.bf16.msra.mxu0 %v12660_v45  ;;  %v9560_v45 = vld [vmem:[%s14636_s5 + $0x34] ss:$8 sps:$4 sm:$0xff]  }
 0x82e   : > { %8984 = vmatprep.subr.bf16.mxu0 %v12928_v38  ;;  %v9574_v38 = vld [vmem:[%s14452_s17 + $0x50] sm:$0xff]  }
 0x830   : > { %6298 = vmatmul.mubr.bf16.gmra.mrb[100].mxu0 %v9556_v13 }
 0x831   : > { %8985 = vmatpush3.bf16.msra.mxu0 %v12690_v2  ;;  %6305 = vmatprep.mubr.bf16.mxu0 %v9557_v54  ;;  %v9562_v2 = vld [vmem:[%s14636_s5 + $0x30] ss:$8 sps:$4 sm:$0xff]   ;;  %s14647_s5 = sld [smem:[#allocation55_spill]] }
 0x832   : > { %8986 = vmatprep.subr.bf16.mxu0 %v12961_v28 }
 0x835   : > { %8987 = vmatpush3.bf16.msra.mxu0 %v12713_v43  ;;  %v9563_v43 = vld [vmem:[%s14637_s0] sm:$0xff]   ;;  %s14640_s0 = sld [smem:[#allocation50_spill]] }
 0x836   : > { %8988 = vmatprep.subr.bf16.mxu0 %v12990_v6  ;;  %v9575_v6 = vld [vmem:[%s14452_s17 + $0x10] sm:$0xff]  }
 0x838   : > { %6306 = vmatmul.mubr.bf16.gmra.mrb[104].mxu0 %v9559_v30 }
 0x839   : > { %8989 = vmatpush3.bf16.msra.mxu0 %v12739_v41  ;;  %6313 = vmatprep.mubr.bf16.mxu0 %v9560_v45  ;;  %v13630_v41 = vld [vmem:[%s14452_s17 + $0x80] sm:$0xff]  }
 0x83a   : > { %8990 = vmatprep.subr.bf16.mxu0 %v13018_v34 }
 0x83d   : > { %8991 = vmatpush3.bf16.msra.mxu0 %v12768_v23  ;;  %v9570_v23 = vld [vmem:[%s14452_s17 + $0x40] sm:$0xff]  }
 0x83e   : > { %8992 = vmatprep.subr.bf16.mxu0 %v13047_v59  ;;  %9025 = vmatprep.subr.bf16.mxu1 %v9570_v23 }
 0x840   : > { %6314 = vmatmul.mubr.bf16.gmra.mrb[108].mxu0 %v9562_v2 }
 0x841   : > { %8993 = vmatpush3.bf16.msra.mxu0 %v12796_v25  ;;  %6358 = vmatprep.mubr.bf16.mxu0 %v13529_v15  ;;  %v9571_v25 = vld [vmem:[%s14452_s17] sm:$0xff]  }
 0x842   : > { %8994 = vmatprep.subr.bf16.mxu0 %v13075_v8  ;;  %9026 = vmatpush3.bf16.msra.mxu1 %v9571_v25 }
 0x845   : > { %8995 = vmatpush3.bf16.msra.mxu0 %v12830_v40  ;;  %v9572_v40 = vld [vmem:[%s14452_s17 + $0x48] sm:$0xff]  }
 0x846   : > { %9226 = vmatprep.subr.bf16.mxu0 %v9563_v43  ;;  %9027 = vmatprep.subr.bf16.mxu1 %v9572_v40 }
 0x847   : > { %9028 = vmatpush3.bf16.msra.mxu1 %v9573_v62 }
 0x848   : > { %6359 = vmatmul.mubr.bf16.vlgmr.msra.gmra.mrb[112].mxu0 %v9551_v31  ;;  %9029 = vmatprep.subr.bf16.mxu1 %v9574_v38 }
 0x849   : > { %6366 = vmatprep.mubr.bf16.mxu0 %v9554_v3  ;;  %9227 = vmatpush3.bf16.msra.mxu0 %v9563_v43 }
 0x84a   : > { %9236 = vmatprep.subr.bf16.mxu0 %v13630_v41 }
 0x84b   : > { %9030 = vmatpush3.bf16.msra.mxu1 %v9575_v6 }
 0x84c   : > { %9031 = vmatprep.subr.bf16.mxu1 %v9576_v44 }
 0x84f   : > { %9032 = vmatpush3.bf16.msra.mxu1 %v9577_v14 }
 0x850   : > { %6367 = vmatmul.mubr.bf16.gmra.mrb[116].mxu0 %v9556_v13  ;;  %9033 = vmatprep.subr.bf16.mxu1 %v9578_v61 }
 0x851   : > { %6374 = vmatprep.mubr.bf16.mxu0 %v9557_v54 }
 0x853   : > { %9034 = vmatpush3.bf16.msra.mxu1 %v9579_v35 }
 0x858   : > { %6375 = vmatmul.mubr.bf16.gmra.mrb[120].mxu0 %v9559_v30  ;;  %v9580_v30 = vld [vmem:[%s14452_s17 + $0x68] sm:$0xff]  }
 0x859   : > { %6382 = vmatprep.mubr.bf16.mxu0 %v9560_v45  ;;  %v9581_v45 = vld [vmem:[%s14452_s17 + $0x28] sm:$0xff]   ;;  %9035 = vmatprep.subr.bf16.mxu1 %v9580_v30 }
 0x85a   : > { %9036 = vmatpush3.bf16.msra.mxu1 %v9581_v45 }
 0x860   : > { %6383 = vmatmul.mubr.bf16.gmra.mrb[124].mxu0 %v9562_v2 }
 0x8fb   : > { %v8956_v32 = vpop.f32.mrb[96].mxu0 }
 0x8fc   : > { %v8957_v28 = vpop.f32.mrb[97].mxu0 }
 0x8fd   : > { %v13651_v34 = vadd.f32 %v8957_v28, %v8956_v32  ;;  %v8959_v59 = vpop.f32.mrb[98].mxu0 }
 0x8fe   : > { %v8960_v8 = vpop.f32.mrb[99].mxu0 }
 0x8ff   : > { %v8961_v15 = vadd.f32 %v8960_v8, %v8959_v59  ;;  %v6488_v0 = vrot.slane %v13651_v34, 7  ;;  %v6538_v48 = vrot.slane %v13651_v34, 1  ;;  %v9582_v59 = vld [vmem:[%s14452_s17 + $0x70] sm:$0xff]  }
 0x900   : > { %v9583_v8 = vld [vmem:[%s14452_s17 + $0x30] sm:$0xff]   ;;  %9037 = vmatprep.subr.bf16.mxu1 %v9582_v59 }
 0x901   : > { %v6489_v21 = vrot.slane %v8961_v15, 7  ;;  %v6539_v10 = vrot.slane %v8961_v15, 1  ;;  %v6322_v20 = vpack.c.bf16 %v8961_v15, %v13651_v34  ;;  %9038 = vmatpush3.bf16.msra.mxu1 %v9583_v8  ;;  %v9569_v8 = vld [vmem:[%s14639_s28 + $0x50] ss:$12 sps:$4 sm:$0xff]  }
 0x903   : > { %v8962_v24 = vpop.f32.mrb[100].mxu0  ;;  %v13660_v47 = vsel %vm1056_vm0, %v6538_v48, %v6539_v10  ;;  %v13666_v33 = vsel %vm861_vm2, %v6488_v0, %v6489_v21  ;;  %6604 = vst.msk [vmem:[#allocation4 + $0x8] sm:$0xff] %vm6508_vm7, %v6322_v20 }
 0x904   : > { %v8963_v53 = vpop.f32.mrb[101].mxu0 }
 0x905   : > { %v8964_v18 = vadd.f32 %v8963_v53, %v8962_v24  ;;  %v8965_v16 = vpop.f32.mrb[102].mxu0 }
 0x906   : > { %v8966_v9 = vpop.f32.mrb[103].mxu0 }
 0x907   : > { %v6490_v46 = vrot.slane %v8964_v18, 7  ;;  %v6540_v27 = vrot.slane %v8964_v18, 1  ;;  %v8967_v49 = vadd.f32 %v8966_v9, %v8965_v16  ;;  %v6514_v4 = vpack.c.bf16 %v8964_v18, %v8961_v15 }
 0x909   : > { %v6491_v42 = vrot.slane %v8967_v49, 7  ;;  %v6541_v17 = vrot.slane %v8967_v49, 1  ;;  %6652 = vrot.lane.b32.xlu0 %v6514_v4, %s14638_s27  ;;  %6523 = vrot.lane.b32.xlu1 %v6514_v4, %s14561_s9  ;;  %v6551_v19 = vsel %vm1056_vm0, %v6539_v10, %v6540_v27  ;;  %v6501_v39 = vsel %vm861_vm2, %v6489_v21, %v6490_v46 }
 0x90a   : > { %v6608_v51 = vpack.c.bf16 %v6551_v19, %v13660_v47  ;;  %v6505_v5 = vpack.c.bf16 %v6501_v39, %v13666_v33  ;;  %v6323_v55 = vpack.c.bf16 %v8967_v49, %v8964_v18 }
 0x90b   : > { %v8968_v37 = vpop.f32.mrb[104].mxu0  ;;  %v6550_v11 = vsel %vm1056_vm0, %v6540_v27, %v6541_v17  ;;  %v6500_v22 = vsel %vm861_vm2, %v6490_v46, %v6491_v42  ;;  %v9584_v46 = vld [vmem:[%s14452_s17 + $0x78] sm:$0xff]  }
 0x90c   : > { %v8969_v57 = vpop.f32.mrb[105].mxu0  ;;  %v6555_v29 = vpack.c.bf16 %v6550_v11, %v6551_v19  ;;  %6510 = vst.msk [vmem:[#allocation4 + $0x18] sm:$0xff] %vm6508_vm7, %v6505_v5  ;;  %v6580_v12 = vpack.c.bf16 %v6500_v22, %v6501_v39  ;;  %6605 = vst.msk [vmem:[#allocation4 + $0x20] sm:$0xff] %vm6508_vm7, %v6323_v55  ;;  %v9585_v27 = vld [vmem:[%s14452_s17 + $0x38] sm:$0xff]   ;;  %9039 = vmatprep.subr.bf16.mxu1 %v9584_v46 }
 0x90d   : > { %v8970_v58 = vadd.f32 %v8969_v57, %v8968_v37  ;;  %v8971_v52 = vpop.f32.mrb[106].mxu0  ;;  %6616 = vrot.lane.b32.xlu0 %v6608_v51, %s14561_s9  ;;  %9040 = vmatpush3.bf16.msra.mxu1 %v9585_v27 }
 0x90e   : > { %v8972_v26 = vpop.f32.mrb[107].mxu0  ;;  %6668 = vst.msk [vmem:[#allocation4 + $0x10] sm:$0xff] %vm6508_vm7, %v6555_v29  ;;  %6564 = vrot.lane.b32.xlu1 %v6555_v29, %s14565_s26 }
 0x90f   : > { %v6492_v7 = vrot.slane %v8970_v58, 7  ;;  %v6542_v60 = vrot.slane %v8970_v58, 1  ;;  %v8973_v50 = vadd.f32 %v8972_v26, %v8971_v52  ;;  %v13698_v36 = vpack.c.bf16 %v8970_v58, %v8967_v49 }
 0x911   : > { %v6493_v56 = vrot.slane %v8973_v50, 7  ;;  %v6543_v63 = vrot.slane %v8973_v50, 1  ;;  %6636 = vrot.lane.b32.xlu0 %v6505_v5, %s14565_s26  ;;  %v6549_v31 = vsel %vm1056_vm0, %v6541_v17, %v6542_v60  ;;  %v13705_v3 = vsel %vm861_vm2, %v6491_v42, %v6492_v7 }
 0x912   : > { %6589 = vrot.lane.b32.xlu1 %v6580_v12, %s14638_s27  ;;  %v6609_v13 = vpack.c.bf16 %v6549_v31, %v6550_v11  ;;  %v6506_v54 = vpack.c.bf16 %v13705_v3, %v6500_v22  ;;  %v6324_v2 = vpack.c.bf16 %v8973_v50, %v8970_v58 }
 0x913   : > { %v8974_v43 = vpop.f32.mrb[108].mxu0  ;;  %v6548_v23 = vsel %vm1056_vm0, %v6542_v60, %v6543_v63  ;;  %v13719_v25 = vsel %vm861_vm2, %v6492_v7, %v6493_v56  ;;  %v9565_v7 = vld [vmem:[%s14452_s17 + $0x88] sm:$0xff]  }
 0x914   : > { %v8975_v40 = vpop.f32.mrb[109].mxu0  ;;  %6511 = vst.msk [vmem:[#allocation4 + $0x30] sm:$0xff] %vm6508_vm7, %v6506_v54  ;;  %v13722_v62 = vpack.c.bf16 %v6548_v23, %v6549_v31  ;;  %v6581_v32 = vpack.c.bf16 %v13719_v25, %v13705_v3  ;;  %6606 = vst.msk [vmem:[#allocation4 + $0x38] sm:$0xff] %vm6508_vm7, %v6324_v2  ;;  %v9566_v3 = vld [vmem:[%s14639_s28 + $0x8] ss:$12 sps:$4 sm:$0xff]  }
 0x915   : > { %v8976_v38 = vadd.f32 %v8975_v40, %v8974_v43  ;;  %v8977_v28 = vpop.f32.mrb[110].mxu0  ;;  %6654 = vrot.lane.b32.xlu0 %v13698_v36, %s14638_s27 }
 0x916   : > { %v8978_v6 = vpop.f32.mrb[111].mxu0  ;;  %6669 = vst.msk [vmem:[#allocation4 + $0x28] sm:$0xff] %vm6508_vm7, %v13722_v62 }
 0x917   : > { %v6494_v15 = vrot.slane %v8976_v38, 7  ;;  %v6544_v21 = vrot.slane %v8976_v38, 1  ;;  %v8979_v10 = vadd.f32 %v8978_v6, %v8977_v28  ;;  %v13737_v20 = vpack.c.bf16 %v8976_v38, %v8973_v50 }
 0x919   : > { %v6495_v24 = vrot.slane %v8979_v10, 7  ;;  %v6545_v53 = vrot.slane %v8979_v10, 1  ;;  %v13740_v18 = vpack.c.bf16 %v13651_v34, %v8979_v10  ;;  %6618 = vrot.lane.b32.xlu0 %v6609_v13, %s14561_s9  ;;  %v6547_v16 = vsel %vm1056_vm0, %v6543_v63, %v6544_v21 }
 0x91a   : > { %v6610_v44 = vpack.c.bf16 %v6547_v16, %v6548_v23  ;;  %v13747_v9 = vsel %vm861_vm2, %v6493_v56, %v6494_v15  ;;  %v6325_v49 = vpack.c.bf16 %v8979_v10, %v8976_v38  ;;  %v6674_v23 = vld [vmem:[#allocation4 + $0x10] sm:$0xff]  ;;  %v9568_v38 = vld [vmem:[%s14639_s28 + $0x38] ss:$12 sps:$4 sm:$0xff]  }
 0x91b   : > { %6521 = vrot.lane.b32.xlu1 %v13740_v18, %s14561_s9  ;;  %v6553_v4 = vsel %vm1056_vm0, %v6545_v53, %v6538_v48  ;;  %v6503_v14 = vsel %vm861_vm2, %v6495_v24, %v6488_v0  ;;  %v8996_v42 = vpop.f32.mrb[112].mxu0  ;;  %v6507_v17 = vpack.c.bf16 %v13747_v9, %v13719_v25  ;;  %v6546_v19 = vsel %vm1056_vm0, %v6544_v21, %v6545_v53 }
 0x91c   : > { %v6554_v39 = vpack.c.bf16 %v13660_v47, %v6553_v4  ;;  %v6579_v51 = vpack.c.bf16 %v13666_v33, %v6503_v14  ;;  %v8997_v5 = vpop.f32.mrb[113].mxu0  ;;  %v6611_v55 = vpack.c.bf16 %v6553_v4, %v6546_v19  ;;  %v6496_v48 = vsel %vm861_vm2, %v6494_v15, %v6495_v24  ;;  %6607 = vst.msk [vmem:[#allocation4 + $0x50] sm:$0xff] %vm6508_vm7, %v6325_v49 }
 0x91d   : > { %6638 = vrot.lane.b32.xlu0 %v6506_v54, %s14565_s26  ;;  %v8998_v34 = vadd.f32 %v8997_v5, %v8996_v42  ;;  %v8999_v0 = vpop.f32.mrb[114].mxu0  ;;  %6512 = vst.msk [vmem:[#allocation4 + $0x48] sm:$0xff] %vm6508_vm7, %v6507_v17  ;;  %v6504_v37 = vpack.c.bf16 %v6503_v14, %v6496_v48  ;;  %v6557_v11 = vpack.c.bf16 %v6546_v19, %v6547_v16  ;;  %v13850_v5 = vld [vmem:[%s14639_s28] ss:$12 sps:$4 sm:$0xff]  }
 0x91e   : > { %v6582_v47 = vpack.c.bf16 %v6496_v48, %v13747_v9  ;;  %6671 = vst.msk [vmem:[#allocation4 + $0x58] sm:$0xff] %vm6508_vm7, %v6554_v39  ;;  %v9000_v33 = vpop.f32.mrb[115].mxu0  ;;  %v6766_v40 = vmul.bf16 %v9566_v3, %v6674_v23  ;;  %v13835_v9 = vld [vmem:[%s14639_s28 + $0x4] ss:$12 sps:$4 sm:$0xff]   ;;  %v13855_v48 = vld [vmem:[%s14639_s28 + $0x1c] ss:$12 sps:$4 sm:$0xff]  }
 0x91f   : > { %6562 = vrot.lane.b32.xlu1 %v6554_v39, %s14565_s26  ;;  %v9001_v22 = vadd.f32 %v9000_v33, %v8999_v0  ;;  %6509 = vst.msk [vmem:[#allocation4] sm:$0xff] %vm6508_vm7, %v6504_v37  ;;  %6670 = vst.msk [vmem:[#allocation4 + $0x40] sm:$0xff] %vm6508_vm7, %v6557_v11  ;;  %v6688_v33 = vld [vmem:[%s14639_s28 + $0x18] sm:$0xff] }
 0x921   : > { %6620 = vrot.lane.b32.xlu0 %v6610_v44, %s14561_s9  ;;  %v6391_v57 = vpack.c.bf16 %v9001_v22, %v8998_v34  ;;  %v6690_v22 = vld [vmem:[%s14639_s28 + $0x24] sm:$0xff] }
 0x923   : > { %6587 = vrot.lane.b32.xlu1 %v6579_v51, %s14638_s27  ;;  %v9002_v29 = vpop.f32.mrb[116].mxu0  ;;  %9228 = vmatprep.mubr.msk.bf16.mxu0 %vm2249_vm13, %v6391_v57 }
 0x924   : > { %v9003_v12 = vpop.f32.mrb[117].mxu0 }
 0x925   : > { %6640 = vrot.lane.b32.xlu0 %v6507_v17, %s14565_s26  ;;  %v9004_v58 = vadd.f32 %v9003_v12, %v9002_v29  ;;  %v9005_v52 = vpop.f32.mrb[118].mxu0  ;;  %v6683_v15 = vld [vmem:[#allocation4 + $0x58] sm:$0xff]  ;;  %v13869_v12 = vcombine.low %v6688_v33, %v6690_v22  ;;  %v9605_v33 = vld [vmem:[%s14454_s19 + $0x48] sm:$0xff]  }
 0x926   : > { %v9006_v26 = vpop.f32.mrb[119].mxu0  ;;  %v6680_v28 = vld [vmem:[#allocation4 + $0x40] sm:$0xff]  ;;  %v6775_v21 = vmul.bf16 %v9569_v8, %v6683_v15 }
 0x927   : > { %6525 = vrot.lane.b32.xlu1 %v13698_v36, %s14561_s9  ;;  %v9007_v61 = vadd.f32 %v9006_v26, %v9005_v52  ;;  %v6772_v59 = vmul.bf16 %v9568_v38, %v6680_v28  ;;  %v13874_v26 = vld [vmem:[%s14639_s28 + $0x34] ss:$12 sps:$4 sm:$0xff]  }
 0x928   : > { %v13918_v15 = vld [vmem:[%s14453_s18] ss:$0 sm:$0xff] }
 0x929   : > { %v6392_v35 = vpack.c.bf16 %v9007_v61, %v9004_v58  ;;  %6656 = vrot.lane.b32.xlu0 %v13737_v20, %s14638_s27 }
 0x92b   : > { %6566 = vrot.lane.b32.xlu1 %v13722_v62, %s14565_s26  ;;  %v9008_v60 = vpop.f32.mrb[120].mxu0  ;;  %9229 = vmatmul.mubr.msk.bf16.vlgmr.msra.gmra.mrb[128].mxu0 %vm2249_vm13, %v6392_v35  ;;  %v9567_v62 = vld [vmem:[%s14639_s28 + $0x20] ss:$12 sps:$4 sm:$0xff]  }
 0x92c   : > { %v9009_v50 = vpop.f32.mrb[121].mxu0  ;;  %9237 = vmatpush3.bf16.msra.mxu0 %v13630_v41 }
 0x92d   : > { %v9010_v56 = vadd.f32 %v9009_v50, %v9008_v60  ;;  %v9011_v36 = vpop.f32.mrb[122].mxu0  ;;  %6622 = vrot.lane.b32.xlu0 %v6611_v55, %s14561_s9  ;;  %9238 = vmatprep.subr.bf16.mxu0 %v9565_v7 }
 0x92e   : > { %v9012_v63 = vpop.f32.mrb[123].mxu0 }
 0x92f   : > { %6591 = vrot.lane.b32.xlu1 %v6581_v32, %s14638_s27  ;;  %v9013_v31 = vadd.f32 %v9012_v63, %v9011_v36  ;;  %v6677_v32 = vld [vmem:[#allocation4 + $0x28] sm:$0xff]  ;;  %v13885_v36 = vld [vmem:[%s14639_s28 + $0x30] ss:$12 sps:$4 sm:$0xff]  }
 0x930   : > { %9239 = vmatpush3.bf16.msra.mxu0 %v9565_v7  ;;  %v6769_v6 = vmul.bf16 %v9567_v62, %v6677_v32  ;;  %v9599_v32 = vld [vmem:[%s14454_s19 + $0x88] sm:$0xff]  }
 0x931   : > { %v6393_v13 = vpack.c.bf16 %v9013_v31, %v9010_v56  ;;  %6642 = vrot.lane.b32.xlu0 %v6504_v37, %s14565_s26  ;;  %v13890_v31 = vld [vmem:[%s14639_s28 + $0x4c] ss:$12 sps:$4 sm:$0xff]  }
 0x933   : > { %v9014_v54 = vpop.f32.mrb[124].mxu0  ;;  %6527 = vrot.lane.b32.xlu1 %v13737_v20, %s14561_s9  ;;  %9232 = vmatprep.mubr.msk.bf16.mxu0 %vm2249_vm13, %v6393_v13 }
 0x934   : > { %v9015_v41 = vpop.f32.mrb[125].mxu0 }
 0x935   : > { %v9016_v30 = vadd.f32 %v9015_v41, %v9014_v54  ;;  %v9017_v45 = vpop.f32.mrb[126].mxu0  ;;  %6658 = vrot.lane.b32.xlu0 %v13740_v18, %s14638_s27 }
 0x936   : > { %v9018_v2 = vpop.f32.mrb[127].mxu0 }
 0x937   : > { %v9019_v43 = vadd.f32 %v9018_v2, %v9017_v45  ;;  %6568 = vrot.lane.b32.xlu1 %v6557_v11, %s14565_s26  ;;  %v13898_v45 = vld [vmem:[%s14639_s28 + $0x48] ss:$12 sps:$4 sm:$0xff]  }
 0x939   : > { %v6394_v25 = vpack.c.bf16 %v9019_v43, %v9016_v30  ;;  %v9597_v43 = vld [vmem:[%s14454_s19 + $0x80] sm:$0xff]  }
 0x93a   : > { %9248 = vmatprep.subr.bf16.mxu1 %v9597_v43 }
 0x93b   : > { %9233 = vmatmul.mubr.msk.bf16.gmra.mrb[132].mxu0 %vm2249_vm13, %v6394_v25  ;;  %6593 = vrot.lane.b32.xlu1 %v6582_v47, %s14638_s27  ;;  %vm7852_vm13 = vcmp.lt.s32.totalorder %v9944_v1, 4 }
 0x93c   : > { %9240 = vmatprep.mubr.msk.bf16.mxu0 %vm6508_vm7, %v6766_v40 }
 0x943   : > { %9241 = vmatmul.mubr.msk.bf16.vlgmr.msra.gmra.mrb[128].mxu0 %vm6508_vm7, %v6769_v6 }
 0x944   : > { %9244 = vmatprep.mubr.msk.bf16.mxu0 %vm6508_vm7, %v6772_v59 }
 0x94b   : > { %9245 = vmatmul.mubr.msk.bf16.gmra.mrb[132].mxu0 %vm6508_vm7, %v6775_v21 }
 0x97b   : > { %v6653_v10 = vpop.permute.xlu0 %6652  ;;  %v6524_v20 = vpop.permute.xlu1 %6523 }
 0x97c   : > { %6535 = vst.msk [vmem:[#allocation4 + $0x18] sm:$0xff] %vm6533_vm8, %v6524_v20 }
 0x97f   : > { %v6617_v24 = vpop.permute.xlu0 %6616 }
 0x980   : > { %6628 = vst.msk [vmem:[#allocation4 + $0x8] sm:$0xff] %vm6533_vm8, %v6617_v24  ;;  %v6565_v53 = vpop.permute.xlu1 %6564 }
 0x981   : > { %6576 = vst.msk [vmem:[#allocation4 + $0x18] sm:$0xff] %vm6574_vm9, %v6565_v53 }
 0x983   : > { %v6637_v18 = vpop.permute.xlu0 %6636 }
 0x984   : > { %6648 = vst.msk [vmem:[#allocation4 + $0x8] sm:$0xff] %vm6574_vm9, %v6637_v18  ;;  %v6590_v16 = vpop.permute.xlu1 %6589 }
 0x985   : > { %6664 = vst.msk [vmem:[#allocation4 + $0x8] sm:$0xff] %vm6599_vm10, %v6653_v10  ;;  %6601 = vst.msk [vmem:[#allocation4 + $0x18] sm:$0xff] %vm6599_vm10, %v6590_v16 }
 0x987   : > { %v6655_v44 = vpop.permute.xlu0 %6654 }
 0x98b   : > { %v6619_v46 = vpop.permute.xlu0 %6618 }
 0x98c   : > { %6629 = vst.msk [vmem:[#allocation4 + $0x20] sm:$0xff] %vm6533_vm8, %v6619_v46  ;;  %v6673_v27 = vld [vmem:[#allocation4 + $0x8] sm:$0xff]  ;;  %v6675_v52 = vld [vmem:[#allocation4 + $0x18] sm:$0xff]  ;;  %v9603_v46 = vld [vmem:[%s14454_s19 + $0x40] sm:$0xff]  }
 0x98d   : > { %v6522_v49 = vpop.permute.xlu1 %6521  ;;  %v6765_v4 = vmul.bf16 %v13835_v9, %v6673_v27  ;;  %v6767_v7 = vmul.bf16 %v13869_v12, %v6675_v52  ;;  %9071 = vmatprep.subr.bf16.mxu0 %v9603_v46 }
 0x98e   : > { %6534 = vst.msk [vmem:[#allocation4] sm:$0xff] %vm6533_vm8, %v6522_v49 }
 0x98f   : > { %v6639_v14 = vpop.permute.xlu0 %6638  ;;  %6971 = vmatprep.mubr.bf16.mxu1 %v6765_v4 }
 0x990   : > { %6649 = vst.msk [vmem:[#allocation4 + $0x20] sm:$0xff] %vm6574_vm9, %v6639_v14 }
 0x991   : > { %v6563_v42 = vpop.permute.xlu1 %6562  ;;  %6665 = vst.msk [vmem:[#allocation4 + $0x20] sm:$0xff] %vm6599_vm10, %v6655_v44 }
 0x992   : > { %6575 = vst.msk [vmem:[#allocation4] sm:$0xff] %vm6574_vm9, %v6563_v42 }
 0x993   : > { %v6621_v17 = vpop.permute.xlu0 %6620 }
 0x994   : > { %6630 = vst.msk [vmem:[#allocation4 + $0x38] sm:$0xff] %vm6533_vm8, %v6621_v17 }
 0x995   : > { %v6588_v19 = vpop.permute.xlu1 %6587 }
 0x996   : > { %6600 = vst.msk [vmem:[#allocation4] sm:$0xff] %vm6599_vm10, %v6588_v19 }
 0x997   : > { %v6641_v39 = vpop.permute.xlu0 %6640 }
 0x998   : > { %6650 = vst.msk [vmem:[#allocation4 + $0x38] sm:$0xff] %vm6574_vm9, %v6641_v39  ;;  %v6676_v34 = vld [vmem:[#allocation4 + $0x20] sm:$0xff] }
 0x999   : > { %v6526_v51 = vpop.permute.xlu1 %6525  ;;  %v6768_v57 = vmul.bf16 %v13855_v48, %v6676_v34  ;;  %v9604_v34 = vld [vmem:[%s14454_s19] sm:$0xff]  }
 0x99a   : > { %6536 = vst.msk [vmem:[#allocation4 + $0x30] sm:$0xff] %vm6533_vm8, %v6526_v51  ;;  %9072 = vmatpush3.bf16.msra.mxu0 %v9604_v34 }
 0x99b   : > { %v6657_v55 = vpop.permute.xlu0 %6656  ;;  %9073 = vmatprep.subr.bf16.mxu0 %v9605_v33  ;;  %v9612_v33 = vld [vmem:[%s14454_s19 + $0x20] sm:$0xff]  }
 0x99c   : > { %6666 = vst.msk [vmem:[#allocation4 + $0x38] sm:$0xff] %vm6599_vm10, %v6657_v55 }
 0x99d   : > { %v6567_v0 = vpop.permute.xlu1 %6566  ;;  %v6672_v37 = vld [vmem:[#allocation4] sm:$0xff] }
 0x99e   : > { %6577 = vst.msk [vmem:[#allocation4 + $0x30] sm:$0xff] %vm6574_vm9, %v6567_v0  ;;  %v6764_v11 = vmul.bf16 %v13850_v5, %v6672_v37 }
 0x99f   : > { %v6623_v47 = vpop.permute.xlu0 %6622 }
 0x9a0   : > { %6972 = vmatmul.mubr.bf16.vlgmr.msra.gmra.mrb[128].mxu1 %v6764_v11  ;;  %6631 = vst.msk [vmem:[#allocation4 + $0x50] sm:$0xff] %vm6533_vm8, %v6623_v47 }
 0x9a1   : > { %v6592_v29 = vpop.permute.xlu1 %6591  ;;  %6979 = vmatprep.mubr.bf16.mxu1 %v6768_v57  ;;  %9249 = vmatpush3.bf16.msra.mxu1 %v9597_v43 }
 0x9a2   : > { %6602 = vst.msk [vmem:[#allocation4 + $0x30] sm:$0xff] %vm6599_vm10, %v6592_v29  ;;  %9250 = vmatprep.subr.bf16.mxu1 %v9599_v32 }
 0x9a3   : > { %v6643_v58 = vpop.permute.xlu0 %6642  ;;  %v6679_v61 = vld [vmem:[#allocation4 + $0x38] sm:$0xff] }
 0x9a4   : > { %6651 = vst.msk [vmem:[#allocation4 + $0x50] sm:$0xff] %vm6574_vm9, %v6643_v58  ;;  %v6771_v50 = vmul.bf16 %v13874_v26, %v6679_v61  ;;  %v9606_v61 = vld [vmem:[%s14454_s19 + $0x8] sm:$0xff]  }
 0x9a5   : > { %v6528_v35 = vpop.permute.xlu1 %6527  ;;  %9251 = vmatpush3.bf16.msra.mxu1 %v9599_v32  ;;  %9074 = vmatpush3.bf16.msra.mxu0 %v9606_v61 }
 0x9a6   : > { %6537 = vst.msk [vmem:[#allocation4 + $0x48] sm:$0xff] %vm6533_vm8, %v6528_v35 }
 0x9a7   : > { %v6659_v60 = vpop.permute.xlu0 %6658 }
 0x9a8   : > { %6980 = vmatmul.mubr.bf16.gmra.mrb[132].mxu1 %v6767_v7  ;;  %6667 = vst.msk [vmem:[#allocation4 + $0x50] sm:$0xff] %vm6599_vm10, %v6659_v60 }
 0x9a9   : > { %v6569_v56 = vpop.permute.xlu1 %6568  ;;  %6987 = vmatprep.mubr.bf16.mxu1 %v6771_v50  ;;  %v6678_v63 = vld [vmem:[#allocation4 + $0x30] sm:$0xff] }
 0x9aa   : > { %6578 = vst.msk [vmem:[#allocation4 + $0x48] sm:$0xff] %vm6574_vm9, %v6569_v56  ;;  %v6770_v54 = vmul.bf16 %v13885_v36, %v6678_v63  ;;  %v9607_v50 = vld [vmem:[%s14454_s19 + $0x50] sm:$0xff]  }
 0x9ab   : > { %9075 = vmatprep.subr.bf16.mxu0 %v9607_v50 }
 0x9ad   : > { %v6594_v13 = vpop.permute.xlu1 %6593 }
 0x9ae   : > { %6603 = vst.msk [vmem:[#allocation4 + $0x48] sm:$0xff] %vm6599_vm10, %v6594_v13 }
 0x9af   : > { %v6682_v41 = vld [vmem:[#allocation4 + $0x50] sm:$0xff] }
 0x9b0   : > { %6988 = vmatmul.mubr.bf16.gmra.mrb[136].mxu1 %v6770_v54  ;;  %v6774_v30 = vmul.bf16 %v13890_v31, %v6682_v41 }
 0x9b2   : > { %6995 = vmatprep.mubr.bf16.mxu1 %v6774_v30 }
 0x9b5   : > { %v6681_v2 = vld [vmem:[#allocation4 + $0x48] sm:$0xff] }
 0x9b6   : > { %v6773_v3 = vmul.bf16 %v13898_v45, %v6681_v2  ;;  %v9608_v2 = vld [vmem:[%s14454_s19 + $0x10] sm:$0xff]  }
 0x9b7   : > { %9076 = vmatpush3.bf16.msra.mxu0 %v9608_v2 }
 0x9b8   : > { %6996 = vmatmul.mubr.bf16.gmra.mrb[140].mxu1 %v6773_v3  ;;  %v9609_v3 = vld [vmem:[%s14454_s19 + $0x58] sm:$0xff]  }
 0x9b9   : > { %9077 = vmatprep.subr.bf16.mxu0 %v9609_v3 }
 0xa16   : > { %v9242_v23 = vpop.f32.mrb[128].mxu0 }
 0xa17   : > { %v7038_v25 = vpop.f32.mrb[129].mxu0 }
 0xa18   : > { %v9243_v40 = vpop.f32.mrb[130].mxu0 }
 0xa19   : > { %v7041_v62 = vpop.f32.mrb[131].mxu0 }
 0xa1e   : > { %v13907_v38 = vpop.f32.mrb[132].mxu0 }
 0xa1f   : > { %v13909_v28 = vpop.f32.mrb[133].mxu0 }
 0xa20   : > { %v13911_v6 = vpop.f32.mrb[134].mxu0 }
 0xa21   : > { %v13913_v59 = vpop.f32.mrb[135].mxu0 }
 0xa73   : > { %v9041_v8 = vpop.f32.mrb[128].mxu1 }
 0xa74   : > { %v9042_v21 = vpop.f32.mrb[129].mxu1 }
 0xa75   : > { %v9043_v10 = vadd.f32 %v9042_v21, %v9041_v8  ;;  %v9044_v20 = vpop.f32.mrb[130].mxu1 }
 0xa76   : > { %v9045_v24 = vpop.f32.mrb[131].mxu1 }
 0xa77   : > { %v6974_v53 = vadd.f32 %v9043_v10, %v13918_v15  ;;  %v9046_v18 = vadd.f32 %v9045_v24, %v9044_v20 }
 0xa79   : > { %v7039_v16 = vadd.f32 %v7038_v25, %v6974_v53  ;;  %v6977_v44 = vadd.f32 %v9046_v18, %v13918_v15 }
 0xa7b   : > { %v13925_v27 = vmax.f32 %v7039_v16, 0.0  ;;  %v7042_v49 = vadd.f32 %v7041_v62, %v6977_v44  ;;  %v9047_v4 = vpop.f32.mrb[132].mxu1 }
 0xa7c   : > { %v9048_v14 = vpop.f32.mrb[133].mxu1 }
 0xa7d   : > { %v7078_v42 = vmax.f32 %v7042_v49, 0.0  ;;  %v9049_v17 = vadd.f32 %v9048_v14, %v9047_v4  ;;  %v9050_v19 = vpop.f32.mrb[134].mxu1  ;;  %v7147_v51 = vrot.slane %v13925_v27, 1  ;;  %v7099_v55 = vrot.slane %v13925_v27, 7 }
 0xa7e   : > { %v9051_v39 = vpop.f32.mrb[135].mxu1 }
 0xa7f   : > { %v6982_v0 = vadd.f32 %v9049_v17, %v13918_v15  ;;  %v9052_v37 = vadd.f32 %v9051_v39, %v9050_v19  ;;  %v7148_v11 = vrot.slane %v7078_v42, 1  ;;  %v7100_v47 = vrot.slane %v7078_v42, 7  ;;  %v9611_v19 = vld [vmem:[%s14454_s19 + $0x60] sm:$0xff]  }
 0xa80   : > { %v13937_v22 = vpack.c.bf16 %v7078_v42, %v13925_v27 }
 0xa81   : > { %v7047_v57 = vadd.f32 %v9242_v23, %v6982_v0  ;;  %v6985_v29 = vadd.f32 %v9052_v37, %v13918_v15  ;;  %v13944_v58 = vsel %vm1056_vm0, %v7147_v51, %v7148_v11  ;;  %v13950_v52 = vsel %vm861_vm2, %v7099_v55, %v7100_v47 }
 0xa82   : > { %7211 = vst.msk [vmem:[#allocation4 + $0x8] sm:$0xff] %vm6508_vm7, %v13937_v22 }
 0xa83   : > { %v7079_v35 = vmax.f32 %v7047_v57, 0.0  ;;  %v7050_v7 = vadd.f32 %v9243_v40, %v6985_v29  ;;  %v9053_v60 = vpop.f32.mrb[136].mxu1 }
 0xa84   : > { %v9054_v56 = vpop.f32.mrb[137].mxu1 }
 0xa85   : > { %v7080_v63 = vmax.f32 %v7050_v7, 0.0  ;;  %v9055_v13 = vadd.f32 %v9054_v56, %v9053_v60  ;;  %v9056_v54 = vpop.f32.mrb[138].mxu1  ;;  %v7124_v41 = vpack.c.bf16 %v7079_v35, %v7078_v42  ;;  %v7149_v30 = vrot.slane %v7079_v35, 1  ;;  %v9598_v7 = vld [vmem:[%s14639_s28 + $0x8] ss:$12 sps:$4 sm:$0xff]  }
 0xa86   : > { %v9057_v43 = vpop.f32.mrb[139].mxu1  ;;  %v7101_v23 = vrot.slane %v7079_v35, 7 }
 0xa87   : > { %v6990_v25 = vadd.f32 %v9055_v13, %v13918_v15  ;;  %v9058_v40 = vadd.f32 %v9057_v43, %v9056_v54  ;;  %7133 = vrot.lane.b32.xlu1 %v7124_v41, %s14561_s9  ;;  %7259 = vrot.lane.b32.xlu0 %v7124_v41, %s14638_s27  ;;  %v7160_v62 = vsel %vm1056_vm0, %v7148_v11, %v7149_v30  ;;  %v7150_v32 = vrot.slane %v7080_v63, 1 }
 0xa88   : > { %v7215_v8 = vpack.c.bf16 %v7160_v62, %v13944_v58  ;;  %v7112_v21 = vsel %vm861_vm2, %v7100_v47, %v7101_v23  ;;  %v7102_v10 = vrot.slane %v7080_v63, 7  ;;  %v13974_v20 = vpack.c.bf16 %v7080_v63, %v7079_v35 }
 0xa89   : > { %v7055_v24 = vadd.f32 %v13909_v28, %v6990_v25  ;;  %v6993_v53 = vadd.f32 %v9058_v40, %v13918_v15  ;;  %v13980_v18 = vsel %vm1056_vm0, %v7149_v30, %v7150_v32  ;;  %v7116_v16 = vpack.c.bf16 %v7112_v21, %v13950_v52  ;;  %v9610_v28 = vld [vmem:[%s14454_s19 + $0x18] sm:$0xff]  }
 0xa8a   : > { %v7164_v44 = vpack.c.bf16 %v13980_v18, %v7160_v62  ;;  %v7111_v46 = vsel %vm861_vm2, %v7101_v23, %v7102_v10  ;;  %7212 = vst.msk [vmem:[#allocation4 + $0x20] sm:$0xff] %vm6508_vm7, %v13974_v20  ;;  %9078 = vmatpush3.bf16.msra.mxu0 %v9610_v28 }
 0xa8b   : > { %v7081_v49 = vmax.f32 %v7055_v24, 0.0  ;;  %v7058_v4 = vadd.f32 %v13913_v59, %v6993_v53  ;;  %v9059_v14 = vpop.f32.mrb[140].mxu1  ;;  %7223 = vrot.lane.b32.xlu0 %v7215_v8, %s14561_s9  ;;  %7120 = vst.msk [vmem:[#allocation4 + $0x18] sm:$0xff] %vm6508_vm7, %v7116_v16  ;;  %v7188_v42 = vpack.c.bf16 %v7111_v46, %v7112_v21  ;;  %9079 = vmatprep.subr.bf16.mxu0 %v9611_v19  ;;  %v9616_v24 = vld [vmem:[%s14454_s19 + $0x30] sm:$0xff]  }
 0xa8c   : > { %v9060_v17 = vpop.f32.mrb[141].mxu1  ;;  %7275 = vst.msk [vmem:[#allocation4 + $0x10] sm:$0xff] %vm6508_vm7, %v7164_v44  ;;  %7173 = vrot.lane.b32.xlu1 %v7164_v44, %s14565_s26 }
 0xa8d   : > { %v7082_v39 = vmax.f32 %v7058_v4, 0.0  ;;  %v9061_v34 = vadd.f32 %v9060_v17, %v9059_v14  ;;  %v9062_v0 = vpop.f32.mrb[142].mxu1  ;;  %v13999_v59 = vpack.c.bf16 %v7081_v49, %v7080_v63  ;;  %v7151_v37 = vrot.slane %v7081_v49, 1  ;;  %v9613_v63 = vld [vmem:[%s14454_s19 + $0x68] sm:$0xff]   ;;  %v9617_v4 = vld [vmem:[%s14454_s19 + $0x78] sm:$0xff]  }
 0xa8e   : > { %v9063_v11 = vpop.f32.mrb[143].mxu1  ;;  %v7103_v47 = vrot.slane %v7081_v49, 7  ;;  %9080 = vmatpush3.bf16.msra.mxu0 %v9612_v33  ;;  %v9761_v33 = vmov 0.0  }
 0xa8f   : > { %v7152_v57 = vrot.slane %v7082_v39, 1  ;;  %v6998_v29 = vadd.f32 %v9061_v34, %v13918_v15  ;;  %v9064_v61 = vadd.f32 %v9063_v11, %v9062_v0  ;;  %7243 = vrot.lane.b32.xlu0 %v7116_v16, %s14565_s26  ;;  %v7158_v35 = vsel %vm1056_vm0, %v7150_v32, %v7151_v37  ;;  %9081 = vmatprep.subr.bf16.mxu0 %v9613_v63  ;;  %v9615_v32 = vld [vmem:[%s14454_s19 + $0x70] sm:$0xff]  }
 0xa90   : > { %7197 = vrot.lane.b32.xlu1 %v7188_v42, %s14638_s27  ;;  %v7216_v60 = vpack.c.bf16 %v7158_v35, %v13980_v18  ;;  %v14015_v50 = vsel %vm861_vm2, %v7102_v10, %v7103_v47  ;;  %v7104_v56 = vrot.slane %v7082_v39, 7  ;;  %v14020_v13 = vpack.c.bf16 %v7082_v39, %v7081_v49  ;;  %9260 = vmatprep.subr.bf16.mxu1 %v9761_v33 }
 0xa91   : > { %v7063_v54 = vadd.f32 %v13907_v38, %v6998_v29  ;;  %v7001_v41 = vadd.f32 %v9064_v61, %v13918_v15  ;;  %v14026_v30 = vsel %vm1056_vm0, %v7151_v37, %v7152_v57  ;;  %v7117_v2 = vpack.c.bf16 %v14015_v50, %v7111_v46  ;;  %v9614_v38 = vld [vmem:[%s14454_s19 + $0x28] sm:$0xff]   ;;  %v9602_v29 = vld [vmem:[%s14639_s28 + $0x50] ss:$12 sps:$4 sm:$0xff]  }
 0xa92   : > { %v14030_v3 = vpack.c.bf16 %v14026_v30, %v7158_v35  ;;  %v14034_v43 = vsel %vm861_vm2, %v7103_v47, %v7104_v56  ;;  %7213 = vst.msk [vmem:[#allocation4 + $0x38] sm:$0xff] %vm6508_vm7, %v14020_v13  ;;  %9082 = vmatpush3.bf16.msra.mxu0 %v9614_v38  ;;  %v9600_v46 = vld [vmem:[%s14639_s28 + $0x20] ss:$12 sps:$4 sm:$0xff]  }
 0xa93   : > { %v7083_v15 = vmax.f32 %v7063_v54, 0.0  ;;  %v7066_v23 = vadd.f32 %v13911_v6, %v7001_v41  ;;  %7261 = vrot.lane.b32.xlu0 %v13999_v59, %s14638_s27  ;;  %v7281_v25 = vld [vmem:[#allocation4 + $0x10] sm:$0xff]  ;;  %7121 = vst.msk [vmem:[#allocation4 + $0x30] sm:$0xff] %vm6508_vm7, %v7117_v2  ;;  %v7189_v40 = vpack.c.bf16 %v14034_v43, %v14015_v50  ;;  %9083 = vmatprep.subr.bf16.mxu0 %v9615_v32 }
 0xa94   : > { %v7373_v62 = vmul.bf16 %v9598_v7, %v7281_v25  ;;  %7276 = vst.msk [vmem:[#allocation4 + $0x28] sm:$0xff] %vm6508_vm7, %v14030_v3 }
 0xa95   : > { %v7084_v8 = vmax.f32 %v7066_v23, 0.0  ;;  %v7153_v6 = vrot.slane %v7083_v15, 1  ;;  %v7105_v21 = vrot.slane %v7083_v15, 7  ;;  %v7126_v10 = vpack.c.bf16 %v7083_v15, %v7082_v39 }
 0xa96   : > { %9252 = vmatprep.mubr.msk.bf16.mxu1 %vm6508_vm7, %v7373_v62  ;;  %9084 = vmatpush3.bf16.msra.mxu0 %v9616_v24 }
 0xa97   : > { %7225 = vrot.lane.b32.xlu0 %v7216_v60, %s14561_s9  ;;  %v7123_v53 = vpack.c.bf16 %v13925_v27, %v7084_v8  ;;  %v7154_v18 = vrot.slane %v7084_v8, 1  ;;  %v7156_v16 = vsel %vm1056_vm0, %v7152_v57, %v7153_v6  ;;  %v7106_v44 = vrot.slane %v7084_v8, 7  ;;  %9085 = vmatprep.subr.bf16.mxu0 %v9617_v4  ;;  %v9601_v57 = vld [vmem:[%s14639_s28 + $0x38] ss:$12 sps:$4 sm:$0xff]  }
 0xa98   : > { %v7217_v28 = vpack.c.bf16 %v7156_v16, %v14026_v30  ;;  %v7108_v49 = vsel %vm861_vm2, %v7104_v56, %v7105_v21  ;;  %v14069_v14 = vpack.c.bf16 %v7084_v8, %v7083_v15 }
 0xa99   : > { %7131 = vrot.lane.b32.xlu1 %v7123_v53, %s14561_s9  ;;  %v7162_v42 = vsel %vm1056_vm0, %v7154_v18, %v7147_v51  ;;  %v7155_v17 = vsel %vm1056_vm0, %v7153_v6, %v7154_v18  ;;  %v7114_v19 = vsel %vm861_vm2, %v7106_v44, %v7099_v55  ;;  %v7118_v39 = vpack.c.bf16 %v7108_v49, %v14034_v43  ;;  %v9618_v51 = vld [vmem:[%s14454_s19 + $0x38] sm:$0xff]  }
 0xa9a   : > { %v7163_v34 = vpack.c.bf16 %v13944_v58, %v7162_v42  ;;  %v7166_v0 = vpack.c.bf16 %v7155_v17, %v7156_v16  ;;  %v7187_v37 = vpack.c.bf16 %v13950_v52, %v7114_v19  ;;  %v7218_v11 = vpack.c.bf16 %v7162_v42, %v7155_v17  ;;  %7214 = vst.msk [vmem:[#allocation4 + $0x50] sm:$0xff] %vm6508_vm7, %v14069_v14 }
 0xa9b   : > { %7245 = vrot.lane.b32.xlu0 %v7117_v2, %s14565_s26  ;;  %v7284_v27 = vld [vmem:[#allocation4 + $0x28] sm:$0xff]  ;;  %7122 = vst.msk [vmem:[#allocation4 + $0x48] sm:$0xff] %vm6508_vm7, %v7118_v39  ;;  %v7107_v55 = vsel %vm861_vm2, %v7105_v21, %v7106_v44  ;;  %9086 = vmatpush3.bf16.msra.mxu0 %v9618_v51 }
 0xa9c   : > { %7278 = vst.msk [vmem:[#allocation4 + $0x58] sm:$0xff] %vm6508_vm7, %v7163_v34  ;;  %v7376_v58 = vmul.bf16 %v9600_v46, %v7284_v27  ;;  %7277 = vst.msk [vmem:[#allocation4 + $0x40] sm:$0xff] %vm6508_vm7, %v7166_v0  ;;  %v7115_v52 = vpack.c.bf16 %v7114_v19, %v7107_v55  ;;  %v7190_v47 = vpack.c.bf16 %v7107_v55, %v7108_v49  ;;  %9272 = vmatprep.subr.bf16.mxu0 %v9761_v33 }
 0xa9d   : > { %7171 = vrot.lane.b32.xlu1 %v7163_v34, %s14565_s26 }
 0xa9e   : > { %9253 = vmatmul.mubr.msk.bf16.vlgmr.msra.gmra.mrb[144].mxu1 %vm6508_vm7, %v7376_v58  ;;  %7119 = vst.msk [vmem:[#allocation4] sm:$0xff] %vm6508_vm7, %v7115_v52 }
 0xa9f   : > { %7227 = vrot.lane.b32.xlu0 %v7217_v28, %s14561_s9 }
 0xaa1   : > { %7195 = vrot.lane.b32.xlu1 %v7187_v37, %s14638_s27 }
 0xaa3   : > { %7247 = vrot.lane.b32.xlu0 %v7118_v39, %s14565_s26  ;;  %v7287_v61 = vld [vmem:[#allocation4 + $0x40] sm:$0xff]  ;;  %v7290_v35 = vld [vmem:[#allocation4 + $0x58] sm:$0xff] }
 0xaa4   : > { %v7379_v7 = vmul.bf16 %v9601_v57, %v7287_v61  ;;  %v7382_v60 = vmul.bf16 %v9602_v29, %v7290_v35 }
 0xaa5   : > { %7135 = vrot.lane.b32.xlu1 %v13999_v59, %s14561_s9 }
 0xaa6   : > { %9256 = vmatprep.mubr.msk.bf16.mxu1 %vm6508_vm7, %v7379_v7 }
 0xaa7   : > { %9257 = vmatmul.mubr.msk.bf16.gmra.mrb[148].mxu1 %vm6508_vm7, %v7382_v60  ;;  %7263 = vrot.lane.b32.xlu0 %v7126_v10, %s14638_s27 }
 0xaa8   : > { %9268 = vmatprep.mubr.msk.bf16.mxu1 %vm9762_vm11, %v9761_v33 }
 0xaa9   : > { %7175 = vrot.lane.b32.xlu1 %v14030_v3, %s14565_s26 }
 0xaab   : > { %7229 = vrot.lane.b32.xlu0 %v7218_v11, %s14561_s9 }
 0xaad   : > { %7199 = vrot.lane.b32.xlu1 %v7189_v40, %s14638_s27 }
 0xaaf   : > { %7249 = vrot.lane.b32.xlu0 %v7115_v52, %s14565_s26 }
 0xab1   : > { %7137 = vrot.lane.b32.xlu1 %v7126_v10, %s14561_s9  ;;  %s756_s9 = scalar_lea.vmem [#allocation6], %s755_s29 }
 0xab3   : > { %7265 = vrot.lane.b32.xlu0 %v7123_v53, %s14638_s27 }
 0xab5   : > { %7177 = vrot.lane.b32.xlu1 %v7166_v0, %s14565_s26 }
 0xab9   : > { %7201 = vrot.lane.b32.xlu1 %v7190_v47, %s14638_s27  ;;  %s8473_s27 = sshll.u32 %s756_s9, 4  ;;  %s14395_s27 = int_to_ptr.vmem [resolvable:$true] %s8473_s27 }
 0xaba   : > { %s9685_s3 = scalar_lea.vmem %s14395_s27, 16 }
 0xabb   : > { %p9686_p11 = scmp.ne.s32.totalorder %s14395_s27, %s9685_s3 }
 0xabd   : > { %p9687_p12 = pnand %p9686_p11, %p9932_p5 }
 0xabf   : > { %p9688_p13 = pneg %p9687_p12 }
 0xaf9   : > { %v7134_v59 = vpop.permute.xlu1 %7133  ;;  %v7260_v56 = vpop.permute.xlu0 %7259 }
 0xafa   : > { %7144 = vst.msk [vmem:[#allocation4 + $0x18] sm:$0xff] %vm6533_vm8, %v7134_v59 }
 0xafd   : > { %v7224_v63 = vpop.permute.xlu0 %7223 }
 0xafe   : > { %7235 = vst.msk [vmem:[#allocation4 + $0x8] sm:$0xff] %vm6533_vm8, %v7224_v63  ;;  %v7174_v54 = vpop.permute.xlu1 %7173 }
 0xaff   : > { %7184 = vst.msk [vmem:[#allocation4 + $0x18] sm:$0xff] %vm6574_vm9, %v7174_v54 }
 0xb01   : > { %v7244_v50 = vpop.permute.xlu0 %7243 }
 0xb02   : > { %7255 = vst.msk [vmem:[#allocation4 + $0x8] sm:$0xff] %vm6574_vm9, %v7244_v50  ;;  %v7198_v41 = vpop.permute.xlu1 %7197 }
 0xb03   : > { %7271 = vst.msk [vmem:[#allocation4 + $0x8] sm:$0xff] %vm6599_vm10, %v7260_v56  ;;  %7208 = vst.msk [vmem:[#allocation4 + $0x18] sm:$0xff] %vm6599_vm10, %v7198_v41 }
 0xb05   : > { %v7262_v30 = vpop.permute.xlu0 %7261 }
 0xb09   : > { %v7226_v2 = vpop.permute.xlu0 %7225 }
 0xb0a   : > { %7236 = vst.msk [vmem:[#allocation4 + $0x20] sm:$0xff] %vm6533_vm8, %v7226_v2  ;;  %v7280_v3 = vld [vmem:[#allocation4 + $0x8] sm:$0xff]  ;;  %v7282_v44 = vld [vmem:[#allocation4 + $0x18] sm:$0xff] }
 0xb0b   : > { %v7132_v43 = vpop.permute.xlu1 %7131  ;;  %v7372_v38 = vmul.bf16 %v13835_v9, %v7280_v3 }
 0xb0c   : > { %7143 = vst.msk [vmem:[#allocation4] sm:$0xff] %vm6533_vm8, %v7132_v43 }
 0xb0d   : > { %v7246_v15 = vpop.permute.xlu0 %7245  ;;  %7578 = vmatprep.mubr.bf16.mxu0 %v7372_v38 }
 0xb0e   : > { %7256 = vst.msk [vmem:[#allocation4 + $0x20] sm:$0xff] %vm6574_vm9, %v7246_v15 }
 0xb0f   : > { %7272 = vst.msk [vmem:[#allocation4 + $0x20] sm:$0xff] %vm6599_vm10, %v7262_v30  ;;  %v7172_v23 = vpop.permute.xlu1 %7171 }
 0xb10   : > { %7183 = vst.msk [vmem:[#allocation4] sm:$0xff] %vm6574_vm9, %v7172_v23 }
 0xb11   : > { %v7228_v25 = vpop.permute.xlu0 %7227 }
 0xb12   : > { %7237 = vst.msk [vmem:[#allocation4 + $0x38] sm:$0xff] %vm6533_vm8, %v7228_v25 }
 0xb13   : > { %v7196_v40 = vpop.permute.xlu1 %7195 }
 0xb14   : > { %7207 = vst.msk [vmem:[#allocation4] sm:$0xff] %vm6599_vm10, %v7196_v40 }
 0xb15   : > { %v7248_v62 = vpop.permute.xlu0 %7247 }
 0xb16   : > { %7257 = vst.msk [vmem:[#allocation4 + $0x38] sm:$0xff] %vm6574_vm9, %v7248_v62  ;;  %v7283_v8 = vld [vmem:[#allocation4 + $0x20] sm:$0xff] }
 0xb17   : > { %v7136_v9 = vpop.permute.xlu1 %7135  ;;  %v7375_v53 = vmul.bf16 %v13855_v48, %v7283_v8  ;;  %v7374_v48 = vmul.bf16 %v13869_v12, %v7282_v44 }
 0xb18   : > { %7145 = vst.msk [vmem:[#allocation4 + $0x30] sm:$0xff] %vm6533_vm8, %v7136_v9 }
 0xb19   : > { %v7264_v32 = vpop.permute.xlu0 %7263 }
 0xb1a   : > { %7273 = vst.msk [vmem:[#allocation4 + $0x38] sm:$0xff] %vm6599_vm10, %v7264_v32 }
 0xb1b   : > { %v7176_v6 = vpop.permute.xlu1 %7175  ;;  %v7279_v21 = vld [vmem:[#allocation4] sm:$0xff] }
 0xb1c   : > { %7185 = vst.msk [vmem:[#allocation4 + $0x30] sm:$0xff] %vm6574_vm9, %v7176_v6  ;;  %v7371_v10 = vmul.bf16 %v13850_v5, %v7279_v21 }
 0xb1d   : > { %v7230_v24 = vpop.permute.xlu0 %7229 }
 0xb1e   : > { %7238 = vst.msk [vmem:[#allocation4 + $0x50] sm:$0xff] %vm6533_vm8, %v7230_v24  ;;  %7579 = vmatmul.mubr.bf16.vlgmr.msra.gmra.mrb[136].mxu0 %v7371_v10 }
 0xb1f   : > { %9273 = vmatpush3.bf16.msra.mxu0 %v13937_v22  ;;  %v7200_v18 = vpop.permute.xlu1 %7199  ;;  %7586 = vmatprep.mubr.bf16.mxu0 %v7375_v53 }
 0xb20   : > { %7209 = vst.msk [vmem:[#allocation4 + $0x30] sm:$0xff] %vm6599_vm10, %v7200_v18  ;;  %9274 = vmatprep.subr.bf16.mxu0 %v9761_v33 }
 0xb21   : > { %v7250_v16 = vpop.permute.xlu0 %7249  ;;  %v7286_v46 = vld [vmem:[#allocation4 + $0x38] sm:$0xff] }
 0xb22   : > { %7258 = vst.msk [vmem:[#allocation4 + $0x50] sm:$0xff] %vm6574_vm9, %v7250_v16  ;;  %v7378_v28 = vmul.bf16 %v13874_v26, %v7286_v46 }
 0xb23   : > { %9275 = vmatpush3.bf16.msra.mxu0 %v13974_v20  ;;  %v7138_v5 = vpop.permute.xlu1 %7137 }
 0xb24   : > { %7146 = vst.msk [vmem:[#allocation4 + $0x48] sm:$0xff] %vm6533_vm8, %v7138_v5  ;;  %9276 = vmatprep.subr.bf16.mxu0 %v9761_v33 }
 0xb25   : > { %v7266_v22 = vpop.permute.xlu0 %7265 }
 0xb26   : > { %7274 = vst.msk [vmem:[#allocation4 + $0x50] sm:$0xff] %vm6599_vm10, %v7266_v22  ;;  %7587 = vmatmul.mubr.bf16.gmra.mrb[140].mxu0 %v7374_v48 }
 0xb27   : > { %9277 = vmatpush3.bf16.msra.mxu0 %v14020_v13  ;;  %v7178_v49 = vpop.permute.xlu1 %7177  ;;  %7594 = vmatprep.mubr.bf16.mxu0 %v7378_v28  ;;  %v7285_v20 = vld [vmem:[#allocation4 + $0x30] sm:$0xff] }
 0xb28   : > { %7186 = vst.msk [vmem:[#allocation4 + $0x48] sm:$0xff] %vm6574_vm9, %v7178_v49  ;;  %9278 = vmatprep.subr.bf16.mxu0 %v9761_v33  ;;  %v7377_v12 = vmul.bf16 %v13885_v36, %v7285_v20  ;;  %v14171_v36 = vld [vmem:[%s14640_s0] sm:$0xff]  }
 0xb2b   : > { %9279 = vmatpush3.bf16.msra.mxu0 %v14069_v14  ;;  %v7202_v4 = vpop.permute.xlu1 %7201 }
 0xb2c   : > { %7210 = vst.msk [vmem:[#allocation4 + $0x48] sm:$0xff] %vm6599_vm10, %v7202_v4 }
 0xb2d   : > { %v7289_v26 = vld [vmem:[#allocation4 + $0x50] sm:$0xff] }
 0xb2e   : > { %7595 = vmatmul.mubr.bf16.gmra.mrb[144].mxu0 %v7377_v12  ;;  %v7381_v42 = vmul.bf16 %v13890_v31, %v7289_v26 }
 0xb30   : > { %7602 = vmatprep.mubr.bf16.mxu0 %v7381_v42 }
 0xb33   : > { %v7288_v13 = vld [vmem:[#allocation4 + $0x48] sm:$0xff] }
 0xb34   : > { %v7380_v17 = vmul.bf16 %v13898_v45, %v7288_v13  ;;  %v8838_v45 = vld [vmem:[%s14455_s20] ss:$0 sm:$0xff] }
 0xb36   : > { %7603 = vmatmul.mubr.bf16.gmra.mrb[148].mxu0 %v7380_v17 }
 0xb37   : > { %9280 = vmatprep.mubr.msk.bf16.mxu0 %vm9762_vm11, %v9761_v33 }
 0xb3e   : > { %9281 = vmatmul.mubr.msk.bf16.vlgmr.msra.gmra.mrb[152].mxu0 %vm7693_vm12, %v14171_v36 }
 0xb71   : > { %v9254_v19 = vpop.f32.mrb[144].mxu1 }
 0xb72   : > { %v7645_v39 = vpop.f32.mrb[145].mxu1 }
 0xb73   : > { %v9255_v34 = vpop.f32.mrb[146].mxu1 }
 0xb74   : > { %v7648_v0 = vpop.f32.mrb[147].mxu1 }
 0xb7a   : > { %v9258_v37 = vpop.f32.mrb[148].mxu1 }
 0xb7b   : > { %v7661_v14 = vpop.f32.mrb[149].mxu1 }
 0xb7c   : > { %v14166_v11 = vpop.f32.mrb[150].mxu1 }
 0xb7d   : > { %v7664_v51 = vpop.f32.mrb[151].mxu1 }
 0xbf1   : > { %v9087_v31 = vpop.f32.mrb[136].mxu0 }
 0xbf2   : > { %v9088_v27 = vpop.f32.mrb[137].mxu0 }
 0xbf3   : > { %v9089_v55 = vadd.f32 %v9088_v27, %v9087_v31  ;;  %v9090_v58 = vpop.f32.mrb[138].mxu0  ;;  %v9634_v27 = vld [vmem:[%s14456_s21 + $0x88] sm:$0xff]  }
 0xbf4   : > { %v9091_v52 = vpop.f32.mrb[139].mxu0 }
 0xbf5   : > { %v7581_v47 = vadd.f32 %v9089_v55, %v8838_v45  ;;  %v9092_v57 = vadd.f32 %v9091_v52, %v9090_v58  ;;  %v9623_v55 = vld [vmem:[%s14456_s21] sm:$0xff]   ;;  %v9636_v58 = vld [vmem:[%s14456_s21 + $0xd0] sm:$0xff]   ;;  %v9624_v52 = vld [vmem:[%s14456_s21 + $0x48] sm:$0xff]  }
 0xbf7   : > { %v7646_v29 = vadd.f32 %v7645_v39, %v7581_v47  ;;  %v7584_v61 = vadd.f32 %v9092_v57, %v8838_v45  ;;  %v9638_v47 = vld [vmem:[%s14456_s21 + $0x90] sm:$0xff]   ;;  %v9625_v57 = vld [vmem:[%s14456_s21 + $0x8] sm:$0xff]  }
 0xbf9   : > { %v7649_v35 = vadd.f32 %v7648_v0, %v7584_v61  ;;  %v9093_v7 = vpop.f32.mrb[140].mxu0  ;;  %v7676_v59 = vmax.f32 %v7646_v29, 0.0  ;;  %v9621_v0 = vld [vmem:[%s14642_s1 + $0x8] sm:$0xff]   ;;  %v9626_v29 = vld [vmem:[%s14456_s21 + $0x50] sm:$0xff]  }
 0xbfa   : > { %v9094_v60 = vpop.f32.mrb[141].mxu0  ;;  %v9627_v61 = vld [vmem:[%s14456_s21 + $0x10] sm:$0xff]  }
 0xbfb   : > { %v7677_v56 = vmax.f32 %v7649_v35, 0.0  ;;  %v9095_v63 = vadd.f32 %v9094_v60, %v9093_v7  ;;  %v9096_v54 = vpop.f32.mrb[142].mxu0  ;;  %v9629_v35 = vld [vmem:[%s14456_s21 + $0x58] sm:$0xff]   ;;  %v9633_v60 = vld [vmem:[%s14456_s21 + $0x60] sm:$0xff]  }
 0xbfc   : > { %v9097_v50 = vpop.f32.mrb[143].mxu0  ;;  %v9631_v7 = vld [vmem:[%s14456_s21 + $0x18] sm:$0xff]  }
 0xbfd   : > { %v7684_v41 = vpack.c.bf16 %v7677_v56, %v7676_v59  ;;  %v7589_v30 = vadd.f32 %v9095_v63, %v8838_v45  ;;  %v9098_v2 = vadd.f32 %v9097_v50, %v9096_v54  ;;  %v9635_v59 = vld [vmem:[%s14456_s21 + $0x20] sm:$0xff]   ;;  %v9637_v56 = vld [vmem:[%s14456_s21 + $0x68] sm:$0xff]   ;;  %v9640_v54 = vld [vmem:[%s14456_s21 + $0xd8] sm:$0xff]  }
 0xbfe   : > { %v9639_v63 = vld [vmem:[%s14456_s21 + $0x28] sm:$0xff]   ;;  %v9642_v50 = vld [vmem:[%s14456_s21 + $0x98] sm:$0xff]  }
 0xbff   : > { %v7654_v3 = vadd.f32 %v9254_v19, %v7589_v30  ;;  %v7592_v43 = vadd.f32 %v9098_v2, %v8838_v45  ;;  %9261 = vmatpush3.bf16.msra.mxu1 %v7684_v41  ;;  %v9620_v19 = vld [vmem:[%s14641_s30] sm:$0xff]   ;;  %v9641_v41 = vld [vmem:[%s14456_s21 + $0x70] sm:$0xff]   ;;  %s14643_s30 = sld [smem:[#allocation48_spill]] }
 0xc00   : > { %9262 = vmatprep.subr.bf16.mxu1 %v9761_v33  ;;  %v9643_v30 = vld [vmem:[%s14456_s21 + $0x30] sm:$0xff]   ;;  %v9644_v2 = vld [vmem:[%s14456_s21 + $0xe0] sm:$0xff]  }
 0xc01   : > { %v7657_v38 = vadd.f32 %v9255_v34, %v7592_v43  ;;  %v9099_v15 = vpop.f32.mrb[144].mxu0  ;;  %v7678_v25 = vmax.f32 %v7654_v3, 0.0  ;;  %v9645_v3 = vld [vmem:[%s14456_s21 + $0x78] sm:$0xff]   ;;  %v9646_v43 = vld [vmem:[%s14456_s21 + $0xa0] sm:$0xff]  }
 0xc02   : > { %v9100_v23 = vpop.f32.mrb[145].mxu0 }
 0xc03   : > { %v7679_v40 = vmax.f32 %v7657_v38, 0.0  ;;  %v9101_v62 = vadd.f32 %v9100_v23, %v9099_v15  ;;  %v9102_v9 = vpop.f32.mrb[146].mxu0  ;;  %v9648_v38 = vld [vmem:[%s14456_s21 + $0xe8] sm:$0xff]   ;;  %v9647_v15 = vld [vmem:[%s14456_s21 + $0x38] sm:$0xff]  }
 0xc04   : > { %v9103_v32 = vpop.f32.mrb[147].mxu0 }
 0xc05   : > { %v7685_v8 = vpack.c.bf16 %v7679_v40, %v7678_v25  ;;  %v7597_v6 = vadd.f32 %v9101_v62, %v8838_v45  ;;  %v9104_v21 = vadd.f32 %v9103_v32, %v9102_v9  ;;  %v9652_v40 = vld [vmem:[%s14456_s21 + $0xa8] sm:$0xff]   ;;  %s14644_s8 = smov %s14643_s30 }
 0xc07   : > { %v7662_v10 = vadd.f32 %v7661_v14, %v7597_v6  ;;  %v7600_v24 = vadd.f32 %v9104_v21, %v8838_v45  ;;  %9263 = vmatpush3.bf16.msra.mxu1 %v7685_v8  ;;  %v9628_v14 = vld [vmem:[%s14456_s21 + $0xc0] sm:$0xff]  }
 0xc08   : > { %9264 = vmatprep.subr.bf16.mxu1 %v9761_v33  ;;  %9152 = vmatprep.subr.bf16.mxu0 %v9628_v14  ;;  %v9657_v14 = vld [vmem:[%s14456_s21 + $0xf8] sm:$0xff]  }
 0xc09   : > { %v7665_v53 = vadd.f32 %v7664_v51, %v7600_v24  ;;  %v9105_v18 = vpop.f32.mrb[148].mxu0  ;;  %v7680_v44 = vmax.f32 %v7662_v10, 0.0  ;;  %v9622_v51 = vld [vmem:[%s14456_s21 + $0x40] sm:$0xff]  }
 0xc0a   : > { %v9106_v16 = vpop.f32.mrb[149].mxu0 }
 0xc0b   : > { %v7681_v46 = vmax.f32 %v7665_v53, 0.0  ;;  %v9107_v5 = vadd.f32 %v9106_v16, %v9105_v18  ;;  %v9108_v48 = vpop.f32.mrb[150].mxu0 }
 0xc0c   : > { %v9109_v22 = vpop.f32.mrb[151].mxu0 }
 0xc0d   : > { %v7686_v28 = vpack.c.bf16 %v7681_v46, %v7680_v44  ;;  %v7605_v49 = vadd.f32 %v9107_v5, %v8838_v45  ;;  %v9110_v20 = vadd.f32 %v9109_v22, %v9108_v48  ;;  %v9654_v5 = vld [vmem:[%s14456_s21 + $0xf0] sm:$0xff]  }
 0xc0f   : > { %v7670_v4 = vadd.f32 %v9258_v37, %v7605_v49  ;;  %v7608_v12 = vadd.f32 %v9110_v20, %v8838_v45  ;;  %9265 = vmatpush3.bf16.msra.mxu1 %v7686_v28  ;;  %v9632_v45 = vld [vmem:[%s14456_s21 + $0xc8] sm:$0xff]   ;;  %v9655_v20 = vld [vmem:[%s14456_s21 + $0xb0] sm:$0xff]  }
 0xc10   : > { %9266 = vmatprep.subr.bf16.mxu1 %v9761_v33 }
 0xc11   : > { %v7673_v26 = vadd.f32 %v14166_v11, %v7608_v12  ;;  %v7682_v42 = vmax.f32 %v7670_v4, 0.0  ;;  %v7773_v39 = vpop.f32.mrb[152].mxu0 }
 0xc12   : > { %v9282_v34 = vpop.f32.mrb[153].mxu0 }
 0xc13   : > { %v7683_v13 = vmax.f32 %v7673_v26, 0.0  ;;  %v7776_v37 = vpop.f32.mrb[154].mxu0 }
 0xc14   : > { %v7780_v11 = vpack.c.bf16 %v7776_v37, %v7773_v39  ;;  %v9283_v31 = vpop.f32.mrb[155].mxu0 }
 0xc15   : > { %v7687_v17 = vpack.c.bf16 %v7683_v13, %v7682_v42 }
 0xc17   : > { %9267 = vmatpush3.bf16.msra.mxu1 %v7687_v17 }
 0xc18   : > { %9284 = vmatprep.subr.bf16.mxu1 %v9761_v33 }
 0xc1a   : > { %9269 = vmatmul.mubr.msk.bf16.vlgmr.msra.gmra.mrb[152].mxu1 %vm7693_vm12, %v14171_v36  ;;  %v9630_v36 = vld [vmem:[%s14456_s21 + $0x80] sm:$0xff]  }
 0xc1b   : > { %9288 = vmatprep.mubr.msk.bf16.mxu1 %vm9762_vm11, %v9761_v33  ;;  %9285 = vmatpush3.bf16.msra.mxu1 %v9620_v19 }
 0xc1c   : > { %9286 = vmatprep.subr.bf16.mxu1 %v9761_v33  ;;  %9153 = vmatpush3.bf16.msra.mxu0 %v9630_v36 }
 0xc1d   : > { %9154 = vmatprep.subr.bf16.mxu0 %v9632_v45 }
 0xc1f   : > { %9287 = vmatpush3.bf16.msra.mxu1 %v9621_v0 }
 0xc20   : > { %9130 = vmatprep.subr.bf16.mxu1 %v9622_v51  ;;  %9155 = vmatpush3.bf16.msra.mxu0 %v9634_v27  ;;  %v9658_v51 = vld [vmem:[%s14456_s21 + $0xb8] sm:$0xff]  }
 0xc21   : > { %9156 = vmatprep.subr.bf16.mxu0 %v9636_v58  ;;  %v9649_v58 = vld [vmem:[%s14643_s30] ss:$20 sps:$4 sm:$0xff]   ;;  %s14645_s30 = sld [smem:[#allocation54_spill]] }
 0xc22   : > { %9289 = vmatmul.mubr.msk.bf16.vlgmr.msra.gmra.mrb[156].mxu1 %vm6508_vm7, %v7780_v11 }
 0xc23   : > { %9131 = vmatpush3.bf16.msra.mxu1 %v9623_v55 }
 0xc24   : > { %9132 = vmatprep.subr.bf16.mxu1 %v9624_v52  ;;  %9157 = vmatpush3.bf16.msra.mxu0 %v9638_v47  ;;  %v9651_v52 = vld [vmem:[%s14644_s8 + $0x4] ss:$20 sps:$4 sm:$0xff]  }
 0xc25   : > { %9158 = vmatprep.subr.bf16.mxu0 %v9640_v54 }
 0xc27   : > { %9133 = vmatpush3.bf16.msra.mxu1 %v9625_v57 }
 0xc28   : > { %9134 = vmatprep.subr.bf16.mxu1 %v9626_v29  ;;  %9159 = vmatpush3.bf16.msra.mxu0 %v9642_v50 }
 0xc29   : > { %9160 = vmatprep.subr.bf16.mxu0 %v9644_v2  ;;  %v9664_v2 = vld [vmem:[%s14644_s8 + $0x10] ss:$20 sps:$4 sm:$0xff]  }
 0xc2b   : > { %9135 = vmatpush3.bf16.msra.mxu1 %v9627_v61 }
 0xc2c   : > { %9136 = vmatprep.subr.bf16.mxu1 %v9629_v35  ;;  %9161 = vmatpush3.bf16.msra.mxu0 %v9646_v43  ;;  %v9653_v35 = vld [vmem:[%s14456_s21 + $0x100] sm:$0xff]  }
 0xc2d   : > { %9162 = vmatprep.subr.bf16.mxu0 %v9648_v38  ;;  %v9665_v38 = vld [vmem:[%s14458_s23] sm:$0xff]  }
 0xc2f   : > { %9137 = vmatpush3.bf16.msra.mxu1 %v9631_v7  ;;  %v9660_v7 = vld [vmem:[%s14644_s8 + $0x8] ss:$20 sps:$4 sm:$0xff]  }
 0xc30   : > { %9138 = vmatprep.subr.bf16.mxu1 %v9633_v60  ;;  %9163 = vmatpush3.bf16.msra.mxu0 %v9652_v40  ;;  %v9662_v60 = vld [vmem:[%s14644_s8 + $0xc] ss:$20 sps:$4 sm:$0xff]  }
 0xc31   : > { %9164 = vmatprep.subr.bf16.mxu0 %v9654_v5 }
 0xc33   : > { %9139 = vmatpush3.bf16.msra.mxu1 %v9635_v59 }
 0xc34   : > { %9140 = vmatprep.subr.bf16.mxu1 %v9637_v56  ;;  %9165 = vmatpush3.bf16.msra.mxu0 %v9655_v20 }
 0xc35   : > { %9166 = vmatprep.subr.bf16.mxu0 %v9657_v14 }
 0xc37   : > { %9141 = vmatpush3.bf16.msra.mxu1 %v9639_v63  ;;  %v9656_v63 = vld [vmem:[%s14456_s21 + $0x108] sm:$0xff]  }
 0xc38   : > { %9142 = vmatprep.subr.bf16.mxu1 %v9641_v41  ;;  %9167 = vmatpush3.bf16.msra.mxu0 %v9658_v51  ;;  %v9659_v41 = vld [vmem:[%s14456_s21 + $0x110] sm:$0xff]  }
 0xc39   : > { %9304 = vmatprep.subr.bf16.mxu0 %v9761_v33 }
 0xc3b   : > { %9143 = vmatpush3.bf16.msra.mxu1 %v9643_v30  ;;  %v9663_v30 = vld [vmem:[%s14456_s21 + $0x118] sm:$0xff]  }
 0xc3c   : > { %9144 = vmatprep.subr.bf16.mxu1 %v9645_v3 }
 0xc3f   : > { %9145 = vmatpush3.bf16.msra.mxu1 %v9647_v15  ;;  %v9666_v15 = vld [vmem:[%s14458_s23 + $0x8] sm:$0xff]  }
 0xc40   : > { %9292 = vmatprep.subr.bf16.mxu1 %v9761_v33 }
 0xced   : > { %v7731_v23 = vpop.f32.mrb[152].mxu1 }
 0xcee   : > { %v9270_v25 = vpop.f32.mrb[153].mxu1  ;;  %v7850_v62 = vrot.slane %v7731_v23, 4  ;;  %v7869_v9 = vrot.slane %v7731_v23, 7  ;;  %v7880_v32 = vrot.slane %v7731_v23, 1  ;;  %v7862_v18 = vrot.slane %v7731_v23, 5 }
 0xcef   : > { %v7734_v8 = vpop.f32.mrb[154].mxu1  ;;  %v7843_v16 = vrot.slane %v7731_v23, 3  ;;  %v9668_v25 = vld [vmem:[%s14458_s23 + $0x18] sm:$0xff]  }
 0xcf0   : > { %v7851_v6 = vrot.slane %v7734_v8, 4  ;;  %v7870_v21 = vrot.slane %v7734_v8, 7  ;;  %v7881_v10 = vrot.slane %v7734_v8, 1  ;;  %v9271_v24 = vpop.f32.mrb[155].mxu1  ;;  %v7863_v53 = vrot.slane %v7734_v8, 5 }
 0xcf1   : > { %v7844_v44 = vrot.slane %v7734_v8, 3  ;;  %v7738_v46 = vpack.c.bf16 %v7734_v8, %v7731_v23  ;;  %v9667_v23 = vld [vmem:[%s14458_s23 + $0x10] sm:$0xff]   ;;  %v8872_v8 = vld [vmem:[%s14457_s22] ss:$0 sm:$0xff] }
 0xcf2   : > { %v7871_v48 = vsel %vm861_vm2, %v7869_v9, %v7870_v21  ;;  %v7872_v22 = vsel %vm861_vm2, %v7870_v21, %v7869_v9  ;;  %v7853_v28 = vsel %vm7852_vm13, %v7850_v62, %v7851_v6  ;;  %v7854_v49 = vsel %vm7852_vm13, %v7851_v6, %v7850_v62 }
 0xcf3   : > { %v7873_v4 = vpack.c.bf16 %v7871_v48, %v7872_v22  ;;  %v7855_v12 = vpack.c.bf16 %v7853_v28, %v7854_v49  ;;  %v7892_v26 = vpack.c.bf16 %v7854_v49, %v7853_v28  ;;  %v7882_v42 = vsel %vm1056_vm0, %v7880_v32, %v7881_v10  ;;  %7879 = vst.msk [vmem:[#allocation5 + $0x10] sm:$0xff] %vm7693_vm12, %v7738_v46 }
 0xcf4   : > { %v7883_v13 = vsel %vm1056_vm0, %v7881_v10, %v7880_v32  ;;  %v7865_v17 = vsel %vm7864_vm14, %v7862_v18, %v7863_v53  ;;  %v7866_v19 = vsel %vm7864_vm14, %v7863_v53, %v7862_v18  ;;  %v7846_v39 = vsel %vm7845_vm15, %v7843_v16, %v7844_v44 }
 0xcf5   : > { %7875 = vrot.lane.b32.xlu0 %v7873_v4, %s14565_s26  ;;  %7857 = vrot.lane.b32.xlu1 %v7855_v12, %s14565_s26  ;;  %v7884_v34 = vpack.c.bf16 %v7883_v13, %v7882_v42  ;;  %v7867_v0 = vpack.c.bf16 %v7865_v17, %v7866_v19  ;;  %v7898_v37 = vpack.c.bf16 %v7866_v19, %v7865_v17  ;;  %vm7860_vm0 = vcmask 1048064  }
 0xcf6   : > { %v7847_v11 = vsel %vm7845_vm15, %v7844_v44, %v7843_v16  ;;  %vm8458_vm2 = vcmask 73728  }
 0xcf7   : > { %7868 = vst.msk [vmem:[#allocation5 + $0x8] sm:$0xff] %vm7693_vm12, %v7867_v0  ;;  %7899 = vst.msk [vmem:[#allocation5 + $0x20] sm:$0xff] %vm7693_vm12, %v7898_v37  ;;  %v7848_v36 = vpack.c.bf16 %v7846_v39, %v7847_v11  ;;  %v7890_v31 = vpack.c.bf16 %v7847_v11, %v7846_v39 }
 0xcf9   : > { %7894 = vrot.lane.b32.xlu0 %v7892_v26, %s14565_s26  ;;  %7886 = vrot.lane.b32.xlu1 %v7884_v34, %s14565_s26  ;;  %7849 = vst.msk [vmem:[#allocation5] sm:$0xff] %vm7693_vm12, %v7848_v36  ;;  %7891 = vst.msk [vmem:[#allocation5 + $0x18] sm:$0xff] %vm7693_vm12, %v7890_v31  ;;  %s8915_s26 = sshll.u32 %s9915_s7, 4  ;;  %s8461_s7 = scalar_lea.sflag [#allocation7], %s755_s29 }
 0xcfa   : > { %s14393_s8 = scalar_lea.hbm %s14647_s5, %s8915_s26 }
 0xcfe   : > { %v7904_v3 = vld [vmem:[#allocation5 + $0x20] sm:$0xff] }
 0xcff   : > { %v7941_v43 = vmul.bf16 %v9664_v2, %v7904_v3 }
 0xd67   : > { %v7876_v1 = vpop.permute.xlu0 %7875  ;;  %v7858_v45 = vpop.permute.xlu1 %7857 }
 0xd68   : > { %7878 = vst.msk [vmem:[#allocation5 + $0x8] sm:$0xff] %vm7860_vm0, %v7876_v1  ;;  %7861 = vst.msk [vmem:[#allocation5] sm:$0xff] %vm7860_vm0, %v7858_v45 }
 0xd6b   : > { %v7895_v27 = vpop.permute.xlu0 %7894  ;;  %v7887_v55 = vpop.permute.xlu1 %7886 }
 0xd6c   : > { %7897 = vst.msk [vmem:[#allocation5 + $0x18] sm:$0xff] %vm7860_vm0, %v7895_v27  ;;  %7889 = vst.msk [vmem:[#allocation5 + $0x10] sm:$0xff] %vm7860_vm0, %v7887_v55  ;;  %v8390_v27 = vld [vmem:[%s14645_s30] sm:$0x1]  ;;  %s9689_s30 = sshll.u32 %s9763_s4, 4  ;;  %s9690_s30 = int_to_ptr.vmem [resolvable:$false] %s9689_s30 }
 0xd6d   : > { %s9691_s0 = scalar_lea.vmem %s9690_s30, 32  ;;  %p9692_p0 = scmp.lt.s32.totalorder %s14395_s27, %s9690_s30 }
 0xd6e   : > { %p9693_p1 = scmp.lt.s32.totalorder %s9691_s0, %s9685_s3 }
 0xd6f   : > { %v7901_v47 = vld [vmem:[#allocation5 + $0x8] sm:$0xff]  ;;  %v7900_v57 = vld [vmem:[#allocation5] sm:$0xff] }
 0xd70   : > { %v7938_v29 = vmul.bf16 %v9651_v52, %v7901_v47  ;;  %v7937_v61 = vmul.bf16 %v9649_v58, %v7900_v57  ;;  %p9694_p2 = por %p9693_p1, %p9692_p0 }
 0xd72   : > { %8272 = vmatprep.mubr.bf16.mxu1 %v7938_v29  ;;  %p9695_p3 = pnand %p9694_p2, %p9688_p13 }
 0xd73   : > { %8273 = vmatmul.mubr.bf16.vlgmr.msra.gmra.mrb[160].mxu1 %v7937_v61  ;;  %v7903_v59 = vld [vmem:[#allocation5 + $0x18] sm:$0xff]  ;;  %v7902_v56 = vld [vmem:[#allocation5 + $0x10] sm:$0xff] }
 0xd74   : > { %9293 = vmatpush3.bf16.msra.mxu1 %v9653_v35  ;;  %v7940_v54 = vmul.bf16 %v9662_v60, %v7903_v59  ;;  %v7939_v50 = vmul.bf16 %v9660_v7, %v7902_v56  ;;  %9300 = vmatprep.mubr.msk.bf16.mxu1 %vm9762_vm11, %v9761_v33 }
 0xd75   : > { %9294 = vmatprep.subr.bf16.mxu1 %v9761_v33 }
 0xd76   : > { %8313 = vmatprep.mubr.bf16.mxu0 %v7940_v54 }
 0xd77   : > { %8314 = vmatmul.mubr.bf16.vlgmr.msra.gmra.mrb[156].mxu0 %v7939_v50 }
 0xd78   : > { %9295 = vmatpush3.bf16.msra.mxu1 %v9656_v63  ;;  %9312 = vmatprep.mubr.msk.bf16.mxu0 %vm9762_vm11, %v9761_v33 }
 0xd79   : > { %9296 = vmatprep.subr.bf16.mxu1 %v9761_v33  ;;  %9305 = vmatpush3.bf16.msra.mxu0 %v9665_v38 }
 0xd7a   : > { %9306 = vmatprep.subr.bf16.mxu0 %v9761_v33 }
 0xd7c   : > { %9297 = vmatpush3.bf16.msra.mxu1 %v9659_v41 }
 0xd7d   : > { %9298 = vmatprep.subr.bf16.mxu1 %v9761_v33  ;;  %9307 = vmatpush3.bf16.msra.mxu0 %v9666_v15 }
 0xd7e   : > { %9308 = vmatprep.subr.bf16.mxu0 %v9761_v33 }
 0xd80   : > { %9299 = vmatpush3.bf16.msra.mxu1 %v9663_v30 }
 0xd81   : > { %9309 = vmatpush3.bf16.msra.mxu0 %v9667_v23 }
 0xd82   : > { %9310 = vmatprep.subr.bf16.mxu0 %v9761_v33 }
 0xd83   : > { %9301 = vmatmul.mubr.msk.bf16.vlgmr.msra.gmra.mrb[156].mxu1 %vm7693_vm12, %v7941_v43 }
 0xd85   : > { %9311 = vmatpush3.bf16.msra.mxu0 %v9668_v25 }
 0xe46   : > { %v9146_v40 = vpop.f32.mrb[160].mxu1 }
 0xe47   : > { %v9147_v62 = vpop.f32.mrb[161].mxu1 }
 0xe48   : > { %v9148_v9 = vadd.f32 %v9147_v62, %v9146_v40  ;;  %v9149_v32 = vpop.f32.mrb[162].mxu1 }
 0xe49   : > { %v9150_v6 = vpop.f32.mrb[163].mxu1 }
 0xe4a   : > { %v9168_v21 = vpop.f32.mrb[156].mxu0  ;;  %v9151_v10 = vadd.f32 %v9150_v6, %v9149_v32  ;;  %v8275_v53 = vadd.f32 %v9148_v9, %v8872_v8 }
 0xe4b   : > { %v9169_v24 = vpop.f32.mrb[157].mxu0 }
 0xe4c   : > { %v9170_v18 = vadd.f32 %v9169_v24, %v9168_v21  ;;  %v9171_v16 = vpop.f32.mrb[158].mxu0  ;;  %v8278_v46 = vadd.f32 %v9151_v10, %v8872_v8 }
 0xe4d   : > { %v9172_v44 = vpop.f32.mrb[159].mxu0 }
 0xe4e   : > { %v9173_v5 = vadd.f32 %v9172_v44, %v9171_v16  ;;  %v8316_v33 = vadd.f32 %v9170_v18, %v8275_v53 }
 0xe50   : > { %v8319_v48 = vadd.f32 %v9173_v5, %v8278_v46 }
 0xe56   : > { %v8356_v22 = vpop.f32.mrb[156].mxu1 }
 0xe57   : > { %v8357_v28 = vadd.f32 %v8356_v22, %v8316_v33  ;;  %v9302_v49 = vpop.f32.mrb[157].mxu1 }
 0xe58   : > { %v8359_v20 = vpop.f32.mrb[158].mxu1 }
 0xe59   : > { %v8360_v4 = vadd.f32 %v8359_v20, %v8319_v48  ;;  %v9303_v12 = vpop.f32.mrb[159].mxu1  ;;  %v8365_v26 = vmax.f32 %v8357_v28, 0.0 }
 0xe5b   : > { %v8366_v42 = vmax.f32 %v8360_v4, 0.0 }
 0xe5d   : > { %v8367_v13 = vpack.c.bf16 %v8366_v42, %v8365_v26 }
 0xe5f   : > { %v8368_v17 = vunpack.c.l.bf16 %v8367_v13  ;;  %v8369_v19 = vunpack.c.h.bf16 %v8367_v13 }
 0xe61   : > { %v8370_v39 = vsel %vm7693_vm12, %v8368_v17, 0.0  ;;  %v8371_v34 = vsel %vm7693_vm12, %v8369_v19, 0.0 }
 0xe62   : > { %v8372_v0 = vadd.f32 %v8371_v34, %v8370_v39 }
 0xe64   : > { %v8373_v37 = vrot.slane %v8372_v0, 4 }
 0xe66   : > { %v8374_v14 = vadd.f32 %v8373_v37, %v8372_v0 }
 0xe68   : > { %v8375_v11 = vrot.slane %v8374_v14, 2 }
 0xe6a   : > { %v8376_v51 = vadd.f32 %v8375_v11, %v8374_v14 }
 0xe6c   : > { %v8377_v36 = vrot.slane %v8376_v51, 1 }
 0xe6e   : > { %v8378_v31 = vadd.f32 %v8377_v36, %v8376_v51 }
 0xe70   : > { %v8380_v1 = vmul.f32 0.0625, %v8378_v31 }
 0xe72   : > { %v8381_v45 = vpack.c.bf16 %v8380_v1, %v8380_v1 }
 0xe74   : > { %9313 = vmatmul.mubr.msk.bf16.vlgmr.msra.gmra.mrb[160].mxu0 %vm7693_vm12, %v8381_v45 }
 0xf47   : > { %v8452_v55 = vpop.f32.mrb[160].mxu0 }
 0xf48   : > { %v8453_v58 = vadd.f32 %v8452_v55, %v8390_v27  ;;  %v9314_v52 = vpop.f32.mrb[161].mxu0 }
 0xf49   : > { %v8455_v47 = vpop.f32.mrb[162].mxu0 }
 0xf4a   : > { %v9315_v57 = vpop.f32.mrb[163].mxu0  ;;  %8459 = vst.msk [vmem:[%s756_s9] sm:$0x1] %vm8458_vm2, %v8453_v58 }
 0xf4b   : > { %9698 = shalt.err (!%p9695_p3)
}
 0xf4c   : > { %s9699_s29 = scalar_lea.hbm %s14393_s8, 16  ;;  %s9703_s6 = scalar_lea.hbm %s14647_s5, 32 }
 0xf4d   : > { %p9700_p4 = scmp.ne.s32.totalorder %s14393_s8, %s9699_s29  ;;  %p9704_p9 = scmp.lt.u32.totalorder %s14393_s8, %s14647_s5 }
 0xf4e   : > { %p9705_p10 = scmp.lt.u32.totalorder %s9703_s6, %s9699_s29  ;;  %p9707_p12 = scmp.lt.u32.totalorder %s9699_s29, %s14393_s8 }
 0xf4f   : > { %p9701_p7 = pnand %p9700_p4, %p9932_p5 }
 0xf50   : > { %p9706_p11 = por %p9705_p10, %p9704_p9 }
 0xf51   : > { %p9702_p8 = pneg %p9701_p7 }
 0xf52   : > { %p9708_p13 = por %p9707_p12, %p9706_p11 }
 0xf54   : > { %p9709_p0 = pnand %p9708_p13, %p9702_p8 }
 0xf56   : > { %9712 = shalt.err (!%p9709_p0)
}
 0xf57   : > { %9339 = dma.vmem_to_hbm [thread:$0]  (%p9932_p5), %s14395_s27, 16, %s14393_s8, %s8461_s7  }
 0xf58 PF: > { %s14648_s3 = sld [smem:[#allocation11_spill]]  ;;  %s14649_s0 = sld [smem:[#allocation9_spill]] }
 0xf5e   : > { %p9345_p1 = scmp.ge.s32.totalorder %s14648_s3, 2  ;;  %s8485_s9 = sand.u32 1, %s14649_s0  }
 0xf5f   : > { %s8486_s4 = scalar_lea.sflag [#allocation7], %s8485_s9 }
 0xf60   : > { %p9342_p2 = pnand %p9345_p1, %p9936_p6 }
 0xf62   : > { %9730 = dma.done.wait (!%p9342_p2), %s8486_s4, 16  }
 0xf63   : > { %9732 = vsyncadd (!%p9342_p2), %s8486_s4, 4294967280  ;;  %s14651_s30 = sld [smem:[#allocation12_spill]]  ;;  %s14652_s6 = sld [smem:[#allocation10_spill]] }
 0xf64   : > { %s14653_s5 = sld [smem:[#allocation13_spill]]  ;;  %s14654_s29 = smov %s9739_s2 }
 0xf69   : > { %p35_p3 = scmp.ge.s32.totalorder %s14651_s30, 4   ;;  %s14655_s2 = smov %s14652_s6 }
 0xf6a   : > { %s14656_s6 = smov %s14653_s5 }
 0xf6b   :  { %37 = sbr.rel (!%p35_p3) target bundleno = 16 (0x10), region = 155 }
 0xf72   :  { %8490 = vsyncpa [#allocation7], 1 }
 0xf73   :  { %8492 = vsyncpa [#allocation7 + $0x1], 1 }

</bundles_post_ra>
